<compile_context>
chip_gen: v7x
topology: tpu7x:2x2x1
jax: 0.10.0
libtpu: 0.0.40
codegen_flags: <defaults>
</compile_context>

<pallas_src>
import functools

import jax
import jax.numpy as jnp
from jax import lax
from jax.experimental import pallas as pl
from jax.experimental.pallas import tpu as pltpu

EPS_IN = 1e-5        # nn.InstanceNorm2d default eps
NEG_SLOPE = 0.2      # LeakyReLU(0.2)
VMEM_LIMIT = 64 * 1024 * 1024


# ----------------------------------------------------------------------------
# Padded-flat activation layout helpers
#   A (C, H, W) activation is stored as (C, Hp*Wp) with Hp=H+2, Wp=W+2 and zero
#   borders -- exactly the zero padding the next 3x3 conv needs.  For tap (kh,kw)
#   the conv input window is a contiguous lane slice at offset kh*Wp+kw of length
#   Lv = (H-1)*Wp + W;  output flat position p = h*Wp + w is valid iff (p % Wp) < W.
# ----------------------------------------------------------------------------
def to_padded_flat(x):
    # x: (N, C, H, W) -> (N, C, (H+2)*(W+2)) bf16, zero borders
    N, C, H, W = x.shape
    xp = jnp.pad(x.astype(jnp.bfloat16), ((0, 0), (0, 0), (1, 1), (1, 1)))
    return xp.reshape(N, C, (H + 2) * (W + 2))


def from_padded_flat(y, H, W):
    # y: (N, C, (H+2)*(W+2)) -> (N, C, H, W)
    N, C, _ = y.shape
    return y.reshape(N, C, H + 2, W + 2)[:, :, 1:H + 1, 1:W + 1]


# ----------------------------------------------------------------------------
# Pallas kernels
# ----------------------------------------------------------------------------
def _conv3x3_in_lrelu_body(x_ref, w_ref, m_ref, H, W):
    # x_ref: (Cin, Hp*Wp) bf16 padded-flat, w_ref: (9, Cout, Cin) bf16,
    # m_ref: (1, Lv) f32 valid-column mask.  Returns masked f32 (Cout, Lv):
    # conv3x3 -> InstanceNorm2d (one-pass stats) -> LeakyReLU(0.2).
    Wp = W + 2
    Lv = (H - 1) * Wp + W
    cout = w_ref.shape[1]
    acc = jnp.zeros((cout, Lv), jnp.float32)
    for kh in range(3):
        for kw in range(3):
            off = kh * Wp + kw
            acc = acc + jnp.dot(w_ref[kh * 3 + kw], x_ref[:, off:off + Lv],
                                preferred_element_type=jnp.float32)
    m = m_ref[...]                                   # (1, Lv)
    cnt = float(H * W)
    s = jnp.sum(acc * m, axis=1, keepdims=True)
    ss = jnp.sum(acc * acc * m, axis=1, keepdims=True)
    mean = s / cnt
    var = jnp.maximum(ss / cnt - mean * mean, 0.0)
    y = (acc - mean) * lax.rsqrt(var + EPS_IN)
    y = jnp.where(y >= 0.0, y, NEG_SLOPE * y)
    return y * m, Wp, Lv                             # garbage columns zeroed


def _conv3x3_in_lrelu_kernel(x_ref, w_ref, m_ref, o_ref, *, H, W):
    # o_ref: (Cout, Hp*Wp) bf16, padded-flat (ready for the next 3x3 conv).
    y, Wp, Lv = _conv3x3_in_lrelu_body(x_ref, w_ref, m_ref, H, W)
    o_ref[...] = jnp.zeros(o_ref.shape, o_ref.dtype)
    o_ref[:, Wp + 1:Wp + 1 + Lv] = y.astype(o_ref.dtype)


def _conv3x3_in_lrelu_conv1x1_kernel(x_ref, w_ref, m_ref, w2_ref, b_ref, o_ref, *, H, W):
    # Last Unet layer: conv3x3+IN+LReLU fused with conv1x1(+bias), f32 output.
    # w2_ref: (Cout2, Cmid) bf16, b_ref: (Cout2, 1) f32, o_ref: (Cout2, Hp*Wp) f32.
    y, Wp, Lv = _conv3x3_in_lrelu_body(x_ref, w_ref, m_ref, H, W)
    y2 = jnp.dot(w2_ref[...], y.astype(jnp.bfloat16),
                 preferred_element_type=jnp.float32) + b_ref[...]
    o_ref[...] = jnp.zeros(o_ref.shape, o_ref.dtype)
    o_ref[:, Wp + 1:Wp + 1 + Lv] = y2.astype(o_ref.dtype)


def _tconv_in_lrelu_kernel(x_ref, w_ref, o_ref, *, cout, hw):
    # ConvTranspose2d(k=2, s=2, bias=False) + InstanceNorm2d + LeakyReLU(0.2)
    # x_ref: (Cin, HW) bf16, w_ref: (4*Cout, Cin) bf16 [row = (kh*2+kw)*Cout + co],
    # o_ref: (4*Cout, HW) bf16.
    y = jnp.dot(w_ref[...], x_ref[...], preferred_element_type=jnp.float32)
    s = jnp.sum(y, axis=1, keepdims=True)            # (4*Cout, 1)
    ss = jnp.sum(y * y, axis=1, keepdims=True)
    sc = s[0:cout] + s[cout:2 * cout] + s[2 * cout:3 * cout] + s[3 * cout:4 * cout]
    ssc = ss[0:cout] + ss[cout:2 * cout] + ss[2 * cout:3 * cout] + ss[3 * cout:4 * cout]
    n = 4.0 * hw                                     # stats over the full 2H x 2W output
    mean = sc / n
    var = jnp.maximum(ssc / n - mean * mean, 0.0)
    inv = lax.rsqrt(var + EPS_IN)
    mean4 = jnp.concatenate([mean, mean, mean, mean], axis=0)
    inv4 = jnp.concatenate([inv, inv, inv, inv], axis=0)
    yn = (y - mean4) * inv4
    yn = jnp.where(yn >= 0.0, yn, NEG_SLOPE * yn)
    o_ref[...] = yn.astype(o_ref.dtype)


def _rss_divide_kernel(x_ref, o_ref):
    # x_ref/o_ref: (2*C, H*W) f32 (lane-dense).  out = x * rsqrt(sum x^2 over coils).
    x = x_ref[...]
    inv = lax.rsqrt(jnp.sum(x * x, axis=0, keepdims=True))
    o_ref[...] = x * inv


# ----------------------------------------------------------------------------
# Pallas wrappers
# ----------------------------------------------------------------------------
def _valid_mask(H, W):
    Wp = W + 2
    Lv = (H - 1) * Wp + W
    return ((jnp.arange(Lv, dtype=jnp.int32) % Wp) < W).astype(jnp.float32).reshape(1, Lv)


def conv3x3_in_lrelu_pf(xpf, w, H, W):
    # xpf: (N, Cin, Hp*Wp) bf16 padded-flat, w: (Cout, Cin, 3, 3) torch Conv2d layout.
    N, Cin, Lp = xpf.shape
    Cout = w.shape[0]
    Wp = W + 2
    Lv = (H - 1) * Wp + W
    w9 = jnp.transpose(w, (2, 3, 0, 1)).reshape(9, Cout, Cin).astype(jnp.bfloat16)
    mask = _valid_mask(H, W)
    return pl.pallas_call(
        functools.partial(_conv3x3_in_lrelu_kernel, H=H, W=W),
        out_shape=jax.ShapeDtypeStruct((N, Cout, Lp), jnp.bfloat16),
        grid=(N,),
        in_specs=[pl.BlockSpec((None, Cin, Lp), lambda n: (n, 0, 0)),
                  pl.BlockSpec((9, Cout, Cin), lambda n: (0, 0, 0)),
                  pl.BlockSpec((1, Lv), lambda n: (0, 0))],
        out_specs=pl.BlockSpec((None, Cout, Lp), lambda n: (n, 0, 0)),
        compiler_params=pltpu.CompilerParams(
            dimension_semantics=("parallel",), vmem_limit_bytes=VMEM_LIMIT),
    )(xpf, w9, mask)


def conv3x3_in_lrelu_final_pf(xpf, w, w1x1, b, H, W):
    # Fused last layer: conv3x3+IN+LReLU then conv1x1(+bias).  f32 output.
    N, Cin, Lp = xpf.shape
    Cmid = w.shape[0]
    Cout2 = w1x1.shape[0]
    Wp = W + 2
    Lv = (H - 1) * Wp + W
    w9 = jnp.transpose(w, (2, 3, 0, 1)).reshape(9, Cmid, Cin).astype(jnp.bfloat16)
    w2 = w1x1.astype(jnp.bfloat16)
    b2 = b.reshape(Cout2, 1).astype(jnp.float32)
    mask = _valid_mask(H, W)
    return pl.pallas_call(
        functools.partial(_conv3x3_in_lrelu_conv1x1_kernel, H=H, W=W),
        out_shape=jax.ShapeDtypeStruct((N, Cout2, Lp), jnp.float32),
        grid=(N,),
        in_specs=[pl.BlockSpec((None, Cin, Lp), lambda n: (n, 0, 0)),
                  pl.BlockSpec((9, Cmid, Cin), lambda n: (0, 0, 0)),
                  pl.BlockSpec((1, Lv), lambda n: (0, 0)),
                  pl.BlockSpec((Cout2, Cmid), lambda n: (0, 0)),
                  pl.BlockSpec((Cout2, 1), lambda n: (0, 0))],
        out_specs=pl.BlockSpec((None, Cout2, Lp), lambda n: (n, 0, 0)),
        compiler_params=pltpu.CompilerParams(
            dimension_semantics=("parallel",), vmem_limit_bytes=VMEM_LIMIT),
    )(xpf, w9, mask, w2, b2)


def tconv2x2_in_lrelu(x, w):
    # x: (N, Cin, H, W), w: (Cin, Cout, 2, 2)  (torch ConvTranspose2d layout, bias=False)
    N, Cin, H, W = x.shape
    Cout = w.shape[1]
    xf = x.astype(jnp.bfloat16).reshape(N, Cin, H * W)
    w4 = jnp.transpose(w, (2, 3, 1, 0)).reshape(4 * Cout, Cin).astype(jnp.bfloat16)
    out = pl.pallas_call(
        functools.partial(_tconv_in_lrelu_kernel, cout=Cout, hw=H * W),
        out_shape=jax.ShapeDtypeStruct((N, 4 * Cout, H * W), jnp.bfloat16),
        grid=(N,),
        in_specs=[pl.BlockSpec((None, Cin, H * W), lambda n: (n, 0, 0)),
                  pl.BlockSpec((4 * Cout, Cin), lambda n: (0, 0))],
        out_specs=pl.BlockSpec((None, 4 * Cout, H * W), lambda n: (n, 0, 0)),
        compiler_params=pltpu.CompilerParams(
            dimension_semantics=("parallel",), vmem_limit_bytes=VMEM_LIMIT),
    )(xf, w4)
    # interleave: out[n, (kh*2+kw)*Cout + co, h*W+w] -> y[n, co, 2h+kh, 2w+kw]
    out = out.reshape(N, 2, 2, Cout, H, W)
    out = jnp.transpose(out, (0, 3, 4, 1, 5, 2)).reshape(N, Cout, 2 * H, 2 * W)
    return out


def rss_divide(x):
    # x: (B, C, H, W, 2) f32 -> x / rss_complex(x, dim=1)   (lane-dense kernel)
    B, C, H, W, _ = x.shape
    xr = jnp.transpose(x, (0, 1, 4, 2, 3)).reshape(B, 2 * C, H * W)
    out = pl.pallas_call(
        _rss_divide_kernel,
        out_shape=jax.ShapeDtypeStruct((B, 2 * C, H * W), jnp.float32),
        grid=(B,),
        in_specs=[pl.BlockSpec((None, 2 * C, H * W), lambda b: (b, 0, 0))],
        out_specs=pl.BlockSpec((None, 2 * C, H * W), lambda b: (b, 0, 0)),
        compiler_params=pltpu.CompilerParams(dimension_semantics=("parallel",)),
    )(xr)
    out = out.reshape(B, C, 2, H, W)
    return jnp.transpose(out, (0, 1, 3, 4, 2))


# ----------------------------------------------------------------------------
# U-Net / NormUnet (fastMRI) built from the kernels above
# ----------------------------------------------------------------------------
def avg_pool2x2(x):
    N, C, H, W = x.shape
    return x.reshape(N, C, H // 2, 2, W // 2, 2).mean(axis=(3, 5))


def conv_block(x, wpair, final=None):
    # ConvBlock = 2x (conv3x3 + InstanceNorm + LeakyReLU + Dropout(p=0));
    # `final` = (w1x1, bias) fuses the Unet's terminal 1x1 conv into the 2nd conv.
    H, W = x.shape[2], x.shape[3]
    w1, w2 = wpair
    xpf = to_padded_flat(x)
    ypf = conv3x3_in_lrelu_pf(xpf, w1, H, W)
    if final is None:
        ypf = conv3x3_in_lrelu_pf(ypf, w2, H, W)
    else:
        ypf = conv3x3_in_lrelu_final_pf(ypf, w2, final[0], final[1], H, W)
    return from_padded_flat(ypf, H, W)


def unet_forward(x, p, num_pools):
    stack = []
    out = x
    for wpair in p['down']:
        out = conv_block(out, wpair)
        stack.append(out)
        out = avg_pool2x2(out)
    out = conv_block(out, p['bottleneck'])
    for i in range(num_pools):
        skip = stack.pop()
        out = tconv2x2_in_lrelu(out, p['up_t'][i])
        # TODO(synk): reflect-pad for odd spatial mismatch skipped; shapes always match here.
        out = jnp.concatenate([out, skip.astype(out.dtype)], axis=1)
        final = (p['final_w'], p['final_b']) if i == num_pools - 1 else None
        out = conv_block(out, p['up_c'][i], final=final)
    return out


def norm_unet_forward(x, p, num_pools):
    # x: (N, 1, H, W, 2)
    N, c, H, W, _ = x.shape
    # complex_to_chan_dim
    x = jnp.transpose(x, (0, 4, 1, 2, 3)).reshape(N, 2 * c, H, W)
    # NormUnet.norm: group stats over (real group, imag group), unbiased std
    xg = x.reshape(N, 2, -1)
    mean = jnp.mean(xg, axis=2)
    std = jnp.std(xg, axis=2, ddof=1)
    mean4 = mean[:, :, None, None]
    std4 = std[:, :, None, None]
    x = (x - mean4) / std4
    # NormUnet.pad: pad H, W to next multiple of 16 (no-op for 16x16)
    h_mult = ((H - 1) | 15) + 1
    w_mult = ((W - 1) | 15) + 1
    hp, wp = h_mult - H, w_mult - W
    hpad = (hp // 2, hp - hp // 2)
    wpad = (wp // 2, wp - wp // 2)
    x = jnp.pad(x, ((0, 0), (0, 0), hpad, wpad))
    x = unet_forward(x, p, num_pools)
    x = x[:, :, hpad[0]:hpad[0] + H, wpad[0]:wpad[0] + W].astype(jnp.float32)
    # unnorm + chan_complex_to_last_dim
    x = x * std4 + mean4
    x = x.reshape(N, 2, c, H, W)
    return jnp.transpose(x, (0, 2, 3, 4, 1))


# ----------------------------------------------------------------------------
# SensitivityModel forward
# ----------------------------------------------------------------------------
def sensitivity_model_forward(masked_kspace, mask, params, num_pools):
    B, C, H, W, _ = masked_kspace.shape
    masked_kspace = masked_kspace.astype(jnp.float32)

    # get_low_frequency_lines + mask_center  (data-dependent scalar glue, plain JAX)
    m1d = (mask.reshape(-1) > 0)                      # mask over dim -2 of kspace (W)
    Wm = m1d.shape[0]
    col = jnp.arange(Wm)
    center = Wm // 2
    r = jnp.min(jnp.where((col >= center) & (~m1d), col, Wm))   # first zero right of center
    l = jnp.max(jnp.where((col <= center) & (~m1d), col, -1))   # first zero left of center
    num_low = r - (l + 1)
    pad = (Wm - num_low + 1) // 2
    keep = ((col >= pad) & (col < pad + num_low)).astype(jnp.float32)
    x = masked_kspace * keep[None, None, None, :, None]

    # ifft2 (ortho, with fftshifts).  TODO(synk): FFT has no Pallas primitive; plain JAX/XLA.
    xc = x[..., 0] + 1j * x[..., 1]
    xc = jnp.fft.ifftshift(xc, axes=(-2, -1))
    xc = jnp.fft.ifft2(xc, axes=(-2, -1), norm="ortho")
    xc = jnp.fft.fftshift(xc, axes=(-2, -1))
    x = jnp.stack([jnp.real(xc), jnp.imag(xc)], axis=-1).astype(jnp.float32)

    # chans_to_batch_dim -> NormUnet -> batch_chans_to_chan_dim
    x = x.reshape(B * C, 1, H, W, 2)
    x = norm_unet_forward(x, params, num_pools)
    x = x.reshape(B, C, H, W, 2)

    # divide_root_sum_of_squares (Pallas)
    return rss_divide(x)


# ----------------------------------------------------------------------------
# Deterministic parameter init (mirrors fastMRI Unet(in=2, out=2, chans, num_pools))
# ----------------------------------------------------------------------------
def init_unet_params(in_chans, out_chans, chans, num_pools, key):
    keys = iter(jax.random.split(key, 64))

    def conv_w(cout, cin, k):
        fan = cin * k * k
        return jax.random.normal(next(keys), (cout, cin, k, k), jnp.float32) / jnp.sqrt(fan)

    def tconv_w(cin, cout):
        fan = cin * 4
        return jax.random.normal(next(keys), (cin, cout, 2, 2), jnp.float32) / jnp.sqrt(fan)

    p = {'down': [], 'up_t': [], 'up_c': []}
    ch = chans
    p['down'].append((conv_w(chans, in_chans, 3), conv_w(chans, chans, 3)))
    for _ in range(num_pools - 1):
        p['down'].append((conv_w(ch * 2, ch, 3), conv_w(ch * 2, ch * 2, 3)))
        ch *= 2
    p['bottleneck'] = (conv_w(ch * 2, ch, 3), conv_w(ch * 2, ch * 2, 3))
    for _ in range(num_pools - 1):
        p['up_t'].append(tconv_w(ch * 2, ch))
        p['up_c'].append((conv_w(ch, ch * 2, 3), conv_w(ch, ch, 3)))
        ch //= 2
    p['up_t'].append(tconv_w(ch * 2, ch))
    p['up_c'].append((conv_w(ch, ch * 2, 3), conv_w(ch, ch, 3)))
    p['final_w'] = jax.random.normal(next(keys), (out_chans, ch), jnp.float32) / jnp.sqrt(ch)
    p['final_b'] = jnp.full((out_chans,), 0.01, jnp.float32)
    return p


if __name__ == "__main__":
    chans, num_pools = 4, 2
    B, C, H, W = 2, 4, 16, 16

    key = jax.random.PRNGKey(0)
    k_params, k_data = jax.random.split(key)
    params = init_unet_params(2, 2, chans, num_pools, k_params)

    kspace = jax.random.normal(k_data, (B, C, H, W, 2), jnp.float32)
    # undersampling mask along the phase-encode (W) dim with a fully-sampled center band
    cols = jnp.zeros((W,), jnp.float32)
    cols = cols.at[5:11].set(1.0)     # contiguous low-frequency lines around W//2
    cols = cols.at[1].set(1.0)
    cols = cols.at[14].set(1.0)
    mask = cols.reshape(1, 1, 1, W, 1)
    masked_kspace = kspace * mask

    fwd = jax.jit(functools.partial(sensitivity_model_forward, num_pools=num_pools))
    out = fwd(masked_kspace, mask, params)
    jax.block_until_ready(out)
    assert out.shape == (B, C, H, W, 2)
    assert bool(jnp.all(jnp.isfinite(out)))
    print("KERNEL_OK")
</pallas_src>

<mosaic_0001>
module attributes {stable_mosaic.version = 11 : i64} {
  func.func @_conv3x3_in_lrelu_kernel(%arg0: i32, %arg1: memref<1x2x324xbf16, #tpu.memory_space<vmem>>, %arg2: memref<9x4x2xbf16, #tpu.memory_space<vmem>>, %arg3: memref<1x286xf32, #tpu.memory_space<vmem>>, %arg4: memref<1x4x324xbf16, #tpu.memory_space<vmem>>) attributes {dimension_semantics = [#tpu.dimension_semantics<parallel>], iteration_bounds = array<i64: 8>, scalar_prefetch = 0 : i64, scratch_operands = 0 : i64, tpu.core_type = #tpu.core_type<tc>, window_params = [{transform_indices = @transform_0, window_bounds = array<i64: 1, 2, 324>}, {pipeline_mode = #tpu.pipeline_mode<synchronous>, transform_indices = @transform_1, window_bounds = array<i64: 9, 4, 2>}, {pipeline_mode = #tpu.pipeline_mode<synchronous>, transform_indices = @transform_2, window_bounds = array<i64: 1, 286>}, {transform_indices = @transform_3, window_bounds = array<i64: 1, 4, 324>}]} {
    %cst = arith.constant 0.000000e+00 : f32
    %0 = vector.broadcast %cst : f32 to vector<4x286xf32>
    %c0 = arith.constant 0 : index
    %c0_0 = arith.constant 0 : index
    %c0_1 = arith.constant 0 : index
    %1 = vector.load %arg2[%c0, %c0_0, %c0_1] : memref<9x4x2xbf16, #tpu.memory_space<vmem>>, vector<1x4x2xbf16>
    %2 = vector.shape_cast %1 : vector<1x4x2xbf16> to vector<4x2xbf16>
    %c0_2 = arith.constant 0 : index
    %c0_3 = arith.constant 0 : index
    %c0_4 = arith.constant 0 : index
    %3 = vector.load %arg1[%c0_2, %c0_3, %c0_4] : memref<1x2x324xbf16, #tpu.memory_space<vmem>>, vector<1x2x286xbf16>
    %4 = vector.shape_cast %3 : vector<1x2x286xbf16> to vector<2x286xbf16>
    %cst_5 = arith.constant dense<0.000000e+00> : vector<4x286xf32>
    %5 = tpu.matmul %2, %4, %cst_5 {dimension_numbers = #tpu.dot_dimension_numbers<[1], [0], [0], [1], [0, 0, 1, 1], [], []>} : vector<4x2xbf16>, vector<2x286xbf16>, vector<4x286xf32> -> vector<4x286xf32>
    %6 = arith.addf %0, %5 : vector<4x286xf32>
    %c1 = arith.constant 1 : index
    %c0_6 = arith.constant 0 : index
    %c0_7 = arith.constant 0 : index
    %7 = vector.load %arg2[%c1, %c0_6, %c0_7] : memref<9x4x2xbf16, #tpu.memory_space<vmem>>, vector<1x4x2xbf16>
    %8 = vector.shape_cast %7 : vector<1x4x2xbf16> to vector<4x2xbf16>
    %c0_8 = arith.constant 0 : index
    %c0_9 = arith.constant 0 : index
    %c1_10 = arith.constant 1 : index
    %9 = vector.load %arg1[%c0_8, %c0_9, %c1_10] : memref<1x2x324xbf16, #tpu.memory_space<vmem>>, vector<1x2x286xbf16>
    %10 = vector.shape_cast %9 : vector<1x2x286xbf16> to vector<2x286xbf16>
    %cst_11 = arith.constant dense<0.000000e+00> : vector<4x286xf32>
    %11 = tpu.matmul %8, %10, %cst_11 {dimension_numbers = #tpu.dot_dimension_numbers<[1], [0], [0], [1], [0, 0, 1, 1], [], []>} : vector<4x2xbf16>, vector<2x286xbf16>, vector<4x286xf32> -> vector<4x286xf32>
    %12 = arith.addf %6, %11 : vector<4x286xf32>
    %c2 = arith.constant 2 : index
    %c0_12 = arith.constant 0 : index
    %c0_13 = arith.constant 0 : index
    %13 = vector.load %arg2[%c2, %c0_12, %c0_13] : memref<9x4x2xbf16, #tpu.memory_space<vmem>>, vector<1x4x2xbf16>
    %14 = vector.shape_cast %13 : vector<1x4x2xbf16> to vector<4x2xbf16>
    %c0_14 = arith.constant 0 : index
    %c0_15 = arith.constant 0 : index
    %c2_16 = arith.constant 2 : index
    %15 = vector.load %arg1[%c0_14, %c0_15, %c2_16] : memref<1x2x324xbf16, #tpu.memory_space<vmem>>, vector<1x2x286xbf16>
    %16 = vector.shape_cast %15 : vector<1x2x286xbf16> to vector<2x286xbf16>
    %cst_17 = arith.constant dense<0.000000e+00> : vector<4x286xf32>
    %17 = tpu.matmul %14, %16, %cst_17 {dimension_numbers = #tpu.dot_dimension_numbers<[1], [0], [0], [1], [0, 0, 1, 1], [], []>} : vector<4x2xbf16>, vector<2x286xbf16>, vector<4x286xf32> -> vector<4x286xf32>
    %18 = arith.addf %12, %17 : vector<4x286xf32>
    %c3 = arith.constant 3 : index
    %c0_18 = arith.constant 0 : index
    %c0_19 = arith.constant 0 : index
    %19 = vector.load %arg2[%c3, %c0_18, %c0_19] : memref<9x4x2xbf16, #tpu.memory_space<vmem>>, vector<1x4x2xbf16>
    %20 = vector.shape_cast %19 : vector<1x4x2xbf16> to vector<4x2xbf16>
    %c0_20 = arith.constant 0 : index
    %c0_21 = arith.constant 0 : index
    %c18 = arith.constant 18 : index
    %21 = vector.load %arg1[%c0_20, %c0_21, %c18] : memref<1x2x324xbf16, #tpu.memory_space<vmem>>, vector<1x2x286xbf16>
    %22 = vector.shape_cast %21 : vector<1x2x286xbf16> to vector<2x286xbf16>
    %cst_22 = arith.constant dense<0.000000e+00> : vector<4x286xf32>
    %23 = tpu.matmul %20, %22, %cst_22 {dimension_numbers = #tpu.dot_dimension_numbers<[1], [0], [0], [1], [0, 0, 1, 1], [], []>} : vector<4x2xbf16>, vector<2x286xbf16>, vector<4x286xf32> -> vector<4x286xf32>
    %24 = arith.addf %18, %23 : vector<4x286xf32>
    %c4 = arith.constant 4 : index
    %c0_23 = arith.constant 0 : index
    %c0_24 = arith.constant 0 : index
    %25 = vector.load %arg2[%c4, %c0_23, %c0_24] : memref<9x4x2xbf16, #tpu.memory_space<vmem>>, vector<1x4x2xbf16>
    %26 = vector.shape_cast %25 : vector<1x4x2xbf16> to vector<4x2xbf16>
    %c0_25 = arith.constant 0 : index
    %c0_26 = arith.constant 0 : index
    %c19 = arith.constant 19 : index
    %27 = vector.load %arg1[%c0_25, %c0_26, %c19] : memref<1x2x324xbf16, #tpu.memory_space<vmem>>, vector<1x2x286xbf16>
    %28 = vector.shape_cast %27 : vector<1x2x286xbf16> to vector<2x286xbf16>
    %cst_27 = arith.constant dense<0.000000e+00> : vector<4x286xf32>
    %29 = tpu.matmul %26, %28, %cst_27 {dimension_numbers = #tpu.dot_dimension_numbers<[1], [0], [0], [1], [0, 0, 1, 1], [], []>} : vector<4x2xbf16>, vector<2x286xbf16>, vector<4x286xf32> -> vector<4x286xf32>
    %30 = arith.addf %24, %29 : vector<4x286xf32>
    %c5 = arith.constant 5 : index
    %c0_28 = arith.constant 0 : index
    %c0_29 = arith.constant 0 : index
    %31 = vector.load %arg2[%c5, %c0_28, %c0_29] : memref<9x4x2xbf16, #tpu.memory_space<vmem>>, vector<1x4x2xbf16>
    %32 = vector.shape_cast %31 : vector<1x4x2xbf16> to vector<4x2xbf16>
    %c0_30 = arith.constant 0 : index
    %c0_31 = arith.constant 0 : index
    %c20 = arith.constant 20 : index
    %33 = vector.load %arg1[%c0_30, %c0_31, %c20] : memref<1x2x324xbf16, #tpu.memory_space<vmem>>, vector<1x2x286xbf16>
    %34 = vector.shape_cast %33 : vector<1x2x286xbf16> to vector<2x286xbf16>
    %cst_32 = arith.constant dense<0.000000e+00> : vector<4x286xf32>
    %35 = tpu.matmul %32, %34, %cst_32 {dimension_numbers = #tpu.dot_dimension_numbers<[1], [0], [0], [1], [0, 0, 1, 1], [], []>} : vector<4x2xbf16>, vector<2x286xbf16>, vector<4x286xf32> -> vector<4x286xf32>
    %36 = arith.addf %30, %35 : vector<4x286xf32>
    %c6 = arith.constant 6 : index
    %c0_33 = arith.constant 0 : index
    %c0_34 = arith.constant 0 : index
    %37 = vector.load %arg2[%c6, %c0_33, %c0_34] : memref<9x4x2xbf16, #tpu.memory_space<vmem>>, vector<1x4x2xbf16>
    %38 = vector.shape_cast %37 : vector<1x4x2xbf16> to vector<4x2xbf16>
    %c0_35 = arith.constant 0 : index
    %c0_36 = arith.constant 0 : index
    %c36 = arith.constant 36 : index
    %39 = vector.load %arg1[%c0_35, %c0_36, %c36] : memref<1x2x324xbf16, #tpu.memory_space<vmem>>, vector<1x2x286xbf16>
    %40 = vector.shape_cast %39 : vector<1x2x286xbf16> to vector<2x286xbf16>
    %cst_37 = arith.constant dense<0.000000e+00> : vector<4x286xf32>
    %41 = tpu.matmul %38, %40, %cst_37 {dimension_numbers = #tpu.dot_dimension_numbers<[1], [0], [0], [1], [0, 0, 1, 1], [], []>} : vector<4x2xbf16>, vector<2x286xbf16>, vector<4x286xf32> -> vector<4x286xf32>
    %42 = arith.addf %36, %41 : vector<4x286xf32>
    %c7 = arith.constant 7 : index
    %c0_38 = arith.constant 0 : index
    %c0_39 = arith.constant 0 : index
    %43 = vector.load %arg2[%c7, %c0_38, %c0_39] : memref<9x4x2xbf16, #tpu.memory_space<vmem>>, vector<1x4x2xbf16>
    %44 = vector.shape_cast %43 : vector<1x4x2xbf16> to vector<4x2xbf16>
    %c0_40 = arith.constant 0 : index
    %c0_41 = arith.constant 0 : index
    %c37 = arith.constant 37 : index
    %45 = vector.load %arg1[%c0_40, %c0_41, %c37] : memref<1x2x324xbf16, #tpu.memory_space<vmem>>, vector<1x2x286xbf16>
    %46 = vector.shape_cast %45 : vector<1x2x286xbf16> to vector<2x286xbf16>
    %cst_42 = arith.constant dense<0.000000e+00> : vector<4x286xf32>
    %47 = tpu.matmul %44, %46, %cst_42 {dimension_numbers = #tpu.dot_dimension_numbers<[1], [0], [0], [1], [0, 0, 1, 1], [], []>} : vector<4x2xbf16>, vector<2x286xbf16>, vector<4x286xf32> -> vector<4x286xf32>
    %48 = arith.addf %42, %47 : vector<4x286xf32>
    %c8 = arith.constant 8 : index
    %c0_43 = arith.constant 0 : index
    %c0_44 = arith.constant 0 : index
    %49 = vector.load %arg2[%c8, %c0_43, %c0_44] : memref<9x4x2xbf16, #tpu.memory_space<vmem>>, vector<1x4x2xbf16>
    %50 = vector.shape_cast %49 : vector<1x4x2xbf16> to vector<4x2xbf16>
    %c0_45 = arith.constant 0 : index
    %c0_46 = arith.constant 0 : index
    %c38 = arith.constant 38 : index
    %51 = vector.load %arg1[%c0_45, %c0_46, %c38] : memref<1x2x324xbf16, #tpu.memory_space<vmem>>, vector<1x2x286xbf16>
    %52 = vector.shape_cast %51 : vector<1x2x286xbf16> to vector<2x286xbf16>
    %cst_47 = arith.constant dense<0.000000e+00> : vector<4x286xf32>
    %53 = tpu.matmul %50, %52, %cst_47 {dimension_numbers = #tpu.dot_dimension_numbers<[1], [0], [0], [1], [0, 0, 1, 1], [], []>} : vector<4x2xbf16>, vector<2x286xbf16>, vector<4x286xf32> -> vector<4x286xf32>
    %54 = arith.addf %48, %53 : vector<4x286xf32>
    %c0_48 = arith.constant 0 : index
    %c0_49 = arith.constant 0 : index
    %55 = vector.load %arg3[%c0_48, %c0_49] : memref<1x286xf32, #tpu.memory_space<vmem>>, vector<1x286xf32>
    %56 = vector.broadcast %55 : vector<1x286xf32> to vector<4x286xf32>
    %57 = arith.mulf %54, %56 : vector<4x286xf32>
    %cst_50 = arith.constant dense<0.000000e+00> : vector<4xf32>
    %58 = vector.multi_reduction <add>, %57, %cst_50 [1] : vector<4x286xf32> to vector<4xf32>
    %59 = vector.shape_cast %58 : vector<4xf32> to vector<4x1xf32>
    %60 = arith.mulf %54, %54 : vector<4x286xf32>
    %61 = vector.broadcast %55 : vector<1x286xf32> to vector<4x286xf32>
    %62 = arith.mulf %60, %61 : vector<4x286xf32>
    %cst_51 = arith.constant dense<0.000000e+00> : vector<4xf32>
    %63 = vector.multi_reduction <add>, %62, %cst_51 [1] : vector<4x286xf32> to vector<4xf32>
    %64 = vector.shape_cast %63 : vector<4xf32> to vector<4x1xf32>
    %cst_52 = arith.constant 2.560000e+02 : f32
    %65 = vector.broadcast %cst_52 : f32 to vector<4x1xf32>
    %66 = arith.divf %59, %65 : vector<4x1xf32>
    %cst_53 = arith.constant 2.560000e+02 : f32
    %67 = vector.broadcast %cst_53 : f32 to vector<4x1xf32>
    %68 = arith.divf %64, %67 : vector<4x1xf32>
    %69 = arith.mulf %66, %66 : vector<4x1xf32>
    %70 = arith.subf %68, %69 : vector<4x1xf32>
    %cst_54 = arith.constant 0.000000e+00 : f32
    %71 = vector.broadcast %cst_54 : f32 to vector<4x1xf32>
    %72 = arith.maximumf %70, %71 : vector<4x1xf32>
    %73 = vector.broadcast %66 : vector<4x1xf32> to vector<4x286xf32>
    %74 = arith.subf %54, %73 : vector<4x286xf32>
    %cst_55 = arith.constant 9.99999974E-6 : f32
    %75 = vector.broadcast %cst_55 : f32 to vector<4x1xf32>
    %76 = arith.addf %72, %75 : vector<4x1xf32>
    %77 = math.rsqrt %76 : vector<4x1xf32>
    %78 = vector.broadcast %77 : vector<4x1xf32> to vector<4x286xf32>
    %79 = arith.mulf %74, %78 : vector<4x286xf32>
    %cst_56 = arith.constant 0.000000e+00 : f32
    %80 = vector.broadcast %cst_56 : f32 to vector<4x286xf32>
    %81 = arith.cmpf oge, %79, %80 : vector<4x286xf32>
    %cst_57 = arith.constant 2.000000e-01 : f32
    %82 = vector.broadcast %cst_57 : f32 to vector<4x286xf32>
    %83 = arith.mulf %82, %79 : vector<4x286xf32>
    %84 = arith.select %81, %79, %83 : vector<4x286xi1>, vector<4x286xf32>
    %85 = vector.broadcast %55 : vector<1x286xf32> to vector<4x286xf32>
    %86 = arith.mulf %84, %85 : vector<4x286xf32>
    %cst_58 = arith.constant 0.000000e+00 : bf16
    %87 = vector.broadcast %cst_58 : bf16 to vector<4x324xbf16>
    %c0_59 = arith.constant 0 : index
    %c0_60 = arith.constant 0 : index
    %c0_61 = arith.constant 0 : index
    %88 = vector.load %arg4[%c0_59, %c0_60, %c0_61] : memref<1x4x324xbf16, #tpu.memory_space<vmem>>, vector<1x4x324xbf16>
    %89 = vector.shape_cast %88 : vector<1x4x324xbf16> to vector<4x324xbf16>
    %90 = vector.shape_cast %87 : vector<4x324xbf16> to vector<1x4x324xbf16>
    tpu.vector_store %arg4[%c0_59, %c0_60, %c0_61], %90 {strides = array<i32>} : memref<1x4x324xbf16, #tpu.memory_space<vmem>>, vector<1x4x324xbf16>,
    %91 = arith.truncf %86 : vector<4x286xf32> to vector<4x286xbf16>
    %c0_62 = arith.constant 0 : index
    %c0_63 = arith.constant 0 : index
    %c19_64 = arith.constant 19 : index
    %92 = vector.load %arg4[%c0_62, %c0_63, %c19_64] : memref<1x4x324xbf16, #tpu.memory_space<vmem>>, vector<1x4x286xbf16>
    %93 = vector.shape_cast %92 : vector<1x4x286xbf16> to vector<4x286xbf16>
    %94 = vector.shape_cast %91 : vector<4x286xbf16> to vector<1x4x286xbf16>
    tpu.vector_store %arg4[%c0_62, %c0_63, %c19_64], %94 {strides = array<i32>} : memref<1x4x324xbf16, #tpu.memory_space<vmem>>, vector<1x4x286xbf16>,
    return
  }
  func.func @transform_0(%arg0: i32) -> (i32, i32, i32) {
    %c0_i32 = arith.constant 0 : i32
    %c0_i32_0 = arith.constant 0 : i32
    %c0_i32_1 = arith.constant 0 : i32
    return %arg0, %c0_i32, %c0_i32_0 : i32, i32, i32
  }
  func.func @transform_1(%arg0: i32) -> (i32, i32, i32) {
    %c0_i32 = arith.constant 0 : i32
    %c0_i32_0 = arith.constant 0 : i32
    %c0_i32_1 = arith.constant 0 : i32
    %c0_i32_2 = arith.constant 0 : i32
    return %c0_i32, %c0_i32_0, %c0_i32_1 : i32, i32, i32
  }
  func.func @transform_2(%arg0: i32) -> (i32, i32) {
    %c0_i32 = arith.constant 0 : i32
    %c0_i32_0 = arith.constant 0 : i32
    %c0_i32_1 = arith.constant 0 : i32
    return %c0_i32, %c0_i32_0 : i32, i32
  }
  func.func @transform_3(%arg0: i32) -> (i32, i32, i32) {
    %c0_i32 = arith.constant 0 : i32
    %c0_i32_0 = arith.constant 0 : i32
    %c0_i32_1 = arith.constant 0 : i32
    return %arg0, %c0_i32, %c0_i32_0 : i32, i32, i32
  }
}

module attributes {stable_mosaic.version = 11 : i64} {
  func.func @_conv3x3_in_lrelu_kernel(%arg0: i32, %arg1: memref<1x4x324xbf16, #tpu.memory_space<vmem>>, %arg2: memref<9x4x4xbf16, #tpu.memory_space<vmem>>, %arg3: memref<1x286xf32, #tpu.memory_space<vmem>>, %arg4: memref<1x4x324xbf16, #tpu.memory_space<vmem>>) attributes {dimension_semantics = [#tpu.dimension_semantics<parallel>], iteration_bounds = array<i64: 8>, scalar_prefetch = 0 : i64, scratch_operands = 0 : i64, tpu.core_type = #tpu.core_type<tc>, window_params = [{transform_indices = @transform_0, window_bounds = array<i64: 1, 4, 324>}, {pipeline_mode = #tpu.pipeline_mode<synchronous>, transform_indices = @transform_1, window_bounds = array<i64: 9, 4, 4>}, {pipeline_mode = #tpu.pipeline_mode<synchronous>, transform_indices = @transform_2, window_bounds = array<i64: 1, 286>}, {transform_indices = @transform_3, window_bounds = array<i64: 1, 4, 324>}]} {
    %cst = arith.constant 0.000000e+00 : f32
    %0 = vector.broadcast %cst : f32 to vector<4x286xf32>
    %c0 = arith.constant 0 : index
    %c0_0 = arith.constant 0 : index
    %c0_1 = arith.constant 0 : index
    %1 = vector.load %arg2[%c0, %c0_0, %c0_1] : memref<9x4x4xbf16, #tpu.memory_space<vmem>>, vector<1x4x4xbf16>
    %2 = vector.shape_cast %1 : vector<1x4x4xbf16> to vector<4x4xbf16>
    %c0_2 = arith.constant 0 : index
    %c0_3 = arith.constant 0 : index
    %c0_4 = arith.constant 0 : index
    %3 = vector.load %arg1[%c0_2, %c0_3, %c0_4] : memref<1x4x324xbf16, #tpu.memory_space<vmem>>, vector<1x4x286xbf16>
    %4 = vector.shape_cast %3 : vector<1x4x286xbf16> to vector<4x286xbf16>
    %cst_5 = arith.constant dense<0.000000e+00> : vector<4x286xf32>
    %5 = tpu.matmul %2, %4, %cst_5 {dimension_numbers = #tpu.dot_dimension_numbers<[1], [0], [0], [1], [0, 0, 1, 1], [], []>} : vector<4x4xbf16>, vector<4x286xbf16>, vector<4x286xf32> -> vector<4x286xf32>
    %6 = arith.addf %0, %5 : vector<4x286xf32>
    %c1 = arith.constant 1 : index
    %c0_6 = arith.constant 0 : index
    %c0_7 = arith.constant 0 : index
    %7 = vector.load %arg2[%c1, %c0_6, %c0_7] : memref<9x4x4xbf16, #tpu.memory_space<vmem>>, vector<1x4x4xbf16>
    %8 = vector.shape_cast %7 : vector<1x4x4xbf16> to vector<4x4xbf16>
    %c0_8 = arith.constant 0 : index
    %c0_9 = arith.constant 0 : index
    %c1_10 = arith.constant 1 : index
    %9 = vector.load %arg1[%c0_8, %c0_9, %c1_10] : memref<1x4x324xbf16, #tpu.memory_space<vmem>>, vector<1x4x286xbf16>
    %10 = vector.shape_cast %9 : vector<1x4x286xbf16> to vector<4x286xbf16>
    %cst_11 = arith.constant dense<0.000000e+00> : vector<4x286xf32>
    %11 = tpu.matmul %8, %10, %cst_11 {dimension_numbers = #tpu.dot_dimension_numbers<[1], [0], [0], [1], [0, 0, 1, 1], [], []>} : vector<4x4xbf16>, vector<4x286xbf16>, vector<4x286xf32> -> vector<4x286xf32>
    %12 = arith.addf %6, %11 : vector<4x286xf32>
    %c2 = arith.constant 2 : index
    %c0_12 = arith.constant 0 : index
    %c0_13 = arith.constant 0 : index
    %13 = vector.load %arg2[%c2, %c0_12, %c0_13] : memref<9x4x4xbf16, #tpu.memory_space<vmem>>, vector<1x4x4xbf16>
    %14 = vector.shape_cast %13 : vector<1x4x4xbf16> to vector<4x4xbf16>
    %c0_14 = arith.constant 0 : index
    %c0_15 = arith.constant 0 : index
    %c2_16 = arith.constant 2 : index
    %15 = vector.load %arg1[%c0_14, %c0_15, %c2_16] : memref<1x4x324xbf16, #tpu.memory_space<vmem>>, vector<1x4x286xbf16>
    %16 = vector.shape_cast %15 : vector<1x4x286xbf16> to vector<4x286xbf16>
    %cst_17 = arith.constant dense<0.000000e+00> : vector<4x286xf32>
    %17 = tpu.matmul %14, %16, %cst_17 {dimension_numbers = #tpu.dot_dimension_numbers<[1], [0], [0], [1], [0, 0, 1, 1], [], []>} : vector<4x4xbf16>, vector<4x286xbf16>, vector<4x286xf32> -> vector<4x286xf32>
    %18 = arith.addf %12, %17 : vector<4x286xf32>
    %c3 = arith.constant 3 : index
    %c0_18 = arith.constant 0 : index
    %c0_19 = arith.constant 0 : index
    %19 = vector.load %arg2[%c3, %c0_18, %c0_19] : memref<9x4x4xbf16, #tpu.memory_space<vmem>>, vector<1x4x4xbf16>
    %20 = vector.shape_cast %19 : vector<1x4x4xbf16> to vector<4x4xbf16>
    %c0_20 = arith.constant 0 : index
    %c0_21 = arith.constant 0 : index
    %c18 = arith.constant 18 : index
    %21 = vector.load %arg1[%c0_20, %c0_21, %c18] : memref<1x4x324xbf16, #tpu.memory_space<vmem>>, vector<1x4x286xbf16>
    %22 = vector.shape_cast %21 : vector<1x4x286xbf16> to vector<4x286xbf16>
    %cst_22 = arith.constant dense<0.000000e+00> : vector<4x286xf32>
    %23 = tpu.matmul %20, %22, %cst_22 {dimension_numbers = #tpu.dot_dimension_numbers<[1], [0], [0], [1], [0, 0, 1, 1], [], []>} : vector<4x4xbf16>, vector<4x286xbf16>, vector<4x286xf32> -> vector<4x286xf32>
    %24 = arith.addf %18, %23 : vector<4x286xf32>
    %c4 = arith.constant 4 : index
    %c0_23 = arith.constant 0 : index
    %c0_24 = arith.constant 0 : index
    %25 = vector.load %arg2[%c4, %c0_23, %c0_24] : memref<9x4x4xbf16, #tpu.memory_space<vmem>>, vector<1x4x4xbf16>
    %26 = vector.shape_cast %25 : vector<1x4x4xbf16> to vector<4x4xbf16>
    %c0_25 = arith.constant 0 : index
    %c0_26 = arith.constant 0 : index
    %c19 = arith.constant 19 : index
    %27 = vector.load %arg1[%c0_25, %c0_26, %c19] : memref<1x4x324xbf16, #tpu.memory_space<vmem>>, vector<1x4x286xbf16>
    %28 = vector.shape_cast %27 : vector<1x4x286xbf16> to vector<4x286xbf16>
    %cst_27 = arith.constant dense<0.000000e+00> : vector<4x286xf32>
    %29 = tpu.matmul %26, %28, %cst_27 {dimension_numbers = #tpu.dot_dimension_numbers<[1], [0], [0], [1], [0, 0, 1, 1], [], []>} : vector<4x4xbf16>, vector<4x286xbf16>, vector<4x286xf32> -> vector<4x286xf32>
    %30 = arith.addf %24, %29 : vector<4x286xf32>
    %c5 = arith.constant 5 : index
    %c0_28 = arith.constant 0 : index
    %c0_29 = arith.constant 0 : index
    %31 = vector.load %arg2[%c5, %c0_28, %c0_29] : memref<9x4x4xbf16, #tpu.memory_space<vmem>>, vector<1x4x4xbf16>
    %32 = vector.shape_cast %31 : vector<1x4x4xbf16> to vector<4x4xbf16>
    %c0_30 = arith.constant 0 : index
    %c0_31 = arith.constant 0 : index
    %c20 = arith.constant 20 : index
    %33 = vector.load %arg1[%c0_30, %c0_31, %c20] : memref<1x4x324xbf16, #tpu.memory_space<vmem>>, vector<1x4x286xbf16>
    %34 = vector.shape_cast %33 : vector<1x4x286xbf16> to vector<4x286xbf16>
    %cst_32 = arith.constant dense<0.000000e+00> : vector<4x286xf32>
    %35 = tpu.matmul %32, %34, %cst_32 {dimension_numbers = #tpu.dot_dimension_numbers<[1], [0], [0], [1], [0, 0, 1, 1], [], []>} : vector<4x4xbf16>, vector<4x286xbf16>, vector<4x286xf32> -> vector<4x286xf32>
    %36 = arith.addf %30, %35 : vector<4x286xf32>
    %c6 = arith.constant 6 : index
    %c0_33 = arith.constant 0 : index
    %c0_34 = arith.constant 0 : index
    %37 = vector.load %arg2[%c6, %c0_33, %c0_34] : memref<9x4x4xbf16, #tpu.memory_space<vmem>>, vector<1x4x4xbf16>
    %38 = vector.shape_cast %37 : vector<1x4x4xbf16> to vector<4x4xbf16>
    %c0_35 = arith.constant 0 : index
    %c0_36 = arith.constant 0 : index
    %c36 = arith.constant 36 : index
    %39 = vector.load %arg1[%c0_35, %c0_36, %c36] : memref<1x4x324xbf16, #tpu.memory_space<vmem>>, vector<1x4x286xbf16>
    %40 = vector.shape_cast %39 : vector<1x4x286xbf16> to vector<4x286xbf16>
    %cst_37 = arith.constant dense<0.000000e+00> : vector<4x286xf32>
    %41 = tpu.matmul %38, %40, %cst_37 {dimension_numbers = #tpu.dot_dimension_numbers<[1], [0], [0], [1], [0, 0, 1, 1], [], []>} : vector<4x4xbf16>, vector<4x286xbf16>, vector<4x286xf32> -> vector<4x286xf32>
    %42 = arith.addf %36, %41 : vector<4x286xf32>
    %c7 = arith.constant 7 : index
    %c0_38 = arith.constant 0 : index
    %c0_39 = arith.constant 0 : index
    %43 = vector.load %arg2[%c7, %c0_38, %c0_39] : memref<9x4x4xbf16, #tpu.memory_space<vmem>>, vector<1x4x4xbf16>
    %44 = vector.shape_cast %43 : vector<1x4x4xbf16> to vector<4x4xbf16>
    %c0_40 = arith.constant 0 : index
    %c0_41 = arith.constant 0 : index
    %c37 = arith.constant 37 : index
    %45 = vector.load %arg1[%c0_40, %c0_41, %c37] : memref<1x4x324xbf16, #tpu.memory_space<vmem>>, vector<1x4x286xbf16>
    %46 = vector.shape_cast %45 : vector<1x4x286xbf16> to vector<4x286xbf16>
    %cst_42 = arith.constant dense<0.000000e+00> : vector<4x286xf32>
    %47 = tpu.matmul %44, %46, %cst_42 {dimension_numbers = #tpu.dot_dimension_numbers<[1], [0], [0], [1], [0, 0, 1, 1], [], []>} : vector<4x4xbf16>, vector<4x286xbf16>, vector<4x286xf32> -> vector<4x286xf32>
    %48 = arith.addf %42, %47 : vector<4x286xf32>
    %c8 = arith.constant 8 : index
    %c0_43 = arith.constant 0 : index
    %c0_44 = arith.constant 0 : index
    %49 = vector.load %arg2[%c8, %c0_43, %c0_44] : memref<9x4x4xbf16, #tpu.memory_space<vmem>>, vector<1x4x4xbf16>
    %50 = vector.shape_cast %49 : vector<1x4x4xbf16> to vector<4x4xbf16>
    %c0_45 = arith.constant 0 : index
    %c0_46 = arith.constant 0 : index
    %c38 = arith.constant 38 : index
    %51 = vector.load %arg1[%c0_45, %c0_46, %c38] : memref<1x4x324xbf16, #tpu.memory_space<vmem>>, vector<1x4x286xbf16>
    %52 = vector.shape_cast %51 : vector<1x4x286xbf16> to vector<4x286xbf16>
    %cst_47 = arith.constant dense<0.000000e+00> : vector<4x286xf32>
    %53 = tpu.matmul %50, %52, %cst_47 {dimension_numbers = #tpu.dot_dimension_numbers<[1], [0], [0], [1], [0, 0, 1, 1], [], []>} : vector<4x4xbf16>, vector<4x286xbf16>, vector<4x286xf32> -> vector<4x286xf32>
    %54 = arith.addf %48, %53 : vector<4x286xf32>
    %c0_48 = arith.constant 0 : index
    %c0_49 = arith.constant 0 : index
    %55 = vector.load %arg3[%c0_48, %c0_49] : memref<1x286xf32, #tpu.memory_space<vmem>>, vector<1x286xf32>
    %56 = vector.broadcast %55 : vector<1x286xf32> to vector<4x286xf32>
    %57 = arith.mulf %54, %56 : vector<4x286xf32>
    %cst_50 = arith.constant dense<0.000000e+00> : vector<4xf32>
    %58 = vector.multi_reduction <add>, %57, %cst_50 [1] : vector<4x286xf32> to vector<4xf32>
    %59 = vector.shape_cast %58 : vector<4xf32> to vector<4x1xf32>
    %60 = arith.mulf %54, %54 : vector<4x286xf32>
    %61 = vector.broadcast %55 : vector<1x286xf32> to vector<4x286xf32>
    %62 = arith.mulf %60, %61 : vector<4x286xf32>
    %cst_51 = arith.constant dense<0.000000e+00> : vector<4xf32>
    %63 = vector.multi_reduction <add>, %62, %cst_51 [1] : vector<4x286xf32> to vector<4xf32>
    %64 = vector.shape_cast %63 : vector<4xf32> to vector<4x1xf32>
    %cst_52 = arith.constant 2.560000e+02 : f32
    %65 = vector.broadcast %cst_52 : f32 to vector<4x1xf32>
    %66 = arith.divf %59, %65 : vector<4x1xf32>
    %cst_53 = arith.constant 2.560000e+02 : f32
    %67 = vector.broadcast %cst_53 : f32 to vector<4x1xf32>
    %68 = arith.divf %64, %67 : vector<4x1xf32>
    %69 = arith.mulf %66, %66 : vector<4x1xf32>
    %70 = arith.subf %68, %69 : vector<4x1xf32>
    %cst_54 = arith.constant 0.000000e+00 : f32
    %71 = vector.broadcast %cst_54 : f32 to vector<4x1xf32>
    %72 = arith.maximumf %70, %71 : vector<4x1xf32>
    %73 = vector.broadcast %66 : vector<4x1xf32> to vector<4x286xf32>
    %74 = arith.subf %54, %73 : vector<4x286xf32>
    %cst_55 = arith.constant 9.99999974E-6 : f32
    %75 = vector.broadcast %cst_55 : f32 to vector<4x1xf32>
    %76 = arith.addf %72, %75 : vector<4x1xf32>
    %77 = math.rsqrt %76 : vector<4x1xf32>
    %78 = vector.broadcast %77 : vector<4x1xf32> to vector<4x286xf32>
    %79 = arith.mulf %74, %78 : vector<4x286xf32>
    %cst_56 = arith.constant 0.000000e+00 : f32
    %80 = vector.broadcast %cst_56 : f32 to vector<4x286xf32>
    %81 = arith.cmpf oge, %79, %80 : vector<4x286xf32>
    %cst_57 = arith.constant 2.000000e-01 : f32
    %82 = vector.broadcast %cst_57 : f32 to vector<4x286xf32>
    %83 = arith.mulf %82, %79 : vector<4x286xf32>
    %84 = arith.select %81, %79, %83 : vector<4x286xi1>, vector<4x286xf32>
    %85 = vector.broadcast %55 : vector<1x286xf32> to vector<4x286xf32>
    %86 = arith.mulf %84, %85 : vector<4x286xf32>
    %cst_58 = arith.constant 0.000000e+00 : bf16
    %87 = vector.broadcast %cst_58 : bf16 to vector<4x324xbf16>
    %c0_59 = arith.constant 0 : index
    %c0_60 = arith.constant 0 : index
    %c0_61 = arith.constant 0 : index
    %88 = vector.load %arg4[%c0_59, %c0_60, %c0_61] : memref<1x4x324xbf16, #tpu.memory_space<vmem>>, vector<1x4x324xbf16>
    %89 = vector.shape_cast %88 : vector<1x4x324xbf16> to vector<4x324xbf16>
    %90 = vector.shape_cast %87 : vector<4x324xbf16> to vector<1x4x324xbf16>
    tpu.vector_store %arg4[%c0_59, %c0_60, %c0_61], %90 {strides = array<i32>} : memref<1x4x324xbf16, #tpu.memory_space<vmem>>, vector<1x4x324xbf16>,
    %91 = arith.truncf %86 : vector<4x286xf32> to vector<4x286xbf16>
    %c0_62 = arith.constant 0 : index
    %c0_63 = arith.constant 0 : index
    %c19_64 = arith.constant 19 : index
    %92 = vector.load %arg4[%c0_62, %c0_63, %c19_64] : memref<1x4x324xbf16, #tpu.memory_space<vmem>>, vector<1x4x286xbf16>
    %93 = vector.shape_cast %92 : vector<1x4x286xbf16> to vector<4x286xbf16>
    %94 = vector.shape_cast %91 : vector<4x286xbf16> to vector<1x4x286xbf16>
    tpu.vector_store %arg4[%c0_62, %c0_63, %c19_64], %94 {strides = array<i32>} : memref<1x4x324xbf16, #tpu.memory_space<vmem>>, vector<1x4x286xbf16>,
    return
  }
  func.func @transform_0(%arg0: i32) -> (i32, i32, i32) {
    %c0_i32 = arith.constant 0 : i32
    %c0_i32_0 = arith.constant 0 : i32
    %c0_i32_1 = arith.constant 0 : i32
    return %arg0, %c0_i32, %c0_i32_0 : i32, i32, i32
  }
  func.func @transform_1(%arg0: i32) -> (i32, i32, i32) {
    %c0_i32 = arith.constant 0 : i32
    %c0_i32_0 = arith.constant 0 : i32
    %c0_i32_1 = arith.constant 0 : i32
    %c0_i32_2 = arith.constant 0 : i32
    return %c0_i32, %c0_i32_0, %c0_i32_1 : i32, i32, i32
  }
  func.func @transform_2(%arg0: i32) -> (i32, i32) {
    %c0_i32 = arith.constant 0 : i32
    %c0_i32_0 = arith.constant 0 : i32
    %c0_i32_1 = arith.constant 0 : i32
    return %c0_i32, %c0_i32_0 : i32, i32
  }
  func.func @transform_3(%arg0: i32) -> (i32, i32, i32) {
    %c0_i32 = arith.constant 0 : i32
    %c0_i32_0 = arith.constant 0 : i32
    %c0_i32_1 = arith.constant 0 : i32
    return %arg0, %c0_i32, %c0_i32_0 : i32, i32, i32
  }
}

module attributes {stable_mosaic.version = 11 : i64} {
  func.func @_conv3x3_in_lrelu_kernel(%arg0: i32, %arg1: memref<1x8x100xbf16, #tpu.memory_space<vmem>>, %arg2: memref<9x8x8xbf16, #tpu.memory_space<vmem>>, %arg3: memref<1x78xf32, #tpu.memory_space<vmem>>, %arg4: memref<1x8x100xbf16, #tpu.memory_space<vmem>>) attributes {dimension_semantics = [#tpu.dimension_semantics<parallel>], iteration_bounds = array<i64: 8>, scalar_prefetch = 0 : i64, scratch_operands = 0 : i64, tpu.core_type = #tpu.core_type<tc>, window_params = [{transform_indices = @transform_0, window_bounds = array<i64: 1, 8, 100>}, {pipeline_mode = #tpu.pipeline_mode<synchronous>, transform_indices = @transform_1, window_bounds = array<i64: 9, 8, 8>}, {pipeline_mode = #tpu.pipeline_mode<synchronous>, transform_indices = @transform_2, window_bounds = array<i64: 1, 78>}, {transform_indices = @transform_3, window_bounds = array<i64: 1, 8, 100>}]} {
    %cst = arith.constant 0.000000e+00 : f32
    %0 = vector.broadcast %cst : f32 to vector<8x78xf32>
    %c0 = arith.constant 0 : index
    %c0_0 = arith.constant 0 : index
    %c0_1 = arith.constant 0 : index
    %1 = vector.load %arg2[%c0, %c0_0, %c0_1] : memref<9x8x8xbf16, #tpu.memory_space<vmem>>, vector<1x8x8xbf16>
    %2 = vector.shape_cast %1 : vector<1x8x8xbf16> to vector<8x8xbf16>
    %c0_2 = arith.constant 0 : index
    %c0_3 = arith.constant 0 : index
    %c0_4 = arith.constant 0 : index
    %3 = vector.load %arg1[%c0_2, %c0_3, %c0_4] : memref<1x8x100xbf16, #tpu.memory_space<vmem>>, vector<1x8x78xbf16>
    %4 = vector.shape_cast %3 : vector<1x8x78xbf16> to vector<8x78xbf16>
    %cst_5 = arith.constant dense<0.000000e+00> : vector<8x78xf32>
    %5 = tpu.matmul %2, %4, %cst_5 {dimension_numbers = #tpu.dot_dimension_numbers<[1], [0], [0], [1], [0, 0, 1, 1], [], []>} : vector<8x8xbf16>, vector<8x78xbf16>, vector<8x78xf32> -> vector<8x78xf32>
    %6 = arith.addf %0, %5 : vector<8x78xf32>
    %c1 = arith.constant 1 : index
    %c0_6 = arith.constant 0 : index
    %c0_7 = arith.constant 0 : index
    %7 = vector.load %arg2[%c1, %c0_6, %c0_7] : memref<9x8x8xbf16, #tpu.memory_space<vmem>>, vector<1x8x8xbf16>
    %8 = vector.shape_cast %7 : vector<1x8x8xbf16> to vector<8x8xbf16>
    %c0_8 = arith.constant 0 : index
    %c0_9 = arith.constant 0 : index
    %c1_10 = arith.constant 1 : index
    %9 = vector.load %arg1[%c0_8, %c0_9, %c1_10] : memref<1x8x100xbf16, #tpu.memory_space<vmem>>, vector<1x8x78xbf16>
    %10 = vector.shape_cast %9 : vector<1x8x78xbf16> to vector<8x78xbf16>
    %cst_11 = arith.constant dense<0.000000e+00> : vector<8x78xf32>
    %11 = tpu.matmul %8, %10, %cst_11 {dimension_numbers = #tpu.dot_dimension_numbers<[1], [0], [0], [1], [0, 0, 1, 1], [], []>} : vector<8x8xbf16>, vector<8x78xbf16>, vector<8x78xf32> -> vector<8x78xf32>
    %12 = arith.addf %6, %11 : vector<8x78xf32>
    %c2 = arith.constant 2 : index
    %c0_12 = arith.constant 0 : index
    %c0_13 = arith.constant 0 : index
    %13 = vector.load %arg2[%c2, %c0_12, %c0_13] : memref<9x8x8xbf16, #tpu.memory_space<vmem>>, vector<1x8x8xbf16>
    %14 = vector.shape_cast %13 : vector<1x8x8xbf16> to vector<8x8xbf16>
    %c0_14 = arith.constant 0 : index
    %c0_15 = arith.constant 0 : index
    %c2_16 = arith.constant 2 : index
    %15 = vector.load %arg1[%c0_14, %c0_15, %c2_16] : memref<1x8x100xbf16, #tpu.memory_space<vmem>>, vector<1x8x78xbf16>
    %16 = vector.shape_cast %15 : vector<1x8x78xbf16> to vector<8x78xbf16>
    %cst_17 = arith.constant dense<0.000000e+00> : vector<8x78xf32>
    %17 = tpu.matmul %14, %16, %cst_17 {dimension_numbers = #tpu.dot_dimension_numbers<[1], [0], [0], [1], [0, 0, 1, 1], [], []>} : vector<8x8xbf16>, vector<8x78xbf16>, vector<8x78xf32> -> vector<8x78xf32>
    %18 = arith.addf %12, %17 : vector<8x78xf32>
    %c3 = arith.constant 3 : index
    %c0_18 = arith.constant 0 : index
    %c0_19 = arith.constant 0 : index
    %19 = vector.load %arg2[%c3, %c0_18, %c0_19] : memref<9x8x8xbf16, #tpu.memory_space<vmem>>, vector<1x8x8xbf16>
    %20 = vector.shape_cast %19 : vector<1x8x8xbf16> to vector<8x8xbf16>
    %c0_20 = arith.constant 0 : index
    %c0_21 = arith.constant 0 : index
    %c10 = arith.constant 10 : index
    %21 = vector.load %arg1[%c0_20, %c0_21, %c10] : memref<1x8x100xbf16, #tpu.memory_space<vmem>>, vector<1x8x78xbf16>
    %22 = vector.shape_cast %21 : vector<1x8x78xbf16> to vector<8x78xbf16>
    %cst_22 = arith.constant dense<0.000000e+00> : vector<8x78xf32>
    %23 = tpu.matmul %20, %22, %cst_22 {dimension_numbers = #tpu.dot_dimension_numbers<[1], [0], [0], [1], [0, 0, 1, 1], [], []>} : vector<8x8xbf16>, vector<8x78xbf16>, vector<8x78xf32> -> vector<8x78xf32>
    %24 = arith.addf %18, %23 : vector<8x78xf32>
    %c4 = arith.constant 4 : index
    %c0_23 = arith.constant 0 : index
    %c0_24 = arith.constant 0 : index
    %25 = vector.load %arg2[%c4, %c0_23, %c0_24] : memref<9x8x8xbf16, #tpu.memory_space<vmem>>, vector<1x8x8xbf16>
    %26 = vector.shape_cast %25 : vector<1x8x8xbf16> to vector<8x8xbf16>
    %c0_25 = arith.constant 0 : index
    %c0_26 = arith.constant 0 : index
    %c11 = arith.constant 11 : index
    %27 = vector.load %arg1[%c0_25, %c0_26, %c11] : memref<1x8x100xbf16, #tpu.memory_space<vmem>>, vector<1x8x78xbf16>
    %28 = vector.shape_cast %27 : vector<1x8x78xbf16> to vector<8x78xbf16>
    %cst_27 = arith.constant dense<0.000000e+00> : vector<8x78xf32>
    %29 = tpu.matmul %26, %28, %cst_27 {dimension_numbers = #tpu.dot_dimension_numbers<[1], [0], [0], [1], [0, 0, 1, 1], [], []>} : vector<8x8xbf16>, vector<8x78xbf16>, vector<8x78xf32> -> vector<8x78xf32>
    %30 = arith.addf %24, %29 : vector<8x78xf32>
    %c5 = arith.constant 5 : index
    %c0_28 = arith.constant 0 : index
    %c0_29 = arith.constant 0 : index
    %31 = vector.load %arg2[%c5, %c0_28, %c0_29] : memref<9x8x8xbf16, #tpu.memory_space<vmem>>, vector<1x8x8xbf16>
    %32 = vector.shape_cast %31 : vector<1x8x8xbf16> to vector<8x8xbf16>
    %c0_30 = arith.constant 0 : index
    %c0_31 = arith.constant 0 : index
    %c12 = arith.constant 12 : index
    %33 = vector.load %arg1[%c0_30, %c0_31, %c12] : memref<1x8x100xbf16, #tpu.memory_space<vmem>>, vector<1x8x78xbf16>
    %34 = vector.shape_cast %33 : vector<1x8x78xbf16> to vector<8x78xbf16>
    %cst_32 = arith.constant dense<0.000000e+00> : vector<8x78xf32>
    %35 = tpu.matmul %32, %34, %cst_32 {dimension_numbers = #tpu.dot_dimension_numbers<[1], [0], [0], [1], [0, 0, 1, 1], [], []>} : vector<8x8xbf16>, vector<8x78xbf16>, vector<8x78xf32> -> vector<8x78xf32>
    %36 = arith.addf %30, %35 : vector<8x78xf32>
    %c6 = arith.constant 6 : index
    %c0_33 = arith.constant 0 : index
    %c0_34 = arith.constant 0 : index
    %37 = vector.load %arg2[%c6, %c0_33, %c0_34] : memref<9x8x8xbf16, #tpu.memory_space<vmem>>, vector<1x8x8xbf16>
    %38 = vector.shape_cast %37 : vector<1x8x8xbf16> to vector<8x8xbf16>
    %c0_35 = arith.constant 0 : index
    %c0_36 = arith.constant 0 : index
    %c20 = arith.constant 20 : index
    %39 = vector.load %arg1[%c0_35, %c0_36, %c20] : memref<1x8x100xbf16, #tpu.memory_space<vmem>>, vector<1x8x78xbf16>
    %40 = vector.shape_cast %39 : vector<1x8x78xbf16> to vector<8x78xbf16>
    %cst_37 = arith.constant dense<0.000000e+00> : vector<8x78xf32>
    %41 = tpu.matmul %38, %40, %cst_37 {dimension_numbers = #tpu.dot_dimension_numbers<[1], [0], [0], [1], [0, 0, 1, 1], [], []>} : vector<8x8xbf16>, vector<8x78xbf16>, vector<8x78xf32> -> vector<8x78xf32>
    %42 = arith.addf %36, %41 : vector<8x78xf32>
    %c7 = arith.constant 7 : index
    %c0_38 = arith.constant 0 : index
    %c0_39 = arith.constant 0 : index
    %43 = vector.load %arg2[%c7, %c0_38, %c0_39] : memref<9x8x8xbf16, #tpu.memory_space<vmem>>, vector<1x8x8xbf16>
    %44 = vector.shape_cast %43 : vector<1x8x8xbf16> to vector<8x8xbf16>
    %c0_40 = arith.constant 0 : index
    %c0_41 = arith.constant 0 : index
    %c21 = arith.constant 21 : index
    %45 = vector.load %arg1[%c0_40, %c0_41, %c21] : memref<1x8x100xbf16, #tpu.memory_space<vmem>>, vector<1x8x78xbf16>
    %46 = vector.shape_cast %45 : vector<1x8x78xbf16> to vector<8x78xbf16>
    %cst_42 = arith.constant dense<0.000000e+00> : vector<8x78xf32>
    %47 = tpu.matmul %44, %46, %cst_42 {dimension_numbers = #tpu.dot_dimension_numbers<[1], [0], [0], [1], [0, 0, 1, 1], [], []>} : vector<8x8xbf16>, vector<8x78xbf16>, vector<8x78xf32> -> vector<8x78xf32>
    %48 = arith.addf %42, %47 : vector<8x78xf32>
    %c8 = arith.constant 8 : index
    %c0_43 = arith.constant 0 : index
    %c0_44 = arith.constant 0 : index
    %49 = vector.load %arg2[%c8, %c0_43, %c0_44] : memref<9x8x8xbf16, #tpu.memory_space<vmem>>, vector<1x8x8xbf16>
    %50 = vector.shape_cast %49 : vector<1x8x8xbf16> to vector<8x8xbf16>
    %c0_45 = arith.constant 0 : index
    %c0_46 = arith.constant 0 : index
    %c22 = arith.constant 22 : index
    %51 = vector.load %arg1[%c0_45, %c0_46, %c22] : memref<1x8x100xbf16, #tpu.memory_space<vmem>>, vector<1x8x78xbf16>
    %52 = vector.shape_cast %51 : vector<1x8x78xbf16> to vector<8x78xbf16>
    %cst_47 = arith.constant dense<0.000000e+00> : vector<8x78xf32>
    %53 = tpu.matmul %50, %52, %cst_47 {dimension_numbers = #tpu.dot_dimension_numbers<[1], [0], [0], [1], [0, 0, 1, 1], [], []>} : vector<8x8xbf16>, vector<8x78xbf16>, vector<8x78xf32> -> vector<8x78xf32>
    %54 = arith.addf %48, %53 : vector<8x78xf32>
    %c0_48 = arith.constant 0 : index
    %c0_49 = arith.constant 0 : index
    %55 = vector.load %arg3[%c0_48, %c0_49] : memref<1x78xf32, #tpu.memory_space<vmem>>, vector<1x78xf32>
    %56 = vector.broadcast %55 : vector<1x78xf32> to vector<8x78xf32>
    %57 = arith.mulf %54, %56 : vector<8x78xf32>
    %cst_50 = arith.constant dense<0.000000e+00> : vector<8xf32>
    %58 = vector.multi_reduction <add>, %57, %cst_50 [1] : vector<8x78xf32> to vector<8xf32>
    %59 = vector.shape_cast %58 : vector<8xf32> to vector<8x1xf32>
    %60 = arith.mulf %54, %54 : vector<8x78xf32>
    %61 = vector.broadcast %55 : vector<1x78xf32> to vector<8x78xf32>
    %62 = arith.mulf %60, %61 : vector<8x78xf32>
    %cst_51 = arith.constant dense<0.000000e+00> : vector<8xf32>
    %63 = vector.multi_reduction <add>, %62, %cst_51 [1] : vector<8x78xf32> to vector<8xf32>
    %64 = vector.shape_cast %63 : vector<8xf32> to vector<8x1xf32>
    %cst_52 = arith.constant 6.400000e+01 : f32
    %65 = vector.broadcast %cst_52 : f32 to vector<8x1xf32>
    %66 = arith.divf %59, %65 : vector<8x1xf32>
    %cst_53 = arith.constant 6.400000e+01 : f32
    %67 = vector.broadcast %cst_53 : f32 to vector<8x1xf32>
    %68 = arith.divf %64, %67 : vector<8x1xf32>
    %69 = arith.mulf %66, %66 : vector<8x1xf32>
    %70 = arith.subf %68, %69 : vector<8x1xf32>
    %cst_54 = arith.constant 0.000000e+00 : f32
    %71 = vector.broadcast %cst_54 : f32 to vector<8x1xf32>
    %72 = arith.maximumf %70, %71 : vector<8x1xf32>
    %73 = vector.broadcast %66 : vector<8x1xf32> to vector<8x78xf32>
    %74 = arith.subf %54, %73 : vector<8x78xf32>
    %cst_55 = arith.constant 9.99999974E-6 : f32
    %75 = vector.broadcast %cst_55 : f32 to vector<8x1xf32>
    %76 = arith.addf %72, %75 : vector<8x1xf32>
    %77 = math.rsqrt %76 : vector<8x1xf32>
    %78 = vector.broadcast %77 : vector<8x1xf32> to vector<8x78xf32>
    %79 = arith.mulf %74, %78 : vector<8x78xf32>
    %cst_56 = arith.constant 0.000000e+00 : f32
    %80 = vector.broadcast %cst_56 : f32 to vector<8x78xf32>
    %81 = arith.cmpf oge, %79, %80 : vector<8x78xf32>
    %cst_57 = arith.constant 2.000000e-01 : f32
    %82 = vector.broadcast %cst_57 : f32 to vector<8x78xf32>
    %83 = arith.mulf %82, %79 : vector<8x78xf32>
    %84 = arith.select %81, %79, %83 : vector<8x78xi1>, vector<8x78xf32>
    %85 = vector.broadcast %55 : vector<1x78xf32> to vector<8x78xf32>
    %86 = arith.mulf %84, %85 : vector<8x78xf32>
    %cst_58 = arith.constant 0.000000e+00 : bf16
    %87 = vector.broadcast %cst_58 : bf16 to vector<8x100xbf16>
    %c0_59 = arith.constant 0 : index
    %c0_60 = arith.constant 0 : index
    %c0_61 = arith.constant 0 : index
    %88 = vector.load %arg4[%c0_59, %c0_60, %c0_61] : memref<1x8x100xbf16, #tpu.memory_space<vmem>>, vector<1x8x100xbf16>
    %89 = vector.shape_cast %88 : vector<1x8x100xbf16> to vector<8x100xbf16>
    %90 = vector.shape_cast %87 : vector<8x100xbf16> to vector<1x8x100xbf16>
    tpu.vector_store %arg4[%c0_59, %c0_60, %c0_61], %90 {strides = array<i32>} : memref<1x8x100xbf16, #tpu.memory_space<vmem>>, vector<1x8x100xbf16>,
    %91 = arith.truncf %86 : vector<8x78xf32> to vector<8x78xbf16>
    %c0_62 = arith.constant 0 : index
    %c0_63 = arith.constant 0 : index
    %c11_64 = arith.constant 11 : index
    %92 = vector.load %arg4[%c0_62, %c0_63, %c11_64] : memref<1x8x100xbf16, #tpu.memory_space<vmem>>, vector<1x8x78xbf16>
    %93 = vector.shape_cast %92 : vector<1x8x78xbf16> to vector<8x78xbf16>
    %94 = vector.shape_cast %91 : vector<8x78xbf16> to vector<1x8x78xbf16>
    tpu.vector_store %arg4[%c0_62, %c0_63, %c11_64], %94 {strides = array<i32>} : memref<1x8x100xbf16, #tpu.memory_space<vmem>>, vector<1x8x78xbf16>,
    return
  }
  func.func @transform_0(%arg0: i32) -> (i32, i32, i32) {
    %c0_i32 = arith.constant 0 : i32
    %c0_i32_0 = arith.constant 0 : i32
    %c0_i32_1 = arith.constant 0 : i32
    return %arg0, %c0_i32, %c0_i32_0 : i32, i32, i32
  }
  func.func @transform_1(%arg0: i32) -> (i32, i32, i32) {
    %c0_i32 = arith.constant 0 : i32
    %c0_i32_0 = arith.constant 0 : i32
    %c0_i32_1 = arith.constant 0 : i32
    %c0_i32_2 = arith.constant 0 : i32
    return %c0_i32, %c0_i32_0, %c0_i32_1 : i32, i32, i32
  }
  func.func @transform_2(%arg0: i32) -> (i32, i32) {
    %c0_i32 = arith.constant 0 : i32
    %c0_i32_0 = arith.constant 0 : i32
    %c0_i32_1 = arith.constant 0 : i32
    return %c0_i32, %c0_i32_0 : i32, i32
  }
  func.func @transform_3(%arg0: i32) -> (i32, i32, i32) {
    %c0_i32 = arith.constant 0 : i32
    %c0_i32_0 = arith.constant 0 : i32
    %c0_i32_1 = arith.constant 0 : i32
    return %arg0, %c0_i32, %c0_i32_0 : i32, i32, i32
  }
}

module attributes {stable_mosaic.version = 11 : i64} {
  func.func @_conv3x3_in_lrelu_kernel(%arg0: i32, %arg1: memref<1x4x100xbf16, #tpu.memory_space<vmem>>, %arg2: memref<9x8x4xbf16, #tpu.memory_space<vmem>>, %arg3: memref<1x78xf32, #tpu.memory_space<vmem>>, %arg4: memref<1x8x100xbf16, #tpu.memory_space<vmem>>) attributes {dimension_semantics = [#tpu.dimension_semantics<parallel>], iteration_bounds = array<i64: 8>, scalar_prefetch = 0 : i64, scratch_operands = 0 : i64, tpu.core_type = #tpu.core_type<tc>, window_params = [{transform_indices = @transform_0, window_bounds = array<i64: 1, 4, 100>}, {pipeline_mode = #tpu.pipeline_mode<synchronous>, transform_indices = @transform_1, window_bounds = array<i64: 9, 8, 4>}, {pipeline_mode = #tpu.pipeline_mode<synchronous>, transform_indices = @transform_2, window_bounds = array<i64: 1, 78>}, {transform_indices = @transform_3, window_bounds = array<i64: 1, 8, 100>}]} {
    %cst = arith.constant 0.000000e+00 : f32
    %0 = vector.broadcast %cst : f32 to vector<8x78xf32>
    %c0 = arith.constant 0 : index
    %c0_0 = arith.constant 0 : index
    %c0_1 = arith.constant 0 : index
    %1 = vector.load %arg2[%c0, %c0_0, %c0_1] : memref<9x8x4xbf16, #tpu.memory_space<vmem>>, vector<1x8x4xbf16>
    %2 = vector.shape_cast %1 : vector<1x8x4xbf16> to vector<8x4xbf16>
    %c0_2 = arith.constant 0 : index
    %c0_3 = arith.constant 0 : index
    %c0_4 = arith.constant 0 : index
    %3 = vector.load %arg1[%c0_2, %c0_3, %c0_4] : memref<1x4x100xbf16, #tpu.memory_space<vmem>>, vector<1x4x78xbf16>
    %4 = vector.shape_cast %3 : vector<1x4x78xbf16> to vector<4x78xbf16>
    %cst_5 = arith.constant dense<0.000000e+00> : vector<8x78xf32>
    %5 = tpu.matmul %2, %4, %cst_5 {dimension_numbers = #tpu.dot_dimension_numbers<[1], [0], [0], [1], [0, 0, 1, 1], [], []>} : vector<8x4xbf16>, vector<4x78xbf16>, vector<8x78xf32> -> vector<8x78xf32>
    %6 = arith.addf %0, %5 : vector<8x78xf32>
    %c1 = arith.constant 1 : index
    %c0_6 = arith.constant 0 : index
    %c0_7 = arith.constant 0 : index
    %7 = vector.load %arg2[%c1, %c0_6, %c0_7] : memref<9x8x4xbf16, #tpu.memory_space<vmem>>, vector<1x8x4xbf16>
    %8 = vector.shape_cast %7 : vector<1x8x4xbf16> to vector<8x4xbf16>
    %c0_8 = arith.constant 0 : index
    %c0_9 = arith.constant 0 : index
    %c1_10 = arith.constant 1 : index
    %9 = vector.load %arg1[%c0_8, %c0_9, %c1_10] : memref<1x4x100xbf16, #tpu.memory_space<vmem>>, vector<1x4x78xbf16>
    %10 = vector.shape_cast %9 : vector<1x4x78xbf16> to vector<4x78xbf16>
    %cst_11 = arith.constant dense<0.000000e+00> : vector<8x78xf32>
    %11 = tpu.matmul %8, %10, %cst_11 {dimension_numbers = #tpu.dot_dimension_numbers<[1], [0], [0], [1], [0, 0, 1, 1], [], []>} : vector<8x4xbf16>, vector<4x78xbf16>, vector<8x78xf32> -> vector<8x78xf32>
    %12 = arith.addf %6, %11 : vector<8x78xf32>
    %c2 = arith.constant 2 : index
    %c0_12 = arith.constant 0 : index
    %c0_13 = arith.constant 0 : index
    %13 = vector.load %arg2[%c2, %c0_12, %c0_13] : memref<9x8x4xbf16, #tpu.memory_space<vmem>>, vector<1x8x4xbf16>
    %14 = vector.shape_cast %13 : vector<1x8x4xbf16> to vector<8x4xbf16>
    %c0_14 = arith.constant 0 : index
    %c0_15 = arith.constant 0 : index
    %c2_16 = arith.constant 2 : index
    %15 = vector.load %arg1[%c0_14, %c0_15, %c2_16] : memref<1x4x100xbf16, #tpu.memory_space<vmem>>, vector<1x4x78xbf16>
    %16 = vector.shape_cast %15 : vector<1x4x78xbf16> to vector<4x78xbf16>
    %cst_17 = arith.constant dense<0.000000e+00> : vector<8x78xf32>
    %17 = tpu.matmul %14, %16, %cst_17 {dimension_numbers = #tpu.dot_dimension_numbers<[1], [0], [0], [1], [0, 0, 1, 1], [], []>} : vector<8x4xbf16>, vector<4x78xbf16>, vector<8x78xf32> -> vector<8x78xf32>
    %18 = arith.addf %12, %17 : vector<8x78xf32>
    %c3 = arith.constant 3 : index
    %c0_18 = arith.constant 0 : index
    %c0_19 = arith.constant 0 : index
    %19 = vector.load %arg2[%c3, %c0_18, %c0_19] : memref<9x8x4xbf16, #tpu.memory_space<vmem>>, vector<1x8x4xbf16>
    %20 = vector.shape_cast %19 : vector<1x8x4xbf16> to vector<8x4xbf16>
    %c0_20 = arith.constant 0 : index
    %c0_21 = arith.constant 0 : index
    %c10 = arith.constant 10 : index
    %21 = vector.load %arg1[%c0_20, %c0_21, %c10] : memref<1x4x100xbf16, #tpu.memory_space<vmem>>, vector<1x4x78xbf16>
    %22 = vector.shape_cast %21 : vector<1x4x78xbf16> to vector<4x78xbf16>
    %cst_22 = arith.constant dense<0.000000e+00> : vector<8x78xf32>
    %23 = tpu.matmul %20, %22, %cst_22 {dimension_numbers = #tpu.dot_dimension_numbers<[1], [0], [0], [1], [0, 0, 1, 1], [], []>} : vector<8x4xbf16>, vector<4x78xbf16>, vector<8x78xf32> -> vector<8x78xf32>
    %24 = arith.addf %18, %23 : vector<8x78xf32>
    %c4 = arith.constant 4 : index
    %c0_23 = arith.constant 0 : index
    %c0_24 = arith.constant 0 : index
    %25 = vector.load %arg2[%c4, %c0_23, %c0_24] : memref<9x8x4xbf16, #tpu.memory_space<vmem>>, vector<1x8x4xbf16>
    %26 = vector.shape_cast %25 : vector<1x8x4xbf16> to vector<8x4xbf16>
    %c0_25 = arith.constant 0 : index
    %c0_26 = arith.constant 0 : index
    %c11 = arith.constant 11 : index
    %27 = vector.load %arg1[%c0_25, %c0_26, %c11] : memref<1x4x100xbf16, #tpu.memory_space<vmem>>, vector<1x4x78xbf16>
    %28 = vector.shape_cast %27 : vector<1x4x78xbf16> to vector<4x78xbf16>
    %cst_27 = arith.constant dense<0.000000e+00> : vector<8x78xf32>
    %29 = tpu.matmul %26, %28, %cst_27 {dimension_numbers = #tpu.dot_dimension_numbers<[1], [0], [0], [1], [0, 0, 1, 1], [], []>} : vector<8x4xbf16>, vector<4x78xbf16>, vector<8x78xf32> -> vector<8x78xf32>
    %30 = arith.addf %24, %29 : vector<8x78xf32>
    %c5 = arith.constant 5 : index
    %c0_28 = arith.constant 0 : index
    %c0_29 = arith.constant 0 : index
    %31 = vector.load %arg2[%c5, %c0_28, %c0_29] : memref<9x8x4xbf16, #tpu.memory_space<vmem>>, vector<1x8x4xbf16>
    %32 = vector.shape_cast %31 : vector<1x8x4xbf16> to vector<8x4xbf16>
    %c0_30 = arith.constant 0 : index
    %c0_31 = arith.constant 0 : index
    %c12 = arith.constant 12 : index
    %33 = vector.load %arg1[%c0_30, %c0_31, %c12] : memref<1x4x100xbf16, #tpu.memory_space<vmem>>, vector<1x4x78xbf16>
    %34 = vector.shape_cast %33 : vector<1x4x78xbf16> to vector<4x78xbf16>
    %cst_32 = arith.constant dense<0.000000e+00> : vector<8x78xf32>
    %35 = tpu.matmul %32, %34, %cst_32 {dimension_numbers = #tpu.dot_dimension_numbers<[1], [0], [0], [1], [0, 0, 1, 1], [], []>} : vector<8x4xbf16>, vector<4x78xbf16>, vector<8x78xf32> -> vector<8x78xf32>
    %36 = arith.addf %30, %35 : vector<8x78xf32>
    %c6 = arith.constant 6 : index
    %c0_33 = arith.constant 0 : index
    %c0_34 = arith.constant 0 : index
    %37 = vector.load %arg2[%c6, %c0_33, %c0_34] : memref<9x8x4xbf16, #tpu.memory_space<vmem>>, vector<1x8x4xbf16>
    %38 = vector.shape_cast %37 : vector<1x8x4xbf16> to vector<8x4xbf16>
    %c0_35 = arith.constant 0 : index
    %c0_36 = arith.constant 0 : index
    %c20 = arith.constant 20 : index
    %39 = vector.load %arg1[%c0_35, %c0_36, %c20] : memref<1x4x100xbf16, #tpu.memory_space<vmem>>, vector<1x4x78xbf16>
    %40 = vector.shape_cast %39 : vector<1x4x78xbf16> to vector<4x78xbf16>
    %cst_37 = arith.constant dense<0.000000e+00> : vector<8x78xf32>
    %41 = tpu.matmul %38, %40, %cst_37 {dimension_numbers = #tpu.dot_dimension_numbers<[1], [0], [0], [1], [0, 0, 1, 1], [], []>} : vector<8x4xbf16>, vector<4x78xbf16>, vector<8x78xf32> -> vector<8x78xf32>
    %42 = arith.addf %36, %41 : vector<8x78xf32>
    %c7 = arith.constant 7 : index
    %c0_38 = arith.constant 0 : index
    %c0_39 = arith.constant 0 : index
    %43 = vector.load %arg2[%c7, %c0_38, %c0_39] : memref<9x8x4xbf16, #tpu.memory_space<vmem>>, vector<1x8x4xbf16>
    %44 = vector.shape_cast %43 : vector<1x8x4xbf16> to vector<8x4xbf16>
    %c0_40 = arith.constant 0 : index
    %c0_41 = arith.constant 0 : index
    %c21 = arith.constant 21 : index
    %45 = vector.load %arg1[%c0_40, %c0_41, %c21] : memref<1x4x100xbf16, #tpu.memory_space<vmem>>, vector<1x4x78xbf16>
    %46 = vector.shape_cast %45 : vector<1x4x78xbf16> to vector<4x78xbf16>
    %cst_42 = arith.constant dense<0.000000e+00> : vector<8x78xf32>
    %47 = tpu.matmul %44, %46, %cst_42 {dimension_numbers = #tpu.dot_dimension_numbers<[1], [0], [0], [1], [0, 0, 1, 1], [], []>} : vector<8x4xbf16>, vector<4x78xbf16>, vector<8x78xf32> -> vector<8x78xf32>
    %48 = arith.addf %42, %47 : vector<8x78xf32>
    %c8 = arith.constant 8 : index
    %c0_43 = arith.constant 0 : index
    %c0_44 = arith.constant 0 : index
    %49 = vector.load %arg2[%c8, %c0_43, %c0_44] : memref<9x8x4xbf16, #tpu.memory_space<vmem>>, vector<1x8x4xbf16>
    %50 = vector.shape_cast %49 : vector<1x8x4xbf16> to vector<8x4xbf16>
    %c0_45 = arith.constant 0 : index
    %c0_46 = arith.constant 0 : index
    %c22 = arith.constant 22 : index
    %51 = vector.load %arg1[%c0_45, %c0_46, %c22] : memref<1x4x100xbf16, #tpu.memory_space<vmem>>, vector<1x4x78xbf16>
    %52 = vector.shape_cast %51 : vector<1x4x78xbf16> to vector<4x78xbf16>
    %cst_47 = arith.constant dense<0.000000e+00> : vector<8x78xf32>
    %53 = tpu.matmul %50, %52, %cst_47 {dimension_numbers = #tpu.dot_dimension_numbers<[1], [0], [0], [1], [0, 0, 1, 1], [], []>} : vector<8x4xbf16>, vector<4x78xbf16>, vector<8x78xf32> -> vector<8x78xf32>
    %54 = arith.addf %48, %53 : vector<8x78xf32>
    %c0_48 = arith.constant 0 : index
    %c0_49 = arith.constant 0 : index
    %55 = vector.load %arg3[%c0_48, %c0_49] : memref<1x78xf32, #tpu.memory_space<vmem>>, vector<1x78xf32>
    %56 = vector.broadcast %55 : vector<1x78xf32> to vector<8x78xf32>
    %57 = arith.mulf %54, %56 : vector<8x78xf32>
    %cst_50 = arith.constant dense<0.000000e+00> : vector<8xf32>
    %58 = vector.multi_reduction <add>, %57, %cst_50 [1] : vector<8x78xf32> to vector<8xf32>
    %59 = vector.shape_cast %58 : vector<8xf32> to vector<8x1xf32>
    %60 = arith.mulf %54, %54 : vector<8x78xf32>
    %61 = vector.broadcast %55 : vector<1x78xf32> to vector<8x78xf32>
    %62 = arith.mulf %60, %61 : vector<8x78xf32>
    %cst_51 = arith.constant dense<0.000000e+00> : vector<8xf32>
    %63 = vector.multi_reduction <add>, %62, %cst_51 [1] : vector<8x78xf32> to vector<8xf32>
    %64 = vector.shape_cast %63 : vector<8xf32> to vector<8x1xf32>
    %cst_52 = arith.constant 6.400000e+01 : f32
    %65 = vector.broadcast %cst_52 : f32 to vector<8x1xf32>
    %66 = arith.divf %59, %65 : vector<8x1xf32>
    %cst_53 = arith.constant 6.400000e+01 : f32
    %67 = vector.broadcast %cst_53 : f32 to vector<8x1xf32>
    %68 = arith.divf %64, %67 : vector<8x1xf32>
    %69 = arith.mulf %66, %66 : vector<8x1xf32>
    %70 = arith.subf %68, %69 : vector<8x1xf32>
    %cst_54 = arith.constant 0.000000e+00 : f32
    %71 = vector.broadcast %cst_54 : f32 to vector<8x1xf32>
    %72 = arith.maximumf %70, %71 : vector<8x1xf32>
    %73 = vector.broadcast %66 : vector<8x1xf32> to vector<8x78xf32>
    %74 = arith.subf %54, %73 : vector<8x78xf32>
    %cst_55 = arith.constant 9.99999974E-6 : f32
    %75 = vector.broadcast %cst_55 : f32 to vector<8x1xf32>
    %76 = arith.addf %72, %75 : vector<8x1xf32>
    %77 = math.rsqrt %76 : vector<8x1xf32>
    %78 = vector.broadcast %77 : vector<8x1xf32> to vector<8x78xf32>
    %79 = arith.mulf %74, %78 : vector<8x78xf32>
    %cst_56 = arith.constant 0.000000e+00 : f32
    %80 = vector.broadcast %cst_56 : f32 to vector<8x78xf32>
    %81 = arith.cmpf oge, %79, %80 : vector<8x78xf32>
    %cst_57 = arith.constant 2.000000e-01 : f32
    %82 = vector.broadcast %cst_57 : f32 to vector<8x78xf32>
    %83 = arith.mulf %82, %79 : vector<8x78xf32>
    %84 = arith.select %81, %79, %83 : vector<8x78xi1>, vector<8x78xf32>
    %85 = vector.broadcast %55 : vector<1x78xf32> to vector<8x78xf32>
    %86 = arith.mulf %84, %85 : vector<8x78xf32>
    %cst_58 = arith.constant 0.000000e+00 : bf16
    %87 = vector.broadcast %cst_58 : bf16 to vector<8x100xbf16>
    %c0_59 = arith.constant 0 : index
    %c0_60 = arith.constant 0 : index
    %c0_61 = arith.constant 0 : index
    %88 = vector.load %arg4[%c0_59, %c0_60, %c0_61] : memref<1x8x100xbf16, #tpu.memory_space<vmem>>, vector<1x8x100xbf16>
    %89 = vector.shape_cast %88 : vector<1x8x100xbf16> to vector<8x100xbf16>
    %90 = vector.shape_cast %87 : vector<8x100xbf16> to vector<1x8x100xbf16>
    tpu.vector_store %arg4[%c0_59, %c0_60, %c0_61], %90 {strides = array<i32>} : memref<1x8x100xbf16, #tpu.memory_space<vmem>>, vector<1x8x100xbf16>,
    %91 = arith.truncf %86 : vector<8x78xf32> to vector<8x78xbf16>
    %c0_62 = arith.constant 0 : index
    %c0_63 = arith.constant 0 : index
    %c11_64 = arith.constant 11 : index
    %92 = vector.load %arg4[%c0_62, %c0_63, %c11_64] : memref<1x8x100xbf16, #tpu.memory_space<vmem>>, vector<1x8x78xbf16>
    %93 = vector.shape_cast %92 : vector<1x8x78xbf16> to vector<8x78xbf16>
    %94 = vector.shape_cast %91 : vector<8x78xbf16> to vector<1x8x78xbf16>
    tpu.vector_store %arg4[%c0_62, %c0_63, %c11_64], %94 {strides = array<i32>} : memref<1x8x100xbf16, #tpu.memory_space<vmem>>, vector<1x8x78xbf16>,
    return
  }
  func.func @transform_0(%arg0: i32) -> (i32, i32, i32) {
    %c0_i32 = arith.constant 0 : i32
    %c0_i32_0 = arith.constant 0 : i32
    %c0_i32_1 = arith.constant 0 : i32
    return %arg0, %c0_i32, %c0_i32_0 : i32, i32, i32
  }
  func.func @transform_1(%arg0: i32) -> (i32, i32, i32) {
    %c0_i32 = arith.constant 0 : i32
    %c0_i32_0 = arith.constant 0 : i32
    %c0_i32_1 = arith.constant 0 : i32
    %c0_i32_2 = arith.constant 0 : i32
    return %c0_i32, %c0_i32_0, %c0_i32_1 : i32, i32, i32
  }
  func.func @transform_2(%arg0: i32) -> (i32, i32) {
    %c0_i32 = arith.constant 0 : i32
    %c0_i32_0 = arith.constant 0 : i32
    %c0_i32_1 = arith.constant 0 : i32
    return %c0_i32, %c0_i32_0 : i32, i32
  }
  func.func @transform_3(%arg0: i32) -> (i32, i32, i32) {
    %c0_i32 = arith.constant 0 : i32
    %c0_i32_0 = arith.constant 0 : i32
    %c0_i32_1 = arith.constant 0 : i32
    return %arg0, %c0_i32, %c0_i32_0 : i32, i32, i32
  }
}

module attributes {stable_mosaic.version = 11 : i64} {
  func.func @_conv3x3_in_lrelu_kernel(%arg0: i32, %arg1: memref<1x8x36xbf16, #tpu.memory_space<vmem>>, %arg2: memref<9x16x8xbf16, #tpu.memory_space<vmem>>, %arg3: memref<1x22xf32, #tpu.memory_space<vmem>>, %arg4: memref<1x16x36xbf16, #tpu.memory_space<vmem>>) attributes {dimension_semantics = [#tpu.dimension_semantics<parallel>], iteration_bounds = array<i64: 8>, scalar_prefetch = 0 : i64, scratch_operands = 0 : i64, tpu.core_type = #tpu.core_type<tc>, window_params = [{transform_indices = @transform_0, window_bounds = array<i64: 1, 8, 36>}, {pipeline_mode = #tpu.pipeline_mode<synchronous>, transform_indices = @transform_1, window_bounds = array<i64: 9, 16, 8>}, {pipeline_mode = #tpu.pipeline_mode<synchronous>, transform_indices = @transform_2, window_bounds = array<i64: 1, 22>}, {transform_indices = @transform_3, window_bounds = array<i64: 1, 16, 36>}]} {
    %cst = arith.constant 0.000000e+00 : f32
    %0 = vector.broadcast %cst : f32 to vector<16x22xf32>
    %c0 = arith.constant 0 : index
    %c0_0 = arith.constant 0 : index
    %c0_1 = arith.constant 0 : index
    %1 = vector.load %arg2[%c0, %c0_0, %c0_1] : memref<9x16x8xbf16, #tpu.memory_space<vmem>>, vector<1x16x8xbf16>
    %2 = vector.shape_cast %1 : vector<1x16x8xbf16> to vector<16x8xbf16>
    %c0_2 = arith.constant 0 : index
    %c0_3 = arith.constant 0 : index
    %c0_4 = arith.constant 0 : index
    %3 = vector.load %arg1[%c0_2, %c0_3, %c0_4] : memref<1x8x36xbf16, #tpu.memory_space<vmem>>, vector<1x8x22xbf16>
    %4 = vector.shape_cast %3 : vector<1x8x22xbf16> to vector<8x22xbf16>
    %cst_5 = arith.constant dense<0.000000e+00> : vector<16x22xf32>
    %5 = tpu.matmul %2, %4, %cst_5 {dimension_numbers = #tpu.dot_dimension_numbers<[1], [0], [0], [1], [0, 0, 1, 1], [], []>} : vector<16x8xbf16>, vector<8x22xbf16>, vector<16x22xf32> -> vector<16x22xf32>
    %6 = arith.addf %0, %5 : vector<16x22xf32>
    %c1 = arith.constant 1 : index
    %c0_6 = arith.constant 0 : index
    %c0_7 = arith.constant 0 : index
    %7 = vector.load %arg2[%c1, %c0_6, %c0_7] : memref<9x16x8xbf16, #tpu.memory_space<vmem>>, vector<1x16x8xbf16>
    %8 = vector.shape_cast %7 : vector<1x16x8xbf16> to vector<16x8xbf16>
    %c0_8 = arith.constant 0 : index
    %c0_9 = arith.constant 0 : index
    %c1_10 = arith.constant 1 : index
    %9 = vector.load %arg1[%c0_8, %c0_9, %c1_10] : memref<1x8x36xbf16, #tpu.memory_space<vmem>>, vector<1x8x22xbf16>
    %10 = vector.shape_cast %9 : vector<1x8x22xbf16> to vector<8x22xbf16>
    %cst_11 = arith.constant dense<0.000000e+00> : vector<16x22xf32>
    %11 = tpu.matmul %8, %10, %cst_11 {dimension_numbers = #tpu.dot_dimension_numbers<[1], [0], [0], [1], [0, 0, 1, 1], [], []>} : vector<16x8xbf16>, vector<8x22xbf16>, vector<16x22xf32> -> vector<16x22xf32>
    %12 = arith.addf %6, %11 : vector<16x22xf32>
    %c2 = arith.constant 2 : index
    %c0_12 = arith.constant 0 : index
    %c0_13 = arith.constant 0 : index
    %13 = vector.load %arg2[%c2, %c0_12, %c0_13] : memref<9x16x8xbf16, #tpu.memory_space<vmem>>, vector<1x16x8xbf16>
    %14 = vector.shape_cast %13 : vector<1x16x8xbf16> to vector<16x8xbf16>
    %c0_14 = arith.constant 0 : index
    %c0_15 = arith.constant 0 : index
    %c2_16 = arith.constant 2 : index
    %15 = vector.load %arg1[%c0_14, %c0_15, %c2_16] : memref<1x8x36xbf16, #tpu.memory_space<vmem>>, vector<1x8x22xbf16>
    %16 = vector.shape_cast %15 : vector<1x8x22xbf16> to vector<8x22xbf16>
    %cst_17 = arith.constant dense<0.000000e+00> : vector<16x22xf32>
    %17 = tpu.matmul %14, %16, %cst_17 {dimension_numbers = #tpu.dot_dimension_numbers<[1], [0], [0], [1], [0, 0, 1, 1], [], []>} : vector<16x8xbf16>, vector<8x22xbf16>, vector<16x22xf32> -> vector<16x22xf32>
    %18 = arith.addf %12, %17 : vector<16x22xf32>
    %c3 = arith.constant 3 : index
    %c0_18 = arith.constant 0 : index
    %c0_19 = arith.constant 0 : index
    %19 = vector.load %arg2[%c3, %c0_18, %c0_19] : memref<9x16x8xbf16, #tpu.memory_space<vmem>>, vector<1x16x8xbf16>
    %20 = vector.shape_cast %19 : vector<1x16x8xbf16> to vector<16x8xbf16>
    %c0_20 = arith.constant 0 : index
    %c0_21 = arith.constant 0 : index
    %c6 = arith.constant 6 : index
    %21 = vector.load %arg1[%c0_20, %c0_21, %c6] : memref<1x8x36xbf16, #tpu.memory_space<vmem>>, vector<1x8x22xbf16>
    %22 = vector.shape_cast %21 : vector<1x8x22xbf16> to vector<8x22xbf16>
    %cst_22 = arith.constant dense<0.000000e+00> : vector<16x22xf32>
    %23 = tpu.matmul %20, %22, %cst_22 {dimension_numbers = #tpu.dot_dimension_numbers<[1], [0], [0], [1], [0, 0, 1, 1], [], []>} : vector<16x8xbf16>, vector<8x22xbf16>, vector<16x22xf32> -> vector<16x22xf32>
    %24 = arith.addf %18, %23 : vector<16x22xf32>
    %c4 = arith.constant 4 : index
    %c0_23 = arith.constant 0 : index
    %c0_24 = arith.constant 0 : index
    %25 = vector.load %arg2[%c4, %c0_23, %c0_24] : memref<9x16x8xbf16, #tpu.memory_space<vmem>>, vector<1x16x8xbf16>
    %26 = vector.shape_cast %25 : vector<1x16x8xbf16> to vector<16x8xbf16>
    %c0_25 = arith.constant 0 : index
    %c0_26 = arith.constant 0 : index
    %c7 = arith.constant 7 : index
    %27 = vector.load %arg1[%c0_25, %c0_26, %c7] : memref<1x8x36xbf16, #tpu.memory_space<vmem>>, vector<1x8x22xbf16>
    %28 = vector.shape_cast %27 : vector<1x8x22xbf16> to vector<8x22xbf16>
    %cst_27 = arith.constant dense<0.000000e+00> : vector<16x22xf32>
    %29 = tpu.matmul %26, %28, %cst_27 {dimension_numbers = #tpu.dot_dimension_numbers<[1], [0], [0], [1], [0, 0, 1, 1], [], []>} : vector<16x8xbf16>, vector<8x22xbf16>, vector<16x22xf32> -> vector<16x22xf32>
    %30 = arith.addf %24, %29 : vector<16x22xf32>
    %c5 = arith.constant 5 : index
    %c0_28 = arith.constant 0 : index
    %c0_29 = arith.constant 0 : index
    %31 = vector.load %arg2[%c5, %c0_28, %c0_29] : memref<9x16x8xbf16, #tpu.memory_space<vmem>>, vector<1x16x8xbf16>
    %32 = vector.shape_cast %31 : vector<1x16x8xbf16> to vector<16x8xbf16>
    %c0_30 = arith.constant 0 : index
    %c0_31 = arith.constant 0 : index
    %c8 = arith.constant 8 : index
    %33 = vector.load %arg1[%c0_30, %c0_31, %c8] : memref<1x8x36xbf16, #tpu.memory_space<vmem>>, vector<1x8x22xbf16>
    %34 = vector.shape_cast %33 : vector<1x8x22xbf16> to vector<8x22xbf16>
    %cst_32 = arith.constant dense<0.000000e+00> : vector<16x22xf32>
    %35 = tpu.matmul %32, %34, %cst_32 {dimension_numbers = #tpu.dot_dimension_numbers<[1], [0], [0], [1], [0, 0, 1, 1], [], []>} : vector<16x8xbf16>, vector<8x22xbf16>, vector<16x22xf32> -> vector<16x22xf32>
    %36 = arith.addf %30, %35 : vector<16x22xf32>
    %c6_33 = arith.constant 6 : index
    %c0_34 = arith.constant 0 : index
    %c0_35 = arith.constant 0 : index
    %37 = vector.load %arg2[%c6_33, %c0_34, %c0_35] : memref<9x16x8xbf16, #tpu.memory_space<vmem>>, vector<1x16x8xbf16>
    %38 = vector.shape_cast %37 : vector<1x16x8xbf16> to vector<16x8xbf16>
    %c0_36 = arith.constant 0 : index
    %c0_37 = arith.constant 0 : index
    %c12 = arith.constant 12 : index
    %39 = vector.load %arg1[%c0_36, %c0_37, %c12] : memref<1x8x36xbf16, #tpu.memory_space<vmem>>, vector<1x8x22xbf16>
    %40 = vector.shape_cast %39 : vector<1x8x22xbf16> to vector<8x22xbf16>
    %cst_38 = arith.constant dense<0.000000e+00> : vector<16x22xf32>
    %41 = tpu.matmul %38, %40, %cst_38 {dimension_numbers = #tpu.dot_dimension_numbers<[1], [0], [0], [1], [0, 0, 1, 1], [], []>} : vector<16x8xbf16>, vector<8x22xbf16>, vector<16x22xf32> -> vector<16x22xf32>
    %42 = arith.addf %36, %41 : vector<16x22xf32>
    %c7_39 = arith.constant 7 : index
    %c0_40 = arith.constant 0 : index
    %c0_41 = arith.constant 0 : index
    %43 = vector.load %arg2[%c7_39, %c0_40, %c0_41] : memref<9x16x8xbf16, #tpu.memory_space<vmem>>, vector<1x16x8xbf16>
    %44 = vector.shape_cast %43 : vector<1x16x8xbf16> to vector<16x8xbf16>
    %c0_42 = arith.constant 0 : index
    %c0_43 = arith.constant 0 : index
    %c13 = arith.constant 13 : index
    %45 = vector.load %arg1[%c0_42, %c0_43, %c13] : memref<1x8x36xbf16, #tpu.memory_space<vmem>>, vector<1x8x22xbf16>
    %46 = vector.shape_cast %45 : vector<1x8x22xbf16> to vector<8x22xbf16>
    %cst_44 = arith.constant dense<0.000000e+00> : vector<16x22xf32>
    %47 = tpu.matmul %44, %46, %cst_44 {dimension_numbers = #tpu.dot_dimension_numbers<[1], [0], [0], [1], [0, 0, 1, 1], [], []>} : vector<16x8xbf16>, vector<8x22xbf16>, vector<16x22xf32> -> vector<16x22xf32>
    %48 = arith.addf %42, %47 : vector<16x22xf32>
    %c8_45 = arith.constant 8 : index
    %c0_46 = arith.constant 0 : index
    %c0_47 = arith.constant 0 : index
    %49 = vector.load %arg2[%c8_45, %c0_46, %c0_47] : memref<9x16x8xbf16, #tpu.memory_space<vmem>>, vector<1x16x8xbf16>
    %50 = vector.shape_cast %49 : vector<1x16x8xbf16> to vector<16x8xbf16>
    %c0_48 = arith.constant 0 : index
    %c0_49 = arith.constant 0 : index
    %c14 = arith.constant 14 : index
    %51 = vector.load %arg1[%c0_48, %c0_49, %c14] : memref<1x8x36xbf16, #tpu.memory_space<vmem>>, vector<1x8x22xbf16>
    %52 = vector.shape_cast %51 : vector<1x8x22xbf16> to vector<8x22xbf16>
    %cst_50 = arith.constant dense<0.000000e+00> : vector<16x22xf32>
    %53 = tpu.matmul %50, %52, %cst_50 {dimension_numbers = #tpu.dot_dimension_numbers<[1], [0], [0], [1], [0, 0, 1, 1], [], []>} : vector<16x8xbf16>, vector<8x22xbf16>, vector<16x22xf32> -> vector<16x22xf32>
    %54 = arith.addf %48, %53 : vector<16x22xf32>
    %c0_51 = arith.constant 0 : index
    %c0_52 = arith.constant 0 : index
    %55 = vector.load %arg3[%c0_51, %c0_52] : memref<1x22xf32, #tpu.memory_space<vmem>>, vector<1x22xf32>
    %56 = vector.broadcast %55 : vector<1x22xf32> to vector<16x22xf32>
    %57 = arith.mulf %54, %56 : vector<16x22xf32>
    %cst_53 = arith.constant dense<0.000000e+00> : vector<16xf32>
    %58 = vector.multi_reduction <add>, %57, %cst_53 [1] : vector<16x22xf32> to vector<16xf32>
    %59 = vector.shape_cast %58 : vector<16xf32> to vector<16x1xf32>
    %60 = arith.mulf %54, %54 : vector<16x22xf32>
    %61 = vector.broadcast %55 : vector<1x22xf32> to vector<16x22xf32>
    %62 = arith.mulf %60, %61 : vector<16x22xf32>
    %cst_54 = arith.constant dense<0.000000e+00> : vector<16xf32>
    %63 = vector.multi_reduction <add>, %62, %cst_54 [1] : vector<16x22xf32> to vector<16xf32>
    %64 = vector.shape_cast %63 : vector<16xf32> to vector<16x1xf32>
    %cst_55 = arith.constant 1.600000e+01 : f32
    %65 = vector.broadcast %cst_55 : f32 to vector<16x1xf32>
    %66 = arith.divf %59, %65 : vector<16x1xf32>
    %cst_56 = arith.constant 1.600000e+01 : f32
    %67 = vector.broadcast %cst_56 : f32 to vector<16x1xf32>
    %68 = arith.divf %64, %67 : vector<16x1xf32>
    %69 = arith.mulf %66, %66 : vector<16x1xf32>
    %70 = arith.subf %68, %69 : vector<16x1xf32>
    %cst_57 = arith.constant 0.000000e+00 : f32
    %71 = vector.broadcast %cst_57 : f32 to vector<16x1xf32>
    %72 = arith.maximumf %70, %71 : vector<16x1xf32>
    %73 = vector.broadcast %66 : vector<16x1xf32> to vector<16x22xf32>
    %74 = arith.subf %54, %73 : vector<16x22xf32>
    %cst_58 = arith.constant 9.99999974E-6 : f32
    %75 = vector.broadcast %cst_58 : f32 to vector<16x1xf32>
    %76 = arith.addf %72, %75 : vector<16x1xf32>
    %77 = math.rsqrt %76 : vector<16x1xf32>
    %78 = vector.broadcast %77 : vector<16x1xf32> to vector<16x22xf32>
    %79 = arith.mulf %74, %78 : vector<16x22xf32>
    %cst_59 = arith.constant 0.000000e+00 : f32
    %80 = vector.broadcast %cst_59 : f32 to vector<16x22xf32>
    %81 = arith.cmpf oge, %79, %80 : vector<16x22xf32>
    %cst_60 = arith.constant 2.000000e-01 : f32
    %82 = vector.broadcast %cst_60 : f32 to vector<16x22xf32>
    %83 = arith.mulf %82, %79 : vector<16x22xf32>
    %84 = arith.select %81, %79, %83 : vector<16x22xi1>, vector<16x22xf32>
    %85 = vector.broadcast %55 : vector<1x22xf32> to vector<16x22xf32>
    %86 = arith.mulf %84, %85 : vector<16x22xf32>
    %cst_61 = arith.constant 0.000000e+00 : bf16
    %87 = vector.broadcast %cst_61 : bf16 to vector<16x36xbf16>
    %c0_62 = arith.constant 0 : index
    %c0_63 = arith.constant 0 : index
    %c0_64 = arith.constant 0 : index
    %88 = vector.load %arg4[%c0_62, %c0_63, %c0_64] : memref<1x16x36xbf16, #tpu.memory_space<vmem>>, vector<1x16x36xbf16>
    %89 = vector.shape_cast %88 : vector<1x16x36xbf16> to vector<16x36xbf16>
    %90 = vector.shape_cast %87 : vector<16x36xbf16> to vector<1x16x36xbf16>
    tpu.vector_store %arg4[%c0_62, %c0_63, %c0_64], %90 {strides = array<i32>} : memref<1x16x36xbf16, #tpu.memory_space<vmem>>, vector<1x16x36xbf16>,
    %91 = arith.truncf %86 : vector<16x22xf32> to vector<16x22xbf16>
    %c0_65 = arith.constant 0 : index
    %c0_66 = arith.constant 0 : index
    %c7_67 = arith.constant 7 : index
    %92 = vector.load %arg4[%c0_65, %c0_66, %c7_67] : memref<1x16x36xbf16, #tpu.memory_space<vmem>>, vector<1x16x22xbf16>
    %93 = vector.shape_cast %92 : vector<1x16x22xbf16> to vector<16x22xbf16>
    %94 = vector.shape_cast %91 : vector<16x22xbf16> to vector<1x16x22xbf16>
    tpu.vector_store %arg4[%c0_65, %c0_66, %c7_67], %94 {strides = array<i32>} : memref<1x16x36xbf16, #tpu.memory_space<vmem>>, vector<1x16x22xbf16>,
    return
  }
  func.func @transform_0(%arg0: i32) -> (i32, i32, i32) {
    %c0_i32 = arith.constant 0 : i32
    %c0_i32_0 = arith.constant 0 : i32
    %c0_i32_1 = arith.constant 0 : i32
    return %arg0, %c0_i32, %c0_i32_0 : i32, i32, i32
  }
  func.func @transform_1(%arg0: i32) -> (i32, i32, i32) {
    %c0_i32 = arith.constant 0 : i32
    %c0_i32_0 = arith.constant 0 : i32
    %c0_i32_1 = arith.constant 0 : i32
    %c0_i32_2 = arith.constant 0 : i32
    return %c0_i32, %c0_i32_0, %c0_i32_1 : i32, i32, i32
  }
  func.func @transform_2(%arg0: i32) -> (i32, i32) {
    %c0_i32 = arith.constant 0 : i32
    %c0_i32_0 = arith.constant 0 : i32
    %c0_i32_1 = arith.constant 0 : i32
    return %c0_i32, %c0_i32_0 : i32, i32
  }
  func.func @transform_3(%arg0: i32) -> (i32, i32, i32) {
    %c0_i32 = arith.constant 0 : i32
    %c0_i32_0 = arith.constant 0 : i32
    %c0_i32_1 = arith.constant 0 : i32
    return %arg0, %c0_i32, %c0_i32_0 : i32, i32, i32
  }
}

module attributes {stable_mosaic.version = 11 : i64} {
  func.func @_conv3x3_in_lrelu_kernel(%arg0: i32, %arg1: memref<1x16x36xbf16, #tpu.memory_space<vmem>>, %arg2: memref<9x16x16xbf16, #tpu.memory_space<vmem>>, %arg3: memref<1x22xf32, #tpu.memory_space<vmem>>, %arg4: memref<1x16x36xbf16, #tpu.memory_space<vmem>>) attributes {dimension_semantics = [#tpu.dimension_semantics<parallel>], iteration_bounds = array<i64: 8>, scalar_prefetch = 0 : i64, scratch_operands = 0 : i64, tpu.core_type = #tpu.core_type<tc>, window_params = [{transform_indices = @transform_0, window_bounds = array<i64: 1, 16, 36>}, {pipeline_mode = #tpu.pipeline_mode<synchronous>, transform_indices = @transform_1, window_bounds = array<i64: 9, 16, 16>}, {pipeline_mode = #tpu.pipeline_mode<synchronous>, transform_indices = @transform_2, window_bounds = array<i64: 1, 22>}, {transform_indices = @transform_3, window_bounds = array<i64: 1, 16, 36>}]} {
    %cst = arith.constant 0.000000e+00 : f32
    %0 = vector.broadcast %cst : f32 to vector<16x22xf32>
    %c0 = arith.constant 0 : index
    %c0_0 = arith.constant 0 : index
    %c0_1 = arith.constant 0 : index
    %1 = vector.load %arg2[%c0, %c0_0, %c0_1] : memref<9x16x16xbf16, #tpu.memory_space<vmem>>, vector<1x16x16xbf16>
    %2 = vector.shape_cast %1 : vector<1x16x16xbf16> to vector<16x16xbf16>
    %c0_2 = arith.constant 0 : index
    %c0_3 = arith.constant 0 : index
    %c0_4 = arith.constant 0 : index
    %3 = vector.load %arg1[%c0_2, %c0_3, %c0_4] : memref<1x16x36xbf16, #tpu.memory_space<vmem>>, vector<1x16x22xbf16>
    %4 = vector.shape_cast %3 : vector<1x16x22xbf16> to vector<16x22xbf16>
    %cst_5 = arith.constant dense<0.000000e+00> : vector<16x22xf32>
    %5 = tpu.matmul %2, %4, %cst_5 {dimension_numbers = #tpu.dot_dimension_numbers<[1], [0], [0], [1], [0, 0, 1, 1], [], []>} : vector<16x16xbf16>, vector<16x22xbf16>, vector<16x22xf32> -> vector<16x22xf32>
    %6 = arith.addf %0, %5 : vector<16x22xf32>
    %c1 = arith.constant 1 : index
    %c0_6 = arith.constant 0 : index
    %c0_7 = arith.constant 0 : index
    %7 = vector.load %arg2[%c1, %c0_6, %c0_7] : memref<9x16x16xbf16, #tpu.memory_space<vmem>>, vector<1x16x16xbf16>
    %8 = vector.shape_cast %7 : vector<1x16x16xbf16> to vector<16x16xbf16>
    %c0_8 = arith.constant 0 : index
    %c0_9 = arith.constant 0 : index
    %c1_10 = arith.constant 1 : index
    %9 = vector.load %arg1[%c0_8, %c0_9, %c1_10] : memref<1x16x36xbf16, #tpu.memory_space<vmem>>, vector<1x16x22xbf16>
    %10 = vector.shape_cast %9 : vector<1x16x22xbf16> to vector<16x22xbf16>
    %cst_11 = arith.constant dense<0.000000e+00> : vector<16x22xf32>
    %11 = tpu.matmul %8, %10, %cst_11 {dimension_numbers = #tpu.dot_dimension_numbers<[1], [0], [0], [1], [0, 0, 1, 1], [], []>} : vector<16x16xbf16>, vector<16x22xbf16>, vector<16x22xf32> -> vector<16x22xf32>
    %12 = arith.addf %6, %11 : vector<16x22xf32>
    %c2 = arith.constant 2 : index
    %c0_12 = arith.constant 0 : index
    %c0_13 = arith.constant 0 : index
    %13 = vector.load %arg2[%c2, %c0_12, %c0_13] : memref<9x16x16xbf16, #tpu.memory_space<vmem>>, vector<1x16x16xbf16>
    %14 = vector.shape_cast %13 : vector<1x16x16xbf16> to vector<16x16xbf16>
    %c0_14 = arith.constant 0 : index
    %c0_15 = arith.constant 0 : index
    %c2_16 = arith.constant 2 : index
    %15 = vector.load %arg1[%c0_14, %c0_15, %c2_16] : memref<1x16x36xbf16, #tpu.memory_space<vmem>>, vector<1x16x22xbf16>
    %16 = vector.shape_cast %15 : vector<1x16x22xbf16> to vector<16x22xbf16>
    %cst_17 = arith.constant dense<0.000000e+00> : vector<16x22xf32>
    %17 = tpu.matmul %14, %16, %cst_17 {dimension_numbers = #tpu.dot_dimension_numbers<[1], [0], [0], [1], [0, 0, 1, 1], [], []>} : vector<16x16xbf16>, vector<16x22xbf16>, vector<16x22xf32> -> vector<16x22xf32>
    %18 = arith.addf %12, %17 : vector<16x22xf32>
    %c3 = arith.constant 3 : index
    %c0_18 = arith.constant 0 : index
    %c0_19 = arith.constant 0 : index
    %19 = vector.load %arg2[%c3, %c0_18, %c0_19] : memref<9x16x16xbf16, #tpu.memory_space<vmem>>, vector<1x16x16xbf16>
    %20 = vector.shape_cast %19 : vector<1x16x16xbf16> to vector<16x16xbf16>
    %c0_20 = arith.constant 0 : index
    %c0_21 = arith.constant 0 : index
    %c6 = arith.constant 6 : index
    %21 = vector.load %arg1[%c0_20, %c0_21, %c6] : memref<1x16x36xbf16, #tpu.memory_space<vmem>>, vector<1x16x22xbf16>
    %22 = vector.shape_cast %21 : vector<1x16x22xbf16> to vector<16x22xbf16>
    %cst_22 = arith.constant dense<0.000000e+00> : vector<16x22xf32>
    %23 = tpu.matmul %20, %22, %cst_22 {dimension_numbers = #tpu.dot_dimension_numbers<[1], [0], [0], [1], [0, 0, 1, 1], [], []>} : vector<16x16xbf16>, vector<16x22xbf16>, vector<16x22xf32> -> vector<16x22xf32>
    %24 = arith.addf %18, %23 : vector<16x22xf32>
    %c4 = arith.constant 4 : index
    %c0_23 = arith.constant 0 : index
    %c0_24 = arith.constant 0 : index
    %25 = vector.load %arg2[%c4, %c0_23, %c0_24] : memref<9x16x16xbf16, #tpu.memory_space<vmem>>, vector<1x16x16xbf16>
    %26 = vector.shape_cast %25 : vector<1x16x16xbf16> to vector<16x16xbf16>
    %c0_25 = arith.constant 0 : index
    %c0_26 = arith.constant 0 : index
    %c7 = arith.constant 7 : index
    %27 = vector.load %arg1[%c0_25, %c0_26, %c7] : memref<1x16x36xbf16, #tpu.memory_space<vmem>>, vector<1x16x22xbf16>
    %28 = vector.shape_cast %27 : vector<1x16x22xbf16> to vector<16x22xbf16>
    %cst_27 = arith.constant dense<0.000000e+00> : vector<16x22xf32>
    %29 = tpu.matmul %26, %28, %cst_27 {dimension_numbers = #tpu.dot_dimension_numbers<[1], [0], [0], [1], [0, 0, 1, 1], [], []>} : vector<16x16xbf16>, vector<16x22xbf16>, vector<16x22xf32> -> vector<16x22xf32>
    %30 = arith.addf %24, %29 : vector<16x22xf32>
    %c5 = arith.constant 5 : index
    %c0_28 = arith.constant 0 : index
    %c0_29 = arith.constant 0 : index
    %31 = vector.load %arg2[%c5, %c0_28, %c0_29] : memref<9x16x16xbf16, #tpu.memory_space<vmem>>, vector<1x16x16xbf16>
    %32 = vector.shape_cast %31 : vector<1x16x16xbf16> to vector<16x16xbf16>
    %c0_30 = arith.constant 0 : index
    %c0_31 = arith.constant 0 : index
    %c8 = arith.constant 8 : index
    %33 = vector.load %arg1[%c0_30, %c0_31, %c8] : memref<1x16x36xbf16, #tpu.memory_space<vmem>>, vector<1x16x22xbf16>
    %34 = vector.shape_cast %33 : vector<1x16x22xbf16> to vector<16x22xbf16>
    %cst_32 = arith.constant dense<0.000000e+00> : vector<16x22xf32>
    %35 = tpu.matmul %32, %34, %cst_32 {dimension_numbers = #tpu.dot_dimension_numbers<[1], [0], [0], [1], [0, 0, 1, 1], [], []>} : vector<16x16xbf16>, vector<16x22xbf16>, vector<16x22xf32> -> vector<16x22xf32>
    %36 = arith.addf %30, %35 : vector<16x22xf32>
    %c6_33 = arith.constant 6 : index
    %c0_34 = arith.constant 0 : index
    %c0_35 = arith.constant 0 : index
    %37 = vector.load %arg2[%c6_33, %c0_34, %c0_35] : memref<9x16x16xbf16, #tpu.memory_space<vmem>>, vector<1x16x16xbf16>
    %38 = vector.shape_cast %37 : vector<1x16x16xbf16> to vector<16x16xbf16>
    %c0_36 = arith.constant 0 : index
    %c0_37 = arith.constant 0 : index
    %c12 = arith.constant 12 : index
    %39 = vector.load %arg1[%c0_36, %c0_37, %c12] : memref<1x16x36xbf16, #tpu.memory_space<vmem>>, vector<1x16x22xbf16>
    %40 = vector.shape_cast %39 : vector<1x16x22xbf16> to vector<16x22xbf16>
    %cst_38 = arith.constant dense<0.000000e+00> : vector<16x22xf32>
    %41 = tpu.matmul %38, %40, %cst_38 {dimension_numbers = #tpu.dot_dimension_numbers<[1], [0], [0], [1], [0, 0, 1, 1], [], []>} : vector<16x16xbf16>, vector<16x22xbf16>, vector<16x22xf32> -> vector<16x22xf32>
    %42 = arith.addf %36, %41 : vector<16x22xf32>
    %c7_39 = arith.constant 7 : index
    %c0_40 = arith.constant 0 : index
    %c0_41 = arith.constant 0 : index
    %43 = vector.load %arg2[%c7_39, %c0_40, %c0_41] : memref<9x16x16xbf16, #tpu.memory_space<vmem>>, vector<1x16x16xbf16>
    %44 = vector.shape_cast %43 : vector<1x16x16xbf16> to vector<16x16xbf16>
    %c0_42 = arith.constant 0 : index
    %c0_43 = arith.constant 0 : index
    %c13 = arith.constant 13 : index
    %45 = vector.load %arg1[%c0_42, %c0_43, %c13] : memref<1x16x36xbf16, #tpu.memory_space<vmem>>, vector<1x16x22xbf16>
    %46 = vector.shape_cast %45 : vector<1x16x22xbf16> to vector<16x22xbf16>
    %cst_44 = arith.constant dense<0.000000e+00> : vector<16x22xf32>
    %47 = tpu.matmul %44, %46, %cst_44 {dimension_numbers = #tpu.dot_dimension_numbers<[1], [0], [0], [1], [0, 0, 1, 1], [], []>} : vector<16x16xbf16>, vector<16x22xbf16>, vector<16x22xf32> -> vector<16x22xf32>
    %48 = arith.addf %42, %47 : vector<16x22xf32>
    %c8_45 = arith.constant 8 : index
    %c0_46 = arith.constant 0 : index
    %c0_47 = arith.constant 0 : index
    %49 = vector.load %arg2[%c8_45, %c0_46, %c0_47] : memref<9x16x16xbf16, #tpu.memory_space<vmem>>, vector<1x16x16xbf16>
    %50 = vector.shape_cast %49 : vector<1x16x16xbf16> to vector<16x16xbf16>
    %c0_48 = arith.constant 0 : index
    %c0_49 = arith.constant 0 : index
    %c14 = arith.constant 14 : index
    %51 = vector.load %arg1[%c0_48, %c0_49, %c14] : memref<1x16x36xbf16, #tpu.memory_space<vmem>>, vector<1x16x22xbf16>
    %52 = vector.shape_cast %51 : vector<1x16x22xbf16> to vector<16x22xbf16>
    %cst_50 = arith.constant dense<0.000000e+00> : vector<16x22xf32>
    %53 = tpu.matmul %50, %52, %cst_50 {dimension_numbers = #tpu.dot_dimension_numbers<[1], [0], [0], [1], [0, 0, 1, 1], [], []>} : vector<16x16xbf16>, vector<16x22xbf16>, vector<16x22xf32> -> vector<16x22xf32>
    %54 = arith.addf %48, %53 : vector<16x22xf32>
    %c0_51 = arith.constant 0 : index
    %c0_52 = arith.constant 0 : index
    %55 = vector.load %arg3[%c0_51, %c0_52] : memref<1x22xf32, #tpu.memory_space<vmem>>, vector<1x22xf32>
    %56 = vector.broadcast %55 : vector<1x22xf32> to vector<16x22xf32>
    %57 = arith.mulf %54, %56 : vector<16x22xf32>
    %cst_53 = arith.constant dense<0.000000e+00> : vector<16xf32>
    %58 = vector.multi_reduction <add>, %57, %cst_53 [1] : vector<16x22xf32> to vector<16xf32>
    %59 = vector.shape_cast %58 : vector<16xf32> to vector<16x1xf32>
    %60 = arith.mulf %54, %54 : vector<16x22xf32>
    %61 = vector.broadcast %55 : vector<1x22xf32> to vector<16x22xf32>
    %62 = arith.mulf %60, %61 : vector<16x22xf32>
    %cst_54 = arith.constant dense<0.000000e+00> : vector<16xf32>
    %63 = vector.multi_reduction <add>, %62, %cst_54 [1] : vector<16x22xf32> to vector<16xf32>
    %64 = vector.shape_cast %63 : vector<16xf32> to vector<16x1xf32>
    %cst_55 = arith.constant 1.600000e+01 : f32
    %65 = vector.broadcast %cst_55 : f32 to vector<16x1xf32>
    %66 = arith.divf %59, %65 : vector<16x1xf32>
    %cst_56 = arith.constant 1.600000e+01 : f32
    %67 = vector.broadcast %cst_56 : f32 to vector<16x1xf32>
    %68 = arith.divf %64, %67 : vector<16x1xf32>
    %69 = arith.mulf %66, %66 : vector<16x1xf32>
    %70 = arith.subf %68, %69 : vector<16x1xf32>
    %cst_57 = arith.constant 0.000000e+00 : f32
    %71 = vector.broadcast %cst_57 : f32 to vector<16x1xf32>
    %72 = arith.maximumf %70, %71 : vector<16x1xf32>
    %73 = vector.broadcast %66 : vector<16x1xf32> to vector<16x22xf32>
    %74 = arith.subf %54, %73 : vector<16x22xf32>
    %cst_58 = arith.constant 9.99999974E-6 : f32
    %75 = vector.broadcast %cst_58 : f32 to vector<16x1xf32>
    %76 = arith.addf %72, %75 : vector<16x1xf32>
    %77 = math.rsqrt %76 : vector<16x1xf32>
    %78 = vector.broadcast %77 : vector<16x1xf32> to vector<16x22xf32>
    %79 = arith.mulf %74, %78 : vector<16x22xf32>
    %cst_59 = arith.constant 0.000000e+00 : f32
    %80 = vector.broadcast %cst_59 : f32 to vector<16x22xf32>
    %81 = arith.cmpf oge, %79, %80 : vector<16x22xf32>
    %cst_60 = arith.constant 2.000000e-01 : f32
    %82 = vector.broadcast %cst_60 : f32 to vector<16x22xf32>
    %83 = arith.mulf %82, %79 : vector<16x22xf32>
    %84 = arith.select %81, %79, %83 : vector<16x22xi1>, vector<16x22xf32>
    %85 = vector.broadcast %55 : vector<1x22xf32> to vector<16x22xf32>
    %86 = arith.mulf %84, %85 : vector<16x22xf32>
    %cst_61 = arith.constant 0.000000e+00 : bf16
    %87 = vector.broadcast %cst_61 : bf16 to vector<16x36xbf16>
    %c0_62 = arith.constant 0 : index
    %c0_63 = arith.constant 0 : index
    %c0_64 = arith.constant 0 : index
    %88 = vector.load %arg4[%c0_62, %c0_63, %c0_64] : memref<1x16x36xbf16, #tpu.memory_space<vmem>>, vector<1x16x36xbf16>
    %89 = vector.shape_cast %88 : vector<1x16x36xbf16> to vector<16x36xbf16>
    %90 = vector.shape_cast %87 : vector<16x36xbf16> to vector<1x16x36xbf16>
    tpu.vector_store %arg4[%c0_62, %c0_63, %c0_64], %90 {strides = array<i32>} : memref<1x16x36xbf16, #tpu.memory_space<vmem>>, vector<1x16x36xbf16>,
    %91 = arith.truncf %86 : vector<16x22xf32> to vector<16x22xbf16>
    %c0_65 = arith.constant 0 : index
    %c0_66 = arith.constant 0 : index
    %c7_67 = arith.constant 7 : index
    %92 = vector.load %arg4[%c0_65, %c0_66, %c7_67] : memref<1x16x36xbf16, #tpu.memory_space<vmem>>, vector<1x16x22xbf16>
    %93 = vector.shape_cast %92 : vector<1x16x22xbf16> to vector<16x22xbf16>
    %94 = vector.shape_cast %91 : vector<16x22xbf16> to vector<1x16x22xbf16>
    tpu.vector_store %arg4[%c0_65, %c0_66, %c7_67], %94 {strides = array<i32>} : memref<1x16x36xbf16, #tpu.memory_space<vmem>>, vector<1x16x22xbf16>,
    return
  }
  func.func @transform_0(%arg0: i32) -> (i32, i32, i32) {
    %c0_i32 = arith.constant 0 : i32
    %c0_i32_0 = arith.constant 0 : i32
    %c0_i32_1 = arith.constant 0 : i32
    return %arg0, %c0_i32, %c0_i32_0 : i32, i32, i32
  }
  func.func @transform_1(%arg0: i32) -> (i32, i32, i32) {
    %c0_i32 = arith.constant 0 : i32
    %c0_i32_0 = arith.constant 0 : i32
    %c0_i32_1 = arith.constant 0 : i32
    %c0_i32_2 = arith.constant 0 : i32
    return %c0_i32, %c0_i32_0, %c0_i32_1 : i32, i32, i32
  }
  func.func @transform_2(%arg0: i32) -> (i32, i32) {
    %c0_i32 = arith.constant 0 : i32
    %c0_i32_0 = arith.constant 0 : i32
    %c0_i32_1 = arith.constant 0 : i32
    return %c0_i32, %c0_i32_0 : i32, i32
  }
  func.func @transform_3(%arg0: i32) -> (i32, i32, i32) {
    %c0_i32 = arith.constant 0 : i32
    %c0_i32_0 = arith.constant 0 : i32
    %c0_i32_1 = arith.constant 0 : i32
    return %arg0, %c0_i32, %c0_i32_0 : i32, i32, i32
  }
}

module attributes {stable_mosaic.version = 11 : i64} {
  func.func @_tconv_in_lrelu_kernel(%arg0: i32, %arg1: memref<1x16x16xbf16, #tpu.memory_space<vmem>>, %arg2: memref<32x16xbf16, #tpu.memory_space<vmem>>, %arg3: memref<1x32x16xbf16, #tpu.memory_space<vmem>>) attributes {dimension_semantics = [#tpu.dimension_semantics<parallel>], iteration_bounds = array<i64: 8>, scalar_prefetch = 0 : i64, scratch_operands = 0 : i64, tpu.core_type = #tpu.core_type<tc>, window_params = [{transform_indices = @transform_0, window_bounds = array<i64: 1, 16, 16>}, {pipeline_mode = #tpu.pipeline_mode<synchronous>, transform_indices = @transform_1, window_bounds = array<i64: 32, 16>}, {transform_indices = @transform_2, window_bounds = array<i64: 1, 32, 16>}]} {
    %c0 = arith.constant 0 : index
    %c0_0 = arith.constant 0 : index
    %0 = vector.load %arg2[%c0, %c0_0] : memref<32x16xbf16, #tpu.memory_space<vmem>>, vector<32x16xbf16>
    %c0_1 = arith.constant 0 : index
    %c0_2 = arith.constant 0 : index
    %c0_3 = arith.constant 0 : index
    %1 = vector.load %arg1[%c0_1, %c0_2, %c0_3] : memref<1x16x16xbf16, #tpu.memory_space<vmem>>, vector<1x16x16xbf16>
    %2 = vector.shape_cast %1 : vector<1x16x16xbf16> to vector<16x16xbf16>
    %cst = arith.constant dense<0.000000e+00> : vector<32x16xf32>
    %3 = tpu.matmul %0, %2, %cst {dimension_numbers = #tpu.dot_dimension_numbers<[1], [0], [0], [1], [0, 0, 1, 1], [], []>} : vector<32x16xbf16>, vector<16x16xbf16>, vector<32x16xf32> -> vector<32x16xf32>
    %cst_4 = arith.constant dense<0.000000e+00> : vector<32xf32>
    %4 = vector.multi_reduction <add>, %3, %cst_4 [1] : vector<32x16xf32> to vector<32xf32>
    %5 = vector.shape_cast %4 : vector<32xf32> to vector<32x1xf32>
    %6 = arith.mulf %3, %3 : vector<32x16xf32>
    %cst_5 = arith.constant dense<0.000000e+00> : vector<32xf32>
    %7 = vector.multi_reduction <add>, %6, %cst_5 [1] : vector<32x16xf32> to vector<32xf32>
    %8 = vector.shape_cast %7 : vector<32xf32> to vector<32x1xf32>
    %9 = vector.extract_strided_slice %5 {offsets = [0, 0], sizes = [8, 1], strides = [1, 1]} : vector<32x1xf32> to vector<8x1xf32>
    %10 = vector.extract_strided_slice %5 {offsets = [8, 0], sizes = [8, 1], strides = [1, 1]} : vector<32x1xf32> to vector<8x1xf32>
    %11 = arith.addf %9, %10 : vector<8x1xf32>
    %12 = vector.extract_strided_slice %5 {offsets = [16, 0], sizes = [8, 1], strides = [1, 1]} : vector<32x1xf32> to vector<8x1xf32>
    %13 = arith.addf %11, %12 : vector<8x1xf32>
    %14 = vector.extract_strided_slice %5 {offsets = [24, 0], sizes = [8, 1], strides = [1, 1]} : vector<32x1xf32> to vector<8x1xf32>
    %15 = arith.addf %13, %14 : vector<8x1xf32>
    %16 = vector.extract_strided_slice %8 {offsets = [0, 0], sizes = [8, 1], strides = [1, 1]} : vector<32x1xf32> to vector<8x1xf32>
    %17 = vector.extract_strided_slice %8 {offsets = [8, 0], sizes = [8, 1], strides = [1, 1]} : vector<32x1xf32> to vector<8x1xf32>
    %18 = arith.addf %16, %17 : vector<8x1xf32>
    %19 = vector.extract_strided_slice %8 {offsets = [16, 0], sizes = [8, 1], strides = [1, 1]} : vector<32x1xf32> to vector<8x1xf32>
    %20 = arith.addf %18, %19 : vector<8x1xf32>
    %21 = vector.extract_strided_slice %8 {offsets = [24, 0], sizes = [8, 1], strides = [1, 1]} : vector<32x1xf32> to vector<8x1xf32>
    %22 = arith.addf %20, %21 : vector<8x1xf32>
    %cst_6 = arith.constant 6.400000e+01 : f32
    %23 = vector.broadcast %cst_6 : f32 to vector<8x1xf32>
    %24 = arith.divf %15, %23 : vector<8x1xf32>
    %cst_7 = arith.constant 6.400000e+01 : f32
    %25 = vector.broadcast %cst_7 : f32 to vector<8x1xf32>
    %26 = arith.divf %22, %25 : vector<8x1xf32>
    %27 = arith.mulf %24, %24 : vector<8x1xf32>
    %28 = arith.subf %26, %27 : vector<8x1xf32>
    %cst_8 = arith.constant 0.000000e+00 : f32
    %29 = vector.broadcast %cst_8 : f32 to vector<8x1xf32>
    %30 = arith.maximumf %28, %29 : vector<8x1xf32>
    %cst_9 = arith.constant 9.99999974E-6 : f32
    %31 = vector.broadcast %cst_9 : f32 to vector<8x1xf32>
    %32 = arith.addf %30, %31 : vector<8x1xf32>
    %33 = math.rsqrt %32 : vector<8x1xf32>
    %34 = tpu.concatenate %24, %24, %24, %24 in 0 : vector<8x1xf32>, vector<8x1xf32>, vector<8x1xf32>, vector<8x1xf32> -> vector<32x1xf32>
    %35 = tpu.concatenate %33, %33, %33, %33 in 0 : vector<8x1xf32>, vector<8x1xf32>, vector<8x1xf32>, vector<8x1xf32> -> vector<32x1xf32>
    %36 = vector.broadcast %34 : vector<32x1xf32> to vector<32x16xf32>
    %37 = arith.subf %3, %36 : vector<32x16xf32>
    %38 = vector.broadcast %35 : vector<32x1xf32> to vector<32x16xf32>
    %39 = arith.mulf %37, %38 : vector<32x16xf32>
    %cst_10 = arith.constant 0.000000e+00 : f32
    %40 = vector.broadcast %cst_10 : f32 to vector<32x16xf32>
    %41 = arith.cmpf oge, %39, %40 : vector<32x16xf32>
    %cst_11 = arith.constant 2.000000e-01 : f32
    %42 = vector.broadcast %cst_11 : f32 to vector<32x16xf32>
    %43 = arith.mulf %42, %39 : vector<32x16xf32>
    %44 = arith.select %41, %39, %43 : vector<32x16xi1>, vector<32x16xf32>
    %45 = arith.truncf %44 : vector<32x16xf32> to vector<32x16xbf16>
    %c0_12 = arith.constant 0 : index
    %c0_13 = arith.constant 0 : index
    %c0_14 = arith.constant 0 : index
    %46 = vector.load %arg3[%c0_12, %c0_13, %c0_14] : memref<1x32x16xbf16, #tpu.memory_space<vmem>>, vector<1x32x16xbf16>
    %47 = vector.shape_cast %46 : vector<1x32x16xbf16> to vector<32x16xbf16>
    %48 = vector.shape_cast %45 : vector<32x16xbf16> to vector<1x32x16xbf16>
    tpu.vector_store %arg3[%c0_12, %c0_13, %c0_14], %48 {strides = array<i32>} : memref<1x32x16xbf16, #tpu.memory_space<vmem>>, vector<1x32x16xbf16>,
    return
  }
  func.func @transform_0(%arg0: i32) -> (i32, i32, i32) {
    %c0_i32 = arith.constant 0 : i32
    %c0_i32_0 = arith.constant 0 : i32
    %c0_i32_1 = arith.constant 0 : i32
    return %arg0, %c0_i32, %c0_i32_0 : i32, i32, i32
  }
  func.func @transform_1(%arg0: i32) -> (i32, i32) {
    %c0_i32 = arith.constant 0 : i32
    %c0_i32_0 = arith.constant 0 : i32
    %c0_i32_1 = arith.constant 0 : i32
    return %c0_i32, %c0_i32_0 : i32, i32
  }
  func.func @transform_2(%arg0: i32) -> (i32, i32, i32) {
    %c0_i32 = arith.constant 0 : i32
    %c0_i32_0 = arith.constant 0 : i32
    %c0_i32_1 = arith.constant 0 : i32
    return %arg0, %c0_i32, %c0_i32_0 : i32, i32, i32
  }
}

module attributes {stable_mosaic.version = 11 : i64} {
  func.func @_conv3x3_in_lrelu_kernel(%arg0: i32, %arg1: memref<1x16x100xbf16, #tpu.memory_space<vmem>>, %arg2: memref<9x8x16xbf16, #tpu.memory_space<vmem>>, %arg3: memref<1x78xf32, #tpu.memory_space<vmem>>, %arg4: memref<1x8x100xbf16, #tpu.memory_space<vmem>>) attributes {dimension_semantics = [#tpu.dimension_semantics<parallel>], iteration_bounds = array<i64: 8>, scalar_prefetch = 0 : i64, scratch_operands = 0 : i64, tpu.core_type = #tpu.core_type<tc>, window_params = [{transform_indices = @transform_0, window_bounds = array<i64: 1, 16, 100>}, {pipeline_mode = #tpu.pipeline_mode<synchronous>, transform_indices = @transform_1, window_bounds = array<i64: 9, 8, 16>}, {pipeline_mode = #tpu.pipeline_mode<synchronous>, transform_indices = @transform_2, window_bounds = array<i64: 1, 78>}, {transform_indices = @transform_3, window_bounds = array<i64: 1, 8, 100>}]} {
    %cst = arith.constant 0.000000e+00 : f32
    %0 = vector.broadcast %cst : f32 to vector<8x78xf32>
    %c0 = arith.constant 0 : index
    %c0_0 = arith.constant 0 : index
    %c0_1 = arith.constant 0 : index
    %1 = vector.load %arg2[%c0, %c0_0, %c0_1] : memref<9x8x16xbf16, #tpu.memory_space<vmem>>, vector<1x8x16xbf16>
    %2 = vector.shape_cast %1 : vector<1x8x16xbf16> to vector<8x16xbf16>
    %c0_2 = arith.constant 0 : index
    %c0_3 = arith.constant 0 : index
    %c0_4 = arith.constant 0 : index
    %3 = vector.load %arg1[%c0_2, %c0_3, %c0_4] : memref<1x16x100xbf16, #tpu.memory_space<vmem>>, vector<1x16x78xbf16>
    %4 = vector.shape_cast %3 : vector<1x16x78xbf16> to vector<16x78xbf16>
    %cst_5 = arith.constant dense<0.000000e+00> : vector<8x78xf32>
    %5 = tpu.matmul %2, %4, %cst_5 {dimension_numbers = #tpu.dot_dimension_numbers<[1], [0], [0], [1], [0, 0, 1, 1], [], []>} : vector<8x16xbf16>, vector<16x78xbf16>, vector<8x78xf32> -> vector<8x78xf32>
    %6 = arith.addf %0, %5 : vector<8x78xf32>
    %c1 = arith.constant 1 : index
    %c0_6 = arith.constant 0 : index
    %c0_7 = arith.constant 0 : index
    %7 = vector.load %arg2[%c1, %c0_6, %c0_7] : memref<9x8x16xbf16, #tpu.memory_space<vmem>>, vector<1x8x16xbf16>
    %8 = vector.shape_cast %7 : vector<1x8x16xbf16> to vector<8x16xbf16>
    %c0_8 = arith.constant 0 : index
    %c0_9 = arith.constant 0 : index
    %c1_10 = arith.constant 1 : index
    %9 = vector.load %arg1[%c0_8, %c0_9, %c1_10] : memref<1x16x100xbf16, #tpu.memory_space<vmem>>, vector<1x16x78xbf16>
    %10 = vector.shape_cast %9 : vector<1x16x78xbf16> to vector<16x78xbf16>
    %cst_11 = arith.constant dense<0.000000e+00> : vector<8x78xf32>
    %11 = tpu.matmul %8, %10, %cst_11 {dimension_numbers = #tpu.dot_dimension_numbers<[1], [0], [0], [1], [0, 0, 1, 1], [], []>} : vector<8x16xbf16>, vector<16x78xbf16>, vector<8x78xf32> -> vector<8x78xf32>
    %12 = arith.addf %6, %11 : vector<8x78xf32>
    %c2 = arith.constant 2 : index
    %c0_12 = arith.constant 0 : index
    %c0_13 = arith.constant 0 : index
    %13 = vector.load %arg2[%c2, %c0_12, %c0_13] : memref<9x8x16xbf16, #tpu.memory_space<vmem>>, vector<1x8x16xbf16>
    %14 = vector.shape_cast %13 : vector<1x8x16xbf16> to vector<8x16xbf16>
    %c0_14 = arith.constant 0 : index
    %c0_15 = arith.constant 0 : index
    %c2_16 = arith.constant 2 : index
    %15 = vector.load %arg1[%c0_14, %c0_15, %c2_16] : memref<1x16x100xbf16, #tpu.memory_space<vmem>>, vector<1x16x78xbf16>
    %16 = vector.shape_cast %15 : vector<1x16x78xbf16> to vector<16x78xbf16>
    %cst_17 = arith.constant dense<0.000000e+00> : vector<8x78xf32>
    %17 = tpu.matmul %14, %16, %cst_17 {dimension_numbers = #tpu.dot_dimension_numbers<[1], [0], [0], [1], [0, 0, 1, 1], [], []>} : vector<8x16xbf16>, vector<16x78xbf16>, vector<8x78xf32> -> vector<8x78xf32>
    %18 = arith.addf %12, %17 : vector<8x78xf32>
    %c3 = arith.constant 3 : index
    %c0_18 = arith.constant 0 : index
    %c0_19 = arith.constant 0 : index
    %19 = vector.load %arg2[%c3, %c0_18, %c0_19] : memref<9x8x16xbf16, #tpu.memory_space<vmem>>, vector<1x8x16xbf16>
    %20 = vector.shape_cast %19 : vector<1x8x16xbf16> to vector<8x16xbf16>
    %c0_20 = arith.constant 0 : index
    %c0_21 = arith.constant 0 : index
    %c10 = arith.constant 10 : index
    %21 = vector.load %arg1[%c0_20, %c0_21, %c10] : memref<1x16x100xbf16, #tpu.memory_space<vmem>>, vector<1x16x78xbf16>
    %22 = vector.shape_cast %21 : vector<1x16x78xbf16> to vector<16x78xbf16>
    %cst_22 = arith.constant dense<0.000000e+00> : vector<8x78xf32>
    %23 = tpu.matmul %20, %22, %cst_22 {dimension_numbers = #tpu.dot_dimension_numbers<[1], [0], [0], [1], [0, 0, 1, 1], [], []>} : vector<8x16xbf16>, vector<16x78xbf16>, vector<8x78xf32> -> vector<8x78xf32>
    %24 = arith.addf %18, %23 : vector<8x78xf32>
    %c4 = arith.constant 4 : index
    %c0_23 = arith.constant 0 : index
    %c0_24 = arith.constant 0 : index
    %25 = vector.load %arg2[%c4, %c0_23, %c0_24] : memref<9x8x16xbf16, #tpu.memory_space<vmem>>, vector<1x8x16xbf16>
    %26 = vector.shape_cast %25 : vector<1x8x16xbf16> to vector<8x16xbf16>
    %c0_25 = arith.constant 0 : index
    %c0_26 = arith.constant 0 : index
    %c11 = arith.constant 11 : index
    %27 = vector.load %arg1[%c0_25, %c0_26, %c11] : memref<1x16x100xbf16, #tpu.memory_space<vmem>>, vector<1x16x78xbf16>
    %28 = vector.shape_cast %27 : vector<1x16x78xbf16> to vector<16x78xbf16>
    %cst_27 = arith.constant dense<0.000000e+00> : vector<8x78xf32>
    %29 = tpu.matmul %26, %28, %cst_27 {dimension_numbers = #tpu.dot_dimension_numbers<[1], [0], [0], [1], [0, 0, 1, 1], [], []>} : vector<8x16xbf16>, vector<16x78xbf16>, vector<8x78xf32> -> vector<8x78xf32>
    %30 = arith.addf %24, %29 : vector<8x78xf32>
    %c5 = arith.constant 5 : index
    %c0_28 = arith.constant 0 : index
    %c0_29 = arith.constant 0 : index
    %31 = vector.load %arg2[%c5, %c0_28, %c0_29] : memref<9x8x16xbf16, #tpu.memory_space<vmem>>, vector<1x8x16xbf16>
    %32 = vector.shape_cast %31 : vector<1x8x16xbf16> to vector<8x16xbf16>
    %c0_30 = arith.constant 0 : index
    %c0_31 = arith.constant 0 : index
    %c12 = arith.constant 12 : index
    %33 = vector.load %arg1[%c0_30, %c0_31, %c12] : memref<1x16x100xbf16, #tpu.memory_space<vmem>>, vector<1x16x78xbf16>
    %34 = vector.shape_cast %33 : vector<1x16x78xbf16> to vector<16x78xbf16>
    %cst_32 = arith.constant dense<0.000000e+00> : vector<8x78xf32>
    %35 = tpu.matmul %32, %34, %cst_32 {dimension_numbers = #tpu.dot_dimension_numbers<[1], [0], [0], [1], [0, 0, 1, 1], [], []>} : vector<8x16xbf16>, vector<16x78xbf16>, vector<8x78xf32> -> vector<8x78xf32>
    %36 = arith.addf %30, %35 : vector<8x78xf32>
    %c6 = arith.constant 6 : index
    %c0_33 = arith.constant 0 : index
    %c0_34 = arith.constant 0 : index
    %37 = vector.load %arg2[%c6, %c0_33, %c0_34] : memref<9x8x16xbf16, #tpu.memory_space<vmem>>, vector<1x8x16xbf16>
    %38 = vector.shape_cast %37 : vector<1x8x16xbf16> to vector<8x16xbf16>
    %c0_35 = arith.constant 0 : index
    %c0_36 = arith.constant 0 : index
    %c20 = arith.constant 20 : index
    %39 = vector.load %arg1[%c0_35, %c0_36, %c20] : memref<1x16x100xbf16, #tpu.memory_space<vmem>>, vector<1x16x78xbf16>
    %40 = vector.shape_cast %39 : vector<1x16x78xbf16> to vector<16x78xbf16>
    %cst_37 = arith.constant dense<0.000000e+00> : vector<8x78xf32>
    %41 = tpu.matmul %38, %40, %cst_37 {dimension_numbers = #tpu.dot_dimension_numbers<[1], [0], [0], [1], [0, 0, 1, 1], [], []>} : vector<8x16xbf16>, vector<16x78xbf16>, vector<8x78xf32> -> vector<8x78xf32>
    %42 = arith.addf %36, %41 : vector<8x78xf32>
    %c7 = arith.constant 7 : index
    %c0_38 = arith.constant 0 : index
    %c0_39 = arith.constant 0 : index
    %43 = vector.load %arg2[%c7, %c0_38, %c0_39] : memref<9x8x16xbf16, #tpu.memory_space<vmem>>, vector<1x8x16xbf16>
    %44 = vector.shape_cast %43 : vector<1x8x16xbf16> to vector<8x16xbf16>
    %c0_40 = arith.constant 0 : index
    %c0_41 = arith.constant 0 : index
    %c21 = arith.constant 21 : index
    %45 = vector.load %arg1[%c0_40, %c0_41, %c21] : memref<1x16x100xbf16, #tpu.memory_space<vmem>>, vector<1x16x78xbf16>
    %46 = vector.shape_cast %45 : vector<1x16x78xbf16> to vector<16x78xbf16>
    %cst_42 = arith.constant dense<0.000000e+00> : vector<8x78xf32>
    %47 = tpu.matmul %44, %46, %cst_42 {dimension_numbers = #tpu.dot_dimension_numbers<[1], [0], [0], [1], [0, 0, 1, 1], [], []>} : vector<8x16xbf16>, vector<16x78xbf16>, vector<8x78xf32> -> vector<8x78xf32>
    %48 = arith.addf %42, %47 : vector<8x78xf32>
    %c8 = arith.constant 8 : index
    %c0_43 = arith.constant 0 : index
    %c0_44 = arith.constant 0 : index
    %49 = vector.load %arg2[%c8, %c0_43, %c0_44] : memref<9x8x16xbf16, #tpu.memory_space<vmem>>, vector<1x8x16xbf16>
    %50 = vector.shape_cast %49 : vector<1x8x16xbf16> to vector<8x16xbf16>
    %c0_45 = arith.constant 0 : index
    %c0_46 = arith.constant 0 : index
    %c22 = arith.constant 22 : index
    %51 = vector.load %arg1[%c0_45, %c0_46, %c22] : memref<1x16x100xbf16, #tpu.memory_space<vmem>>, vector<1x16x78xbf16>
    %52 = vector.shape_cast %51 : vector<1x16x78xbf16> to vector<16x78xbf16>
    %cst_47 = arith.constant dense<0.000000e+00> : vector<8x78xf32>
    %53 = tpu.matmul %50, %52, %cst_47 {dimension_numbers = #tpu.dot_dimension_numbers<[1], [0], [0], [1], [0, 0, 1, 1], [], []>} : vector<8x16xbf16>, vector<16x78xbf16>, vector<8x78xf32> -> vector<8x78xf32>
    %54 = arith.addf %48, %53 : vector<8x78xf32>
    %c0_48 = arith.constant 0 : index
    %c0_49 = arith.constant 0 : index
    %55 = vector.load %arg3[%c0_48, %c0_49] : memref<1x78xf32, #tpu.memory_space<vmem>>, vector<1x78xf32>
    %56 = vector.broadcast %55 : vector<1x78xf32> to vector<8x78xf32>
    %57 = arith.mulf %54, %56 : vector<8x78xf32>
    %cst_50 = arith.constant dense<0.000000e+00> : vector<8xf32>
    %58 = vector.multi_reduction <add>, %57, %cst_50 [1] : vector<8x78xf32> to vector<8xf32>
    %59 = vector.shape_cast %58 : vector<8xf32> to vector<8x1xf32>
    %60 = arith.mulf %54, %54 : vector<8x78xf32>
    %61 = vector.broadcast %55 : vector<1x78xf32> to vector<8x78xf32>
    %62 = arith.mulf %60, %61 : vector<8x78xf32>
    %cst_51 = arith.constant dense<0.000000e+00> : vector<8xf32>
    %63 = vector.multi_reduction <add>, %62, %cst_51 [1] : vector<8x78xf32> to vector<8xf32>
    %64 = vector.shape_cast %63 : vector<8xf32> to vector<8x1xf32>
    %cst_52 = arith.constant 6.400000e+01 : f32
    %65 = vector.broadcast %cst_52 : f32 to vector<8x1xf32>
    %66 = arith.divf %59, %65 : vector<8x1xf32>
    %cst_53 = arith.constant 6.400000e+01 : f32
    %67 = vector.broadcast %cst_53 : f32 to vector<8x1xf32>
    %68 = arith.divf %64, %67 : vector<8x1xf32>
    %69 = arith.mulf %66, %66 : vector<8x1xf32>
    %70 = arith.subf %68, %69 : vector<8x1xf32>
    %cst_54 = arith.constant 0.000000e+00 : f32
    %71 = vector.broadcast %cst_54 : f32 to vector<8x1xf32>
    %72 = arith.maximumf %70, %71 : vector<8x1xf32>
    %73 = vector.broadcast %66 : vector<8x1xf32> to vector<8x78xf32>
    %74 = arith.subf %54, %73 : vector<8x78xf32>
    %cst_55 = arith.constant 9.99999974E-6 : f32
    %75 = vector.broadcast %cst_55 : f32 to vector<8x1xf32>
    %76 = arith.addf %72, %75 : vector<8x1xf32>
    %77 = math.rsqrt %76 : vector<8x1xf32>
    %78 = vector.broadcast %77 : vector<8x1xf32> to vector<8x78xf32>
    %79 = arith.mulf %74, %78 : vector<8x78xf32>
    %cst_56 = arith.constant 0.000000e+00 : f32
    %80 = vector.broadcast %cst_56 : f32 to vector<8x78xf32>
    %81 = arith.cmpf oge, %79, %80 : vector<8x78xf32>
    %cst_57 = arith.constant 2.000000e-01 : f32
    %82 = vector.broadcast %cst_57 : f32 to vector<8x78xf32>
    %83 = arith.mulf %82, %79 : vector<8x78xf32>
    %84 = arith.select %81, %79, %83 : vector<8x78xi1>, vector<8x78xf32>
    %85 = vector.broadcast %55 : vector<1x78xf32> to vector<8x78xf32>
    %86 = arith.mulf %84, %85 : vector<8x78xf32>
    %cst_58 = arith.constant 0.000000e+00 : bf16
    %87 = vector.broadcast %cst_58 : bf16 to vector<8x100xbf16>
    %c0_59 = arith.constant 0 : index
    %c0_60 = arith.constant 0 : index
    %c0_61 = arith.constant 0 : index
    %88 = vector.load %arg4[%c0_59, %c0_60, %c0_61] : memref<1x8x100xbf16, #tpu.memory_space<vmem>>, vector<1x8x100xbf16>
    %89 = vector.shape_cast %88 : vector<1x8x100xbf16> to vector<8x100xbf16>
    %90 = vector.shape_cast %87 : vector<8x100xbf16> to vector<1x8x100xbf16>
    tpu.vector_store %arg4[%c0_59, %c0_60, %c0_61], %90 {strides = array<i32>} : memref<1x8x100xbf16, #tpu.memory_space<vmem>>, vector<1x8x100xbf16>,
    %91 = arith.truncf %86 : vector<8x78xf32> to vector<8x78xbf16>
    %c0_62 = arith.constant 0 : index
    %c0_63 = arith.constant 0 : index
    %c11_64 = arith.constant 11 : index
    %92 = vector.load %arg4[%c0_62, %c0_63, %c11_64] : memref<1x8x100xbf16, #tpu.memory_space<vmem>>, vector<1x8x78xbf16>
    %93 = vector.shape_cast %92 : vector<1x8x78xbf16> to vector<8x78xbf16>
    %94 = vector.shape_cast %91 : vector<8x78xbf16> to vector<1x8x78xbf16>
    tpu.vector_store %arg4[%c0_62, %c0_63, %c11_64], %94 {strides = array<i32>} : memref<1x8x100xbf16, #tpu.memory_space<vmem>>, vector<1x8x78xbf16>,
    return
  }
  func.func @transform_0(%arg0: i32) -> (i32, i32, i32) {
    %c0_i32 = arith.constant 0 : i32
    %c0_i32_0 = arith.constant 0 : i32
    %c0_i32_1 = arith.constant 0 : i32
    return %arg0, %c0_i32, %c0_i32_0 : i32, i32, i32
  }
  func.func @transform_1(%arg0: i32) -> (i32, i32, i32) {
    %c0_i32 = arith.constant 0 : i32
    %c0_i32_0 = arith.constant 0 : i32
    %c0_i32_1 = arith.constant 0 : i32
    %c0_i32_2 = arith.constant 0 : i32
    return %c0_i32, %c0_i32_0, %c0_i32_1 : i32, i32, i32
  }
  func.func @transform_2(%arg0: i32) -> (i32, i32) {
    %c0_i32 = arith.constant 0 : i32
    %c0_i32_0 = arith.constant 0 : i32
    %c0_i32_1 = arith.constant 0 : i32
    return %c0_i32, %c0_i32_0 : i32, i32
  }
  func.func @transform_3(%arg0: i32) -> (i32, i32, i32) {
    %c0_i32 = arith.constant 0 : i32
    %c0_i32_0 = arith.constant 0 : i32
    %c0_i32_1 = arith.constant 0 : i32
    return %arg0, %c0_i32, %c0_i32_0 : i32, i32, i32
  }
}

module attributes {stable_mosaic.version = 11 : i64} {
  func.func @_tconv_in_lrelu_kernel(%arg0: i32, %arg1: memref<1x8x64xbf16, #tpu.memory_space<vmem>>, %arg2: memref<16x8xbf16, #tpu.memory_space<vmem>>, %arg3: memref<1x16x64xbf16, #tpu.memory_space<vmem>>) attributes {dimension_semantics = [#tpu.dimension_semantics<parallel>], iteration_bounds = array<i64: 8>, scalar_prefetch = 0 : i64, scratch_operands = 0 : i64, tpu.core_type = #tpu.core_type<tc>, window_params = [{transform_indices = @transform_0, window_bounds = array<i64: 1, 8, 64>}, {pipeline_mode = #tpu.pipeline_mode<synchronous>, transform_indices = @transform_1, window_bounds = array<i64: 16, 8>}, {transform_indices = @transform_2, window_bounds = array<i64: 1, 16, 64>}]} {
    %c0 = arith.constant 0 : index
    %c0_0 = arith.constant 0 : index
    %0 = vector.load %arg2[%c0, %c0_0] : memref<16x8xbf16, #tpu.memory_space<vmem>>, vector<16x8xbf16>
    %c0_1 = arith.constant 0 : index
    %c0_2 = arith.constant 0 : index
    %c0_3 = arith.constant 0 : index
    %1 = vector.load %arg1[%c0_1, %c0_2, %c0_3] : memref<1x8x64xbf16, #tpu.memory_space<vmem>>, vector<1x8x64xbf16>
    %2 = vector.shape_cast %1 : vector<1x8x64xbf16> to vector<8x64xbf16>
    %cst = arith.constant dense<0.000000e+00> : vector<16x64xf32>
    %3 = tpu.matmul %0, %2, %cst {dimension_numbers = #tpu.dot_dimension_numbers<[1], [0], [0], [1], [0, 0, 1, 1], [], []>} : vector<16x8xbf16>, vector<8x64xbf16>, vector<16x64xf32> -> vector<16x64xf32>
    %cst_4 = arith.constant dense<0.000000e+00> : vector<16xf32>
    %4 = vector.multi_reduction <add>, %3, %cst_4 [1] : vector<16x64xf32> to vector<16xf32>
    %5 = vector.shape_cast %4 : vector<16xf32> to vector<16x1xf32>
    %6 = arith.mulf %3, %3 : vector<16x64xf32>
    %cst_5 = arith.constant dense<0.000000e+00> : vector<16xf32>
    %7 = vector.multi_reduction <add>, %6, %cst_5 [1] : vector<16x64xf32> to vector<16xf32>
    %8 = vector.shape_cast %7 : vector<16xf32> to vector<16x1xf32>
    %9 = vector.extract_strided_slice %5 {offsets = [0, 0], sizes = [4, 1], strides = [1, 1]} : vector<16x1xf32> to vector<4x1xf32>
    %10 = vector.extract_strided_slice %5 {offsets = [4, 0], sizes = [4, 1], strides = [1, 1]} : vector<16x1xf32> to vector<4x1xf32>
    %11 = arith.addf %9, %10 : vector<4x1xf32>
    %12 = vector.extract_strided_slice %5 {offsets = [8, 0], sizes = [4, 1], strides = [1, 1]} : vector<16x1xf32> to vector<4x1xf32>
    %13 = arith.addf %11, %12 : vector<4x1xf32>
    %14 = vector.extract_strided_slice %5 {offsets = [12, 0], sizes = [4, 1], strides = [1, 1]} : vector<16x1xf32> to vector<4x1xf32>
    %15 = arith.addf %13, %14 : vector<4x1xf32>
    %16 = vector.extract_strided_slice %8 {offsets = [0, 0], sizes = [4, 1], strides = [1, 1]} : vector<16x1xf32> to vector<4x1xf32>
    %17 = vector.extract_strided_slice %8 {offsets = [4, 0], sizes = [4, 1], strides = [1, 1]} : vector<16x1xf32> to vector<4x1xf32>
    %18 = arith.addf %16, %17 : vector<4x1xf32>
    %19 = vector.extract_strided_slice %8 {offsets = [8, 0], sizes = [4, 1], strides = [1, 1]} : vector<16x1xf32> to vector<4x1xf32>
    %20 = arith.addf %18, %19 : vector<4x1xf32>
    %21 = vector.extract_strided_slice %8 {offsets = [12, 0], sizes = [4, 1], strides = [1, 1]} : vector<16x1xf32> to vector<4x1xf32>
    %22 = arith.addf %20, %21 : vector<4x1xf32>
    %cst_6 = arith.constant 2.560000e+02 : f32
    %23 = vector.broadcast %cst_6 : f32 to vector<4x1xf32>
    %24 = arith.divf %15, %23 : vector<4x1xf32>
    %cst_7 = arith.constant 2.560000e+02 : f32
    %25 = vector.broadcast %cst_7 : f32 to vector<4x1xf32>
    %26 = arith.divf %22, %25 : vector<4x1xf32>
    %27 = arith.mulf %24, %24 : vector<4x1xf32>
    %28 = arith.subf %26, %27 : vector<4x1xf32>
    %cst_8 = arith.constant 0.000000e+00 : f32
    %29 = vector.broadcast %cst_8 : f32 to vector<4x1xf32>
    %30 = arith.maximumf %28, %29 : vector<4x1xf32>
    %cst_9 = arith.constant 9.99999974E-6 : f32
    %31 = vector.broadcast %cst_9 : f32 to vector<4x1xf32>
    %32 = arith.addf %30, %31 : vector<4x1xf32>
    %33 = math.rsqrt %32 : vector<4x1xf32>
    %34 = tpu.concatenate %24, %24, %24, %24 in 0 : vector<4x1xf32>, vector<4x1xf32>, vector<4x1xf32>, vector<4x1xf32> -> vector<16x1xf32>
    %35 = tpu.concatenate %33, %33, %33, %33 in 0 : vector<4x1xf32>, vector<4x1xf32>, vector<4x1xf32>, vector<4x1xf32> -> vector<16x1xf32>
    %36 = vector.broadcast %34 : vector<16x1xf32> to vector<16x64xf32>
    %37 = arith.subf %3, %36 : vector<16x64xf32>
    %38 = vector.broadcast %35 : vector<16x1xf32> to vector<16x64xf32>
    %39 = arith.mulf %37, %38 : vector<16x64xf32>
    %cst_10 = arith.constant 0.000000e+00 : f32
    %40 = vector.broadcast %cst_10 : f32 to vector<16x64xf32>
    %41 = arith.cmpf oge, %39, %40 : vector<16x64xf32>
    %cst_11 = arith.constant 2.000000e-01 : f32
    %42 = vector.broadcast %cst_11 : f32 to vector<16x64xf32>
    %43 = arith.mulf %42, %39 : vector<16x64xf32>
    %44 = arith.select %41, %39, %43 : vector<16x64xi1>, vector<16x64xf32>
    %45 = arith.truncf %44 : vector<16x64xf32> to vector<16x64xbf16>
    %c0_12 = arith.constant 0 : index
    %c0_13 = arith.constant 0 : index
    %c0_14 = arith.constant 0 : index
    %46 = vector.load %arg3[%c0_12, %c0_13, %c0_14] : memref<1x16x64xbf16, #tpu.memory_space<vmem>>, vector<1x16x64xbf16>
    %47 = vector.shape_cast %46 : vector<1x16x64xbf16> to vector<16x64xbf16>
    %48 = vector.shape_cast %45 : vector<16x64xbf16> to vector<1x16x64xbf16>
    tpu.vector_store %arg3[%c0_12, %c0_13, %c0_14], %48 {strides = array<i32>} : memref<1x16x64xbf16, #tpu.memory_space<vmem>>, vector<1x16x64xbf16>,
    return
  }
  func.func @transform_0(%arg0: i32) -> (i32, i32, i32) {
    %c0_i32 = arith.constant 0 : i32
    %c0_i32_0 = arith.constant 0 : i32
    %c0_i32_1 = arith.constant 0 : i32
    return %arg0, %c0_i32, %c0_i32_0 : i32, i32, i32
  }
  func.func @transform_1(%arg0: i32) -> (i32, i32) {
    %c0_i32 = arith.constant 0 : i32
    %c0_i32_0 = arith.constant 0 : i32
    %c0_i32_1 = arith.constant 0 : i32
    return %c0_i32, %c0_i32_0 : i32, i32
  }
  func.func @transform_2(%arg0: i32) -> (i32, i32, i32) {
    %c0_i32 = arith.constant 0 : i32
    %c0_i32_0 = arith.constant 0 : i32
    %c0_i32_1 = arith.constant 0 : i32
    return %arg0, %c0_i32, %c0_i32_0 : i32, i32, i32
  }
}

module attributes {stable_mosaic.version = 11 : i64} {
  func.func @_conv3x3_in_lrelu_kernel(%arg0: i32, %arg1: memref<1x8x324xbf16, #tpu.memory_space<vmem>>, %arg2: memref<9x4x8xbf16, #tpu.memory_space<vmem>>, %arg3: memref<1x286xf32, #tpu.memory_space<vmem>>, %arg4: memref<1x4x324xbf16, #tpu.memory_space<vmem>>) attributes {dimension_semantics = [#tpu.dimension_semantics<parallel>], iteration_bounds = array<i64: 8>, scalar_prefetch = 0 : i64, scratch_operands = 0 : i64, tpu.core_type = #tpu.core_type<tc>, window_params = [{transform_indices = @transform_0, window_bounds = array<i64: 1, 8, 324>}, {pipeline_mode = #tpu.pipeline_mode<synchronous>, transform_indices = @transform_1, window_bounds = array<i64: 9, 4, 8>}, {pipeline_mode = #tpu.pipeline_mode<synchronous>, transform_indices = @transform_2, window_bounds = array<i64: 1, 286>}, {transform_indices = @transform_3, window_bounds = array<i64: 1, 4, 324>}]} {
    %cst = arith.constant 0.000000e+00 : f32
    %0 = vector.broadcast %cst : f32 to vector<4x286xf32>
    %c0 = arith.constant 0 : index
    %c0_0 = arith.constant 0 : index
    %c0_1 = arith.constant 0 : index
    %1 = vector.load %arg2[%c0, %c0_0, %c0_1] : memref<9x4x8xbf16, #tpu.memory_space<vmem>>, vector<1x4x8xbf16>
    %2 = vector.shape_cast %1 : vector<1x4x8xbf16> to vector<4x8xbf16>
    %c0_2 = arith.constant 0 : index
    %c0_3 = arith.constant 0 : index
    %c0_4 = arith.constant 0 : index
    %3 = vector.load %arg1[%c0_2, %c0_3, %c0_4] : memref<1x8x324xbf16, #tpu.memory_space<vmem>>, vector<1x8x286xbf16>
    %4 = vector.shape_cast %3 : vector<1x8x286xbf16> to vector<8x286xbf16>
    %cst_5 = arith.constant dense<0.000000e+00> : vector<4x286xf32>
    %5 = tpu.matmul %2, %4, %cst_5 {dimension_numbers = #tpu.dot_dimension_numbers<[1], [0], [0], [1], [0, 0, 1, 1], [], []>} : vector<4x8xbf16>, vector<8x286xbf16>, vector<4x286xf32> -> vector<4x286xf32>
    %6 = arith.addf %0, %5 : vector<4x286xf32>
    %c1 = arith.constant 1 : index
    %c0_6 = arith.constant 0 : index
    %c0_7 = arith.constant 0 : index
    %7 = vector.load %arg2[%c1, %c0_6, %c0_7] : memref<9x4x8xbf16, #tpu.memory_space<vmem>>, vector<1x4x8xbf16>
    %8 = vector.shape_cast %7 : vector<1x4x8xbf16> to vector<4x8xbf16>
    %c0_8 = arith.constant 0 : index
    %c0_9 = arith.constant 0 : index
    %c1_10 = arith.constant 1 : index
    %9 = vector.load %arg1[%c0_8, %c0_9, %c1_10] : memref<1x8x324xbf16, #tpu.memory_space<vmem>>, vector<1x8x286xbf16>
    %10 = vector.shape_cast %9 : vector<1x8x286xbf16> to vector<8x286xbf16>
    %cst_11 = arith.constant dense<0.000000e+00> : vector<4x286xf32>
    %11 = tpu.matmul %8, %10, %cst_11 {dimension_numbers = #tpu.dot_dimension_numbers<[1], [0], [0], [1], [0, 0, 1, 1], [], []>} : vector<4x8xbf16>, vector<8x286xbf16>, vector<4x286xf32> -> vector<4x286xf32>
    %12 = arith.addf %6, %11 : vector<4x286xf32>
    %c2 = arith.constant 2 : index
    %c0_12 = arith.constant 0 : index
    %c0_13 = arith.constant 0 : index
    %13 = vector.load %arg2[%c2, %c0_12, %c0_13] : memref<9x4x8xbf16, #tpu.memory_space<vmem>>, vector<1x4x8xbf16>
    %14 = vector.shape_cast %13 : vector<1x4x8xbf16> to vector<4x8xbf16>
    %c0_14 = arith.constant 0 : index
    %c0_15 = arith.constant 0 : index
    %c2_16 = arith.constant 2 : index
    %15 = vector.load %arg1[%c0_14, %c0_15, %c2_16] : memref<1x8x324xbf16, #tpu.memory_space<vmem>>, vector<1x8x286xbf16>
    %16 = vector.shape_cast %15 : vector<1x8x286xbf16> to vector<8x286xbf16>
    %cst_17 = arith.constant dense<0.000000e+00> : vector<4x286xf32>
    %17 = tpu.matmul %14, %16, %cst_17 {dimension_numbers = #tpu.dot_dimension_numbers<[1], [0], [0], [1], [0, 0, 1, 1], [], []>} : vector<4x8xbf16>, vector<8x286xbf16>, vector<4x286xf32> -> vector<4x286xf32>
    %18 = arith.addf %12, %17 : vector<4x286xf32>
    %c3 = arith.constant 3 : index
    %c0_18 = arith.constant 0 : index
    %c0_19 = arith.constant 0 : index
    %19 = vector.load %arg2[%c3, %c0_18, %c0_19] : memref<9x4x8xbf16, #tpu.memory_space<vmem>>, vector<1x4x8xbf16>
    %20 = vector.shape_cast %19 : vector<1x4x8xbf16> to vector<4x8xbf16>
    %c0_20 = arith.constant 0 : index
    %c0_21 = arith.constant 0 : index
    %c18 = arith.constant 18 : index
    %21 = vector.load %arg1[%c0_20, %c0_21, %c18] : memref<1x8x324xbf16, #tpu.memory_space<vmem>>, vector<1x8x286xbf16>
    %22 = vector.shape_cast %21 : vector<1x8x286xbf16> to vector<8x286xbf16>
    %cst_22 = arith.constant dense<0.000000e+00> : vector<4x286xf32>
    %23 = tpu.matmul %20, %22, %cst_22 {dimension_numbers = #tpu.dot_dimension_numbers<[1], [0], [0], [1], [0, 0, 1, 1], [], []>} : vector<4x8xbf16>, vector<8x286xbf16>, vector<4x286xf32> -> vector<4x286xf32>
    %24 = arith.addf %18, %23 : vector<4x286xf32>
    %c4 = arith.constant 4 : index
    %c0_23 = arith.constant 0 : index
    %c0_24 = arith.constant 0 : index
    %25 = vector.load %arg2[%c4, %c0_23, %c0_24] : memref<9x4x8xbf16, #tpu.memory_space<vmem>>, vector<1x4x8xbf16>
    %26 = vector.shape_cast %25 : vector<1x4x8xbf16> to vector<4x8xbf16>
    %c0_25 = arith.constant 0 : index
    %c0_26 = arith.constant 0 : index
    %c19 = arith.constant 19 : index
    %27 = vector.load %arg1[%c0_25, %c0_26, %c19] : memref<1x8x324xbf16, #tpu.memory_space<vmem>>, vector<1x8x286xbf16>
    %28 = vector.shape_cast %27 : vector<1x8x286xbf16> to vector<8x286xbf16>
    %cst_27 = arith.constant dense<0.000000e+00> : vector<4x286xf32>
    %29 = tpu.matmul %26, %28, %cst_27 {dimension_numbers = #tpu.dot_dimension_numbers<[1], [0], [0], [1], [0, 0, 1, 1], [], []>} : vector<4x8xbf16>, vector<8x286xbf16>, vector<4x286xf32> -> vector<4x286xf32>
    %30 = arith.addf %24, %29 : vector<4x286xf32>
    %c5 = arith.constant 5 : index
    %c0_28 = arith.constant 0 : index
    %c0_29 = arith.constant 0 : index
    %31 = vector.load %arg2[%c5, %c0_28, %c0_29] : memref<9x4x8xbf16, #tpu.memory_space<vmem>>, vector<1x4x8xbf16>
    %32 = vector.shape_cast %31 : vector<1x4x8xbf16> to vector<4x8xbf16>
    %c0_30 = arith.constant 0 : index
    %c0_31 = arith.constant 0 : index
    %c20 = arith.constant 20 : index
    %33 = vector.load %arg1[%c0_30, %c0_31, %c20] : memref<1x8x324xbf16, #tpu.memory_space<vmem>>, vector<1x8x286xbf16>
    %34 = vector.shape_cast %33 : vector<1x8x286xbf16> to vector<8x286xbf16>
    %cst_32 = arith.constant dense<0.000000e+00> : vector<4x286xf32>
    %35 = tpu.matmul %32, %34, %cst_32 {dimension_numbers = #tpu.dot_dimension_numbers<[1], [0], [0], [1], [0, 0, 1, 1], [], []>} : vector<4x8xbf16>, vector<8x286xbf16>, vector<4x286xf32> -> vector<4x286xf32>
    %36 = arith.addf %30, %35 : vector<4x286xf32>
    %c6 = arith.constant 6 : index
    %c0_33 = arith.constant 0 : index
    %c0_34 = arith.constant 0 : index
    %37 = vector.load %arg2[%c6, %c0_33, %c0_34] : memref<9x4x8xbf16, #tpu.memory_space<vmem>>, vector<1x4x8xbf16>
    %38 = vector.shape_cast %37 : vector<1x4x8xbf16> to vector<4x8xbf16>
    %c0_35 = arith.constant 0 : index
    %c0_36 = arith.constant 0 : index
    %c36 = arith.constant 36 : index
    %39 = vector.load %arg1[%c0_35, %c0_36, %c36] : memref<1x8x324xbf16, #tpu.memory_space<vmem>>, vector<1x8x286xbf16>
    %40 = vector.shape_cast %39 : vector<1x8x286xbf16> to vector<8x286xbf16>
    %cst_37 = arith.constant dense<0.000000e+00> : vector<4x286xf32>
    %41 = tpu.matmul %38, %40, %cst_37 {dimension_numbers = #tpu.dot_dimension_numbers<[1], [0], [0], [1], [0, 0, 1, 1], [], []>} : vector<4x8xbf16>, vector<8x286xbf16>, vector<4x286xf32> -> vector<4x286xf32>
    %42 = arith.addf %36, %41 : vector<4x286xf32>
    %c7 = arith.constant 7 : index
    %c0_38 = arith.constant 0 : index
    %c0_39 = arith.constant 0 : index
    %43 = vector.load %arg2[%c7, %c0_38, %c0_39] : memref<9x4x8xbf16, #tpu.memory_space<vmem>>, vector<1x4x8xbf16>
    %44 = vector.shape_cast %43 : vector<1x4x8xbf16> to vector<4x8xbf16>
    %c0_40 = arith.constant 0 : index
    %c0_41 = arith.constant 0 : index
    %c37 = arith.constant 37 : index
    %45 = vector.load %arg1[%c0_40, %c0_41, %c37] : memref<1x8x324xbf16, #tpu.memory_space<vmem>>, vector<1x8x286xbf16>
    %46 = vector.shape_cast %45 : vector<1x8x286xbf16> to vector<8x286xbf16>
    %cst_42 = arith.constant dense<0.000000e+00> : vector<4x286xf32>
    %47 = tpu.matmul %44, %46, %cst_42 {dimension_numbers = #tpu.dot_dimension_numbers<[1], [0], [0], [1], [0, 0, 1, 1], [], []>} : vector<4x8xbf16>, vector<8x286xbf16>, vector<4x286xf32> -> vector<4x286xf32>
    %48 = arith.addf %42, %47 : vector<4x286xf32>
    %c8 = arith.constant 8 : index
    %c0_43 = arith.constant 0 : index
    %c0_44 = arith.constant 0 : index
    %49 = vector.load %arg2[%c8, %c0_43, %c0_44] : memref<9x4x8xbf16, #tpu.memory_space<vmem>>, vector<1x4x8xbf16>
    %50 = vector.shape_cast %49 : vector<1x4x8xbf16> to vector<4x8xbf16>
    %c0_45 = arith.constant 0 : index
    %c0_46 = arith.constant 0 : index
    %c38 = arith.constant 38 : index
    %51 = vector.load %arg1[%c0_45, %c0_46, %c38] : memref<1x8x324xbf16, #tpu.memory_space<vmem>>, vector<1x8x286xbf16>
    %52 = vector.shape_cast %51 : vector<1x8x286xbf16> to vector<8x286xbf16>
    %cst_47 = arith.constant dense<0.000000e+00> : vector<4x286xf32>
    %53 = tpu.matmul %50, %52, %cst_47 {dimension_numbers = #tpu.dot_dimension_numbers<[1], [0], [0], [1], [0, 0, 1, 1], [], []>} : vector<4x8xbf16>, vector<8x286xbf16>, vector<4x286xf32> -> vector<4x286xf32>
    %54 = arith.addf %48, %53 : vector<4x286xf32>
    %c0_48 = arith.constant 0 : index
    %c0_49 = arith.constant 0 : index
    %55 = vector.load %arg3[%c0_48, %c0_49] : memref<1x286xf32, #tpu.memory_space<vmem>>, vector<1x286xf32>
    %56 = vector.broadcast %55 : vector<1x286xf32> to vector<4x286xf32>
    %57 = arith.mulf %54, %56 : vector<4x286xf32>
    %cst_50 = arith.constant dense<0.000000e+00> : vector<4xf32>
    %58 = vector.multi_reduction <add>, %57, %cst_50 [1] : vector<4x286xf32> to vector<4xf32>
    %59 = vector.shape_cast %58 : vector<4xf32> to vector<4x1xf32>
    %60 = arith.mulf %54, %54 : vector<4x286xf32>
    %61 = vector.broadcast %55 : vector<1x286xf32> to vector<4x286xf32>
    %62 = arith.mulf %60, %61 : vector<4x286xf32>
    %cst_51 = arith.constant dense<0.000000e+00> : vector<4xf32>
    %63 = vector.multi_reduction <add>, %62, %cst_51 [1] : vector<4x286xf32> to vector<4xf32>
    %64 = vector.shape_cast %63 : vector<4xf32> to vector<4x1xf32>
    %cst_52 = arith.constant 2.560000e+02 : f32
    %65 = vector.broadcast %cst_52 : f32 to vector<4x1xf32>
    %66 = arith.divf %59, %65 : vector<4x1xf32>
    %cst_53 = arith.constant 2.560000e+02 : f32
    %67 = vector.broadcast %cst_53 : f32 to vector<4x1xf32>
    %68 = arith.divf %64, %67 : vector<4x1xf32>
    %69 = arith.mulf %66, %66 : vector<4x1xf32>
    %70 = arith.subf %68, %69 : vector<4x1xf32>
    %cst_54 = arith.constant 0.000000e+00 : f32
    %71 = vector.broadcast %cst_54 : f32 to vector<4x1xf32>
    %72 = arith.maximumf %70, %71 : vector<4x1xf32>
    %73 = vector.broadcast %66 : vector<4x1xf32> to vector<4x286xf32>
    %74 = arith.subf %54, %73 : vector<4x286xf32>
    %cst_55 = arith.constant 9.99999974E-6 : f32
    %75 = vector.broadcast %cst_55 : f32 to vector<4x1xf32>
    %76 = arith.addf %72, %75 : vector<4x1xf32>
    %77 = math.rsqrt %76 : vector<4x1xf32>
    %78 = vector.broadcast %77 : vector<4x1xf32> to vector<4x286xf32>
    %79 = arith.mulf %74, %78 : vector<4x286xf32>
    %cst_56 = arith.constant 0.000000e+00 : f32
    %80 = vector.broadcast %cst_56 : f32 to vector<4x286xf32>
    %81 = arith.cmpf oge, %79, %80 : vector<4x286xf32>
    %cst_57 = arith.constant 2.000000e-01 : f32
    %82 = vector.broadcast %cst_57 : f32 to vector<4x286xf32>
    %83 = arith.mulf %82, %79 : vector<4x286xf32>
    %84 = arith.select %81, %79, %83 : vector<4x286xi1>, vector<4x286xf32>
    %85 = vector.broadcast %55 : vector<1x286xf32> to vector<4x286xf32>
    %86 = arith.mulf %84, %85 : vector<4x286xf32>
    %cst_58 = arith.constant 0.000000e+00 : bf16
    %87 = vector.broadcast %cst_58 : bf16 to vector<4x324xbf16>
    %c0_59 = arith.constant 0 : index
    %c0_60 = arith.constant 0 : index
    %c0_61 = arith.constant 0 : index
    %88 = vector.load %arg4[%c0_59, %c0_60, %c0_61] : memref<1x4x324xbf16, #tpu.memory_space<vmem>>, vector<1x4x324xbf16>
    %89 = vector.shape_cast %88 : vector<1x4x324xbf16> to vector<4x324xbf16>
    %90 = vector.shape_cast %87 : vector<4x324xbf16> to vector<1x4x324xbf16>
    tpu.vector_store %arg4[%c0_59, %c0_60, %c0_61], %90 {strides = array<i32>} : memref<1x4x324xbf16, #tpu.memory_space<vmem>>, vector<1x4x324xbf16>,
    %91 = arith.truncf %86 : vector<4x286xf32> to vector<4x286xbf16>
    %c0_62 = arith.constant 0 : index
    %c0_63 = arith.constant 0 : index
    %c19_64 = arith.constant 19 : index
    %92 = vector.load %arg4[%c0_62, %c0_63, %c19_64] : memref<1x4x324xbf16, #tpu.memory_space<vmem>>, vector<1x4x286xbf16>
    %93 = vector.shape_cast %92 : vector<1x4x286xbf16> to vector<4x286xbf16>
    %94 = vector.shape_cast %91 : vector<4x286xbf16> to vector<1x4x286xbf16>
    tpu.vector_store %arg4[%c0_62, %c0_63, %c19_64], %94 {strides = array<i32>} : memref<1x4x324xbf16, #tpu.memory_space<vmem>>, vector<1x4x286xbf16>,
    return
  }
  func.func @transform_0(%arg0: i32) -> (i32, i32, i32) {
    %c0_i32 = arith.constant 0 : i32
    %c0_i32_0 = arith.constant 0 : i32
    %c0_i32_1 = arith.constant 0 : i32
    return %arg0, %c0_i32, %c0_i32_0 : i32, i32, i32
  }
  func.func @transform_1(%arg0: i32) -> (i32, i32, i32) {
    %c0_i32 = arith.constant 0 : i32
    %c0_i32_0 = arith.constant 0 : i32
    %c0_i32_1 = arith.constant 0 : i32
    %c0_i32_2 = arith.constant 0 : i32
    return %c0_i32, %c0_i32_0, %c0_i32_1 : i32, i32, i32
  }
  func.func @transform_2(%arg0: i32) -> (i32, i32) {
    %c0_i32 = arith.constant 0 : i32
    %c0_i32_0 = arith.constant 0 : i32
    %c0_i32_1 = arith.constant 0 : i32
    return %c0_i32, %c0_i32_0 : i32, i32
  }
  func.func @transform_3(%arg0: i32) -> (i32, i32, i32) {
    %c0_i32 = arith.constant 0 : i32
    %c0_i32_0 = arith.constant 0 : i32
    %c0_i32_1 = arith.constant 0 : i32
    return %arg0, %c0_i32, %c0_i32_0 : i32, i32, i32
  }
}

module attributes {stable_mosaic.version = 11 : i64} {
  func.func @_conv3x3_in_lrelu_conv1x1_kernel(%arg0: i32, %arg1: memref<1x4x324xbf16, #tpu.memory_space<vmem>>, %arg2: memref<9x4x4xbf16, #tpu.memory_space<vmem>>, %arg3: memref<1x286xf32, #tpu.memory_space<vmem>>, %arg4: memref<2x4xbf16, #tpu.memory_space<vmem>>, %arg5: memref<2x1xf32, #tpu.memory_space<vmem>>, %arg6: memref<1x2x324xf32, #tpu.memory_space<vmem>>) attributes {dimension_semantics = [#tpu.dimension_semantics<parallel>], iteration_bounds = array<i64: 8>, scalar_prefetch = 0 : i64, scratch_operands = 0 : i64, tpu.core_type = #tpu.core_type<tc>, window_params = [{transform_indices = @transform_0, window_bounds = array<i64: 1, 4, 324>}, {pipeline_mode = #tpu.pipeline_mode<synchronous>, transform_indices = @transform_1, window_bounds = array<i64: 9, 4, 4>}, {pipeline_mode = #tpu.pipeline_mode<synchronous>, transform_indices = @transform_2, window_bounds = array<i64: 1, 286>}, {pipeline_mode = #tpu.pipeline_mode<synchronous>, transform_indices = @transform_3, window_bounds = array<i64: 2, 4>}, {pipeline_mode = #tpu.pipeline_mode<synchronous>, transform_indices = @transform_4, window_bounds = array<i64: 2, 1>}, {transform_indices = @transform_5, window_bounds = array<i64: 1, 2, 324>}]} {
    %cst = arith.constant 0.000000e+00 : f32
    %0 = vector.broadcast %cst : f32 to vector<4x286xf32>
    %c0 = arith.constant 0 : index
    %c0_0 = arith.constant 0 : index
    %c0_1 = arith.constant 0 : index
    %1 = vector.load %arg2[%c0, %c0_0, %c0_1] : memref<9x4x4xbf16, #tpu.memory_space<vmem>>, vector<1x4x4xbf16>
    %2 = vector.shape_cast %1 : vector<1x4x4xbf16> to vector<4x4xbf16>
    %c0_2 = arith.constant 0 : index
    %c0_3 = arith.constant 0 : index
    %c0_4 = arith.constant 0 : index
    %3 = vector.load %arg1[%c0_2, %c0_3, %c0_4] : memref<1x4x324xbf16, #tpu.memory_space<vmem>>, vector<1x4x286xbf16>
    %4 = vector.shape_cast %3 : vector<1x4x286xbf16> to vector<4x286xbf16>
    %cst_5 = arith.constant dense<0.000000e+00> : vector<4x286xf32>
    %5 = tpu.matmul %2, %4, %cst_5 {dimension_numbers = #tpu.dot_dimension_numbers<[1], [0], [0], [1], [0, 0, 1, 1], [], []>} : vector<4x4xbf16>, vector<4x286xbf16>, vector<4x286xf32> -> vector<4x286xf32>
    %6 = arith.addf %0, %5 : vector<4x286xf32>
    %c1 = arith.constant 1 : index
    %c0_6 = arith.constant 0 : index
    %c0_7 = arith.constant 0 : index
    %7 = vector.load %arg2[%c1, %c0_6, %c0_7] : memref<9x4x4xbf16, #tpu.memory_space<vmem>>, vector<1x4x4xbf16>
    %8 = vector.shape_cast %7 : vector<1x4x4xbf16> to vector<4x4xbf16>
    %c0_8 = arith.constant 0 : index
    %c0_9 = arith.constant 0 : index
    %c1_10 = arith.constant 1 : index
    %9 = vector.load %arg1[%c0_8, %c0_9, %c1_10] : memref<1x4x324xbf16, #tpu.memory_space<vmem>>, vector<1x4x286xbf16>
    %10 = vector.shape_cast %9 : vector<1x4x286xbf16> to vector<4x286xbf16>
    %cst_11 = arith.constant dense<0.000000e+00> : vector<4x286xf32>
    %11 = tpu.matmul %8, %10, %cst_11 {dimension_numbers = #tpu.dot_dimension_numbers<[1], [0], [0], [1], [0, 0, 1, 1], [], []>} : vector<4x4xbf16>, vector<4x286xbf16>, vector<4x286xf32> -> vector<4x286xf32>
    %12 = arith.addf %6, %11 : vector<4x286xf32>
    %c2 = arith.constant 2 : index
    %c0_12 = arith.constant 0 : index
    %c0_13 = arith.constant 0 : index
    %13 = vector.load %arg2[%c2, %c0_12, %c0_13] : memref<9x4x4xbf16, #tpu.memory_space<vmem>>, vector<1x4x4xbf16>
    %14 = vector.shape_cast %13 : vector<1x4x4xbf16> to vector<4x4xbf16>
    %c0_14 = arith.constant 0 : index
    %c0_15 = arith.constant 0 : index
    %c2_16 = arith.constant 2 : index
    %15 = vector.load %arg1[%c0_14, %c0_15, %c2_16] : memref<1x4x324xbf16, #tpu.memory_space<vmem>>, vector<1x4x286xbf16>
    %16 = vector.shape_cast %15 : vector<1x4x286xbf16> to vector<4x286xbf16>
    %cst_17 = arith.constant dense<0.000000e+00> : vector<4x286xf32>
    %17 = tpu.matmul %14, %16, %cst_17 {dimension_numbers = #tpu.dot_dimension_numbers<[1], [0], [0], [1], [0, 0, 1, 1], [], []>} : vector<4x4xbf16>, vector<4x286xbf16>, vector<4x286xf32> -> vector<4x286xf32>
    %18 = arith.addf %12, %17 : vector<4x286xf32>
    %c3 = arith.constant 3 : index
    %c0_18 = arith.constant 0 : index
    %c0_19 = arith.constant 0 : index
    %19 = vector.load %arg2[%c3, %c0_18, %c0_19] : memref<9x4x4xbf16, #tpu.memory_space<vmem>>, vector<1x4x4xbf16>
    %20 = vector.shape_cast %19 : vector<1x4x4xbf16> to vector<4x4xbf16>
    %c0_20 = arith.constant 0 : index
    %c0_21 = arith.constant 0 : index
    %c18 = arith.constant 18 : index
    %21 = vector.load %arg1[%c0_20, %c0_21, %c18] : memref<1x4x324xbf16, #tpu.memory_space<vmem>>, vector<1x4x286xbf16>
    %22 = vector.shape_cast %21 : vector<1x4x286xbf16> to vector<4x286xbf16>
    %cst_22 = arith.constant dense<0.000000e+00> : vector<4x286xf32>
    %23 = tpu.matmul %20, %22, %cst_22 {dimension_numbers = #tpu.dot_dimension_numbers<[1], [0], [0], [1], [0, 0, 1, 1], [], []>} : vector<4x4xbf16>, vector<4x286xbf16>, vector<4x286xf32> -> vector<4x286xf32>
    %24 = arith.addf %18, %23 : vector<4x286xf32>
    %c4 = arith.constant 4 : index
    %c0_23 = arith.constant 0 : index
    %c0_24 = arith.constant 0 : index
    %25 = vector.load %arg2[%c4, %c0_23, %c0_24] : memref<9x4x4xbf16, #tpu.memory_space<vmem>>, vector<1x4x4xbf16>
    %26 = vector.shape_cast %25 : vector<1x4x4xbf16> to vector<4x4xbf16>
    %c0_25 = arith.constant 0 : index
    %c0_26 = arith.constant 0 : index
    %c19 = arith.constant 19 : index
    %27 = vector.load %arg1[%c0_25, %c0_26, %c19] : memref<1x4x324xbf16, #tpu.memory_space<vmem>>, vector<1x4x286xbf16>
    %28 = vector.shape_cast %27 : vector<1x4x286xbf16> to vector<4x286xbf16>
    %cst_27 = arith.constant dense<0.000000e+00> : vector<4x286xf32>
    %29 = tpu.matmul %26, %28, %cst_27 {dimension_numbers = #tpu.dot_dimension_numbers<[1], [0], [0], [1], [0, 0, 1, 1], [], []>} : vector<4x4xbf16>, vector<4x286xbf16>, vector<4x286xf32> -> vector<4x286xf32>
    %30 = arith.addf %24, %29 : vector<4x286xf32>
    %c5 = arith.constant 5 : index
    %c0_28 = arith.constant 0 : index
    %c0_29 = arith.constant 0 : index
    %31 = vector.load %arg2[%c5, %c0_28, %c0_29] : memref<9x4x4xbf16, #tpu.memory_space<vmem>>, vector<1x4x4xbf16>
    %32 = vector.shape_cast %31 : vector<1x4x4xbf16> to vector<4x4xbf16>
    %c0_30 = arith.constant 0 : index
    %c0_31 = arith.constant 0 : index
    %c20 = arith.constant 20 : index
    %33 = vector.load %arg1[%c0_30, %c0_31, %c20] : memref<1x4x324xbf16, #tpu.memory_space<vmem>>, vector<1x4x286xbf16>
    %34 = vector.shape_cast %33 : vector<1x4x286xbf16> to vector<4x286xbf16>
    %cst_32 = arith.constant dense<0.000000e+00> : vector<4x286xf32>
    %35 = tpu.matmul %32, %34, %cst_32 {dimension_numbers = #tpu.dot_dimension_numbers<[1], [0], [0], [1], [0, 0, 1, 1], [], []>} : vector<4x4xbf16>, vector<4x286xbf16>, vector<4x286xf32> -> vector<4x286xf32>
    %36 = arith.addf %30, %35 : vector<4x286xf32>
    %c6 = arith.constant 6 : index
    %c0_33 = arith.constant 0 : index
    %c0_34 = arith.constant 0 : index
    %37 = vector.load %arg2[%c6, %c0_33, %c0_34] : memref<9x4x4xbf16, #tpu.memory_space<vmem>>, vector<1x4x4xbf16>
    %38 = vector.shape_cast %37 : vector<1x4x4xbf16> to vector<4x4xbf16>
    %c0_35 = arith.constant 0 : index
    %c0_36 = arith.constant 0 : index
    %c36 = arith.constant 36 : index
    %39 = vector.load %arg1[%c0_35, %c0_36, %c36] : memref<1x4x324xbf16, #tpu.memory_space<vmem>>, vector<1x4x286xbf16>
    %40 = vector.shape_cast %39 : vector<1x4x286xbf16> to vector<4x286xbf16>
    %cst_37 = arith.constant dense<0.000000e+00> : vector<4x286xf32>
    %41 = tpu.matmul %38, %40, %cst_37 {dimension_numbers = #tpu.dot_dimension_numbers<[1], [0], [0], [1], [0, 0, 1, 1], [], []>} : vector<4x4xbf16>, vector<4x286xbf16>, vector<4x286xf32> -> vector<4x286xf32>
    %42 = arith.addf %36, %41 : vector<4x286xf32>
    %c7 = arith.constant 7 : index
    %c0_38 = arith.constant 0 : index
    %c0_39 = arith.constant 0 : index
    %43 = vector.load %arg2[%c7, %c0_38, %c0_39] : memref<9x4x4xbf16, #tpu.memory_space<vmem>>, vector<1x4x4xbf16>
    %44 = vector.shape_cast %43 : vector<1x4x4xbf16> to vector<4x4xbf16>
    %c0_40 = arith.constant 0 : index
    %c0_41 = arith.constant 0 : index
    %c37 = arith.constant 37 : index
    %45 = vector.load %arg1[%c0_40, %c0_41, %c37] : memref<1x4x324xbf16, #tpu.memory_space<vmem>>, vector<1x4x286xbf16>
    %46 = vector.shape_cast %45 : vector<1x4x286xbf16> to vector<4x286xbf16>
    %cst_42 = arith.constant dense<0.000000e+00> : vector<4x286xf32>
    %47 = tpu.matmul %44, %46, %cst_42 {dimension_numbers = #tpu.dot_dimension_numbers<[1], [0], [0], [1], [0, 0, 1, 1], [], []>} : vector<4x4xbf16>, vector<4x286xbf16>, vector<4x286xf32> -> vector<4x286xf32>
    %48 = arith.addf %42, %47 : vector<4x286xf32>
    %c8 = arith.constant 8 : index
    %c0_43 = arith.constant 0 : index
    %c0_44 = arith.constant 0 : index
    %49 = vector.load %arg2[%c8, %c0_43, %c0_44] : memref<9x4x4xbf16, #tpu.memory_space<vmem>>, vector<1x4x4xbf16>
    %50 = vector.shape_cast %49 : vector<1x4x4xbf16> to vector<4x4xbf16>
    %c0_45 = arith.constant 0 : index
    %c0_46 = arith.constant 0 : index
    %c38 = arith.constant 38 : index
    %51 = vector.load %arg1[%c0_45, %c0_46, %c38] : memref<1x4x324xbf16, #tpu.memory_space<vmem>>, vector<1x4x286xbf16>
    %52 = vector.shape_cast %51 : vector<1x4x286xbf16> to vector<4x286xbf16>
    %cst_47 = arith.constant dense<0.000000e+00> : vector<4x286xf32>
    %53 = tpu.matmul %50, %52, %cst_47 {dimension_numbers = #tpu.dot_dimension_numbers<[1], [0], [0], [1], [0, 0, 1, 1], [], []>} : vector<4x4xbf16>, vector<4x286xbf16>, vector<4x286xf32> -> vector<4x286xf32>
    %54 = arith.addf %48, %53 : vector<4x286xf32>
    %c0_48 = arith.constant 0 : index
    %c0_49 = arith.constant 0 : index
    %55 = vector.load %arg3[%c0_48, %c0_49] : memref<1x286xf32, #tpu.memory_space<vmem>>, vector<1x286xf32>
    %56 = vector.broadcast %55 : vector<1x286xf32> to vector<4x286xf32>
    %57 = arith.mulf %54, %56 : vector<4x286xf32>
    %cst_50 = arith.constant dense<0.000000e+00> : vector<4xf32>
    %58 = vector.multi_reduction <add>, %57, %cst_50 [1] : vector<4x286xf32> to vector<4xf32>
    %59 = vector.shape_cast %58 : vector<4xf32> to vector<4x1xf32>
    %60 = arith.mulf %54, %54 : vector<4x286xf32>
    %61 = vector.broadcast %55 : vector<1x286xf32> to vector<4x286xf32>
    %62 = arith.mulf %60, %61 : vector<4x286xf32>
    %cst_51 = arith.constant dense<0.000000e+00> : vector<4xf32>
    %63 = vector.multi_reduction <add>, %62, %cst_51 [1] : vector<4x286xf32> to vector<4xf32>
    %64 = vector.shape_cast %63 : vector<4xf32> to vector<4x1xf32>
    %cst_52 = arith.constant 2.560000e+02 : f32
    %65 = vector.broadcast %cst_52 : f32 to vector<4x1xf32>
    %66 = arith.divf %59, %65 : vector<4x1xf32>
    %cst_53 = arith.constant 2.560000e+02 : f32
    %67 = vector.broadcast %cst_53 : f32 to vector<4x1xf32>
    %68 = arith.divf %64, %67 : vector<4x1xf32>
    %69 = arith.mulf %66, %66 : vector<4x1xf32>
    %70 = arith.subf %68, %69 : vector<4x1xf32>
    %cst_54 = arith.constant 0.000000e+00 : f32
    %71 = vector.broadcast %cst_54 : f32 to vector<4x1xf32>
    %72 = arith.maximumf %70, %71 : vector<4x1xf32>
    %73 = vector.broadcast %66 : vector<4x1xf32> to vector<4x286xf32>
    %74 = arith.subf %54, %73 : vector<4x286xf32>
    %cst_55 = arith.constant 9.99999974E-6 : f32
    %75 = vector.broadcast %cst_55 : f32 to vector<4x1xf32>
    %76 = arith.addf %72, %75 : vector<4x1xf32>
    %77 = math.rsqrt %76 : vector<4x1xf32>
    %78 = vector.broadcast %77 : vector<4x1xf32> to vector<4x286xf32>
    %79 = arith.mulf %74, %78 : vector<4x286xf32>
    %cst_56 = arith.constant 0.000000e+00 : f32
    %80 = vector.broadcast %cst_56 : f32 to vector<4x286xf32>
    %81 = arith.cmpf oge, %79, %80 : vector<4x286xf32>
    %cst_57 = arith.constant 2.000000e-01 : f32
    %82 = vector.broadcast %cst_57 : f32 to vector<4x286xf32>
    %83 = arith.mulf %82, %79 : vector<4x286xf32>
    %84 = arith.select %81, %79, %83 : vector<4x286xi1>, vector<4x286xf32>
    %85 = vector.broadcast %55 : vector<1x286xf32> to vector<4x286xf32>
    %86 = arith.mulf %84, %85 : vector<4x286xf32>
    %c0_58 = arith.constant 0 : index
    %c0_59 = arith.constant 0 : index
    %87 = vector.load %arg4[%c0_58, %c0_59] : memref<2x4xbf16, #tpu.memory_space<vmem>>, vector<2x4xbf16>
    %88 = arith.truncf %86 : vector<4x286xf32> to vector<4x286xbf16>
    %cst_60 = arith.constant dense<0.000000e+00> : vector<2x286xf32>
    %89 = tpu.matmul %87, %88, %cst_60 {dimension_numbers = #tpu.dot_dimension_numbers<[1], [0], [0], [1], [0, 0, 1, 1], [], []>} : vector<2x4xbf16>, vector<4x286xbf16>, vector<2x286xf32> -> vector<2x286xf32>
    %c0_61 = arith.constant 0 : index
    %c0_62 = arith.constant 0 : index
    %90 = vector.load %arg5[%c0_61, %c0_62] : memref<2x1xf32, #tpu.memory_space<vmem>>, vector<2x1xf32>
    %91 = vector.broadcast %90 : vector<2x1xf32> to vector<2x286xf32>
    %92 = arith.addf %89, %91 : vector<2x286xf32>
    %cst_63 = arith.constant 0.000000e+00 : f32
    %93 = vector.broadcast %cst_63 : f32 to vector<2x324xf32>
    %c0_64 = arith.constant 0 : index
    %c0_65 = arith.constant 0 : index
    %c0_66 = arith.constant 0 : index
    %94 = vector.load %arg6[%c0_64, %c0_65, %c0_66] : memref<1x2x324xf32, #tpu.memory_space<vmem>>, vector<1x2x324xf32>
    %95 = vector.shape_cast %94 : vector<1x2x324xf32> to vector<2x324xf32>
    %96 = vector.shape_cast %93 : vector<2x324xf32> to vector<1x2x324xf32>
    tpu.vector_store %arg6[%c0_64, %c0_65, %c0_66], %96 {strides = array<i32>} : memref<1x2x324xf32, #tpu.memory_space<vmem>>, vector<1x2x324xf32>,
    %c0_67 = arith.constant 0 : index
    %c0_68 = arith.constant 0 : index
    %c19_69 = arith.constant 19 : index
    %97 = vector.load %arg6[%c0_67, %c0_68, %c19_69] : memref<1x2x324xf32, #tpu.memory_space<vmem>>, vector<1x2x286xf32>
    %98 = vector.shape_cast %97 : vector<1x2x286xf32> to vector<2x286xf32>
    %99 = vector.shape_cast %92 : vector<2x286xf32> to vector<1x2x286xf32>
    tpu.vector_store %arg6[%c0_67, %c0_68, %c19_69], %99 {strides = array<i32>} : memref<1x2x324xf32, #tpu.memory_space<vmem>>, vector<1x2x286xf32>,
    return
  }
  func.func @transform_0(%arg0: i32) -> (i32, i32, i32) {
    %c0_i32 = arith.constant 0 : i32
    %c0_i32_0 = arith.constant 0 : i32
    %c0_i32_1 = arith.constant 0 : i32
    return %arg0, %c0_i32, %c0_i32_0 : i32, i32, i32
  }
  func.func @transform_1(%arg0: i32) -> (i32, i32, i32) {
    %c0_i32 = arith.constant 0 : i32
    %c0_i32_0 = arith.constant 0 : i32
    %c0_i32_1 = arith.constant 0 : i32
    %c0_i32_2 = arith.constant 0 : i32
    return %c0_i32, %c0_i32_0, %c0_i32_1 : i32, i32, i32
  }
  func.func @transform_2(%arg0: i32) -> (i32, i32) {
    %c0_i32 = arith.constant 0 : i32
    %c0_i32_0 = arith.constant 0 : i32
    %c0_i32_1 = arith.constant 0 : i32
    return %c0_i32, %c0_i32_0 : i32, i32
  }
  func.func @transform_3(%arg0: i32) -> (i32, i32) {
    %c0_i32 = arith.constant 0 : i32
    %c0_i32_0 = arith.constant 0 : i32
    %c0_i32_1 = arith.constant 0 : i32
    return %c0_i32, %c0_i32_0 : i32, i32
  }
  func.func @transform_4(%arg0: i32) -> (i32, i32) {
    %c0_i32 = arith.constant 0 : i32
    %c0_i32_0 = arith.constant 0 : i32
    %c0_i32_1 = arith.constant 0 : i32
    return %c0_i32, %c0_i32_0 : i32, i32
  }
  func.func @transform_5(%arg0: i32) -> (i32, i32, i32) {
    %c0_i32 = arith.constant 0 : i32
    %c0_i32_0 = arith.constant 0 : i32
    %c0_i32_1 = arith.constant 0 : i32
    return %arg0, %c0_i32, %c0_i32_0 : i32, i32, i32
  }
}

module attributes {stable_mosaic.version = 11 : i64} {
  func.func @_rss_divide_kernel(%arg0: i32, %arg1: memref<1x8x256xf32, #tpu.memory_space<vmem>>, %arg2: memref<1x8x256xf32, #tpu.memory_space<vmem>>) attributes {dimension_semantics = [#tpu.dimension_semantics<parallel>], iteration_bounds = array<i64: 2>, scalar_prefetch = 0 : i64, scratch_operands = 0 : i64, tpu.core_type = #tpu.core_type<tc>, window_params = [{transform_indices = @transform_0, window_bounds = array<i64: 1, 8, 256>}, {transform_indices = @transform_1, window_bounds = array<i64: 1, 8, 256>}]} {
    %c0 = arith.constant 0 : index
    %c0_0 = arith.constant 0 : index
    %c0_1 = arith.constant 0 : index
    %0 = vector.load %arg1[%c0, %c0_0, %c0_1] : memref<1x8x256xf32, #tpu.memory_space<vmem>>, vector<1x8x256xf32>
    %1 = vector.shape_cast %0 : vector<1x8x256xf32> to vector<8x256xf32>
    %2 = arith.mulf %1, %1 : vector<8x256xf32>
    %cst = arith.constant dense<0.000000e+00> : vector<256xf32>
    %3 = vector.multi_reduction <add>, %2, %cst [0] : vector<8x256xf32> to vector<256xf32>
    %4 = vector.shape_cast %3 : vector<256xf32> to vector<1x256xf32>
    %5 = math.rsqrt %4 : vector<1x256xf32>
    %6 = vector.broadcast %5 : vector<1x256xf32> to vector<8x256xf32>
    %7 = arith.mulf %1, %6 : vector<8x256xf32>
    %c0_2 = arith.constant 0 : index
    %c0_3 = arith.constant 0 : index
    %c0_4 = arith.constant 0 : index
    %8 = vector.load %arg2[%c0_2, %c0_3, %c0_4] : memref<1x8x256xf32, #tpu.memory_space<vmem>>, vector<1x8x256xf32>
    %9 = vector.shape_cast %8 : vector<1x8x256xf32> to vector<8x256xf32>
    %10 = vector.shape_cast %7 : vector<8x256xf32> to vector<1x8x256xf32>
    tpu.vector_store %arg2[%c0_2, %c0_3, %c0_4], %10 {strides = array<i32>} : memref<1x8x256xf32, #tpu.memory_space<vmem>>, vector<1x8x256xf32>,
    return
  }
  func.func @transform_0(%arg0: i32) -> (i32, i32, i32) {
    %c0_i32 = arith.constant 0 : i32
    %c0_i32_0 = arith.constant 0 : i32
    %c0_i32_1 = arith.constant 0 : i32
    return %arg0, %c0_i32, %c0_i32_0 : i32, i32, i32
  }
  func.func @transform_1(%arg0: i32) -> (i32, i32, i32) {
    %c0_i32 = arith.constant 0 : i32
    %c0_i32_0 = arith.constant 0 : i32
    %c0_i32_1 = arith.constant 0 : i32
    return %arg0, %c0_i32, %c0_i32_0 : i32, i32, i32
  }
}

</mosaic_0001>

<bundles_post_ra>
// kernel: sensitivity_model_forward.14
= control target key start
LH: loop header
LB: loop body
LE: loop exit
PB: predicated region body
PF: predicated region fallthrough
CT: control target
= control target key end

     0   :  { %8 = vsyncpa [#allocation3], 0  ;;  %s2361_s0 = inlined_call_operand.hbm [shape: bf16[8,4,324], index: 0, kind: input, shape index: {}]   ;;  %s2362_s1 = inlined_call_operand.hbm [shape: bf16[9,4,4], index: 1, kind: input, shape index: {}]   ;;  %s2363_s2 = inlined_call_operand.hbm [shape: f32[1,286], index: 2, kind: input, shape index: {}]   ;;  %s2364_s3 = inlined_call_operand.hbm [shape: bf16[8,4,324], index: 3, kind: output, shape index: {}]  }
   0x1   :  { %10 = vsyncpa [#allocation3 + $0x1], 0 }
   0x2   :  { %11 = vsyncpa [#allocation6], 0 }
   0x3   :  { %12 = vsyncpa [#allocation4], 0 }
   0x4   :  { %14 = vsyncpa [#allocation4 + $0x1], 0  ;;  %s1987_s12 = smov 0   ;;  %s1989_s13 = smov 0  }
   0x5   :  { %s1991_s14 = smov 0   ;;  %s1993_s15 = smov 0  }
   0x6 LB: > { %s2008_s16 = sadd.s32 4294967295, %s1946_s15   ;;  %s1518_s17 = sadd.s32 4294967294, %s1946_s15   ;;  %s1946_s15 = sphi %s1993_s15, %s2383_s15   ;;  %s1942_s14 = sphi %s1991_s14, %s2382_s14   ;;  %s1938_s13 = sphi %s1989_s13, %s2381_s13   ;;  %s1934_s12 = sphi %s1987_s12, %s2380_s12  }
   0x7   : > { %p40_p0 = scmp.ne.s32.totalorder %s1938_s13, %s1934_s12  ;;  %p2365_p1 = scmp.eq.s32.totalorder %s2008_s16, 0 }
   0x8   : > { %p112_p3 = scmp.eq.s32.totalorder %s1518_s17, 7  ;;  %p1519_p5 = scmp.ge.s32.totalorder %s1946_s15, 1 }
   0x9   : > { %p2017_p4 = por %p2365_p1, %p40_p0  ;;  %p119_p7 = scmp.lt.s32.totalorder %s1946_s15, 9 }
   0xa   : > { %p2022_p6 = por %p112_p3, %p40_p0  ;;  %s1948_s21 = smov [#allocation5]  }
   0xb   : > { %s2368_s18 = scalar_select %p2017_p4, 1, 0 }
   0xc   : > { %s2369_s19 = scalar_select %p2022_p6, 1, 0 }
   0xd   : > { %p2027_p8 = pnand %p1519_p5, %p119_p7  ;;  %s131_s22 = sshll.u32 %s1948_s21, 4  ;;  %s132_s22 = int_to_ptr.vmem [resolvable:$true] %s131_s22 }
   0xe   : > { %s1949_s24 = smov [#allocation7]   ;;  %s1790_s28 = scalar_lea.hbm %s2362_s1, 288 }
   0xf   : > { %s2370_s20 = scalar_select %p2027_p8, 1, 0 }
  0x10   : > { %p1710_p9 = pneg %p2027_p8  ;;  %s145_s25 = sshll.u32 %s1949_s24, 4  ;;  %s2039_s25 = int_to_ptr.vmem [resolvable:$true] %s145_s25 }
  0x11   : > { %p1791_p11 = scmp.ne.s32.totalorder %s2362_s1, %s1790_s28  ;;  %p1797_p3 = scmp.lt.u32.totalorder %s1790_s28, %s2362_s1 }
  0x12   : > { %p2035_p10 = pnand %p1710_p9, %p2365_p1 }
  0x14   : > { %p1792_p12 = pneg %p2035_p10 }
  0x16   : > { %p1793_p13 = pnand %p1792_p12, %p1791_p11 }
  0x18   : > { %p1794_p0 = pneg %p1793_p13 }
  0x1a   : > { %p1799_p5 = pnand %p1797_p3, %p1794_p0 }
  0x1c   : > { %1802 = shalt.err (!%p1799_p5)
}
  0x1d   : > { %s1803_s6 = scalar_lea.vmem %s132_s22, 288  ;;  %p1811_p2 = scmp.lt.s32.totalorder %s132_s22, %s132_s22 }
  0x1e   : > { %p1804_p7 = scmp.ne.s32.totalorder %s132_s22, %s1803_s6  ;;  %p1812_p6 = scmp.lt.s32.totalorder %s1803_s6, %s1803_s6 }
  0x20   : > { %p1806_p9 = pnand %p1804_p7, %p1792_p12  ;;  %p1813_p4 = por %p1812_p6, %p1811_p2 }
  0x22   : > { %p1807_p1 = pneg %p1806_p9 }
  0x24   : > { %p1814_p8 = pnand %p1813_p4, %p1807_p1 }
  0x26   : > { %1817 = shalt.err (!%p1814_p8)
}
  0x27   : > { %s1950_s7 = smov 32   ;;  %s1951_s8 = smov 2  }
  0x28   : > { %1713 = dma.hbm_to_vmem [thread:$0]  (!%p2035_p10), %s2362_s1, 288, %s132_s22, [#allocation6], %s1950_s7, %s1950_s7, %s1951_s8  }
  0x29   : > { %s1818_s21 = scalar_lea.hbm %s2363_s2, 48 }
  0x2a   : > { %p1819_p11 = scmp.ne.s32.totalorder %s2363_s2, %s1818_s21  ;;  %p1825_p4 = scmp.lt.u32.totalorder %s1818_s21, %s2363_s2 }
  0x2c   : > { %p1821_p1 = pnand %p1819_p11, %p1792_p12 }
  0x2e   : > { %p1822_p2 = pneg %p1821_p1 }
  0x30   : > { %p1827_p6 = pnand %p1825_p4, %p1822_p2 }
  0x32   : > { %1830 = shalt.err (!%p1827_p6)
}
  0x33   : > { %s1831_s22 = scalar_lea.vmem %s2039_s25, 48  ;;  %s1838_s29 = scalar_lea.vmem %s2039_s25, 64 }
  0x34   : > { %p1832_p8 = scmp.ne.s32.totalorder %s2039_s25, %s1831_s22  ;;  %p1839_p3 = scmp.lt.s32.totalorder %s2039_s25, %s2039_s25 }
  0x35   : > { %p1840_p5 = scmp.lt.s32.totalorder %s1838_s29, %s1831_s22 }
  0x36   : > { %p1834_p13 = pnand %p1832_p8, %p1792_p12 }
  0x37   : > { %p1841_p7 = por %p1840_p5, %p1839_p3 }
  0x38   : > { %p1835_p0 = pneg %p1834_p13 }
  0x3a   : > { %p1842_p9 = pnand %p1841_p7, %p1835_p0 }
  0x3c   : > { %1845 = shalt.err (!%p1842_p9)
}
  0x3d   : > { %1716 = dma.hbm_to_vmem [thread:$0]  (!%p2035_p10), %s2363_s2, 48, %s2039_s25, [#allocation6]  }
  0x3e   : > { %s2090_s5 = sadd.s32 1, %s1946_s15   ;;  %s27_s23 = sadd.s32 1, %s1942_s14 }
  0x3f   : > { %s24_s6 = ssub.s32 %s1946_s15, %s2090_s5  ;;  %p34_p12 = scmp.ne.s32.totalorder %s1942_s14, %s1938_s13 }
  0x40   : > { %p25_p11 = scmp.eq.s32.totalorder %s24_s6, 0  ;;  %p35_p1 = scmp.eq.s32.totalorder %s1946_s15, 0 }
  0x41   : > { %p2372_p2 = scmp.eq.s32.totalorder %s2008_s16, 7  ;;  %p1727_p6 = scmp.lt.s32.totalorder %s1946_s15, 8 }
  0x42   : > { %s2106_s8 = scalar_select %p25_p11, %s1942_s14, %s27_s23  }
  0x43   : > { %p2100_p4 = por %p2372_p2, %p34_p12  ;;  %p36_p8 = por %p35_p1, %p34_p12 }
  0x44   : > { %s156_s9 = sand.u32 1, %s1942_s14   ;;  %s1695_s25 = smul.u32 96, %s1946_s15 }
  0x45   : > { %s1694_s10 = smul.u32 6, %s156_s9  ;;  %p2110_p10 = pnand %p1727_p6, %p36_p8 }
  0x46   : > { %s2117_s24 = scalar_lea.hbm %s2361_s0, %s1695_s25  ;;  %s157_s28 = scalar_lea.sflag [#allocation3], %s156_s9 }
  0x47   : > { %s160_s26 = scalar_lea.vmem [#allocation2], %s1694_s10  ;;  %s1846_s22 = scalar_lea.hbm %s2117_s24, 96 }
  0x48   : > { %s168_s27 = sshll.u32 %s160_s26, 4  ;;  %p1847_p13 = scmp.ne.s32.totalorder %s2117_s24, %s1846_s22  ;;  %s2119_s27 = int_to_ptr.vmem [resolvable:$true] %s168_s27 }
  0x49   : > { %p1848_p0 = pneg %p2110_p10  ;;  %s1851_s4 = scalar_lea.hbm %s2361_s0, 768 }
  0x4a   : > { %p1852_p7 = scmp.lt.u32.totalorder %s2117_s24, %s2361_s0  ;;  %p1853_p9 = scmp.lt.u32.totalorder %s1851_s4, %s1846_s22 }
  0x4b   : > { %p1849_p3 = pnand %p1848_p0, %p1847_p13  ;;  %p1855_p11 = scmp.lt.u32.totalorder %s1846_s22, %s2117_s24 }
  0x4c   : > { %p1854_p12 = por %p1853_p9, %p1852_p7 }
  0x4d   : > { %p1850_p5 = pneg %p1849_p3 }
  0x4e   : > { %p1856_p1 = por %p1855_p11, %p1854_p12 }
  0x50   : > { %p1857_p2 = pnand %p1856_p1, %p1850_p5 }
  0x52   : > { %1860 = shalt.err (!%p1857_p2)
}
  0x53   : > { %s1861_s9 = scalar_lea.vmem %s2119_s27, 96  ;;  %s1952_s10 = smov [#allocation2]  }
  0x54   : > { %p1862_p6 = scmp.ne.s32.totalorder %s2119_s27, %s1861_s9  ;;  %s1866_s25 = sshll.u32 %s1952_s10, 4  ;;  %s1867_s25 = int_to_ptr.vmem [resolvable:$false] %s1866_s25 }
  0x55   : > { %s1868_s17 = scalar_lea.vmem %s1867_s25, 192  ;;  %p1869_p3 = scmp.lt.s32.totalorder %s2119_s27, %s1867_s25 }
  0x56   : > { %p1864_p8 = pnand %p1862_p6, %p1848_p0  ;;  %p1870_p7 = scmp.lt.s32.totalorder %s1868_s17, %s1861_s9 }
  0x58   : > { %p1865_p13 = pneg %p1864_p8  ;;  %p1871_p9 = por %p1870_p7, %p1869_p3 }
  0x5a   : > { %p1872_p12 = pnand %p1871_p9, %p1865_p13 }
  0x5c   : > { %1875 = shalt.err (!%p1872_p12)
}
  0x5d   : > { %1720 = dma.hbm_to_vmem [thread:$0]  (!%p2110_p10), %s2117_s24, 96, %s2119_s27, %s157_s28  }
  0x5e   : > { %p2375_p5 = scmp.ne.s32.totalorder %s2370_s20, 0 }
  0x5f   : > { %s2149_s21 = sand.u32 (!%p2375_p5), 1, %s1938_s13   ;;  %p2376_p0 = scmp.ne.s32.totalorder (!%p2375_p5), %s2368_s18, 0 }
  0x60   : > { %177 = sbr.rel (%p2375_p5) target bundleno = 865 (0x361), region = 32  ;;  %s180_s22 = scalar_lea.sflag (!%p2375_p5), [#allocation3], %s2149_s21 }
  0x61   : > { %s1696_s26 = smul.u32 (!%p2375_p5), 6, %s2149_s21 }
  0x63   : > { %s2155_s29 = scalar_lea.vmem (!%p2375_p5), [#allocation2], %s1696_s26 }
  0x67   : > { %1921 = dma.done.wait (%p2376_p0), %s180_s22, 96  }
  0x68   : > { %1923 = vsyncadd (%p2376_p0), %s180_s22, 4294967200  ;;  %p2377_p10 = scmp.eq.s32.totalorder %s2008_s16, 0 }
  0x6a   : > { %1925 = dma.done.wait (%p2377_p10), [#allocation6], 336   ;;  %p2378_p11 = pmov %p2377_p10 }
  0x6b   : > { %v224_v0 = vlaneseq  ;;  %v1953_v1 = vmov 1983009808   ;;  %v1954_v4 = vmov 0.0   ;;  %vm1955_vm0 = vmmov 0   ;;  %v216_v8 = vld [vmem:[%s2155_s29] sm:$0x3f] }
  0x6c   : > { %1927 = vsyncadd (%p2378_p11), [#allocation6], 4294966960  ;;  %v222_v2 = vunpack.c.l.s4 %v1953_v1  ;;  %1576 = vmatprep.subr.bf16.mxu1 %v1954_v4  ;;  %1578 = vmatprep.mubr.msk.bf16.mxu1 %vm1955_vm0, %v1954_v4  ;;  %v1956_v6 = vmov 0   ;;  %v220_v10 = vcombine.high %v216_v8, %v216_v8  ;;  %v435_v11 = vld [vmem:[%s2155_s29] sm:$0x3f]  ;;  %s1957_s18 = smov 127  }
  0x6d   : > { %v2165_v3 = vshrl.u32 %v224_v0, 7  ;;  %291 = vmatprep.mubr.bf16.mxu0 %v1956_v6  ;;  %v437_v15 = vcombine.high %v435_v11, %v435_v11  ;;  %v560_v17 = vld [vmem:[%s2155_s29] sm:$0x3f]  ;;  %s1958_s20 = smov 126   ;;  %s1959_s11 = smov 110   ;;  %vm249_vm1 = vcmask 1041408  }
  0x6e   : > { %v223_v5 = vunpack.c.0.s8 %v222_v2  ;;  %v562_v20 = vcombine.high %v560_v17, %v560_v17  ;;  %v685_v22 = vld [vmem:[%s2155_s29] sm:$0x3f]  ;;  %s1960_s24 = smov 109   ;;  %s1961_s27 = smov 108   ;;  %vm242_vm2 = vcmask 1039360   ;;  %vm245_vm3 = vcmask 31744  }
  0x6f   : > { %v687_v25 = vcombine.high %v685_v22, %v685_v22  ;;  %v810_v27 = vld [vmem:[%s2155_s29] sm:$0x3f]  ;;  %s1962_s28 = smov 92   ;;  %s1963_s30 = smov 91   ;;  %v218_v52 = vld [vmem:[#allocation5 + $0x2] sm:$0x3] }
  0x70   : > { %v2172_v7 = vsub.s32 %v223_v5, %v2165_v3  ;;  %v812_v30 = vcombine.high %v810_v27, %v810_v27  ;;  %v935_v32 = vld [vmem:[%s2155_s29] sm:$0x3f]  ;;  %s1964_s4 = smov 90   ;;  %vm459_vm4 = vcmask 1031168   ;;  %v215_v63 = vld [vmem:[#allocation5] sm:$0x3] }
  0x71   : > { %v937_v35 = vcombine.high %v935_v32, %v935_v32  ;;  %v1060_v37 = vld [vmem:[%s2155_s29] sm:$0x3f]  ;;  %vm584_vm5 = vcmask 900096   ;;  %vm709_vm6 = vcmask 891904   ;;  %vm834_vm7 = vcmask 883712   ;;  %s213_s23 = scalar_lea.vmem [#allocation8], %s1696_s26 }
  0x72   : > { %v2176_v9 = vrot.slane %v216_v8, %v2172_v7  ;;  %v2181_v12 = vrot.slane %v220_v10, %v2172_v7  ;;  %v444_v14 = vrot.slane %v435_v11, %v2172_v7  ;;  %v451_v18 = vrot.slane %v437_v15, %v2172_v7  ;;  %v1185_v42 = vld [vmem:[%s2155_s29] sm:$0x3f]  ;;  %v434_v11 = vld [vmem:[#allocation5 + $0x4] sm:$0x3]  ;;  %s1965_s6 = smov 19   ;;  %s1697_s9 = smul.u32 96, %s2008_s16 }
  0x73   : > { %v569_v19 = vrot.slane %v560_v17, %v2172_v7  ;;  %v576_v23 = vrot.slane %v562_v20, %v2172_v7  ;;  %v694_v24 = vrot.slane %v685_v22, %v2172_v7  ;;  %v701_v28 = vrot.slane %v687_v25, %v2172_v7  ;;  %s1429_s10 = sshll.u32 %s213_s23, 4  ;;  %s1415_s22 = scalar_lea.sflag [#allocation4], %s2149_s21  ;;  %s2320_s10 = int_to_ptr.vmem [resolvable:$true] %s1429_s10 }
  0x74   : > { %236 = vrot.lane.b32.xlu0 %v2176_v9, %s1957_s18  ;;  %v2185_v13 = vcombine.high %v2176_v9, %v2176_v9  ;;  %240 = vrot.lane.b32.xlu1 %v2181_v12, %s1957_s18  ;;  %v452_v16 = vcombine.high %v444_v14, %v444_v14  ;;  %v819_v29 = vrot.slane %v810_v27, %v2172_v7  ;;  %v350_v55 = vsel %vm249_vm1, %v2181_v12, 0  ;;  %v684_v27 = vld [vmem:[#allocation5 + $0x8] sm:$0x3]  ;;  %s2318_s26 = scalar_lea.hbm %s2364_s3, %s1697_s9  ;;  %s1876_s29 = scalar_lea.vmem %s2320_s10, 96 }
  0x75   : > { %v577_v21 = vcombine.high %v569_v19, %v569_v19  ;;  %v702_v26 = vcombine.high %v694_v24, %v694_v24  ;;  %v826_v33 = vrot.slane %v812_v30, %v2172_v7  ;;  %v944_v34 = vrot.slane %v935_v32, %v2172_v7  ;;  %p1877_p1 = scmp.ne.s32.totalorder %s2320_s10, %s1876_s29  ;;  %s1966_s16 = smov [#allocation8]  }
  0x76   : > { %v827_v31 = vcombine.high %v819_v29, %v819_v29  ;;  %v951_v38 = vrot.slane %v937_v35, %v2172_v7  ;;  %v1069_v39 = vrot.slane %v1060_v37, %v2172_v7  ;;  %v1062_v40 = vcombine.high %v1060_v37, %v1060_v37  ;;  %v809_v35 = vld [vmem:[#allocation5 + $0xa] sm:$0x3] }
  0x77   : > { %v952_v36 = vcombine.high %v944_v34, %v944_v34  ;;  %v1194_v44 = vrot.slane %v1185_v42, %v2172_v7  ;;  %v1187_v45 = vcombine.high %v1185_v42, %v1185_v42  ;;  %v344_v58 = vsel %vm249_vm1, %v2176_v9, 0  ;;  %p1878_p2 = pnand %p1877_p1, %p2100_p4 }
  0x78   : > { %238 = vrot.lane.b32.xlu0 %v2185_v13, %s1957_s18  ;;  %453 = vrot.lane.b32.xlu1 %v444_v14, %s1958_s20  ;;  %v1077_v41 = vcombine.high %v1069_v39, %v1069_v39  ;;  %v1076_v43 = vrot.slane %v1062_v40, %v2172_v7  ;;  %vm959_vm8 = vcmask 752640   ;;  %vm1084_vm9 = vcmask 744448   ;;  %s1880_s18 = sshll.u32 %s1966_s16, 4  ;;  %s1881_s18 = int_to_ptr.vmem [resolvable:$false] %s1880_s18 }
  0x79   : > { %v1202_v46 = vcombine.high %v1194_v44, %v1194_v44  ;;  %v1201_v47 = vrot.slane %v1187_v45, %v2172_v7  ;;  %vm1209_vm10 = vcmask 736256   ;;  %vm1328_vm11 = vcmask 1043456   ;;  %p1879_p6 = pneg %p1878_p2  ;;  %p1883_p8 = scmp.lt.s32.totalorder %s2320_s10, %s1881_s18 }
  0x7a   : > { %vm1332_vm12 = vcmask 240640   ;;  %vm1376_vm13 = vcmask 1043458   ;;  %vm1378_vm15 = vcmask 553988  }
  0x7b   : > { %vm1377_vm14 = vmor %vm1376_vm13, %vm249_vm1 }
  0x7c   : > { %455 = vrot.lane.b32.xlu0 %v452_v16, %s1958_s20  ;;  %457 = vrot.lane.b32.xlu1 %v451_v18, %s1958_s20  ;;  %s1882_s20 = scalar_lea.vmem %s1881_s18, 192 }
  0x7d   : > { %p1884_p13 = scmp.lt.s32.totalorder %s1882_s20, %s1876_s29 }
  0x7f   : > { %p1885_p3 = por %p1884_p13, %p1883_p8 }
  0x80   : > { %578 = vrot.lane.b32.xlu0 %v569_v19, %s1959_s11  ;;  %580 = vrot.lane.b32.xlu1 %v577_v21, %s1959_s11  ;;  %v559_v19 = vld [vmem:[#allocation5 + $0x6] sm:$0x3] }
  0x81   : > { %p1886_p7 = pnand %p1885_p3, %p1879_p6 }
  0x84   : > { %582 = vrot.lane.b32.xlu0 %v576_v23, %s1959_s11  ;;  %703 = vrot.lane.b32.xlu1 %v694_v24, %s1960_s24 }
  0x88   : > { %705 = vrot.lane.b32.xlu0 %v702_v26, %s1960_s24  ;;  %707 = vrot.lane.b32.xlu1 %v701_v28, %s1960_s24 }
  0x8c   : > { %828 = vrot.lane.b32.xlu0 %v819_v29, %s1961_s27  ;;  %830 = vrot.lane.b32.xlu1 %v827_v31, %s1961_s27 }
  0x90   : > { %832 = vrot.lane.b32.xlu0 %v826_v33, %s1961_s27  ;;  %953 = vrot.lane.b32.xlu1 %v944_v34, %s1962_s28 }
  0x94   : > { %955 = vrot.lane.b32.xlu0 %v952_v36, %s1962_s28  ;;  %957 = vrot.lane.b32.xlu1 %v951_v38, %s1962_s28 }
  0x98   : > { %1078 = vrot.lane.b32.xlu0 %v1069_v39, %s1963_s30  ;;  %1080 = vrot.lane.b32.xlu1 %v1077_v41, %s1963_s30 }
  0x9c   : > { %1082 = vrot.lane.b32.xlu0 %v1076_v43, %s1963_s30  ;;  %1203 = vrot.lane.b32.xlu1 %v1194_v44, %s1964_s4  ;;  %v934_v43 = vld [vmem:[#allocation5 + $0xc] sm:$0x3] }
  0xa0   : > { %1205 = vrot.lane.b32.xlu0 %v1202_v46, %s1964_s4  ;;  %1207 = vrot.lane.b32.xlu1 %v1201_v47, %s1964_s4 }
  0xe6   : > { %v237_v48 = vpop.permute.xlu0 %236  ;;  %v241_v49 = vpop.permute.xlu1 %240 }
  0xe7   : > { %v257_v50 = vsel %vm249_vm1, %v241_v49, 0 }
  0xe8   : > { %1577 = vmatpush3.bf16.msra.mxu1 %v257_v50  ;;  %v1059_v50 = vld [vmem:[#allocation5 + $0xe] sm:$0x3] }
  0xe9   : > { %1582 = vmatprep.subr.bf16.mxu1 %v1954_v4 }
  0xea   : > { %v239_v51 = vpop.permute.xlu0 %238  ;;  %v454_v57 = vpop.permute.xlu1 %453 }
  0xeb   : > { %v244_v53 = vsel %vm242_vm2, %v239_v51, %v241_v49  ;;  %v243_v54 = vsel %vm242_vm2, %v237_v48, %v239_v51  ;;  %1579 = vmatmul.mubr.msk.bf16.vlgmr.msra.gmra.mrb[0].mxu1 %vm245_vm3, %v218_v52 }
  0xec   : > { %1527 = vmatprep.subr.msk.bf16.mxu0 %vm249_vm1, %v244_v53  ;;  %v251_v56 = vsel %vm249_vm1, %v243_v54, 0  ;;  %1583 = vmatpush3.bf16.msra.mxu1 %v350_v55  ;;  %v1184_v54 = vld [vmem:[#allocation5 + $0x10] sm:$0x3]  ;;  %v1312_v55 = vsub.s32 0, %v2165_v3 }
  0xed   : > { %260 = vmatpush1.bf16.msra.mxu0 %v251_v56  ;;  %1584 = vmatprep.mubr.msk.bf16.mxu1 %vm1955_vm0, %v1954_v4  ;;  %v1320_v56 = vsub.s32 2, %v2165_v3 }
  0xee   : > { %1530 = vmatprep.subr.msk.bf16.mxu0 %vm249_vm1, %v2185_v13  ;;  %v456_v59 = vpop.permute.xlu0 %455  ;;  %1588 = vmatprep.subr.bf16.mxu1 %v1954_v4  ;;  %v458_v60 = vpop.permute.xlu1 %457 }
  0xef   : > { %v461_v61 = vsel %vm459_vm4, %v456_v59, %v458_v60  ;;  %v460_v0 = vsel %vm459_vm4, %v454_v57, %v456_v59  ;;  %v472_v1 = vsel %vm249_vm1, %v458_v60, 0  ;;  %v1316_v57 = vsub.s32 1, %v2165_v3  ;;  %vm1379_vm4 = vmor %vm1378_vm15, %vm1377_vm14 }
  0xf0   : > { %1528 = vmatmul.mubr.msk.bf16.vlgmr.msra.gmra.mrb[0].mxu0 %vm245_vm3, %v218_v52  ;;  %v466_v8 = vsel %vm249_vm1, %v460_v0, 0  ;;  %1380 = vst.msk [vmem:[%s213_s23] sm:$0x3f] %vm1379_vm4, %v1956_v6 }
  0xf1   : > { %353 = vmatpush1.bf16.msra.mxu0 %v344_v58  ;;  %384 = vmatprep.mubr.bf16.mxu0 %v1956_v6  ;;  %v1308_v58 = vld [vmem:[#allocation7] sm:$0x7] }
  0xf2   : > { %1533 = vmatprep.subr.msk.bf16.mxu0 %vm249_vm1, %v461_v61  ;;  %v579_v62 = vpop.permute.xlu0 %578  ;;  %v581_v2 = vpop.permute.xlu1 %580  ;;  %v2292_v60 = vrot.slane %v1308_v58, %v1312_v55 }
  0xf3   : > { %v585_v12 = vsel %vm584_vm5, %v579_v62, %v581_v2  ;;  %v1317_v62 = vrot.slane %v1308_v58, %v1316_v57 }
  0xf4   : > { %v591_v16 = vsel %vm249_vm1, %v585_v12, 0 }
  0xf6   : > { %v583_v5 = vpop.permute.xlu0 %582  ;;  %v704_v10 = vpop.permute.xlu1 %703 }
  0xf7   : > { %1585 = vmatmul.mubr.msk.bf16.vlgmr.msra.gmra.mrb[0].mxu1 %vm245_vm3, %v215_v63  ;;  %v586_v9 = vsel %vm584_vm5, %v581_v2, %v583_v5  ;;  %v597_v13 = vsel %vm249_vm1, %v583_v5, 0 }
  0xf8   : > { %1589 = vmatpush3.bf16.msra.mxu1 %v472_v1  ;;  %1590 = vmatprep.mubr.msk.bf16.mxu1 %vm1955_vm0, %v1954_v4 }
  0xf9   : > { %1594 = vmatprep.subr.bf16.mxu1 %v1954_v4 }
  0xfa   : > { %v706_v14 = vpop.permute.xlu0 %705  ;;  %v708_v15 = vpop.permute.xlu1 %707 }
  0xfb   : > { %v711_v17 = vsel %vm709_vm6, %v706_v14, %v708_v15  ;;  %v710_v20 = vsel %vm709_vm6, %v704_v10, %v706_v14  ;;  %v722_v21 = vsel %vm249_vm1, %v708_v15, 0  ;;  %vm1411_vm6 = vcmask 398340  }
  0xfc   : > { %1531 = vmatmul.mubr.msk.bf16.vlgmr.msra.gmra.mrb[0].mxu0 %vm245_vm3, %v215_v63  ;;  %v716_v24 = vsel %vm249_vm1, %v710_v20, 0 }
  0xfd   : > { %475 = vmatpush1.bf16.msra.mxu0 %v466_v8  ;;  %506 = vmatprep.mubr.bf16.mxu0 %v1956_v6 }
  0xfe   : > { %1536 = vmatprep.subr.msk.bf16.mxu0 %vm249_vm1, %v586_v9  ;;  %v829_v18 = vpop.permute.xlu0 %828  ;;  %v831_v22 = vpop.permute.xlu1 %830 }
  0xff   : > { %v835_v28 = vsel %vm834_vm7, %v829_v18, %v831_v22 }
 0x100   : > { %v841_v32 = vsel %vm249_vm1, %v835_v28, 0 }
 0x102   : > { %v833_v23 = vpop.permute.xlu0 %832  ;;  %v954_v26 = vpop.permute.xlu1 %953 }
 0x103   : > { %1591 = vmatmul.mubr.msk.bf16.vlgmr.msra.gmra.mrb[0].mxu1 %vm245_vm3, %v434_v11  ;;  %v836_v25 = vsel %vm834_vm7, %v831_v22, %v833_v23  ;;  %v847_v29 = vsel %vm249_vm1, %v833_v23, 0  ;;  %vm1406_vm7 = vcmask 154624  }
 0x104   : > { %1595 = vmatpush3.bf16.msra.mxu1 %v597_v13  ;;  %1596 = vmatprep.mubr.msk.bf16.mxu1 %vm1955_vm0, %v1954_v4 }
 0x105   : > { %1600 = vmatprep.subr.bf16.mxu1 %v1954_v4 }
 0x106   : > { %v956_v30 = vpop.permute.xlu0 %955  ;;  %v958_v31 = vpop.permute.xlu1 %957 }
 0x107   : > { %v961_v33 = vsel %vm959_vm8, %v956_v30, %v958_v31  ;;  %v960_v36 = vsel %vm959_vm8, %v954_v26, %v956_v30  ;;  %v972_v37 = vsel %vm249_vm1, %v958_v31, 0 }
 0x108   : > { %1534 = vmatmul.mubr.msk.bf16.vlgmr.msra.gmra.mrb[0].mxu0 %vm245_vm3, %v434_v11  ;;  %v966_v40 = vsel %vm249_vm1, %v960_v36, 0 }
 0x109   : > { %600 = vmatpush1.bf16.msra.mxu0 %v591_v16  ;;  %631 = vmatprep.mubr.bf16.mxu0 %v1956_v6 }
 0x10a   : > { %1539 = vmatprep.subr.msk.bf16.mxu0 %vm249_vm1, %v711_v17  ;;  %v1079_v34 = vpop.permute.xlu0 %1078  ;;  %v1081_v38 = vpop.permute.xlu1 %1080 }
 0x10b   : > { %v1085_v44 = vsel %vm1084_vm9, %v1079_v34, %v1081_v38 }
 0x10c   : > { %v1091_v48 = vsel %vm249_vm1, %v1085_v44, 0 }
 0x10e   : > { %v1083_v39 = vpop.permute.xlu0 %1082  ;;  %v1204_v42 = vpop.permute.xlu1 %1203 }
 0x10f   : > { %1597 = vmatmul.mubr.msk.bf16.vlgmr.msra.gmra.mrb[0].mxu1 %vm245_vm3, %v559_v19  ;;  %v1086_v41 = vsel %vm1084_vm9, %v1081_v38, %v1083_v39  ;;  %v1097_v45 = vsel %vm249_vm1, %v1083_v39, 0 }
 0x110   : > { %1601 = vmatpush3.bf16.msra.mxu1 %v722_v21  ;;  %1602 = vmatprep.mubr.msk.bf16.mxu1 %vm1955_vm0, %v1954_v4 }
 0x111   : > { %1606 = vmatprep.subr.bf16.mxu1 %v1954_v4 }
 0x112   : > { %v1206_v46 = vpop.permute.xlu0 %1205  ;;  %v1208_v47 = vpop.permute.xlu1 %1207 }
 0x113   : > { %v1211_v49 = vsel %vm1209_vm10, %v1206_v46, %v1208_v47  ;;  %v1210_v51 = vsel %vm1209_vm10, %v1204_v42, %v1206_v46  ;;  %v1222_v52 = vsel %vm249_vm1, %v1208_v47, 0 }
 0x114   : > { %1537 = vmatmul.mubr.msk.bf16.vlgmr.msra.gmra.mrb[0].mxu0 %vm245_vm3, %v559_v19  ;;  %v1216_v53 = vsel %vm249_vm1, %v1210_v51, 0 }
 0x115   : > { %725 = vmatpush1.bf16.msra.mxu0 %v716_v24  ;;  %756 = vmatprep.mubr.bf16.mxu0 %v1956_v6 }
 0x116   : > { %1542 = vmatprep.subr.msk.bf16.mxu0 %vm249_vm1, %v836_v25 }
 0x11b   : > { %1603 = vmatmul.mubr.msk.bf16.vlgmr.msra.gmra.mrb[0].mxu1 %vm245_vm3, %v684_v27 }
 0x11c   : > { %1607 = vmatpush3.bf16.msra.mxu1 %v847_v29  ;;  %1608 = vmatprep.mubr.msk.bf16.mxu1 %vm1955_vm0, %v1954_v4 }
 0x11d   : > { %1612 = vmatprep.subr.bf16.mxu1 %v1954_v4 }
 0x120   : > { %1540 = vmatmul.mubr.msk.bf16.vlgmr.msra.gmra.mrb[0].mxu0 %vm245_vm3, %v684_v27 }
 0x121   : > { %850 = vmatpush1.bf16.msra.mxu0 %v841_v32  ;;  %881 = vmatprep.mubr.bf16.mxu0 %v1956_v6 }
 0x122   : > { %1545 = vmatprep.subr.msk.bf16.mxu0 %vm249_vm1, %v961_v33 }
 0x127   : > { %1609 = vmatmul.mubr.msk.bf16.vlgmr.msra.gmra.mrb[0].mxu1 %vm245_vm3, %v809_v35 }
 0x128   : > { %1613 = vmatpush3.bf16.msra.mxu1 %v972_v37  ;;  %1614 = vmatprep.mubr.msk.bf16.mxu1 %vm1955_vm0, %v1954_v4 }
 0x129   : > { %1618 = vmatprep.subr.bf16.mxu1 %v1954_v4 }
 0x12c   : > { %1543 = vmatmul.mubr.msk.bf16.vlgmr.msra.gmra.mrb[0].mxu0 %vm245_vm3, %v809_v35 }
 0x12d   : > { %975 = vmatpush1.bf16.msra.mxu0 %v966_v40  ;;  %1006 = vmatprep.mubr.bf16.mxu0 %v1956_v6 }
 0x12e   : > { %1548 = vmatprep.subr.msk.bf16.mxu0 %vm249_vm1, %v1086_v41 }
 0x133   : > { %1615 = vmatmul.mubr.msk.bf16.vlgmr.msra.gmra.mrb[0].mxu1 %vm245_vm3, %v934_v43 }
 0x134   : > { %1619 = vmatpush3.bf16.msra.mxu1 %v1097_v45  ;;  %1620 = vmatprep.mubr.msk.bf16.mxu1 %vm1955_vm0, %v1954_v4 }
 0x135   : > { %1624 = vmatprep.subr.bf16.mxu1 %v1954_v4 }
 0x138   : > { %1546 = vmatmul.mubr.msk.bf16.vlgmr.msra.gmra.mrb[0].mxu0 %vm245_vm3, %v934_v43 }
 0x139   : > { %1100 = vmatpush1.bf16.msra.mxu0 %v1091_v48  ;;  %1131 = vmatprep.mubr.bf16.mxu0 %v1956_v6 }
 0x13a   : > { %1551 = vmatprep.subr.msk.bf16.mxu0 %vm249_vm1, %v1211_v49  ;;  %vm1409_vm1 = vcmask 1041560  }
 0x13b   : > { %vm1410_vm5 = vmor %vm1376_vm13, %vm1409_vm1 }
 0x13c   : > { %vm1412_vm8 = vmor %vm1411_vm6, %vm1410_vm5 }
 0x13f   : > { %1621 = vmatmul.mubr.msk.bf16.vlgmr.msra.gmra.mrb[0].mxu1 %vm245_vm3, %v1059_v50 }
 0x140   : > { %1625 = vmatpush3.bf16.msra.mxu1 %v1222_v52  ;;  %1626 = vmatprep.mubr.msk.bf16.mxu1 %vm1955_vm0, %v1954_v4  ;;  %v2294_v4 = vrot.slane %v1308_v58, %v1320_v56 }
 0x144   : > { %1549 = vmatmul.mubr.msk.bf16.vlgmr.msra.gmra.mrb[0].mxu0 %vm245_vm3, %v1059_v50 }
 0x145   : > { %1225 = vmatpush1.bf16.msra.mxu0 %v1216_v53  ;;  %1256 = vmatprep.mubr.bf16.mxu0 %v1956_v6 }
 0x14b   : > { %1627 = vmatmul.mubr.msk.bf16.vlgmr.msra.gmra.mrb[0].mxu1 %vm245_vm3, %v1184_v54 }
 0x150   : > { %1552 = vmatmul.mubr.msk.bf16.vlgmr.msra.gmra.mrb[0].mxu0 %vm245_vm3, %v1184_v54 }
 0x21e   : > { %v1299_v59 = vpop.f32.mrb[0].mxu1 }
 0x21f   : > { %v1628_v61 = vpop.f32.mrb[1].mxu1  ;;  %v1339_v0 = vmul.f32 %v1299_v59, %v1299_v59  ;;  %v1327_v10 = vmul.f32 %v2294_v4, %v1299_v59 }
 0x220   : > { %v1302_v63 = vpop.f32.mrb[2].mxu1 }
 0x221   : > { %v1629_v2 = vpop.f32.mrb[3].mxu1  ;;  %v1342_v18 = vmul.f32 %v1339_v0, %v2294_v4  ;;  %v1333_v21 = vsel %vm1332_vm12, %v1327_v10, 0.0 }
 0x223   : > { %v1258_v1 = vpop.f32.mrb[0].mxu0  ;;  %v1346_v25 = vsel %vm1332_vm12, %v1342_v18, 0.0 }
 0x224   : > { %v1325_v5 = vmul.f32 %v2292_v60, %v1258_v1  ;;  %v1337_v8 = vmul.f32 %v1258_v1, %v1258_v1  ;;  %v1260_v9 = vpop.f32.mrb[1].mxu0 }
 0x225   : > { %v1326_v3 = vmul.f32 %v1317_v62, %v1260_v9  ;;  %v1338_v11 = vmul.f32 %v1260_v9, %v1260_v9  ;;  %v1262_v12 = vpop.f32.mrb[2].mxu0 }
 0x226   : > { %v1340_v13 = vmul.f32 %v1337_v8, %v2292_v60  ;;  %v1263_v14 = vpop.f32.mrb[3].mxu0  ;;  %v1329_v15 = vsel %vm1328_vm11, %v1325_v5, 0.0 }
 0x227   : > { %v1341_v16 = vmul.f32 %v1338_v11, %v1317_v62  ;;  %v1330_v17 = vsel %vm1328_vm11, %v1326_v3, 0.0 }
 0x228   : > { %v1331_v19 = vadd.f32 %v1330_v17, %v1329_v15  ;;  %v1343_v20 = vsel %vm1328_vm11, %v1340_v13, 0.0 }
 0x229   : > { %v1344_v22 = vsel %vm1328_vm11, %v1341_v16, 0.0 }
 0x22a   : > { %v1334_v23 = vadd.f32 %v1333_v21, %v1331_v19  ;;  %v1345_v24 = vadd.f32 %v1344_v22, %v1343_v20 }
 0x22c   : > { %1335 = vadd.xlane.f32.xlu0 %v1334_v23  ;;  %v1347_v26 = vadd.f32 %v1346_v25, %v1345_v24 }
 0x22e   : > { %1348 = vadd.xlane.f32.xlu1 %v1347_v26 }
 0x2b9   : > { %v1336_v27 = vpop.xlane.xlu0 %1335 }
 0x2ba   : > { %v1351_v28 = vmul.f32 0.00390625, %v1336_v27 }
 0x2bb   : > { %v1349_v29 = vpop.xlane.xlu1 %1348 }
 0x2bc   : > { %v1352_v30 = vmul.f32 0.00390625, %v1349_v29  ;;  %v1353_v31 = vmul.f32 %v1351_v28, %v1351_v28  ;;  %v1356_v35 = vsub.f32 %v1258_v1, %v1351_v28  ;;  %v1357_v36 = vsub.f32 %v1260_v9, %v1351_v28 }
 0x2bd   : > { %v1358_v37 = vsub.f32 %v1299_v59, %v1351_v28 }
 0x2be   : > { %v1354_v32 = vsub.f32 %v1352_v30, %v1353_v31 }
 0x2c0   : > { %v1355_v33 = vmax.f32 %v1354_v32, 0.0 }
 0x2c2   : > { %v1359_v34 = vadd.f32 1e-05, %v1355_v33 }
 0x2c4   : > { %1788 = vrsqrt.f32 %v1359_v34 }
 0x2ce   : > { %v1789_v38 = vpop.eup %1788 }
 0x2cf   : > { %v1361_v39 = vmul.f32 %v1789_v38, %v1356_v35  ;;  %v1362_v40 = vmul.f32 %v1789_v38, %v1357_v36  ;;  %v1363_v41 = vmul.f32 %v1789_v38, %v1358_v37 }
 0x2d1   : > { %vm1364_vm0 = vcmp.ge.f32.partialorder %v1361_v39, 0.0  ;;  %vm1365_vm2 = vcmp.ge.f32.partialorder %v1362_v40, 0.0  ;;  %vm1366_vm3 = vcmp.ge.f32.partialorder %v1363_v41, 0.0  ;;  %v1367_v42 = vmul.f32 0.2, %v1361_v39 }
 0x2d2   : > { %v1368_v43 = vmul.f32 0.2, %v1362_v40  ;;  %v1369_v44 = vmul.f32 0.2, %v1363_v41 }
 0x2d3   : > { %v1370_v45 = vsel %vm1364_vm0, %v1361_v39, %v1367_v42 }
 0x2d4   : > { %v1371_v46 = vsel %vm1365_vm2, %v1362_v40, %v1368_v43  ;;  %v1372_v47 = vsel %vm1366_vm3, %v1363_v41, %v1369_v44  ;;  %v1373_v48 = vmul.f32 %v1370_v45, %v2292_v60 }
 0x2d5   : > { %v1374_v49 = vmul.f32 %v1371_v46, %v1317_v62  ;;  %v1375_v50 = vmul.f32 %v1372_v47, %v2294_v4 }
 0x2d7   : > { %v1383_v51 = vpack.c.bf16 %v1375_v50, %v1375_v50  ;;  %v1554_v52 = vpack.c.bf16 %v1374_v49, %v1373_v48 }
 0x2d9   : > { %v1394_v53 = vrot.slane %v1554_v52, %v2172_v7  ;;  %v1401_v54 = vrot.slane %v1383_v51, %v2172_v7 }
 0x2db   : > { %v1402_v55 = vcombine.low %v1394_v53, %v1401_v54 }
 0x2dd   : > { %1403 = vrot.lane.b32.xlu0 %v1402_v55, %s1965_s6 }
 0x34f   : > { %v1404_v6 = vpop.permute.xlu0 %1403 }
 0x350   : > { %v1405_v56 = vrot.slane %v1404_v6, 6 }
 0x352   : > { %v1407_v7 = vsel %vm1406_vm7, %v1405_v56, %v1404_v6 }
 0x353   : > { %1413 = vst.msk [vmem:[%s213_s23] sm:$0x3f] %vm1412_vm8, %v1407_v7 }
 0x354   : > { %1889 = shalt.err (!%p1886_p7)
}
 0x355   : > { %s1890_s21 = scalar_lea.hbm %s2318_s26, 96  ;;  %s1894_s27 = scalar_lea.hbm %s2364_s3, 768 }
 0x356   : > { %p1891_p9 = scmp.ne.s32.totalorder %s2318_s26, %s1890_s21  ;;  %p1895_p0 = scmp.lt.u32.totalorder %s2318_s26, %s2364_s3 }
 0x357   : > { %p1896_p10 = scmp.lt.u32.totalorder %s1894_s27, %s1890_s21  ;;  %p1898_p1 = scmp.lt.u32.totalorder %s1890_s21, %s2318_s26 }
 0x358   : > { %p1892_p12 = pnand %p1891_p9, %p2100_p4 }
 0x359   : > { %p1897_p11 = por %p1896_p10, %p1895_p0 }
 0x35a   : > { %p1893_p5 = pneg %p1892_p12 }
 0x35b   : > { %p1899_p2 = por %p1898_p1, %p1897_p11 }
 0x35d   : > { %p1900_p6 = pnand %p1899_p2, %p1893_p5 }
 0x35f   : > { %1903 = shalt.err (!%p1900_p6)
}
 0x360   : > { %1708 = dma.vmem_to_hbm [thread:$0]  (%p2100_p4), %s2320_s10, 96, %s2318_s26, %s1415_s22  }
 0x361 PF: > { %p1730_p8 = scmp.ge.s32.totalorder %s1946_s15, 2  ;;  %s1441_s4 = sand.u32 1, %s1934_s12  }
 0x362   : > { %p2379_p13 = scmp.ne.s32.totalorder %s2369_s19, 0  ;;  %s1442_s23 = scalar_lea.sflag [#allocation4], %s1441_s4 }
 0x364   : > { %p1722_p3 = pnand %p1730_p8, %p2379_p13 }
 0x366   : > { %1929 = dma.done.wait (!%p1722_p3), %s1442_s23, 96  }
 0x367   : > { %1931 = vsyncadd (!%p1722_p3), %s1442_s23, 4294967200  ;;  %p17_p7 = scmp.ge.s32.totalorder %s2090_s5, 10   ;;  %s2380_s12 = smov %s1938_s13 }
 0x368   : > { %s2381_s13 = smov %s1942_s14  ;;  %s2382_s14 = smov %s2106_s8 }
 0x369   : > { %s2383_s15 = smov %s2090_s5  ;;  %19 = sbr.rel (!%p17_p7) target bundleno = 6 (0x6), region = 93 }
 0x370   :  { %1447 = vsyncpa [#allocation3], 1 }
 0x371   :  { %1449 = vsyncpa [#allocation3 + $0x1], 1 }
 0x372   :  { %1450 = vsyncpa [#allocation6], 1 }
 0x373   :  { %1451 = vsyncpa [#allocation4], 1 }
 0x374   :  { %1453 = vsyncpa [#allocation4 + $0x1], 1 }

// kernel: sensitivity_model_forward.13
= control target key start
LH: loop header
LB: loop body
LE: loop exit
PB: predicated region body
PF: predicated region fallthrough
CT: control target
= control target key end

     0   :  { %8 = vsyncpa [#allocation3], 0  ;;  %s2379_s0 = inlined_call_operand.hbm [shape: bf16[8,2,324], index: 0, kind: input, shape index: {}]   ;;  %s2380_s1 = inlined_call_operand.hbm [shape: bf16[9,4,2], index: 1, kind: input, shape index: {}]   ;;  %s2381_s2 = inlined_call_operand.hbm [shape: f32[1,286], index: 2, kind: input, shape index: {}]   ;;  %s2382_s3 = inlined_call_operand.hbm [shape: bf16[8,4,324], index: 3, kind: output, shape index: {}]  }
   0x1   :  { %10 = vsyncpa [#allocation3 + $0x1], 0 }
   0x2   :  { %11 = vsyncpa [#allocation6], 0 }
   0x3   :  { %12 = vsyncpa [#allocation4], 0 }
   0x4   :  { %14 = vsyncpa [#allocation4 + $0x1], 0  ;;  %s2047_s12 = smov 0   ;;  %s2049_s13 = smov 0  }
   0x5   :  { %s2051_s14 = smov 0   ;;  %s2053_s15 = smov 0  }
   0x6 LB: > { %s2068_s16 = sadd.s32 4294967295, %s2005_s15   ;;  %s1575_s17 = sadd.s32 4294967294, %s2005_s15   ;;  %s2005_s15 = sphi %s2053_s15, %s2401_s15   ;;  %s2001_s14 = sphi %s2051_s14, %s2400_s14   ;;  %s1997_s13 = sphi %s2049_s13, %s2399_s13   ;;  %s1993_s12 = sphi %s2047_s12, %s2398_s12  }
   0x7   : > { %p40_p0 = scmp.ne.s32.totalorder %s1997_s13, %s1993_s12  ;;  %p2383_p1 = scmp.eq.s32.totalorder %s2068_s16, 0 }
   0x8   : > { %p112_p3 = scmp.eq.s32.totalorder %s1575_s17, 7  ;;  %p1576_p5 = scmp.ge.s32.totalorder %s2005_s15, 1 }
   0x9   : > { %p2077_p4 = por %p2383_p1, %p40_p0  ;;  %p119_p7 = scmp.lt.s32.totalorder %s2005_s15, 9 }
   0xa   : > { %p2082_p6 = por %p112_p3, %p40_p0  ;;  %s2007_s21 = smov [#allocation5]  }
   0xb   : > { %s2386_s18 = scalar_select %p2077_p4, 1, 0 }
   0xc   : > { %s2387_s19 = scalar_select %p2082_p6, 1, 0 }
   0xd   : > { %p2087_p8 = pnand %p1576_p5, %p119_p7  ;;  %s131_s22 = sshll.u32 %s2007_s21, 4  ;;  %s132_s22 = int_to_ptr.vmem [resolvable:$true] %s131_s22 }
   0xe   : > { %s2008_s24 = smov [#allocation7]   ;;  %s1849_s28 = scalar_lea.hbm %s2380_s1, 288 }
   0xf   : > { %s2388_s20 = scalar_select %p2087_p8, 1, 0 }
  0x10   : > { %p1776_p9 = pneg %p2087_p8  ;;  %s145_s25 = sshll.u32 %s2008_s24, 4  ;;  %s2099_s25 = int_to_ptr.vmem [resolvable:$true] %s145_s25 }
  0x11   : > { %p1850_p11 = scmp.ne.s32.totalorder %s2380_s1, %s1849_s28  ;;  %p1856_p3 = scmp.lt.u32.totalorder %s1849_s28, %s2380_s1 }
  0x12   : > { %p2095_p10 = pnand %p1776_p9, %p2383_p1 }
  0x14   : > { %p1851_p12 = pneg %p2095_p10 }
  0x16   : > { %p1852_p13 = pnand %p1851_p12, %p1850_p11 }
  0x18   : > { %p1853_p0 = pneg %p1852_p13 }
  0x1a   : > { %p1858_p5 = pnand %p1856_p3, %p1853_p0 }
  0x1c   : > { %1861 = shalt.err (!%p1858_p5)
}
  0x1d   : > { %s1862_s6 = scalar_lea.vmem %s132_s22, 288  ;;  %p1870_p2 = scmp.lt.s32.totalorder %s132_s22, %s132_s22 }
  0x1e   : > { %p1863_p7 = scmp.ne.s32.totalorder %s132_s22, %s1862_s6  ;;  %p1871_p6 = scmp.lt.s32.totalorder %s1862_s6, %s1862_s6 }
  0x20   : > { %p1865_p9 = pnand %p1863_p7, %p1851_p12  ;;  %p1872_p4 = por %p1871_p6, %p1870_p2 }
  0x22   : > { %p1866_p1 = pneg %p1865_p9 }
  0x24   : > { %p1873_p8 = pnand %p1872_p4, %p1866_p1 }
  0x26   : > { %1876 = shalt.err (!%p1873_p8)
}
  0x27   : > { %s2009_s7 = smov 32   ;;  %s2010_s8 = smov 2  }
  0x28   : > { %1779 = dma.hbm_to_vmem [thread:$0]  (!%p2095_p10), %s2380_s1, 288, %s132_s22, [#allocation6], %s2009_s7, %s2009_s7, %s2010_s8  }
  0x29   : > { %s1877_s21 = scalar_lea.hbm %s2381_s2, 48 }
  0x2a   : > { %p1878_p11 = scmp.ne.s32.totalorder %s2381_s2, %s1877_s21  ;;  %p1884_p4 = scmp.lt.u32.totalorder %s1877_s21, %s2381_s2 }
  0x2c   : > { %p1880_p1 = pnand %p1878_p11, %p1851_p12 }
  0x2e   : > { %p1881_p2 = pneg %p1880_p1 }
  0x30   : > { %p1886_p6 = pnand %p1884_p4, %p1881_p2 }
  0x32   : > { %1889 = shalt.err (!%p1886_p6)
}
  0x33   : > { %s1890_s22 = scalar_lea.vmem %s2099_s25, 48  ;;  %s1897_s29 = scalar_lea.vmem %s2099_s25, 64 }
  0x34   : > { %p1891_p8 = scmp.ne.s32.totalorder %s2099_s25, %s1890_s22  ;;  %p1898_p3 = scmp.lt.s32.totalorder %s2099_s25, %s2099_s25 }
  0x35   : > { %p1899_p5 = scmp.lt.s32.totalorder %s1897_s29, %s1890_s22 }
  0x36   : > { %p1893_p13 = pnand %p1891_p8, %p1851_p12 }
  0x37   : > { %p1900_p7 = por %p1899_p5, %p1898_p3 }
  0x38   : > { %p1894_p0 = pneg %p1893_p13 }
  0x3a   : > { %p1901_p9 = pnand %p1900_p7, %p1894_p0 }
  0x3c   : > { %1904 = shalt.err (!%p1901_p9)
}
  0x3d   : > { %1782 = dma.hbm_to_vmem [thread:$0]  (!%p2095_p10), %s2381_s2, 48, %s2099_s25, [#allocation6]  }
  0x3e   : > { %s2150_s5 = sadd.s32 1, %s2005_s15   ;;  %s27_s23 = sadd.s32 1, %s2001_s14 }
  0x3f   : > { %s24_s6 = ssub.s32 %s2005_s15, %s2150_s5  ;;  %p34_p12 = scmp.ne.s32.totalorder %s2001_s14, %s1997_s13 }
  0x40   : > { %p25_p11 = scmp.eq.s32.totalorder %s24_s6, 0  ;;  %p35_p1 = scmp.eq.s32.totalorder %s2005_s15, 0 }
  0x41   : > { %p2390_p2 = scmp.eq.s32.totalorder %s2068_s16, 7  ;;  %p1793_p6 = scmp.lt.s32.totalorder %s2005_s15, 8 }
  0x42   : > { %s2166_s8 = scalar_select %p25_p11, %s2001_s14, %s27_s23  }
  0x43   : > { %p2160_p4 = por %p2390_p2, %p34_p12  ;;  %p36_p8 = por %p35_p1, %p34_p12 }
  0x44   : > { %s156_s9 = sand.u32 1, %s2001_s14   ;;  %s1760_s25 = smul.u32 48, %s2005_s15 }
  0x45   : > { %s1759_s10 = smul.u32 3, %s156_s9  ;;  %p2170_p10 = pnand %p1793_p6, %p36_p8 }
  0x46   : > { %s2177_s24 = scalar_lea.hbm %s2379_s0, %s1760_s25  ;;  %s157_s28 = scalar_lea.sflag [#allocation3], %s156_s9 }
  0x47   : > { %s160_s26 = scalar_lea.vmem [#allocation2], %s1759_s10  ;;  %s1905_s22 = scalar_lea.hbm %s2177_s24, 48 }
  0x48   : > { %s168_s27 = sshll.u32 %s160_s26, 4  ;;  %p1906_p13 = scmp.ne.s32.totalorder %s2177_s24, %s1905_s22  ;;  %s2179_s27 = int_to_ptr.vmem [resolvable:$true] %s168_s27 }
  0x49   : > { %p1907_p0 = pneg %p2170_p10  ;;  %s1910_s4 = scalar_lea.hbm %s2379_s0, 384 }
  0x4a   : > { %p1911_p7 = scmp.lt.u32.totalorder %s2177_s24, %s2379_s0  ;;  %p1912_p9 = scmp.lt.u32.totalorder %s1910_s4, %s1905_s22 }
  0x4b   : > { %p1908_p3 = pnand %p1907_p0, %p1906_p13  ;;  %p1914_p11 = scmp.lt.u32.totalorder %s1905_s22, %s2177_s24 }
  0x4c   : > { %p1913_p12 = por %p1912_p9, %p1911_p7 }
  0x4d   : > { %p1909_p5 = pneg %p1908_p3 }
  0x4e   : > { %p1915_p1 = por %p1914_p11, %p1913_p12 }
  0x50   : > { %p1916_p2 = pnand %p1915_p1, %p1909_p5 }
  0x52   : > { %1919 = shalt.err (!%p1916_p2)
}
  0x53   : > { %s1920_s9 = scalar_lea.vmem %s2179_s27, 48  ;;  %s2011_s10 = smov [#allocation2]  }
  0x54   : > { %p1921_p6 = scmp.ne.s32.totalorder %s2179_s27, %s1920_s9  ;;  %s1925_s25 = sshll.u32 %s2011_s10, 4  ;;  %s1926_s25 = int_to_ptr.vmem [resolvable:$false] %s1925_s25 }
  0x55   : > { %s1927_s17 = scalar_lea.vmem %s1926_s25, 96  ;;  %p1928_p3 = scmp.lt.s32.totalorder %s2179_s27, %s1926_s25 }
  0x56   : > { %p1923_p8 = pnand %p1921_p6, %p1907_p0  ;;  %p1929_p7 = scmp.lt.s32.totalorder %s1927_s17, %s1920_s9 }
  0x58   : > { %p1924_p13 = pneg %p1923_p8  ;;  %p1930_p9 = por %p1929_p7, %p1928_p3 }
  0x5a   : > { %p1931_p12 = pnand %p1930_p9, %p1924_p13 }
  0x5c   : > { %1934 = shalt.err (!%p1931_p12)
}
  0x5d   : > { %1786 = dma.hbm_to_vmem [thread:$0]  (!%p2170_p10), %s2177_s24, 48, %s2179_s27, %s157_s28  }
  0x5e   : > { %p2393_p5 = scmp.ne.s32.totalorder %s2388_s20, 0 }
  0x5f   : > { %s2209_s21 = sand.u32 (!%p2393_p5), 1, %s1997_s13   ;;  %p2394_p0 = scmp.ne.s32.totalorder (!%p2393_p5), %s2386_s18, 0 }
  0x60   : > { %177 = sbr.rel (%p2393_p5) target bundleno = 865 (0x361), region = 32  ;;  %s180_s22 = scalar_lea.sflag (!%p2393_p5), [#allocation3], %s2209_s21 }
  0x61   : > { %s1761_s26 = smul.u32 (!%p2393_p5), 3, %s2209_s21 }
  0x63   : > { %s183_s29 = scalar_lea.vmem (!%p2393_p5), [#allocation2], %s1761_s26 }
  0x67   : > { %1980 = dma.done.wait (%p2394_p0), %s180_s22, 48  }
  0x68   : > { %1982 = vsyncadd (%p2394_p0), %s180_s22, 4294967248  ;;  %p2395_p11 = scmp.eq.s32.totalorder %s2068_s16, 0 }
  0x6a   : > { %1984 = dma.done.wait (%p2395_p11), [#allocation6], 336   ;;  %p2396_p10 = pmov %p2395_p11 }
  0x6b   : > { %v231_v0 = vlaneseq  ;;  %v2012_v1 = vmov 1966171168   ;;  %v2013_v4 = vmov 0.0   ;;  %vm2014_vm0 = vmmov 0   ;;  %s2016_s18 = smov 127   ;;  %s2017_s20 = smov 126  }
  0x6c   : > { %1986 = vsyncadd (%p2396_p10), [#allocation6], 4294966960  ;;  %v229_v2 = vunpack.c.l.s4 %v2012_v1  ;;  %1641 = vmatprep.subr.bf16.mxu1 %v2013_v4  ;;  %1643 = vmatprep.mubr.msk.bf16.mxu1 %vm2014_vm0, %v2013_v4  ;;  %v2015_v6 = vmov 0   ;;  %s2018_s11 = smov 110   ;;  %s2019_s24 = smov 109   ;;  %vm256_vm1 = vcmask 1040384  }
  0x6d   : > { %v2221_v3 = vshrl.u32 %v231_v0, 7  ;;  %298 = vmatprep.mubr.bf16.mxu0 %v2015_v6  ;;  %v1584_v8 = vld.sshfl [vmem:[%s183_s29] sm:$0x13 pattern:$0x75316420]  ;;  %s2020_s27 = smov 108  }
  0x6e   : > { %v230_v5 = vunpack.c.0.s8 %v229_v2  ;;  %v227_v10 = vcombine.high %v1584_v8, %v1584_v8  ;;  %s2021_s28 = smov 92   ;;  %s2022_s30 = smov 91   ;;  %vm249_vm2 = vcmask 1039360   ;;  %v218_v17 = vld [vmem:[#allocation5 + $0x2] sm:$0x3]  ;;  %vm252_vm3 = vcmask 15360  }
  0x6f   : > { %s2023_s4 = smov 90   ;;  %vm473_vm4 = vcmask 1031168   ;;  %v215_v28 = vld [vmem:[#allocation5] sm:$0x3]  ;;  %vm605_vm5 = vcmask 900096   ;;  %vm737_vm6 = vcmask 891904  }
  0x70   : > { %v233_v7 = vsub.s32 %v230_v5, %v2221_v3  ;;  %v441_v36 = vld [vmem:[#allocation5 + $0x4] sm:$0x3]  ;;  %v573_v44 = vld [vmem:[#allocation5 + $0x6] sm:$0x3]  ;;  %vm869_vm7 = vcmask 883712   ;;  %vm1001_vm8 = vcmask 752640  }
  0x71   : > { %v705_v52 = vld [vmem:[#allocation5 + $0x8] sm:$0x3]  ;;  %v837_v60 = vld [vmem:[#allocation5 + $0xa] sm:$0x3]  ;;  %vm1133_vm9 = vcmask 744448   ;;  %vm1265_vm10 = vcmask 736256  }
  0x72   : > { %v234_v9 = vrot.slane %v1584_v8, %v233_v7  ;;  %v241_v12 = vrot.slane %v227_v10, %v233_v7  ;;  %v969_v7 = vld [vmem:[#allocation5 + $0xc] sm:$0x3]  ;;  %vm1384_vm11 = vcmask 1043456   ;;  %vm1388_vm12 = vcmask 240640   ;;  %s1762_s23 = smul.u32 6, %s2209_s21  ;;  %s2025_s9 = smov 19  }
  0x73   : > { %vm1432_vm13 = vcmask 1041408   ;;  %vm1433_vm14 = vcmask 1043458   ;;  %vm1435_vm15 = vcmask 553988   ;;  %s1763_s10 = smul.u32 96, %s2068_s16  ;;  %s1472_s29 = scalar_lea.sflag [#allocation4], %s2209_s21 }
  0x74   : > { %243 = vrot.lane.b32.xlu0 %v234_v9, %s2016_s18  ;;  %v242_v11 = vcombine.high %v234_v9, %v234_v9  ;;  %v351_v23 = vsel %vm256_vm1, %v234_v9, 0  ;;  %s213_s6 = scalar_lea.vmem [#allocation8], %s1762_s23  ;;  %s2026_s16 = smov [#allocation8]  }
  0x75   : > { %s1486_s25 = sshll.u32 %s213_s6, 4  ;;  %s2336_s22 = scalar_lea.hbm %s2382_s3, %s1763_s10  ;;  %s2338_s25 = int_to_ptr.vmem [resolvable:$true] %s1486_s25 }
  0x76   : > { %247 = vrot.lane.b32.xlu1 %v242_v11, %s2016_s18  ;;  %v357_v20 = vsel %vm256_vm1, %v242_v11, 0 }
  0x78   : > { %245 = vrot.lane.b32.xlu0 %v241_v12, %s2016_s18  ;;  %s1935_s18 = scalar_lea.vmem %s2338_s25, 96 }
  0x79   : > { %p1936_p1 = scmp.ne.s32.totalorder %s2338_s25, %s1935_s18 }
  0x7a   : > { %467 = vrot.lane.b32.xlu1 %v234_v9, %s2017_s20 }
  0x7b   : > { %p1937_p2 = pnand %p1936_p1, %p2160_p4 }
  0x7c   : > { %469 = vrot.lane.b32.xlu0 %v241_v12, %s2017_s20 }
  0x7d   : > { %p1938_p6 = pneg %p1937_p2 }
  0x7e   : > { %471 = vrot.lane.b32.xlu1 %v242_v11, %s2017_s20  ;;  %s1939_s20 = sshll.u32 %s2026_s16, 4  ;;  %s1940_s20 = int_to_ptr.vmem [resolvable:$false] %s1939_s20 }
  0x7f   : > { %p1942_p8 = scmp.lt.s32.totalorder %s2338_s25, %s1940_s20 }
  0x80   : > { %599 = vrot.lane.b32.xlu0 %v234_v9, %s2018_s11 }
  0x82   : > { %601 = vrot.lane.b32.xlu1 %v241_v12, %s2018_s11 }
  0x84   : > { %603 = vrot.lane.b32.xlu0 %v242_v11, %s2018_s11  ;;  %s1941_s11 = scalar_lea.vmem %s1940_s20, 192 }
  0x85   : > { %p1943_p13 = scmp.lt.s32.totalorder %s1941_s11, %s1935_s18 }
  0x86   : > { %731 = vrot.lane.b32.xlu1 %v234_v9, %s2019_s24 }
  0x87   : > { %p1944_p3 = por %p1943_p13, %p1942_p8 }
  0x88   : > { %733 = vrot.lane.b32.xlu0 %v241_v12, %s2019_s24 }
  0x89   : > { %p1945_p7 = pnand %p1944_p3, %p1938_p6 }
  0x8a   : > { %735 = vrot.lane.b32.xlu1 %v242_v11, %s2019_s24 }
  0x8c   : > { %863 = vrot.lane.b32.xlu0 %v234_v9, %s2020_s27 }
  0x8e   : > { %865 = vrot.lane.b32.xlu1 %v241_v12, %s2020_s27 }
  0x90   : > { %867 = vrot.lane.b32.xlu0 %v242_v11, %s2020_s27 }
  0x92   : > { %995 = vrot.lane.b32.xlu1 %v234_v9, %s2021_s28 }
  0x94   : > { %997 = vrot.lane.b32.xlu0 %v241_v12, %s2021_s28 }
  0x96   : > { %999 = vrot.lane.b32.xlu1 %v242_v11, %s2021_s28 }
  0x98   : > { %1127 = vrot.lane.b32.xlu0 %v234_v9, %s2022_s30 }
  0x9a   : > { %1129 = vrot.lane.b32.xlu1 %v241_v12, %s2022_s30 }
  0x9c   : > { %1131 = vrot.lane.b32.xlu0 %v242_v11, %s2022_s30 }
  0x9e   : > { %1259 = vrot.lane.b32.xlu1 %v234_v9, %s2023_s4 }
  0xa0   : > { %1261 = vrot.lane.b32.xlu0 %v241_v12, %s2023_s4 }
  0xa2   : > { %1263 = vrot.lane.b32.xlu1 %v242_v11, %s2023_s4 }
  0xe6   : > { %v244_v13 = vpop.permute.xlu0 %243 }
  0xe8   : > { %v248_v14 = vpop.permute.xlu1 %247 }
  0xe9   : > { %v264_v15 = vsel %vm256_vm1, %v248_v14, 0 }
  0xea   : > { %1642 = vmatpush3.bf16.msra.mxu1 %v264_v15  ;;  %v246_v16 = vpop.permute.xlu0 %245 }
  0xeb   : > { %v251_v18 = vsel %vm249_vm2, %v246_v16, %v248_v14  ;;  %v250_v19 = vsel %vm249_vm2, %v244_v13, %v246_v16  ;;  %1647 = vmatprep.subr.bf16.mxu1 %v2013_v4  ;;  %v1101_v14 = vld [vmem:[#allocation5 + $0xe] sm:$0x3] }
  0xec   : > { %1585 = vmatprep.subr.msk.bf16.mxu0 %vm256_vm1, %v251_v18  ;;  %v258_v21 = vsel %vm256_vm1, %v250_v19, 0  ;;  %v468_v22 = vpop.permute.xlu1 %467  ;;  %v1233_v18 = vld [vmem:[#allocation5 + $0x10] sm:$0x3]  ;;  %v1368_v19 = vsub.s32 0, %v2221_v3 }
  0xed   : > { %267 = vmatpush1.bf16.msra.mxu0 %v258_v21  ;;  %1644 = vmatmul.mubr.msk.bf16.vlgmr.msra.gmra.mrb[0].mxu1 %vm252_vm3, %v218_v17  ;;  %v1372_v21 = vsub.s32 1, %v2221_v3 }
  0xee   : > { %1588 = vmatprep.subr.msk.bf16.mxu0 %vm256_vm1, %v241_v12  ;;  %1648 = vmatpush3.bf16.msra.mxu1 %v357_v20  ;;  %v470_v24 = vpop.permute.xlu0 %469  ;;  %v1376_v20 = vsub.s32 2, %v2221_v3 }
  0xef   : > { %1649 = vmatprep.mubr.msk.bf16.mxu1 %vm2014_vm0, %v2013_v4  ;;  %1653 = vmatprep.subr.bf16.mxu1 %v2013_v4  ;;  %v474_v29 = vsel %vm473_vm4, %v468_v22, %v470_v24  ;;  %v1364_v22 = vld [vmem:[#allocation7] sm:$0x7] }
  0xf0   : > { %1586 = vmatmul.mubr.msk.bf16.vlgmr.msra.gmra.mrb[0].mxu0 %vm252_vm3, %v218_v17  ;;  %v472_v25 = vpop.permute.xlu1 %471  ;;  %v480_v33 = vsel %vm256_vm1, %v474_v29, 0 }
  0xf1   : > { %360 = vmatpush1.bf16.msra.mxu0 %v351_v23  ;;  %v475_v26 = vsel %vm473_vm4, %v470_v24, %v472_v25  ;;  %391 = vmatprep.mubr.bf16.mxu0 %v2015_v6  ;;  %v486_v30 = vsel %vm256_vm1, %v472_v25, 0  ;;  %v2308_v24 = vrot.slane %v1364_v22, %v1368_v19 }
  0xf2   : > { %1592 = vmatprep.subr.msk.bf16.mxu0 %vm256_vm1, %v475_v26  ;;  %v600_v27 = vpop.permute.xlu0 %599  ;;  %v2312_v26 = vrot.slane %v1364_v22, %v1372_v21 }
  0xf4   : > { %v602_v31 = vpop.permute.xlu1 %601 }
  0xf5   : > { %v606_v37 = vsel %vm605_vm5, %v600_v27, %v602_v31 }
  0xf6   : > { %v604_v32 = vpop.permute.xlu0 %603  ;;  %v612_v41 = vsel %vm256_vm1, %v606_v37, 0 }
  0xf7   : > { %v607_v34 = vsel %vm605_vm5, %v602_v31, %v604_v32  ;;  %v618_v38 = vsel %vm256_vm1, %v604_v32, 0  ;;  %vm1466_vm5 = vcmask 1041560  }
  0xf8   : > { %v732_v35 = vpop.permute.xlu1 %731 }
  0xf9   : > { %1650 = vmatmul.mubr.msk.bf16.vlgmr.msra.gmra.mrb[0].mxu1 %vm252_vm3, %v215_v28 }
  0xfa   : > { %1654 = vmatpush3.bf16.msra.mxu1 %v486_v30  ;;  %1655 = vmatprep.mubr.msk.bf16.mxu1 %vm2014_vm0, %v2013_v4  ;;  %v734_v39 = vpop.permute.xlu0 %733 }
  0xfb   : > { %1659 = vmatprep.subr.bf16.mxu1 %v2013_v4  ;;  %v738_v45 = vsel %vm737_vm6, %v732_v35, %v734_v39 }
  0xfc   : > { %1589 = vmatmul.mubr.msk.bf16.vlgmr.msra.gmra.mrb[0].mxu0 %vm252_vm3, %v215_v28  ;;  %v736_v40 = vpop.permute.xlu1 %735  ;;  %v744_v49 = vsel %vm256_vm1, %v738_v45, 0 }
  0xfd   : > { %489 = vmatpush1.bf16.msra.mxu0 %v480_v33  ;;  %520 = vmatprep.mubr.bf16.mxu0 %v2015_v6  ;;  %v739_v42 = vsel %vm737_vm6, %v734_v39, %v736_v40  ;;  %v750_v46 = vsel %vm256_vm1, %v736_v40, 0  ;;  %vm1467_vm6 = vmor %vm1433_vm14, %vm1466_vm5 }
  0xfe   : > { %1596 = vmatprep.subr.msk.bf16.mxu0 %vm256_vm1, %v607_v34  ;;  %v864_v43 = vpop.permute.xlu0 %863 }
 0x100   : > { %v866_v47 = vpop.permute.xlu1 %865 }
 0x101   : > { %v870_v53 = vsel %vm869_vm7, %v864_v43, %v866_v47 }
 0x102   : > { %v868_v48 = vpop.permute.xlu0 %867  ;;  %v876_v57 = vsel %vm256_vm1, %v870_v53, 0 }
 0x103   : > { %v871_v50 = vsel %vm869_vm7, %v866_v47, %v868_v48  ;;  %v882_v54 = vsel %vm256_vm1, %v868_v48, 0  ;;  %vm1468_vm7 = vcmask 398340  }
 0x104   : > { %v996_v51 = vpop.permute.xlu1 %995 }
 0x105   : > { %1656 = vmatmul.mubr.msk.bf16.vlgmr.msra.gmra.mrb[0].mxu1 %vm252_vm3, %v441_v36 }
 0x106   : > { %1660 = vmatpush3.bf16.msra.mxu1 %v618_v38  ;;  %1661 = vmatprep.mubr.msk.bf16.mxu1 %vm2014_vm0, %v2013_v4  ;;  %v998_v55 = vpop.permute.xlu0 %997 }
 0x107   : > { %1665 = vmatprep.subr.bf16.mxu1 %v2013_v4  ;;  %v1002_v61 = vsel %vm1001_vm8, %v996_v51, %v998_v55 }
 0x108   : > { %1593 = vmatmul.mubr.msk.bf16.vlgmr.msra.gmra.mrb[0].mxu0 %vm252_vm3, %v441_v36  ;;  %v1000_v56 = vpop.permute.xlu1 %999  ;;  %v1008_v1 = vsel %vm256_vm1, %v1002_v61, 0 }
 0x109   : > { %621 = vmatpush1.bf16.msra.mxu0 %v612_v41  ;;  %652 = vmatprep.mubr.bf16.mxu0 %v2015_v6  ;;  %v1003_v58 = vsel %vm1001_vm8, %v998_v55, %v1000_v56  ;;  %v1014_v62 = vsel %vm256_vm1, %v1000_v56, 0  ;;  %vm1463_vm8 = vcmask 154624  }
 0x10a   : > { %1600 = vmatprep.subr.msk.bf16.mxu0 %vm256_vm1, %v739_v42  ;;  %v1128_v59 = vpop.permute.xlu0 %1127 }
 0x10c   : > { %v1130_v63 = vpop.permute.xlu1 %1129 }
 0x10d   : > { %v1134_v8 = vsel %vm1133_vm9, %v1128_v59, %v1130_v63 }
 0x10e   : > { %v1132_v0 = vpop.permute.xlu0 %1131  ;;  %v1140_v12 = vsel %vm256_vm1, %v1134_v8, 0 }
 0x10f   : > { %v1135_v2 = vsel %vm1133_vm9, %v1130_v63, %v1132_v0  ;;  %v1146_v9 = vsel %vm256_vm1, %v1132_v0, 0  ;;  %vm1469_vm9 = vmor %vm1468_vm7, %vm1467_vm6 }
 0x110   : > { %v1260_v5 = vpop.permute.xlu1 %1259 }
 0x111   : > { %1662 = vmatmul.mubr.msk.bf16.vlgmr.msra.gmra.mrb[0].mxu1 %vm252_vm3, %v573_v44 }
 0x112   : > { %1666 = vmatpush3.bf16.msra.mxu1 %v750_v46  ;;  %1667 = vmatprep.mubr.msk.bf16.mxu1 %vm2014_vm0, %v2013_v4  ;;  %v1262_v10 = vpop.permute.xlu0 %1261 }
 0x113   : > { %1671 = vmatprep.subr.bf16.mxu1 %v2013_v4  ;;  %v1266_v15 = vsel %vm1265_vm10, %v1260_v5, %v1262_v10 }
 0x114   : > { %1597 = vmatmul.mubr.msk.bf16.vlgmr.msra.gmra.mrb[0].mxu0 %vm252_vm3, %v573_v44  ;;  %v1264_v11 = vpop.permute.xlu1 %1263  ;;  %v1272_v17 = vsel %vm256_vm1, %v1266_v15, 0 }
 0x115   : > { %753 = vmatpush1.bf16.msra.mxu0 %v744_v49  ;;  %784 = vmatprep.mubr.bf16.mxu0 %v2015_v6  ;;  %v1267_v13 = vsel %vm1265_vm10, %v1262_v10, %v1264_v11  ;;  %v1278_v16 = vsel %vm256_vm1, %v1264_v11, 0 }
 0x116   : > { %1604 = vmatprep.subr.msk.bf16.mxu0 %vm256_vm1, %v871_v50 }
 0x11d   : > { %1668 = vmatmul.mubr.msk.bf16.vlgmr.msra.gmra.mrb[0].mxu1 %vm252_vm3, %v705_v52 }
 0x11e   : > { %1672 = vmatpush3.bf16.msra.mxu1 %v882_v54  ;;  %1673 = vmatprep.mubr.msk.bf16.mxu1 %vm2014_vm0, %v2013_v4 }
 0x11f   : > { %1677 = vmatprep.subr.bf16.mxu1 %v2013_v4 }
 0x120   : > { %1601 = vmatmul.mubr.msk.bf16.vlgmr.msra.gmra.mrb[0].mxu0 %vm252_vm3, %v705_v52 }
 0x121   : > { %885 = vmatpush1.bf16.msra.mxu0 %v876_v57  ;;  %916 = vmatprep.mubr.bf16.mxu0 %v2015_v6 }
 0x122   : > { %1608 = vmatprep.subr.msk.bf16.mxu0 %vm256_vm1, %v1003_v58 }
 0x129   : > { %1674 = vmatmul.mubr.msk.bf16.vlgmr.msra.gmra.mrb[0].mxu1 %vm252_vm3, %v837_v60 }
 0x12a   : > { %1678 = vmatpush3.bf16.msra.mxu1 %v1014_v62  ;;  %1679 = vmatprep.mubr.msk.bf16.mxu1 %vm2014_vm0, %v2013_v4 }
 0x12b   : > { %1683 = vmatprep.subr.bf16.mxu1 %v2013_v4 }
 0x12c   : > { %1605 = vmatmul.mubr.msk.bf16.vlgmr.msra.gmra.mrb[0].mxu0 %vm252_vm3, %v837_v60  ;;  %v2024_v60 = vmov 1983009808  }
 0x12d   : > { %1017 = vmatpush1.bf16.msra.mxu0 %v1008_v1  ;;  %1048 = vmatprep.mubr.bf16.mxu0 %v2015_v6  ;;  %v1446_v61 = vunpack.c.l.s4 %v2024_v60 }
 0x12e   : > { %1612 = vmatprep.subr.msk.bf16.mxu0 %vm256_vm1, %v1135_v2 }
 0x12f   : > { %v1447_v8 = vunpack.c.0.s8 %v1446_v61 }
 0x135   : > { %1680 = vmatmul.mubr.msk.bf16.vlgmr.msra.gmra.mrb[0].mxu1 %vm252_vm3, %v969_v7 }
 0x136   : > { %1684 = vmatpush3.bf16.msra.mxu1 %v1146_v9  ;;  %1685 = vmatprep.mubr.msk.bf16.mxu1 %vm2014_vm0, %v2013_v4 }
 0x137   : > { %1689 = vmatprep.subr.bf16.mxu1 %v2013_v4 }
 0x138   : > { %1609 = vmatmul.mubr.msk.bf16.vlgmr.msra.gmra.mrb[0].mxu0 %vm252_vm3, %v969_v7 }
 0x139   : > { %1149 = vmatpush1.bf16.msra.mxu0 %v1140_v12  ;;  %1180 = vmatprep.mubr.bf16.mxu0 %v2015_v6 }
 0x13a   : > { %1616 = vmatprep.subr.msk.bf16.mxu0 %vm256_vm1, %v1267_v13 }
 0x141   : > { %1686 = vmatmul.mubr.msk.bf16.vlgmr.msra.gmra.mrb[0].mxu1 %vm252_vm3, %v1101_v14 }
 0x142   : > { %1690 = vmatpush3.bf16.msra.mxu1 %v1278_v16  ;;  %1691 = vmatprep.mubr.msk.bf16.mxu1 %vm2014_vm0, %v2013_v4  ;;  %v2310_v4 = vrot.slane %v1364_v22, %v1376_v20 }
 0x144   : > { %1613 = vmatmul.mubr.msk.bf16.vlgmr.msra.gmra.mrb[0].mxu0 %vm252_vm3, %v1101_v14 }
 0x145   : > { %1281 = vmatpush1.bf16.msra.mxu0 %v1272_v17  ;;  %1312 = vmatprep.mubr.bf16.mxu0 %v2015_v6 }
 0x14d   : > { %1692 = vmatmul.mubr.msk.bf16.vlgmr.msra.gmra.mrb[0].mxu1 %vm252_vm3, %v1233_v18 }
 0x150   : > { %1617 = vmatmul.mubr.msk.bf16.vlgmr.msra.gmra.mrb[0].mxu0 %vm252_vm3, %v1233_v18  ;;  %vm1434_vm3 = vmor %vm1433_vm14, %vm1432_vm13  ;;  %v1450_v18 = vsub.s32 %v1447_v8, %v2221_v3 }
 0x151   : > { %vm1436_vm4 = vmor %vm1435_vm15, %vm1434_vm3 }
 0x152   : > { %1437 = vst.msk [vmem:[%s213_s6] sm:$0x3f] %vm1436_vm4, %v2015_v6 }
 0x220   : > { %v1355_v23 = vpop.f32.mrb[0].mxu1 }
 0x221   : > { %v1693_v25 = vpop.f32.mrb[1].mxu1  ;;  %v1395_v28 = vmul.f32 %v1355_v23, %v1355_v23  ;;  %v1383_v34 = vmul.f32 %v2310_v4, %v1355_v23 }
 0x222   : > { %v1358_v27 = vpop.f32.mrb[2].mxu1 }
 0x223   : > { %v1314_v29 = vpop.f32.mrb[0].mxu0  ;;  %v1694_v30 = vpop.f32.mrb[3].mxu1  ;;  %v1398_v43 = vmul.f32 %v1395_v28, %v2310_v4  ;;  %v1389_v46 = vsel %vm1388_vm12, %v1383_v34, 0.0 }
 0x224   : > { %v1381_v31 = vmul.f32 %v2308_v24, %v1314_v29  ;;  %v1393_v32 = vmul.f32 %v1314_v29, %v1314_v29  ;;  %v1316_v33 = vpop.f32.mrb[1].mxu0 }
 0x225   : > { %v1382_v35 = vmul.f32 %v2312_v26, %v1316_v33  ;;  %v1394_v36 = vmul.f32 %v1316_v33, %v1316_v33  ;;  %v1318_v37 = vpop.f32.mrb[2].mxu0  ;;  %v1402_v50 = vsel %vm1388_vm12, %v1398_v43, 0.0 }
 0x226   : > { %v1396_v38 = vmul.f32 %v1393_v32, %v2308_v24  ;;  %v1319_v39 = vpop.f32.mrb[3].mxu0  ;;  %v1385_v40 = vsel %vm1384_vm11, %v1381_v31, 0.0 }
 0x227   : > { %v1397_v41 = vmul.f32 %v1394_v36, %v2312_v26  ;;  %v1386_v42 = vsel %vm1384_vm11, %v1382_v35, 0.0 }
 0x228   : > { %v1387_v44 = vadd.f32 %v1386_v42, %v1385_v40  ;;  %v1399_v45 = vsel %vm1384_vm11, %v1396_v38, 0.0 }
 0x229   : > { %v1400_v47 = vsel %vm1384_vm11, %v1397_v41, 0.0 }
 0x22a   : > { %v1390_v48 = vadd.f32 %v1389_v46, %v1387_v44  ;;  %v1401_v49 = vadd.f32 %v1400_v47, %v1399_v45 }
 0x22c   : > { %1391 = vadd.xlane.f32.xlu0 %v1390_v48  ;;  %v1403_v51 = vadd.f32 %v1402_v50, %v1401_v49 }
 0x22e   : > { %1404 = vadd.xlane.f32.xlu1 %v1403_v51 }
 0x2b9   : > { %v1392_v52 = vpop.xlane.xlu0 %1391 }
 0x2ba   : > { %v1407_v53 = vmul.f32 0.00390625, %v1392_v52 }
 0x2bb   : > { %v1405_v54 = vpop.xlane.xlu1 %1404 }
 0x2bc   : > { %v1408_v55 = vmul.f32 0.00390625, %v1405_v54  ;;  %v1409_v56 = vmul.f32 %v1407_v53, %v1407_v53  ;;  %v1412_v62 = vsub.f32 %v1314_v29, %v1407_v53  ;;  %v1413_v63 = vsub.f32 %v1316_v33, %v1407_v53 }
 0x2bd   : > { %v1414_v0 = vsub.f32 %v1355_v23, %v1407_v53 }
 0x2be   : > { %v1410_v57 = vsub.f32 %v1408_v55, %v1409_v56 }
 0x2c0   : > { %v1411_v58 = vmax.f32 %v1410_v57, 0.0 }
 0x2c2   : > { %v1415_v59 = vadd.f32 1e-05, %v1411_v58 }
 0x2c4   : > { %1847 = vrsqrt.f32 %v1415_v59 }
 0x2ce   : > { %v1848_v1 = vpop.eup %1847 }
 0x2cf   : > { %v1417_v2 = vmul.f32 %v1848_v1, %v1412_v62  ;;  %v1418_v5 = vmul.f32 %v1848_v1, %v1413_v63  ;;  %v1419_v7 = vmul.f32 %v1848_v1, %v1414_v0 }
 0x2d1   : > { %vm1420_vm0 = vcmp.ge.f32.partialorder %v1417_v2, 0.0  ;;  %vm1421_vm1 = vcmp.ge.f32.partialorder %v1418_v5, 0.0  ;;  %vm1422_vm2 = vcmp.ge.f32.partialorder %v1419_v7, 0.0  ;;  %v1423_v9 = vmul.f32 0.2, %v1417_v2 }
 0x2d2   : > { %v1424_v10 = vmul.f32 0.2, %v1418_v5  ;;  %v1425_v11 = vmul.f32 0.2, %v1419_v7 }
 0x2d3   : > { %v1426_v12 = vsel %vm1420_vm0, %v1417_v2, %v1423_v9 }
 0x2d4   : > { %v1427_v13 = vsel %vm1421_vm1, %v1418_v5, %v1424_v10  ;;  %v1428_v14 = vsel %vm1422_vm2, %v1419_v7, %v1425_v11  ;;  %v1429_v15 = vmul.f32 %v1426_v12, %v2308_v24 }
 0x2d5   : > { %v1430_v16 = vmul.f32 %v1427_v13, %v2312_v26  ;;  %v1431_v17 = vmul.f32 %v1428_v14, %v2310_v4 }
 0x2d7   : > { %v1440_v19 = vpack.c.bf16 %v1431_v17, %v1431_v17  ;;  %v1619_v20 = vpack.c.bf16 %v1430_v16, %v1429_v15 }
 0x2d9   : > { %v1451_v21 = vrot.slane %v1619_v20, %v1450_v18  ;;  %v1458_v22 = vrot.slane %v1440_v19, %v1450_v18 }
 0x2db   : > { %v1459_v23 = vcombine.low %v1451_v21, %v1458_v22 }
 0x2dd   : > { %1460 = vrot.lane.b32.xlu0 %v1459_v23, %s2025_s9 }
 0x34f   : > { %v1461_v6 = vpop.permute.xlu0 %1460 }
 0x350   : > { %v1462_v24 = vrot.slane %v1461_v6, 6 }
 0x352   : > { %v1464_v3 = vsel %vm1463_vm8, %v1462_v24, %v1461_v6 }
 0x353   : > { %1470 = vst.msk [vmem:[%s213_s6] sm:$0x3f] %vm1469_vm9, %v1464_v3 }
 0x354   : > { %1948 = shalt.err (!%p1945_p7)
}
 0x355   : > { %s1949_s21 = scalar_lea.hbm %s2336_s22, 96  ;;  %s1953_s28 = scalar_lea.hbm %s2382_s3, 768 }
 0x356   : > { %p1950_p9 = scmp.ne.s32.totalorder %s2336_s22, %s1949_s21  ;;  %p1954_p0 = scmp.lt.u32.totalorder %s2336_s22, %s2382_s3 }
 0x357   : > { %p1955_p11 = scmp.lt.u32.totalorder %s1953_s28, %s1949_s21  ;;  %p1957_p1 = scmp.lt.u32.totalorder %s1949_s21, %s2336_s22 }
 0x358   : > { %p1951_p12 = pnand %p1950_p9, %p2160_p4 }
 0x359   : > { %p1956_p10 = por %p1955_p11, %p1954_p0 }
 0x35a   : > { %p1952_p5 = pneg %p1951_p12 }
 0x35b   : > { %p1958_p2 = por %p1957_p1, %p1956_p10 }
 0x35d   : > { %p1959_p6 = pnand %p1958_p2, %p1952_p5 }
 0x35f   : > { %1962 = shalt.err (!%p1959_p6)
}
 0x360   : > { %1774 = dma.vmem_to_hbm [thread:$0]  (%p2160_p4), %s2338_s25, 96, %s2336_s22, %s1472_s29  }
 0x361 PF: > { %p1796_p8 = scmp.ge.s32.totalorder %s2005_s15, 2  ;;  %s1498_s23 = sand.u32 1, %s1993_s12  }
 0x362   : > { %p2397_p13 = scmp.ne.s32.totalorder %s2387_s19, 0  ;;  %s1499_s6 = scalar_lea.sflag [#allocation4], %s1498_s23 }
 0x364   : > { %p1788_p3 = pnand %p1796_p8, %p2397_p13 }
 0x366   : > { %1988 = dma.done.wait (!%p1788_p3), %s1499_s6, 96  }
 0x367   : > { %1990 = vsyncadd (!%p1788_p3), %s1499_s6, 4294967200  ;;  %p17_p7 = scmp.ge.s32.totalorder %s2150_s5, 10   ;;  %s2398_s12 = smov %s1997_s13 }
 0x368   : > { %s2399_s13 = smov %s2001_s14  ;;  %s2400_s14 = smov %s2166_s8 }
 0x369   : > { %s2401_s15 = smov %s2150_s5  ;;  %19 = sbr.rel (!%p17_p7) target bundleno = 6 (0x6), region = 93 }
 0x370   :  { %1504 = vsyncpa [#allocation3], 1 }
 0x371   :  { %1506 = vsyncpa [#allocation3 + $0x1], 1 }
 0x372   :  { %1507 = vsyncpa [#allocation6], 1 }
 0x373   :  { %1508 = vsyncpa [#allocation4], 1 }
 0x374   :  { %1510 = vsyncpa [#allocation4 + $0x1], 1 }

// kernel: sensitivity_model_forward.16
= control target key start
LH: loop header
LB: loop body
LE: loop exit
PB: predicated region body
PF: predicated region fallthrough
CT: control target
= control target key end

     0   :  { %8 = vsyncpa [#allocation3], 0  ;;  %s1499_s0 = inlined_call_operand.hbm [shape: bf16[8,8,100], index: 0, kind: input, shape index: {}]   ;;  %s1500_s1 = inlined_call_operand.hbm [shape: bf16[9,8,8], index: 1, kind: input, shape index: {}]   ;;  %s1501_s2 = inlined_call_operand.hbm [shape: f32[1,78], index: 2, kind: input, shape index: {}]   ;;  %s1502_s3 = inlined_call_operand.hbm [shape: bf16[8,8,100], index: 3, kind: output, shape index: {}]  }
   0x1   :  { %10 = vsyncpa [#allocation3 + $0x1], 0 }
   0x2   :  { %11 = vsyncpa [#allocation6], 0 }
   0x3   :  { %12 = vsyncpa [#allocation4], 0 }
   0x4   :  { %14 = vsyncpa [#allocation4 + $0x1], 0  ;;  %s1229_s12 = smov 0   ;;  %s1231_s13 = smov 0  }
   0x5   :  { %s1233_s14 = smov 0   ;;  %s1235_s15 = smov 0  }
   0x6 LB: > { %s1250_s16 = sadd.s32 4294967295, %s1189_s15   ;;  %s819_s17 = sadd.s32 4294967294, %s1189_s15   ;;  %s1189_s15 = sphi %s1235_s15, %s1521_s15   ;;  %s1185_s14 = sphi %s1233_s14, %s1520_s14   ;;  %s1181_s13 = sphi %s1231_s13, %s1519_s13   ;;  %s1177_s12 = sphi %s1229_s12, %s1518_s12  }
   0x7   : > { %p40_p0 = scmp.ne.s32.totalorder %s1181_s13, %s1177_s12  ;;  %p1503_p1 = scmp.eq.s32.totalorder %s1250_s16, 0 }
   0x8   : > { %p112_p3 = scmp.eq.s32.totalorder %s819_s17, 7  ;;  %p820_p5 = scmp.ge.s32.totalorder %s1189_s15, 1 }
   0x9   : > { %p1259_p4 = por %p1503_p1, %p40_p0  ;;  %p119_p7 = scmp.lt.s32.totalorder %s1189_s15, 9 }
   0xa   : > { %p1264_p6 = por %p112_p3, %p40_p0  ;;  %s1191_s21 = smov [#allocation5]  }
   0xb   : > { %s1506_s18 = scalar_select %p1259_p4, 1, 0 }
   0xc   : > { %s1507_s19 = scalar_select %p1264_p6, 1, 0 }
   0xd   : > { %p1269_p8 = pnand %p820_p5, %p119_p7  ;;  %s131_s22 = sshll.u32 %s1191_s21, 4  ;;  %s132_s22 = int_to_ptr.vmem [resolvable:$true] %s131_s22 }
   0xe   : > { %s1192_s24 = smov [#allocation7]   ;;  %s1033_s28 = scalar_lea.hbm %s1500_s1, 576 }
   0xf   : > { %s1508_s20 = scalar_select %p1269_p8, 1, 0 }
  0x10   : > { %p961_p9 = pneg %p1269_p8  ;;  %s145_s25 = sshll.u32 %s1192_s24, 4  ;;  %s1281_s25 = int_to_ptr.vmem [resolvable:$true] %s145_s25 }
  0x11   : > { %p1034_p11 = scmp.ne.s32.totalorder %s1500_s1, %s1033_s28  ;;  %p1040_p3 = scmp.lt.u32.totalorder %s1033_s28, %s1500_s1 }
  0x12   : > { %p1277_p10 = pnand %p961_p9, %p1503_p1 }
  0x14   : > { %p1035_p12 = pneg %p1277_p10 }
  0x16   : > { %p1036_p13 = pnand %p1035_p12, %p1034_p11 }
  0x18   : > { %p1037_p0 = pneg %p1036_p13 }
  0x1a   : > { %p1042_p5 = pnand %p1040_p3, %p1037_p0 }
  0x1c   : > { %1045 = shalt.err (!%p1042_p5)
}
  0x1d   : > { %s1046_s6 = scalar_lea.vmem %s132_s22, 576  ;;  %p1054_p2 = scmp.lt.s32.totalorder %s132_s22, %s132_s22 }
  0x1e   : > { %p1047_p7 = scmp.ne.s32.totalorder %s132_s22, %s1046_s6  ;;  %p1055_p6 = scmp.lt.s32.totalorder %s1046_s6, %s1046_s6 }
  0x20   : > { %p1049_p9 = pnand %p1047_p7, %p1035_p12  ;;  %p1056_p4 = por %p1055_p6, %p1054_p2 }
  0x22   : > { %p1050_p1 = pneg %p1049_p9 }
  0x24   : > { %p1057_p8 = pnand %p1056_p4, %p1050_p1 }
  0x26   : > { %1060 = shalt.err (!%p1057_p8)
}
  0x27   : > { %s1193_s7 = smov 64   ;;  %s1194_s8 = smov 4  }
  0x28   : > { %964 = dma.hbm_to_vmem [thread:$0]  (!%p1277_p10), %s1500_s1, 576, %s132_s22, [#allocation6], %s1193_s7, %s1193_s7, %s1194_s8  }
  0x29   : > { %s1061_s21 = scalar_lea.hbm %s1501_s2, 16 }
  0x2a   : > { %p1062_p11 = scmp.ne.s32.totalorder %s1501_s2, %s1061_s21  ;;  %p1068_p4 = scmp.lt.u32.totalorder %s1061_s21, %s1501_s2 }
  0x2c   : > { %p1064_p1 = pnand %p1062_p11, %p1035_p12 }
  0x2e   : > { %p1065_p2 = pneg %p1064_p1 }
  0x30   : > { %p1070_p6 = pnand %p1068_p4, %p1065_p2 }
  0x32   : > { %1073 = shalt.err (!%p1070_p6)
}
  0x33   : > { %s1074_s22 = scalar_lea.vmem %s1281_s25, 16  ;;  %s1081_s29 = scalar_lea.vmem %s1281_s25, 32 }
  0x34   : > { %p1075_p8 = scmp.ne.s32.totalorder %s1281_s25, %s1074_s22  ;;  %p1082_p3 = scmp.lt.s32.totalorder %s1281_s25, %s1281_s25 }
  0x35   : > { %p1083_p5 = scmp.lt.s32.totalorder %s1081_s29, %s1074_s22 }
  0x36   : > { %p1077_p13 = pnand %p1075_p8, %p1035_p12 }
  0x37   : > { %p1084_p7 = por %p1083_p5, %p1082_p3 }
  0x38   : > { %p1078_p0 = pneg %p1077_p13 }
  0x3a   : > { %p1085_p9 = pnand %p1084_p7, %p1078_p0 }
  0x3c   : > { %1088 = shalt.err (!%p1085_p9)
}
  0x3d   : > { %967 = dma.hbm_to_vmem [thread:$0]  (!%p1277_p10), %s1501_s2, 16, %s1281_s25, [#allocation6]  }
  0x3e   : > { %s1332_s5 = sadd.s32 1, %s1189_s15   ;;  %s27_s23 = sadd.s32 1, %s1185_s14 }
  0x3f   : > { %s24_s6 = ssub.s32 %s1189_s15, %s1332_s5  ;;  %p34_p12 = scmp.ne.s32.totalorder %s1185_s14, %s1181_s13 }
  0x40   : > { %p25_p11 = scmp.eq.s32.totalorder %s24_s6, 0  ;;  %p35_p1 = scmp.eq.s32.totalorder %s1189_s15, 0 }
  0x41   : > { %p1510_p2 = scmp.eq.s32.totalorder %s1250_s16, 7  ;;  %p978_p6 = scmp.lt.s32.totalorder %s1189_s15, 8 }
  0x42   : > { %s1348_s8 = scalar_select %p25_p11, %s1185_s14, %s27_s23  }
  0x43   : > { %p1342_p4 = por %p1510_p2, %p34_p12  ;;  %p36_p8 = por %p35_p1, %p34_p12 }
  0x44   : > { %s156_s9 = sand.u32 1, %s1185_s14   ;;  %s825_s25 = sshll.u32 %s1189_s15, 6 }
  0x45   : > { %s824_s10 = sshll.u32 %s156_s9, 2  ;;  %s1355_s21 = scalar_lea.hbm %s1499_s0, %s825_s25 }
  0x46   : > { %s160_s24 = scalar_lea.vmem [#allocation2], %s824_s10  ;;  %p1359_p10 = pnand %p978_p6, %p36_p8 }
  0x47   : > { %s167_s26 = sshll.u32 %s160_s24, 4  ;;  %s157_s28 = scalar_lea.sflag [#allocation3], %s156_s9  ;;  %s1357_s26 = int_to_ptr.vmem [resolvable:$true] %s167_s26 }
  0x48   : > { %s1089_s22 = scalar_lea.hbm %s1355_s21, 64  ;;  %p1091_p0 = pneg %p1359_p10 }
  0x49   : > { %p1090_p13 = scmp.ne.s32.totalorder %s1355_s21, %s1089_s22  ;;  %s1094_s4 = scalar_lea.hbm %s1499_s0, 512 }
  0x4a   : > { %p1095_p7 = scmp.lt.u32.totalorder %s1355_s21, %s1499_s0  ;;  %p1096_p9 = scmp.lt.u32.totalorder %s1094_s4, %s1089_s22 }
  0x4b   : > { %p1092_p3 = pnand %p1091_p0, %p1090_p13  ;;  %p1098_p11 = scmp.lt.u32.totalorder %s1089_s22, %s1355_s21 }
  0x4c   : > { %p1097_p12 = por %p1096_p9, %p1095_p7 }
  0x4d   : > { %p1093_p5 = pneg %p1092_p3 }
  0x4e   : > { %p1099_p1 = por %p1098_p11, %p1097_p12 }
  0x50   : > { %p1100_p2 = pnand %p1099_p1, %p1093_p5 }
  0x52   : > { %1103 = shalt.err (!%p1100_p2)
}
  0x53   : > { %s1104_s9 = scalar_lea.vmem %s1357_s26, 64  ;;  %s1195_s10 = smov [#allocation2]  }
  0x54   : > { %p1105_p6 = scmp.ne.s32.totalorder %s1357_s26, %s1104_s9  ;;  %s1109_s25 = sshll.u32 %s1195_s10, 4  ;;  %s1110_s25 = int_to_ptr.vmem [resolvable:$false] %s1109_s25 }
  0x55   : > { %s1111_s11 = scalar_lea.vmem %s1110_s25, 128  ;;  %p1112_p3 = scmp.lt.s32.totalorder %s1357_s26, %s1110_s25 }
  0x56   : > { %p1107_p8 = pnand %p1105_p6, %p1091_p0  ;;  %p1113_p7 = scmp.lt.s32.totalorder %s1111_s11, %s1104_s9 }
  0x58   : > { %p1108_p13 = pneg %p1107_p8  ;;  %p1114_p9 = por %p1113_p7, %p1112_p3 }
  0x5a   : > { %p1115_p12 = pnand %p1114_p9, %p1108_p13 }
  0x5c   : > { %1118 = shalt.err (!%p1115_p12)
}
  0x5d   : > { %971 = dma.hbm_to_vmem [thread:$0]  (!%p1359_p10), %s1355_s21, 64, %s1357_s26, %s157_s28  }
  0x5e   : > { %p1513_p5 = scmp.ne.s32.totalorder %s1508_s20, 0 }
  0x5f   : > { %s1391_s17 = sand.u32 (!%p1513_p5), 1, %s1181_s13   ;;  %p1514_p0 = scmp.ne.s32.totalorder (!%p1513_p5), %s1506_s18, 0 }
  0x60   : > { %176 = sbr.rel (%p1513_p5) target bundleno = 795 (0x31b), region = 32  ;;  %s827_s24 = sshll.u32 (!%p1513_p5), %s1391_s17, 2 }
  0x61   : > { %s179_s22 = scalar_lea.sflag (!%p1513_p5), [#allocation3], %s1391_s17  ;;  %s182_s29 = scalar_lea.vmem (!%p1513_p5), [#allocation2], %s827_s24 }
  0x67   : > { %1164 = dma.done.wait (%p1514_p0), %s179_s22, 64  }
  0x68   : > { %1166 = vsyncadd (%p1514_p0), %s179_s22, 4294967232  ;;  %p1515_p10 = scmp.eq.s32.totalorder %s1250_s16, 0 }
  0x6a   : > { %1168 = dma.done.wait (%p1515_p10), [#allocation6], 592   ;;  %p1516_p11 = pmov %p1515_p10 }
  0x6b   : > { %v1196_v0 = vmov 0.0   ;;  %vm1197_vm0 = vmmov 0   ;;  %v215_v1 = vld [vmem:[%s182_s29] sm:$0xf]  ;;  %s1198_s18 = smov 117   ;;  %s1199_s20 = smov 116  }
  0x6c   : > { %1170 = vsyncadd (%p1516_p11), [#allocation6], 4294966704  ;;  %890 = vmatprep.subr.bf16.mxu0 %v1196_v0  ;;  %866 = vmatprep.subr.bf16.mxu1 %v1196_v0  ;;  %v831_v2 = vcombine.low %v215_v1, %v215_v1  ;;  %s1200_s21 = smov 127   ;;  %s1201_s26 = smov 108   ;;  %vm227_vm1 = vcmask 1043456   ;;  %vm223_vm2 = vcmask 64512  }
  0x6d   : > { %892 = vmatprep.mubr.msk.bf16.mxu0 %vm1197_vm0, %v1196_v0  ;;  %868 = vmatprep.mubr.msk.bf16.mxu1 %vm1197_vm0, %v1196_v0  ;;  %s1202_s27 = smov 107   ;;  %s1203_s28 = smov 126   ;;  %v420_v6 = vld [vmem:[#allocation5 + $0x10] sm:$0xf]  ;;  %v217_v10 = vld [vmem:[#allocation5 + $0x4] sm:$0xf] }
  0x6e   : > { %421 = vrot.lane.b32.xlu0 %v831_v2, %s1198_s18  ;;  %472 = vrot.lane.b32.xlu1 %v831_v2, %s1199_s20  ;;  %s1204_s30 = smov 106   ;;  %s1205_s4 = smov 118   ;;  %v275_v11 = vsel %vm227_vm1, %v215_v1, 0  ;;  %v471_v13 = vld [vmem:[#allocation5 + $0x14] sm:$0xf]  ;;  %vm682_vm3 = vcmask 637952  }
  0x6f   : > { %v214_v16 = vld [vmem:[#allocation5] sm:$0xf]  ;;  %v522_v19 = vld [vmem:[#allocation5 + $0x18] sm:$0xf]  ;;  %v318_v22 = vld [vmem:[#allocation5 + $0x8] sm:$0xf] }
  0x70   : > { %v573_v25 = vld [vmem:[#allocation5 + $0x1c] sm:$0xf]  ;;  %v369_v27 = vld [vmem:[#allocation5 + $0xc] sm:$0xf]  ;;  %v624_v28 = vld [vmem:[#allocation5 + $0x20] sm:$0xf] }
  0x71   : > { %v841_v34 = vld [vmem:[#allocation7] ss:$0 sm:$0xff]  ;;  %vm705_vm4 = vcmask 814080   ;;  %s212_s23 = scalar_lea.vmem [#allocation8], %s827_s24  ;;  %v1206_v52 = vmov 0   ;;  %s1207_s6 = smov 11  }
  0x72   : > { %221 = vrot.lane.b32.xlu0 %v831_v2, %s1200_s21  ;;  %523 = vrot.lane.b32.xlu1 %v831_v2, %s1201_s26  ;;  %706 = vst.msk [vmem:[%s212_s23] sm:$0xf] %vm705_vm4, %v1206_v52  ;;  %s844_s9 = sshll.u32 %s1250_s16, 6  ;;  %s730_s10 = sshll.u32 %s212_s23, 4  ;;  %vm714_vm6 = vcmask 724056   ;;  %s1458_s10 = int_to_ptr.vmem [resolvable:$true] %s730_s10 }
  0x73   : > { %s1456_s24 = scalar_lea.hbm %s1502_s3, %s844_s9  ;;  %s717_s22 = scalar_lea.sflag [#allocation4], %s1391_s17 }
  0x74   : > { %s1119_s29 = scalar_lea.vmem %s1458_s10, 64  ;;  %s1208_s16 = smov [#allocation8]  }
  0x75   : > { %p1120_p1 = scmp.ne.s32.totalorder %s1458_s10, %s1119_s29  ;;  %s1123_s18 = sshll.u32 %s1208_s16, 4  ;;  %s1124_s18 = int_to_ptr.vmem [resolvable:$false] %s1123_s18 }
  0x76   : > { %574 = vrot.lane.b32.xlu1 %v831_v2, %s1202_s27  ;;  %319 = vrot.lane.b32.xlu0 %v831_v2, %s1203_s28  ;;  %s1125_s20 = scalar_lea.vmem %s1124_s18, 128  ;;  %p1126_p8 = scmp.lt.s32.totalorder %s1458_s10, %s1124_s18 }
  0x77   : > { %p1121_p2 = pnand %p1120_p1, %p1342_p4  ;;  %p1127_p13 = scmp.lt.s32.totalorder %s1125_s20, %s1119_s29 }
  0x79   : > { %p1122_p6 = pneg %p1121_p2  ;;  %p1128_p3 = por %p1127_p13, %p1126_p8 }
  0x7a   : > { %625 = vrot.lane.b32.xlu1 %v831_v2, %s1204_s30  ;;  %370 = vrot.lane.b32.xlu0 %v831_v2, %s1205_s4 }
  0x7b   : > { %p1129_p7 = pnand %p1128_p3, %p1122_p6 }
  0xe0   : > { %v422_v3 = vpop.permute.xlu0 %421  ;;  %v473_v4 = vpop.permute.xlu1 %472 }
  0xe1   : > { %v427_v5 = vsel %vm227_vm1, %v422_v3, 0  ;;  %v478_v7 = vsel %vm227_vm1, %v473_v4, 0 }
  0xe2   : > { %891 = vmatpush3.bf16.msra.mxu0 %v427_v5 }
  0xe3   : > { %896 = vmatprep.subr.bf16.mxu0 %v1196_v0 }
  0xe4   : > { %v222_v8 = vpop.permute.xlu0 %221  ;;  %v524_v12 = vpop.permute.xlu1 %523 }
  0xe5   : > { %893 = vmatmul.mubr.msk.bf16.vlgmr.msra.gmra.mrb[0].mxu0 %vm223_vm2, %v420_v6  ;;  %v229_v9 = vsel %vm227_vm1, %v222_v8, 0  ;;  %v529_v14 = vsel %vm227_vm1, %v524_v12, 0 }
  0xe6   : > { %867 = vmatpush3.bf16.msra.mxu1 %v229_v9  ;;  %897 = vmatpush3.bf16.msra.mxu0 %v478_v7 }
  0xe7   : > { %898 = vmatprep.mubr.msk.bf16.mxu0 %vm1197_vm0, %v1196_v0  ;;  %872 = vmatprep.subr.bf16.mxu1 %v1196_v0 }
  0xe8   : > { %902 = vmatprep.subr.bf16.mxu0 %v1196_v0  ;;  %v320_v15 = vpop.permute.xlu0 %319  ;;  %v575_v18 = vpop.permute.xlu1 %574 }
  0xe9   : > { %869 = vmatmul.mubr.msk.bf16.vlgmr.msra.gmra.mrb[0].mxu1 %vm223_vm2, %v217_v10  ;;  %v325_v17 = vsel %vm227_vm1, %v320_v15, 0  ;;  %v580_v20 = vsel %vm227_vm1, %v575_v18, 0 }
  0xea   : > { %873 = vmatpush3.bf16.msra.mxu1 %v275_v11  ;;  %874 = vmatprep.mubr.msk.bf16.mxu1 %vm1197_vm0, %v1196_v0 }
  0xeb   : > { %878 = vmatprep.subr.bf16.mxu1 %v1196_v0 }
  0xec   : > { %v371_v21 = vpop.permute.xlu0 %370  ;;  %v626_v24 = vpop.permute.xlu1 %625 }
  0xed   : > { %v376_v23 = vsel %vm227_vm1, %v371_v21, 0  ;;  %v631_v26 = vsel %vm227_vm1, %v626_v24, 0 }
  0xf1   : > { %899 = vmatmul.mubr.msk.bf16.vlgmr.msra.gmra.mrb[0].mxu0 %vm223_vm2, %v471_v13 }
  0xf2   : > { %903 = vmatpush3.bf16.msra.mxu0 %v529_v14  ;;  %904 = vmatprep.mubr.msk.bf16.mxu0 %vm1197_vm0, %v1196_v0 }
  0xf3   : > { %908 = vmatprep.subr.bf16.mxu0 %v1196_v0 }
  0xf5   : > { %875 = vmatmul.mubr.msk.bf16.vlgmr.msra.gmra.mrb[0].mxu1 %vm223_vm2, %v214_v16 }
  0xf6   : > { %879 = vmatpush3.bf16.msra.mxu1 %v325_v17  ;;  %880 = vmatprep.mubr.msk.bf16.mxu1 %vm1197_vm0, %v1196_v0 }
  0xf7   : > { %884 = vmatprep.subr.bf16.mxu1 %v1196_v0 }
  0xfd   : > { %905 = vmatmul.mubr.msk.bf16.vlgmr.msra.gmra.mrb[0].mxu0 %vm223_vm2, %v522_v19 }
  0xfe   : > { %909 = vmatpush3.bf16.msra.mxu0 %v580_v20  ;;  %910 = vmatprep.mubr.msk.bf16.mxu0 %vm1197_vm0, %v1196_v0 }
  0xff   : > { %914 = vmatprep.subr.bf16.mxu0 %v1196_v0 }
 0x101   : > { %881 = vmatmul.mubr.msk.bf16.vlgmr.msra.gmra.mrb[0].mxu1 %vm223_vm2, %v318_v22 }
 0x102   : > { %885 = vmatpush3.bf16.msra.mxu1 %v376_v23  ;;  %886 = vmatprep.mubr.msk.bf16.mxu1 %vm1197_vm0, %v1196_v0 }
 0x109   : > { %911 = vmatmul.mubr.msk.bf16.vlgmr.msra.gmra.mrb[0].mxu0 %vm223_vm2, %v573_v25 }
 0x10a   : > { %915 = vmatpush3.bf16.msra.mxu0 %v631_v26  ;;  %916 = vmatprep.mubr.msk.bf16.mxu0 %vm1197_vm0, %v1196_v0 }
 0x10d   : > { %887 = vmatmul.mubr.msk.bf16.vlgmr.msra.gmra.mrb[0].mxu1 %vm223_vm2, %v369_v27 }
 0x115   : > { %917 = vmatmul.mubr.msk.bf16.vlgmr.msra.gmra.mrb[0].mxu0 %vm223_vm2, %v624_v28 }
 0x1e0   : > { %v412_v29 = vpop.f32.mrb[0].mxu1 }
 0x1e1   : > { %v888_v30 = vpop.f32.mrb[1].mxu1 }
 0x1e2   : > { %v415_v31 = vpop.f32.mrb[2].mxu1 }
 0x1e3   : > { %v889_v32 = vpop.f32.mrb[3].mxu1 }
 0x1e8   : > { %v667_v33 = vpop.f32.mrb[0].mxu0 }
 0x1e9   : > { %v920_v35 = vadd.f32 %v667_v33, %v412_v29  ;;  %v918_v36 = vpop.f32.mrb[1].mxu0 }
 0x1ea   : > { %v670_v37 = vpop.f32.mrb[2].mxu0 }
 0x1eb   : > { %v919_v38 = vpop.f32.mrb[3].mxu0  ;;  %v681_v39 = vmul.f32 %v920_v35, %v841_v34  ;;  %v686_v40 = vmul.f32 %v920_v35, %v920_v35 }
 0x1ed   : > { %v683_v41 = vsel %vm682_vm3, %v681_v39, 0.0  ;;  %v687_v42 = vmul.f32 %v841_v34, %v686_v40 }
 0x1ee   : > { %684 = vadd.xlane.f32.xlu0 %v683_v41 }
 0x1ef   : > { %v688_v43 = vsel %vm682_vm3, %v687_v42, 0.0 }
 0x1f0   : > { %689 = vadd.xlane.f32.xlu1 %v688_v43 }
 0x27b   : > { %v685_v44 = vpop.xlane.xlu0 %684 }
 0x27c   : > { %v692_v45 = vmul.f32 0.015625, %v685_v44 }
 0x27d   : > { %v690_v46 = vpop.xlane.xlu1 %689 }
 0x27e   : > { %v694_v47 = vmul.f32 %v692_v45, %v692_v45  ;;  %v693_v48 = vmul.f32 0.015625, %v690_v46  ;;  %v697_v53 = vsub.f32 %v920_v35, %v692_v45 }
 0x280   : > { %v695_v49 = vsub.f32 %v693_v48, %v694_v47 }
 0x282   : > { %v696_v50 = vmax.f32 %v695_v49, 0.0 }
 0x284   : > { %v698_v51 = vadd.f32 1e-05, %v696_v50 }
 0x286   : > { %1031 = vrsqrt.f32 %v698_v51 }
 0x290   : > { %v1032_v54 = vpop.eup %1031 }
 0x291   : > { %v700_v55 = vmul.f32 %v1032_v54, %v697_v53 }
 0x293   : > { %vm701_vm5 = vcmp.ge.f32.partialorder %v700_v55, 0.0  ;;  %v702_v56 = vmul.f32 0.2, %v700_v55 }
 0x295   : > { %v703_v57 = vsel %vm701_vm5, %v700_v55, %v702_v56 }
 0x296   : > { %v704_v58 = vmul.f32 %v841_v34, %v703_v57 }
 0x298   : > { %v847_v59 = vpack.c.bf16 %v704_v58, %v704_v58 }
 0x29a   : > { %711 = vrot.lane.b32.xlu0 %v847_v59, %s1207_s6 }
 0x30c   : > { %v712_v60 = vpop.permute.xlu0 %711 }
 0x30d   : > { %715 = vst.msk [vmem:[%s212_s23] sm:$0xf] %vm714_vm6, %v712_v60 }
 0x30e   : > { %1132 = shalt.err (!%p1129_p7)
}
 0x30f   : > { %s1133_s17 = scalar_lea.hbm %s1456_s24, 64  ;;  %s1137_s27 = scalar_lea.hbm %s1502_s3, 512 }
 0x310   : > { %p1134_p9 = scmp.ne.s32.totalorder %s1456_s24, %s1133_s17  ;;  %p1138_p0 = scmp.lt.u32.totalorder %s1456_s24, %s1502_s3 }
 0x311   : > { %p1139_p10 = scmp.lt.u32.totalorder %s1137_s27, %s1133_s17  ;;  %p1141_p1 = scmp.lt.u32.totalorder %s1133_s17, %s1456_s24 }
 0x312   : > { %p1135_p12 = pnand %p1134_p9, %p1342_p4 }
 0x313   : > { %p1140_p11 = por %p1139_p10, %p1138_p0 }
 0x314   : > { %p1136_p5 = pneg %p1135_p12 }
 0x315   : > { %p1142_p2 = por %p1141_p1, %p1140_p11 }
 0x317   : > { %p1143_p6 = pnand %p1142_p2, %p1136_p5 }
 0x319   : > { %1146 = shalt.err (!%p1143_p6)
}
 0x31a   : > { %959 = dma.vmem_to_hbm [thread:$0]  (%p1342_p4), %s1458_s10, 64, %s1456_s24, %s717_s22  }
 0x31b PF: > { %p981_p8 = scmp.ge.s32.totalorder %s1189_s15, 2  ;;  %s742_s4 = sand.u32 1, %s1177_s12  }
 0x31c   : > { %p1517_p13 = scmp.ne.s32.totalorder %s1507_s19, 0  ;;  %s743_s23 = scalar_lea.sflag [#allocation4], %s742_s4 }
 0x31e   : > { %p973_p3 = pnand %p981_p8, %p1517_p13 }
 0x320   : > { %1172 = dma.done.wait (!%p973_p3), %s743_s23, 64  }
 0x321   : > { %1174 = vsyncadd (!%p973_p3), %s743_s23, 4294967232  ;;  %p17_p7 = scmp.ge.s32.totalorder %s1332_s5, 10   ;;  %s1518_s12 = smov %s1181_s13 }
 0x322   : > { %s1519_s13 = smov %s1185_s14  ;;  %s1520_s14 = smov %s1348_s8 }
 0x323   : > { %s1521_s15 = smov %s1332_s5  ;;  %19 = sbr.rel (!%p17_p7) target bundleno = 6 (0x6), region = 93 }
 0x32a   :  { %748 = vsyncpa [#allocation3], 1 }
 0x32b   :  { %750 = vsyncpa [#allocation3 + $0x1], 1 }
 0x32c   :  { %751 = vsyncpa [#allocation6], 1 }
 0x32d   :  { %752 = vsyncpa [#allocation4], 1 }
 0x32e   :  { %754 = vsyncpa [#allocation4 + $0x1], 1 }

// kernel: sensitivity_model_forward.15
= control target key start
LH: loop header
LB: loop body
LE: loop exit
PB: predicated region body
PF: predicated region fallthrough
CT: control target
= control target key end

     0   :  { %8 = vsyncpa [#allocation3], 0  ;;  %s1571_s0 = inlined_call_operand.hbm [shape: bf16[8,4,100], index: 0, kind: input, shape index: {}]   ;;  %s1572_s1 = inlined_call_operand.hbm [shape: bf16[9,8,4], index: 1, kind: input, shape index: {}]   ;;  %s1573_s2 = inlined_call_operand.hbm [shape: f32[1,78], index: 2, kind: input, shape index: {}]   ;;  %s1574_s3 = inlined_call_operand.hbm [shape: bf16[8,8,100], index: 3, kind: output, shape index: {}]  }
   0x1   :  { %10 = vsyncpa [#allocation3 + $0x1], 0 }
   0x2   :  { %11 = vsyncpa [#allocation6], 0 }
   0x3   :  { %12 = vsyncpa [#allocation4], 0 }
   0x4   :  { %14 = vsyncpa [#allocation4 + $0x1], 0  ;;  %s1304_s12 = smov 0   ;;  %s1306_s13 = smov 0  }
   0x5   :  { %s1308_s14 = smov 0   ;;  %s1310_s15 = smov 0  }
   0x6 LB: > { %s1325_s16 = sadd.s32 4294967295, %s1263_s15   ;;  %s887_s17 = sadd.s32 4294967294, %s1263_s15   ;;  %s1263_s15 = sphi %s1310_s15, %s1593_s15   ;;  %s1259_s14 = sphi %s1308_s14, %s1592_s14   ;;  %s1255_s13 = sphi %s1306_s13, %s1591_s13   ;;  %s1251_s12 = sphi %s1304_s12, %s1590_s12  }
   0x7   : > { %p40_p0 = scmp.ne.s32.totalorder %s1255_s13, %s1251_s12  ;;  %p1575_p1 = scmp.eq.s32.totalorder %s1325_s16, 0 }
   0x8   : > { %p112_p3 = scmp.eq.s32.totalorder %s887_s17, 7  ;;  %p888_p5 = scmp.ge.s32.totalorder %s1263_s15, 1 }
   0x9   : > { %p1334_p4 = por %p1575_p1, %p40_p0  ;;  %p119_p7 = scmp.lt.s32.totalorder %s1263_s15, 9 }
   0xa   : > { %p1339_p6 = por %p112_p3, %p40_p0  ;;  %s1265_s21 = smov [#allocation5]  }
   0xb   : > { %s1578_s18 = scalar_select %p1334_p4, 1, 0 }
   0xc   : > { %s1579_s19 = scalar_select %p1339_p6, 1, 0 }
   0xd   : > { %p1344_p8 = pnand %p888_p5, %p119_p7  ;;  %s131_s22 = sshll.u32 %s1265_s21, 4  ;;  %s132_s22 = int_to_ptr.vmem [resolvable:$true] %s131_s22 }
   0xe   : > { %s1266_s24 = smov [#allocation7]   ;;  %s1107_s28 = scalar_lea.hbm %s1572_s1, 576 }
   0xf   : > { %s1580_s20 = scalar_select %p1344_p8, 1, 0 }
  0x10   : > { %p1035_p9 = pneg %p1344_p8  ;;  %s145_s25 = sshll.u32 %s1266_s24, 4  ;;  %s1356_s25 = int_to_ptr.vmem [resolvable:$true] %s145_s25 }
  0x11   : > { %p1108_p11 = scmp.ne.s32.totalorder %s1572_s1, %s1107_s28  ;;  %p1114_p3 = scmp.lt.u32.totalorder %s1107_s28, %s1572_s1 }
  0x12   : > { %p1352_p10 = pnand %p1035_p9, %p1575_p1 }
  0x14   : > { %p1109_p12 = pneg %p1352_p10 }
  0x16   : > { %p1110_p13 = pnand %p1109_p12, %p1108_p11 }
  0x18   : > { %p1111_p0 = pneg %p1110_p13 }
  0x1a   : > { %p1116_p5 = pnand %p1114_p3, %p1111_p0 }
  0x1c   : > { %1119 = shalt.err (!%p1116_p5)
}
  0x1d   : > { %s1120_s6 = scalar_lea.vmem %s132_s22, 576  ;;  %p1128_p2 = scmp.lt.s32.totalorder %s132_s22, %s132_s22 }
  0x1e   : > { %p1121_p7 = scmp.ne.s32.totalorder %s132_s22, %s1120_s6  ;;  %p1129_p6 = scmp.lt.s32.totalorder %s1120_s6, %s1120_s6 }
  0x20   : > { %p1123_p9 = pnand %p1121_p7, %p1109_p12  ;;  %p1130_p4 = por %p1129_p6, %p1128_p2 }
  0x22   : > { %p1124_p1 = pneg %p1123_p9 }
  0x24   : > { %p1131_p8 = pnand %p1130_p4, %p1124_p1 }
  0x26   : > { %1134 = shalt.err (!%p1131_p8)
}
  0x27   : > { %s1267_s7 = smov 64   ;;  %s1268_s8 = smov 4  }
  0x28   : > { %1038 = dma.hbm_to_vmem [thread:$0]  (!%p1352_p10), %s1572_s1, 576, %s132_s22, [#allocation6], %s1267_s7, %s1267_s7, %s1268_s8  }
  0x29   : > { %s1135_s21 = scalar_lea.hbm %s1573_s2, 16 }
  0x2a   : > { %p1136_p11 = scmp.ne.s32.totalorder %s1573_s2, %s1135_s21  ;;  %p1142_p4 = scmp.lt.u32.totalorder %s1135_s21, %s1573_s2 }
  0x2c   : > { %p1138_p1 = pnand %p1136_p11, %p1109_p12 }
  0x2e   : > { %p1139_p2 = pneg %p1138_p1 }
  0x30   : > { %p1144_p6 = pnand %p1142_p4, %p1139_p2 }
  0x32   : > { %1147 = shalt.err (!%p1144_p6)
}
  0x33   : > { %s1148_s22 = scalar_lea.vmem %s1356_s25, 16  ;;  %s1155_s29 = scalar_lea.vmem %s1356_s25, 32 }
  0x34   : > { %p1149_p8 = scmp.ne.s32.totalorder %s1356_s25, %s1148_s22  ;;  %p1156_p3 = scmp.lt.s32.totalorder %s1356_s25, %s1356_s25 }
  0x35   : > { %p1157_p5 = scmp.lt.s32.totalorder %s1155_s29, %s1148_s22 }
  0x36   : > { %p1151_p13 = pnand %p1149_p8, %p1109_p12 }
  0x37   : > { %p1158_p7 = por %p1157_p5, %p1156_p3 }
  0x38   : > { %p1152_p0 = pneg %p1151_p13 }
  0x3a   : > { %p1159_p9 = pnand %p1158_p7, %p1152_p0 }
  0x3c   : > { %1162 = shalt.err (!%p1159_p9)
}
  0x3d   : > { %1041 = dma.hbm_to_vmem [thread:$0]  (!%p1352_p10), %s1573_s2, 16, %s1356_s25, [#allocation6]  }
  0x3e   : > { %s1407_s5 = sadd.s32 1, %s1263_s15   ;;  %s27_s23 = sadd.s32 1, %s1259_s14 }
  0x3f   : > { %s24_s6 = ssub.s32 %s1263_s15, %s1407_s5  ;;  %p34_p12 = scmp.ne.s32.totalorder %s1259_s14, %s1255_s13 }
  0x40   : > { %p25_p11 = scmp.eq.s32.totalorder %s24_s6, 0  ;;  %p35_p1 = scmp.eq.s32.totalorder %s1263_s15, 0 }
  0x41   : > { %p1582_p2 = scmp.eq.s32.totalorder %s1325_s16, 7  ;;  %p1052_p6 = scmp.lt.s32.totalorder %s1263_s15, 8 }
  0x42   : > { %s1423_s8 = scalar_select %p25_p11, %s1259_s14, %s27_s23  }
  0x43   : > { %p1417_p4 = por %p1582_p2, %p34_p12  ;;  %p36_p8 = por %p35_p1, %p34_p12 }
  0x44   : > { %s156_s9 = sand.u32 1, %s1259_s14   ;;  %s893_s25 = sshll.u32 %s1263_s15, 5 }
  0x45   : > { %s892_s10 = sshll.u32 %s156_s9, 1  ;;  %s1430_s21 = scalar_lea.hbm %s1571_s0, %s893_s25 }
  0x46   : > { %s160_s24 = scalar_lea.vmem [#allocation2], %s892_s10  ;;  %p1434_p10 = pnand %p1052_p6, %p36_p8 }
  0x47   : > { %s167_s26 = sshll.u32 %s160_s24, 4  ;;  %s157_s28 = scalar_lea.sflag [#allocation3], %s156_s9  ;;  %s1432_s26 = int_to_ptr.vmem [resolvable:$true] %s167_s26 }
  0x48   : > { %s1163_s22 = scalar_lea.hbm %s1430_s21, 32  ;;  %p1165_p0 = pneg %p1434_p10 }
  0x49   : > { %p1164_p13 = scmp.ne.s32.totalorder %s1430_s21, %s1163_s22  ;;  %s1168_s4 = scalar_lea.hbm %s1571_s0, 256 }
  0x4a   : > { %p1169_p7 = scmp.lt.u32.totalorder %s1430_s21, %s1571_s0  ;;  %p1170_p9 = scmp.lt.u32.totalorder %s1168_s4, %s1163_s22 }
  0x4b   : > { %p1166_p3 = pnand %p1165_p0, %p1164_p13  ;;  %p1172_p11 = scmp.lt.u32.totalorder %s1163_s22, %s1430_s21 }
  0x4c   : > { %p1171_p12 = por %p1170_p9, %p1169_p7 }
  0x4d   : > { %p1167_p5 = pneg %p1166_p3 }
  0x4e   : > { %p1173_p1 = por %p1172_p11, %p1171_p12 }
  0x50   : > { %p1174_p2 = pnand %p1173_p1, %p1167_p5 }
  0x52   : > { %1177 = shalt.err (!%p1174_p2)
}
  0x53   : > { %s1178_s9 = scalar_lea.vmem %s1432_s26, 32  ;;  %s1269_s10 = smov [#allocation2]  }
  0x54   : > { %p1179_p6 = scmp.ne.s32.totalorder %s1432_s26, %s1178_s9  ;;  %s1183_s25 = sshll.u32 %s1269_s10, 4  ;;  %s1184_s25 = int_to_ptr.vmem [resolvable:$false] %s1183_s25 }
  0x55   : > { %s1185_s11 = scalar_lea.vmem %s1184_s25, 64  ;;  %p1186_p3 = scmp.lt.s32.totalorder %s1432_s26, %s1184_s25 }
  0x56   : > { %p1181_p8 = pnand %p1179_p6, %p1165_p0  ;;  %p1187_p7 = scmp.lt.s32.totalorder %s1185_s11, %s1178_s9 }
  0x58   : > { %p1182_p13 = pneg %p1181_p8  ;;  %p1188_p9 = por %p1187_p7, %p1186_p3 }
  0x5a   : > { %p1189_p12 = pnand %p1188_p9, %p1182_p13 }
  0x5c   : > { %1192 = shalt.err (!%p1189_p12)
}
  0x5d   : > { %1045 = dma.hbm_to_vmem [thread:$0]  (!%p1434_p10), %s1430_s21, 32, %s1432_s26, %s157_s28  }
  0x5e   : > { %p1585_p5 = scmp.ne.s32.totalorder %s1580_s20, 0 }
  0x5f   : > { %s1466_s17 = sand.u32 (!%p1585_p5), 1, %s1255_s13   ;;  %p1586_p0 = scmp.ne.s32.totalorder (!%p1585_p5), %s1578_s18, 0 }
  0x60   : > { %176 = sbr.rel (%p1585_p5) target bundleno = 795 (0x31b), region = 32  ;;  %s895_s24 = sshll.u32 (!%p1585_p5), %s1466_s17, 1 }
  0x61   : > { %s179_s22 = scalar_lea.sflag (!%p1585_p5), [#allocation3], %s1466_s17  ;;  %s182_s29 = scalar_lea.vmem (!%p1585_p5), [#allocation2], %s895_s24 }
  0x67   : > { %1238 = dma.done.wait (%p1586_p0), %s179_s22, 32  }
  0x68   : > { %1240 = vsyncadd (%p1586_p0), %s179_s22, 4294967264  ;;  %p1587_p11 = scmp.eq.s32.totalorder %s1325_s16, 0 }
  0x6a   : > { %1242 = dma.done.wait (%p1587_p11), [#allocation6], 592   ;;  %p1588_p10 = pmov %p1587_p11 }
  0x6b   : > { %v222_v0 = vlaneseq  ;;  %v1270_v1 = vmov 1983009808   ;;  %v1271_v4 = vmov 0.0   ;;  %vm1272_vm0 = vmmov 0   ;;  %v215_v8 = vld [vmem:[%s182_s29] sm:$0x3] }
  0x6c   : > { %1244 = vsyncadd (%p1588_p10), [#allocation6], 4294966704  ;;  %v220_v2 = vunpack.c.l.s4 %v1270_v1  ;;  %964 = vmatprep.subr.bf16.mxu0 %v1271_v4  ;;  %966 = vmatprep.mubr.msk.bf16.mxu0 %vm1272_vm0, %v1271_v4  ;;  %v905_v7 = vld.sshfl [vmem:[%s182_s29] sm:$0x3 pattern:$0x76325410] }
  0x6d   : > { %v223_v3 = vshrl.u32 %v222_v0, 7  ;;  %940 = vmatprep.subr.bf16.mxu1 %v1271_v4  ;;  %942 = vmatprep.mubr.msk.bf16.mxu1 %vm1272_vm0, %v1271_v4  ;;  %s1273_s18 = smov 117   ;;  %s1274_s20 = smov 116   ;;  %vm232_vm1 = vcmask 1041408   ;;  %vm228_vm2 = vcmask 31744   ;;  %vm750_vm3 = vcmask 637952  }
  0x6e   : > { %v221_v5 = vunpack.c.0.s8 %v220_v2  ;;  %453 = vrot.lane.b32.xlu0 %v905_v7, %s1273_s18  ;;  %513 = vrot.lane.b32.xlu1 %v905_v7, %s1274_s20  ;;  %s1275_s21 = smov 127   ;;  %s1276_s26 = smov 108   ;;  %v443_v13 = vld [vmem:[#allocation5 + $0x10] sm:$0xf]  ;;  %v217_v17 = vld [vmem:[#allocation5 + $0x4] sm:$0xf] }
  0x6f   : > { %s1277_s27 = smov 107   ;;  %s1278_s28 = smov 126   ;;  %v280_v18 = vsel %vm232_vm1, %v215_v8, 0  ;;  %v503_v20 = vld [vmem:[#allocation5 + $0x14] sm:$0xf]  ;;  %vm773_vm4 = vcmask 814080  }
  0x70   : > { %v224_v6 = vsub.s32 %v221_v5, %v223_v3  ;;  %s1279_s30 = smov 106   ;;  %s1280_s4 = smov 118   ;;  %v214_v23 = vld [vmem:[#allocation5] sm:$0xf]  ;;  %v563_v26 = vld [vmem:[#allocation5 + $0x18] sm:$0xf] }
  0x71   : > { %v323_v29 = vld [vmem:[#allocation5 + $0x8] sm:$0xf]  ;;  %v623_v32 = vld [vmem:[#allocation5 + $0x1c] sm:$0xf]  ;;  %v383_v34 = vld [vmem:[#allocation5 + $0xc] sm:$0xf] }
  0x72   : > { %v225_v9 = vrot.slane %v215_v8, %v224_v6  ;;  %573 = vrot.lane.b32.xlu1 %v905_v7, %s1276_s26  ;;  %v683_v35 = vld [vmem:[#allocation5 + $0x20] sm:$0xf]  ;;  %v915_v41 = vld [vmem:[#allocation7] ss:$0 sm:$0xff]  ;;  %s898_s23 = sshll.u32 %s1466_s17, 2  ;;  %v1281_v59 = vmov 0  }
  0x73   : > { %s212_s6 = scalar_lea.vmem [#allocation8], %s898_s23  ;;  %s1282_s9 = smov 11   ;;  %vm782_vm6 = vcmask 724056  }
  0x74   : > { %226 = vrot.lane.b32.xlu0 %v225_v9, %s1275_s21  ;;  %774 = vst.msk [vmem:[%s212_s6] sm:$0xf] %vm773_vm4, %v1281_v59  ;;  %s918_s10 = sshll.u32 %s1325_s16, 6  ;;  %s798_s25 = sshll.u32 %s212_s6, 4  ;;  %s1530_s25 = int_to_ptr.vmem [resolvable:$true] %s798_s25 }
  0x75   : > { %s1528_s22 = scalar_lea.hbm %s1574_s3, %s918_s10  ;;  %s785_s29 = scalar_lea.sflag [#allocation4], %s1466_s17 }
  0x76   : > { %633 = vrot.lane.b32.xlu1 %v905_v7, %s1277_s27  ;;  %s1193_s18 = scalar_lea.vmem %s1530_s25, 64  ;;  %s1283_s16 = smov [#allocation8]  }
  0x77   : > { %p1194_p1 = scmp.ne.s32.totalorder %s1530_s25, %s1193_s18  ;;  %s1197_s20 = sshll.u32 %s1283_s16, 4  ;;  %s1198_s20 = int_to_ptr.vmem [resolvable:$false] %s1197_s20 }
  0x78   : > { %333 = vrot.lane.b32.xlu0 %v905_v7, %s1278_s28  ;;  %s1199_s21 = scalar_lea.vmem %s1198_s20, 128  ;;  %p1200_p8 = scmp.lt.s32.totalorder %s1530_s25, %s1198_s20 }
  0x79   : > { %p1195_p2 = pnand %p1194_p1, %p1417_p4  ;;  %p1201_p13 = scmp.lt.s32.totalorder %s1199_s21, %s1193_s18 }
  0x7a   : > { %693 = vrot.lane.b32.xlu1 %v905_v7, %s1279_s30 }
  0x7b   : > { %p1196_p6 = pneg %p1195_p2  ;;  %p1202_p3 = por %p1201_p13, %p1200_p8 }
  0x7c   : > { %393 = vrot.lane.b32.xlu0 %v905_v7, %s1280_s4 }
  0x7d   : > { %p1203_p7 = pnand %p1202_p3, %p1196_p6 }
  0xe0   : > { %v454_v10 = vpop.permute.xlu0 %453  ;;  %v514_v11 = vpop.permute.xlu1 %513 }
  0xe1   : > { %v459_v12 = vsel %vm232_vm1, %v454_v10, 0  ;;  %v519_v14 = vsel %vm232_vm1, %v514_v11, 0 }
  0xe2   : > { %965 = vmatpush3.bf16.msra.mxu0 %v459_v12 }
  0xe3   : > { %970 = vmatprep.subr.bf16.mxu0 %v1271_v4 }
  0xe4   : > { %v574_v19 = vpop.permute.xlu1 %573 }
  0xe5   : > { %967 = vmatmul.mubr.msk.bf16.vlgmr.msra.gmra.mrb[0].mxu0 %vm228_vm2, %v443_v13  ;;  %v579_v21 = vsel %vm232_vm1, %v574_v19, 0 }
  0xe6   : > { %v227_v15 = vpop.permute.xlu0 %226  ;;  %971 = vmatpush3.bf16.msra.mxu0 %v519_v14  ;;  %972 = vmatprep.mubr.msk.bf16.mxu0 %vm1272_vm0, %v1271_v4 }
  0xe7   : > { %v234_v16 = vsel %vm232_vm1, %v227_v15, 0  ;;  %976 = vmatprep.subr.bf16.mxu0 %v1271_v4 }
  0xe8   : > { %941 = vmatpush3.bf16.msra.mxu1 %v234_v16  ;;  %v634_v25 = vpop.permute.xlu1 %633 }
  0xe9   : > { %946 = vmatprep.subr.bf16.mxu1 %v1271_v4  ;;  %v639_v27 = vsel %vm232_vm1, %v634_v25, 0 }
  0xea   : > { %v334_v22 = vpop.permute.xlu0 %333 }
  0xeb   : > { %943 = vmatmul.mubr.msk.bf16.vlgmr.msra.gmra.mrb[0].mxu1 %vm228_vm2, %v217_v17  ;;  %v339_v24 = vsel %vm232_vm1, %v334_v22, 0 }
  0xec   : > { %947 = vmatpush3.bf16.msra.mxu1 %v280_v18  ;;  %948 = vmatprep.mubr.msk.bf16.mxu1 %vm1272_vm0, %v1271_v4  ;;  %v694_v31 = vpop.permute.xlu1 %693 }
  0xed   : > { %952 = vmatprep.subr.bf16.mxu1 %v1271_v4  ;;  %v699_v33 = vsel %vm232_vm1, %v694_v31, 0 }
  0xee   : > { %v394_v28 = vpop.permute.xlu0 %393 }
  0xef   : > { %v399_v30 = vsel %vm232_vm1, %v394_v28, 0 }
  0xf1   : > { %973 = vmatmul.mubr.msk.bf16.vlgmr.msra.gmra.mrb[0].mxu0 %vm228_vm2, %v503_v20 }
  0xf2   : > { %977 = vmatpush3.bf16.msra.mxu0 %v579_v21  ;;  %978 = vmatprep.mubr.msk.bf16.mxu0 %vm1272_vm0, %v1271_v4 }
  0xf3   : > { %982 = vmatprep.subr.bf16.mxu0 %v1271_v4 }
  0xf7   : > { %949 = vmatmul.mubr.msk.bf16.vlgmr.msra.gmra.mrb[0].mxu1 %vm228_vm2, %v214_v23 }
  0xf8   : > { %953 = vmatpush3.bf16.msra.mxu1 %v339_v24  ;;  %954 = vmatprep.mubr.msk.bf16.mxu1 %vm1272_vm0, %v1271_v4 }
  0xf9   : > { %958 = vmatprep.subr.bf16.mxu1 %v1271_v4 }
  0xfd   : > { %979 = vmatmul.mubr.msk.bf16.vlgmr.msra.gmra.mrb[0].mxu0 %vm228_vm2, %v563_v26 }
  0xfe   : > { %983 = vmatpush3.bf16.msra.mxu0 %v639_v27  ;;  %984 = vmatprep.mubr.msk.bf16.mxu0 %vm1272_vm0, %v1271_v4 }
  0xff   : > { %988 = vmatprep.subr.bf16.mxu0 %v1271_v4 }
 0x103   : > { %955 = vmatmul.mubr.msk.bf16.vlgmr.msra.gmra.mrb[0].mxu1 %vm228_vm2, %v323_v29 }
 0x104   : > { %959 = vmatpush3.bf16.msra.mxu1 %v399_v30  ;;  %960 = vmatprep.mubr.msk.bf16.mxu1 %vm1272_vm0, %v1271_v4 }
 0x109   : > { %985 = vmatmul.mubr.msk.bf16.vlgmr.msra.gmra.mrb[0].mxu0 %vm228_vm2, %v623_v32 }
 0x10a   : > { %989 = vmatpush3.bf16.msra.mxu0 %v699_v33  ;;  %990 = vmatprep.mubr.msk.bf16.mxu0 %vm1272_vm0, %v1271_v4 }
 0x10f   : > { %961 = vmatmul.mubr.msk.bf16.vlgmr.msra.gmra.mrb[0].mxu1 %vm228_vm2, %v383_v34 }
 0x115   : > { %991 = vmatmul.mubr.msk.bf16.vlgmr.msra.gmra.mrb[0].mxu0 %vm228_vm2, %v683_v35 }
 0x1e2   : > { %v435_v36 = vpop.f32.mrb[0].mxu1 }
 0x1e3   : > { %v962_v37 = vpop.f32.mrb[1].mxu1 }
 0x1e4   : > { %v438_v38 = vpop.f32.mrb[2].mxu1 }
 0x1e5   : > { %v963_v39 = vpop.f32.mrb[3].mxu1 }
 0x1e8   : > { %v735_v40 = vpop.f32.mrb[0].mxu0 }
 0x1e9   : > { %v994_v42 = vadd.f32 %v735_v40, %v435_v36  ;;  %v992_v43 = vpop.f32.mrb[1].mxu0 }
 0x1ea   : > { %v738_v44 = vpop.f32.mrb[2].mxu0 }
 0x1eb   : > { %v993_v45 = vpop.f32.mrb[3].mxu0  ;;  %v749_v46 = vmul.f32 %v994_v42, %v915_v41  ;;  %v754_v47 = vmul.f32 %v994_v42, %v994_v42 }
 0x1ed   : > { %v751_v48 = vsel %vm750_vm3, %v749_v46, 0.0  ;;  %v755_v49 = vmul.f32 %v915_v41, %v754_v47 }
 0x1ee   : > { %752 = vadd.xlane.f32.xlu0 %v751_v48 }
 0x1ef   : > { %v756_v50 = vsel %vm750_vm3, %v755_v49, 0.0 }
 0x1f0   : > { %757 = vadd.xlane.f32.xlu1 %v756_v50 }
 0x27b   : > { %v753_v51 = vpop.xlane.xlu0 %752 }
 0x27c   : > { %v760_v52 = vmul.f32 0.015625, %v753_v51 }
 0x27d   : > { %v758_v53 = vpop.xlane.xlu1 %757 }
 0x27e   : > { %v762_v54 = vmul.f32 %v760_v52, %v760_v52  ;;  %v761_v55 = vmul.f32 0.015625, %v758_v53  ;;  %v765_v60 = vsub.f32 %v994_v42, %v760_v52 }
 0x280   : > { %v763_v56 = vsub.f32 %v761_v55, %v762_v54 }
 0x282   : > { %v764_v57 = vmax.f32 %v763_v56, 0.0 }
 0x284   : > { %v766_v58 = vadd.f32 1e-05, %v764_v57 }
 0x286   : > { %1105 = vrsqrt.f32 %v766_v58 }
 0x290   : > { %v1106_v61 = vpop.eup %1105 }
 0x291   : > { %v768_v62 = vmul.f32 %v1106_v61, %v765_v60 }
 0x293   : > { %vm769_vm5 = vcmp.ge.f32.partialorder %v768_v62, 0.0  ;;  %v770_v63 = vmul.f32 0.2, %v768_v62 }
 0x295   : > { %v771_v0 = vsel %vm769_vm5, %v768_v62, %v770_v63 }
 0x296   : > { %v772_v1 = vmul.f32 %v915_v41, %v771_v0 }
 0x298   : > { %v921_v2 = vpack.c.bf16 %v772_v1, %v772_v1 }
 0x29a   : > { %779 = vrot.lane.b32.xlu0 %v921_v2, %s1282_s9 }
 0x30c   : > { %v780_v3 = vpop.permute.xlu0 %779 }
 0x30d   : > { %783 = vst.msk [vmem:[%s212_s6] sm:$0xf] %vm782_vm6, %v780_v3 }
 0x30e   : > { %1206 = shalt.err (!%p1203_p7)
}
 0x30f   : > { %s1207_s17 = scalar_lea.hbm %s1528_s22, 64  ;;  %s1211_s28 = scalar_lea.hbm %s1574_s3, 512 }
 0x310   : > { %p1208_p9 = scmp.ne.s32.totalorder %s1528_s22, %s1207_s17  ;;  %p1212_p0 = scmp.lt.u32.totalorder %s1528_s22, %s1574_s3 }
 0x311   : > { %p1213_p11 = scmp.lt.u32.totalorder %s1211_s28, %s1207_s17  ;;  %p1215_p1 = scmp.lt.u32.totalorder %s1207_s17, %s1528_s22 }
 0x312   : > { %p1209_p12 = pnand %p1208_p9, %p1417_p4 }
 0x313   : > { %p1214_p10 = por %p1213_p11, %p1212_p0 }
 0x314   : > { %p1210_p5 = pneg %p1209_p12 }
 0x315   : > { %p1216_p2 = por %p1215_p1, %p1214_p10 }
 0x317   : > { %p1217_p6 = pnand %p1216_p2, %p1210_p5 }
 0x319   : > { %1220 = shalt.err (!%p1217_p6)
}
 0x31a   : > { %1033 = dma.vmem_to_hbm [thread:$0]  (%p1417_p4), %s1530_s25, 64, %s1528_s22, %s785_s29  }
 0x31b PF: > { %p1055_p8 = scmp.ge.s32.totalorder %s1263_s15, 2  ;;  %s810_s23 = sand.u32 1, %s1251_s12  }
 0x31c   : > { %p1589_p13 = scmp.ne.s32.totalorder %s1579_s19, 0  ;;  %s811_s6 = scalar_lea.sflag [#allocation4], %s810_s23 }
 0x31e   : > { %p1047_p3 = pnand %p1055_p8, %p1589_p13 }
 0x320   : > { %1246 = dma.done.wait (!%p1047_p3), %s811_s6, 64  }
 0x321   : > { %1248 = vsyncadd (!%p1047_p3), %s811_s6, 4294967232  ;;  %p17_p7 = scmp.ge.s32.totalorder %s1407_s5, 10   ;;  %s1590_s12 = smov %s1255_s13 }
 0x322   : > { %s1591_s13 = smov %s1259_s14  ;;  %s1592_s14 = smov %s1423_s8 }
 0x323   : > { %s1593_s15 = smov %s1407_s5  ;;  %19 = sbr.rel (!%p17_p7) target bundleno = 6 (0x6), region = 93 }
 0x32a   :  { %816 = vsyncpa [#allocation3], 1 }
 0x32b   :  { %818 = vsyncpa [#allocation3 + $0x1], 1 }
 0x32c   :  { %819 = vsyncpa [#allocation6], 1 }
 0x32d   :  { %820 = vsyncpa [#allocation4], 1 }
 0x32e   :  { %822 = vsyncpa [#allocation4 + $0x1], 1 }

// kernel: sensitivity_model_forward.17
= control target key start
LH: loop header
LB: loop body
LE: loop exit
PB: predicated region body
PF: predicated region fallthrough
CT: control target
= control target key end

     0   :  { %8 = vsyncpa [#allocation3], 0  ;;  %s1636_s0 = inlined_call_operand.hbm [shape: bf16[8,8,36], index: 0, kind: input, shape index: {}]   ;;  %s1637_s1 = inlined_call_operand.hbm [shape: bf16[9,16,8], index: 1, kind: input, shape index: {}]   ;;  %s1638_s2 = inlined_call_operand.hbm [shape: f32[1,22], index: 2, kind: input, shape index: {}]   ;;  %s1639_s3 = inlined_call_operand.hbm [shape: bf16[8,16,36], index: 3, kind: output, shape index: {}]  }
   0x1   :  { %10 = vsyncpa [#allocation3 + $0x1], 0 }
   0x2   :  { %11 = vsyncpa [#allocation6], 0 }
   0x3   :  { %12 = vsyncpa [#allocation4], 0 }
   0x4   :  { %14 = vsyncpa [#allocation4 + $0x1], 0  ;;  %s1360_s12 = smov 0   ;;  %s1362_s13 = smov 0  }
   0x5   :  { %s1364_s14 = smov 0   ;;  %s1366_s15 = smov 0  }
   0x6 LB: > { %s1381_s16 = sadd.s32 4294967295, %s1318_s15   ;;  %s921_s17 = sadd.s32 4294967294, %s1318_s15   ;;  %s1318_s15 = sphi %s1366_s15, %s1658_s15   ;;  %s1314_s14 = sphi %s1364_s14, %s1657_s14   ;;  %s1310_s13 = sphi %s1362_s13, %s1656_s13   ;;  %s1306_s12 = sphi %s1360_s12, %s1655_s12  }
   0x7   : > { %p40_p0 = scmp.ne.s32.totalorder %s1310_s13, %s1306_s12  ;;  %p1640_p1 = scmp.eq.s32.totalorder %s1381_s16, 0 }
   0x8   : > { %p112_p3 = scmp.eq.s32.totalorder %s921_s17, 7  ;;  %p922_p5 = scmp.ge.s32.totalorder %s1318_s15, 1 }
   0x9   : > { %p1390_p4 = por %p1640_p1, %p40_p0  ;;  %p119_p7 = scmp.lt.s32.totalorder %s1318_s15, 9 }
   0xa   : > { %p1395_p6 = por %p112_p3, %p40_p0  ;;  %s1320_s21 = smov [#allocation5]  }
   0xb   : > { %s1643_s18 = scalar_select %p1390_p4, 1, 0 }
   0xc   : > { %s1644_s19 = scalar_select %p1395_p6, 1, 0 }
   0xd   : > { %p1400_p8 = pnand %p922_p5, %p119_p7  ;;  %s131_s22 = sshll.u32 %s1320_s21, 4  ;;  %s132_s22 = int_to_ptr.vmem [resolvable:$true] %s131_s22 }
   0xe   : > { %s1321_s24 = smov [#allocation7]   ;;  %s1162_s28 = scalar_lea.hbm %s1637_s1, 1152 }
   0xf   : > { %s1645_s20 = scalar_select %p1400_p8, 1, 0 }
  0x10   : > { %p1077_p9 = pneg %p1400_p8  ;;  %s145_s25 = sshll.u32 %s1321_s24, 4  ;;  %s1412_s25 = int_to_ptr.vmem [resolvable:$true] %s145_s25 }
  0x11   : > { %p1163_p11 = scmp.ne.s32.totalorder %s1637_s1, %s1162_s28  ;;  %p1169_p3 = scmp.lt.u32.totalorder %s1162_s28, %s1637_s1 }
  0x12   : > { %p1408_p10 = pnand %p1077_p9, %p1640_p1 }
  0x14   : > { %p1164_p12 = pneg %p1408_p10 }
  0x16   : > { %p1165_p13 = pnand %p1164_p12, %p1163_p11 }
  0x18   : > { %p1166_p0 = pneg %p1165_p13 }
  0x1a   : > { %p1171_p5 = pnand %p1169_p3, %p1166_p0 }
  0x1c   : > { %1174 = shalt.err (!%p1171_p5)
}
  0x1d   : > { %s1175_s6 = scalar_lea.vmem %s132_s22, 1152  ;;  %p1183_p2 = scmp.lt.s32.totalorder %s132_s22, %s132_s22 }
  0x1e   : > { %p1176_p7 = scmp.ne.s32.totalorder %s132_s22, %s1175_s6  ;;  %p1184_p6 = scmp.lt.s32.totalorder %s1175_s6, %s1175_s6 }
  0x20   : > { %p1178_p9 = pnand %p1176_p7, %p1164_p12  ;;  %p1185_p4 = por %p1184_p6, %p1183_p2 }
  0x22   : > { %p1179_p1 = pneg %p1178_p9 }
  0x24   : > { %p1186_p8 = pnand %p1185_p4, %p1179_p1 }
  0x26   : > { %1189 = shalt.err (!%p1186_p8)
}
  0x27   : > { %s1322_s7 = smov 64   ;;  %s1323_s8 = smov 4  }
  0x28   : > { %1080 = dma.hbm_to_vmem [thread:$0]  (!%p1408_p10), %s1637_s1, 1152, %s132_s22, [#allocation6], %s1322_s7, %s1322_s7, %s1323_s8  }
  0x29   : > { %s1190_s21 = scalar_lea.hbm %s1638_s2, 16 }
  0x2a   : > { %p1191_p11 = scmp.ne.s32.totalorder %s1638_s2, %s1190_s21  ;;  %p1197_p4 = scmp.lt.u32.totalorder %s1190_s21, %s1638_s2 }
  0x2c   : > { %p1193_p1 = pnand %p1191_p11, %p1164_p12 }
  0x2e   : > { %p1194_p2 = pneg %p1193_p1 }
  0x30   : > { %p1199_p6 = pnand %p1197_p4, %p1194_p2 }
  0x32   : > { %1202 = shalt.err (!%p1199_p6)
}
  0x33   : > { %s1203_s22 = scalar_lea.vmem %s1412_s25, 16  ;;  %s1210_s29 = scalar_lea.vmem %s1412_s25, 32 }
  0x34   : > { %p1204_p8 = scmp.ne.s32.totalorder %s1412_s25, %s1203_s22  ;;  %p1211_p3 = scmp.lt.s32.totalorder %s1412_s25, %s1412_s25 }
  0x35   : > { %p1212_p5 = scmp.lt.s32.totalorder %s1210_s29, %s1203_s22 }
  0x36   : > { %p1206_p13 = pnand %p1204_p8, %p1164_p12 }
  0x37   : > { %p1213_p7 = por %p1212_p5, %p1211_p3 }
  0x38   : > { %p1207_p0 = pneg %p1206_p13 }
  0x3a   : > { %p1214_p9 = pnand %p1213_p7, %p1207_p0 }
  0x3c   : > { %1217 = shalt.err (!%p1214_p9)
}
  0x3d   : > { %1083 = dma.hbm_to_vmem [thread:$0]  (!%p1408_p10), %s1638_s2, 16, %s1412_s25, [#allocation6]  }
  0x3e   : > { %s1463_s5 = sadd.s32 1, %s1318_s15   ;;  %s27_s23 = sadd.s32 1, %s1314_s14 }
  0x3f   : > { %s24_s6 = ssub.s32 %s1318_s15, %s1463_s5  ;;  %p34_p12 = scmp.ne.s32.totalorder %s1314_s14, %s1310_s13 }
  0x40   : > { %p25_p11 = scmp.eq.s32.totalorder %s24_s6, 0  ;;  %p35_p1 = scmp.eq.s32.totalorder %s1318_s15, 0 }
  0x41   : > { %p1647_p2 = scmp.eq.s32.totalorder %s1381_s16, 7  ;;  %p1094_p6 = scmp.lt.s32.totalorder %s1318_s15, 8 }
  0x42   : > { %s1479_s8 = scalar_select %p25_p11, %s1314_s14, %s27_s23  }
  0x43   : > { %p1473_p4 = por %p1647_p2, %p34_p12  ;;  %p36_p8 = por %p35_p1, %p34_p12 }
  0x44   : > { %s156_s9 = sand.u32 1, %s1314_s14   ;;  %s927_s25 = sshll.u32 %s1318_s15, 6 }
  0x45   : > { %s926_s10 = sshll.u32 %s156_s9, 2  ;;  %s1486_s21 = scalar_lea.hbm %s1636_s0, %s927_s25 }
  0x46   : > { %s160_s24 = scalar_lea.vmem [#allocation2], %s926_s10  ;;  %p1490_p10 = pnand %p1094_p6, %p36_p8 }
  0x47   : > { %s167_s26 = sshll.u32 %s160_s24, 4  ;;  %s157_s28 = scalar_lea.sflag [#allocation3], %s156_s9  ;;  %s1488_s26 = int_to_ptr.vmem [resolvable:$true] %s167_s26 }
  0x48   : > { %s1218_s22 = scalar_lea.hbm %s1486_s21, 64  ;;  %p1220_p0 = pneg %p1490_p10 }
  0x49   : > { %p1219_p13 = scmp.ne.s32.totalorder %s1486_s21, %s1218_s22  ;;  %s1223_s4 = scalar_lea.hbm %s1636_s0, 512 }
  0x4a   : > { %p1224_p7 = scmp.lt.u32.totalorder %s1486_s21, %s1636_s0  ;;  %p1225_p9 = scmp.lt.u32.totalorder %s1223_s4, %s1218_s22 }
  0x4b   : > { %p1221_p3 = pnand %p1220_p0, %p1219_p13  ;;  %p1227_p11 = scmp.lt.u32.totalorder %s1218_s22, %s1486_s21 }
  0x4c   : > { %p1226_p12 = por %p1225_p9, %p1224_p7 }
  0x4d   : > { %p1222_p5 = pneg %p1221_p3 }
  0x4e   : > { %p1228_p1 = por %p1227_p11, %p1226_p12 }
  0x50   : > { %p1229_p2 = pnand %p1228_p1, %p1222_p5 }
  0x52   : > { %1232 = shalt.err (!%p1229_p2)
}
  0x53   : > { %s1233_s9 = scalar_lea.vmem %s1488_s26, 64  ;;  %s1324_s10 = smov [#allocation2]  }
  0x54   : > { %p1234_p6 = scmp.ne.s32.totalorder %s1488_s26, %s1233_s9  ;;  %s1238_s25 = sshll.u32 %s1324_s10, 4  ;;  %s1239_s25 = int_to_ptr.vmem [resolvable:$false] %s1238_s25 }
  0x55   : > { %s1240_s11 = scalar_lea.vmem %s1239_s25, 128  ;;  %p1241_p3 = scmp.lt.s32.totalorder %s1488_s26, %s1239_s25 }
  0x56   : > { %p1236_p8 = pnand %p1234_p6, %p1220_p0  ;;  %p1242_p7 = scmp.lt.s32.totalorder %s1240_s11, %s1233_s9 }
  0x58   : > { %p1237_p13 = pneg %p1236_p8  ;;  %p1243_p9 = por %p1242_p7, %p1241_p3 }
  0x5a   : > { %p1244_p12 = pnand %p1243_p9, %p1237_p13 }
  0x5c   : > { %1247 = shalt.err (!%p1244_p12)
}
  0x5d   : > { %1087 = dma.hbm_to_vmem [thread:$0]  (!%p1490_p10), %s1486_s21, 64, %s1488_s26, %s157_s28  }
  0x5e   : > { %p1650_p5 = scmp.ne.s32.totalorder %s1645_s20, 0 }
  0x5f   : > { %s1522_s17 = sand.u32 (!%p1650_p5), 1, %s1310_s13   ;;  %p1651_p0 = scmp.ne.s32.totalorder (!%p1650_p5), %s1643_s18, 0 }
  0x60   : > { %176 = sbr.rel (%p1650_p5) target bundleno = 802 (0x322), region = 32  ;;  %s929_s24 = sshll.u32 (!%p1650_p5), %s1522_s17, 2 }
  0x61   : > { %s179_s22 = scalar_lea.sflag (!%p1650_p5), [#allocation3], %s1522_s17  ;;  %s182_s29 = scalar_lea.vmem (!%p1650_p5), [#allocation2], %s929_s24 }
  0x67   : > { %1293 = dma.done.wait (%p1651_p0), %s179_s22, 64  }
  0x68   : > { %1295 = vsyncadd (%p1651_p0), %s179_s22, 4294967232  ;;  %p1652_p11 = scmp.eq.s32.totalorder %s1381_s16, 0 }
  0x6a   : > { %1297 = dma.done.wait (%p1652_p11), [#allocation6], 1168   ;;  %p1653_p10 = pmov %p1652_p11 }
  0x6b   : > { %v1325_v0 = vmov 0.0   ;;  %vm1326_vm0 = vmmov 0   ;;  %v216_v1 = vld [vmem:[%s182_s29] sm:$0xf]  ;;  %s1327_s18 = smov 121   ;;  %s1328_s20 = smov 120  }
  0x6c   : > { %1299 = vsyncadd (%p1653_p10), [#allocation6], 4294966128  ;;  %1005 = vmatprep.subr.bf16.mxu0 %v1325_v0  ;;  %981 = vmatprep.subr.bf16.mxu1 %v1325_v0  ;;  %v934_v2 = vcombine.low %v216_v1, %v216_v1  ;;  %s1329_s21 = smov 127   ;;  %s1330_s26 = smov 116   ;;  %vm234_vm1 = vcmask 1043456   ;;  %v1149_v6 = vld [vmem:[#allocation5 + $0x20] sm:$0xff]  }
  0x6d   : > { %1007 = vmatprep.mubr.msk.bf16.mxu0 %vm1326_vm0, %v1325_v0  ;;  %983 = vmatprep.mubr.msk.bf16.mxu1 %vm1326_vm0, %v1325_v0  ;;  %s1331_s27 = smov 115   ;;  %s1332_s28 = smov 126   ;;  %vm230_vm2 = vcmask 64512   ;;  %v1150_v10 = vld [vmem:[#allocation5 + $0x8] sm:$0xff]   ;;  %v288_v11 = vsel %vm234_vm1, %v216_v1, 0  ;;  %v1152_v16 = vld [vmem:[#allocation5] sm:$0xff]  }
  0x6e   : > { %457 = vrot.lane.b32.xlu0 %v934_v2, %s1327_s18  ;;  %516 = vrot.lane.b32.xlu1 %v934_v2, %s1328_s20  ;;  %s1333_s30 = smov 114   ;;  %s1334_s4 = smov 122   ;;  %v1151_v13 = vld [vmem:[#allocation5 + $0x28] sm:$0xff]   ;;  %v1153_v19 = vld [vmem:[#allocation5 + $0x30] sm:$0xff]   ;;  %v1155_v25 = vld [vmem:[#allocation5 + $0x38] sm:$0xff]   ;;  %vm753_vm3 = vcmask 179200  }
  0x6f   : > { %v1154_v22 = vld [vmem:[#allocation5 + $0x10] sm:$0xff]   ;;  %v1156_v27 = vld [vmem:[#allocation5 + $0x18] sm:$0xff]   ;;  %v1157_v28 = vld [vmem:[#allocation5 + $0x40] sm:$0xff]   ;;  %s932_s23 = sshll.u32 %s1522_s17, 3  ;;  %vm797_vm4 = vcmask 289792   ;;  %v1335_v50 = vmov 0  }
  0x70   : > { %v952_v34 = vld [vmem:[#allocation7] ss:$0 sm:$0xff]  ;;  %s1580_s6 = scalar_lea.vmem [#allocation8], %s932_s23  ;;  %s1336_s9 = smov 7   ;;  %vm812_vm7 = vcmask 232504  }
  0x71   : > { %798 = vst.msk [vmem:[%s1580_s6] sm:$0xf] %vm797_vm4, %v1335_v50  ;;  %799 = vst.msk [vmem:[%s1580_s6 + $0x4] sm:$0xf] %vm797_vm4, %v1335_v50  ;;  %s962_s10 = sshll.u32 %s1381_s16, 7  ;;  %s829_s25 = sshll.u32 %s1580_s6, 4  ;;  %s1592_s25 = int_to_ptr.vmem [resolvable:$true] %s829_s25 }
  0x72   : > { %228 = vrot.lane.b32.xlu0 %v934_v2, %s1329_s21  ;;  %575 = vrot.lane.b32.xlu1 %v934_v2, %s1330_s26  ;;  %s1590_s22 = scalar_lea.hbm %s1639_s3, %s962_s10  ;;  %s816_s29 = scalar_lea.sflag [#allocation4], %s1522_s17 }
  0x73   : > { %s1248_s18 = scalar_lea.vmem %s1592_s25, 128  ;;  %s1337_s16 = smov [#allocation8]  }
  0x74   : > { %p1249_p1 = scmp.ne.s32.totalorder %s1592_s25, %s1248_s18  ;;  %s1252_s20 = sshll.u32 %s1337_s16, 4  ;;  %s1253_s20 = int_to_ptr.vmem [resolvable:$false] %s1252_s20 }
  0x75   : > { %s1254_s21 = scalar_lea.vmem %s1253_s20, 256  ;;  %p1255_p8 = scmp.lt.s32.totalorder %s1592_s25, %s1253_s20 }
  0x76   : > { %634 = vrot.lane.b32.xlu1 %v934_v2, %s1331_s27  ;;  %339 = vrot.lane.b32.xlu0 %v934_v2, %s1332_s28  ;;  %p1250_p2 = pnand %p1249_p1, %p1473_p4  ;;  %p1256_p13 = scmp.lt.s32.totalorder %s1254_s21, %s1248_s18 }
  0x78   : > { %p1251_p6 = pneg %p1250_p2  ;;  %p1257_p3 = por %p1256_p13, %p1255_p8 }
  0x7a   : > { %693 = vrot.lane.b32.xlu1 %v934_v2, %s1333_s30  ;;  %398 = vrot.lane.b32.xlu0 %v934_v2, %s1334_s4  ;;  %p1258_p7 = pnand %p1257_p3, %p1251_p6 }
  0xe0   : > { %v458_v3 = vpop.permute.xlu0 %457  ;;  %v517_v4 = vpop.permute.xlu1 %516 }
  0xe1   : > { %v463_v5 = vsel %vm234_vm1, %v458_v3, 0  ;;  %v522_v7 = vsel %vm234_vm1, %v517_v4, 0 }
  0xe2   : > { %1006 = vmatpush3.bf16.msra.mxu0 %v463_v5 }
  0xe3   : > { %1011 = vmatprep.subr.bf16.mxu0 %v1325_v0 }
  0xe4   : > { %v229_v8 = vpop.permute.xlu0 %228  ;;  %v576_v12 = vpop.permute.xlu1 %575 }
  0xe5   : > { %1008 = vmatmul.mubr.msk.bf16.vlgmr.msra.gmra.mrb[0].mxu0 %vm230_vm2, %v1149_v6  ;;  %v236_v9 = vsel %vm234_vm1, %v229_v8, 0  ;;  %v581_v14 = vsel %vm234_vm1, %v576_v12, 0 }
  0xe6   : > { %982 = vmatpush3.bf16.msra.mxu1 %v236_v9  ;;  %1012 = vmatpush3.bf16.msra.mxu0 %v522_v7 }
  0xe7   : > { %1013 = vmatprep.mubr.msk.bf16.mxu0 %vm1326_vm0, %v1325_v0  ;;  %987 = vmatprep.subr.bf16.mxu1 %v1325_v0 }
  0xe8   : > { %1017 = vmatprep.subr.bf16.mxu0 %v1325_v0  ;;  %v340_v15 = vpop.permute.xlu0 %339  ;;  %v635_v18 = vpop.permute.xlu1 %634 }
  0xe9   : > { %984 = vmatmul.mubr.msk.bf16.vlgmr.msra.gmra.mrb[0].mxu1 %vm230_vm2, %v1150_v10  ;;  %v345_v17 = vsel %vm234_vm1, %v340_v15, 0  ;;  %v640_v20 = vsel %vm234_vm1, %v635_v18, 0 }
  0xea   : > { %988 = vmatpush3.bf16.msra.mxu1 %v288_v11  ;;  %989 = vmatprep.mubr.msk.bf16.mxu1 %vm1326_vm0, %v1325_v0 }
  0xeb   : > { %993 = vmatprep.subr.bf16.mxu1 %v1325_v0 }
  0xec   : > { %v399_v21 = vpop.permute.xlu0 %398  ;;  %v694_v24 = vpop.permute.xlu1 %693 }
  0xed   : > { %v404_v23 = vsel %vm234_vm1, %v399_v21, 0  ;;  %v699_v26 = vsel %vm234_vm1, %v694_v24, 0 }
  0xf1   : > { %1014 = vmatmul.mubr.msk.bf16.vlgmr.msra.gmra.mrb[0].mxu0 %vm230_vm2, %v1151_v13 }
  0xf2   : > { %1018 = vmatpush3.bf16.msra.mxu0 %v581_v14  ;;  %1019 = vmatprep.mubr.msk.bf16.mxu0 %vm1326_vm0, %v1325_v0 }
  0xf3   : > { %1023 = vmatprep.subr.bf16.mxu0 %v1325_v0 }
  0xf5   : > { %990 = vmatmul.mubr.msk.bf16.vlgmr.msra.gmra.mrb[0].mxu1 %vm230_vm2, %v1152_v16 }
  0xf6   : > { %994 = vmatpush3.bf16.msra.mxu1 %v345_v17  ;;  %995 = vmatprep.mubr.msk.bf16.mxu1 %vm1326_vm0, %v1325_v0 }
  0xf7   : > { %999 = vmatprep.subr.bf16.mxu1 %v1325_v0 }
  0xfd   : > { %1020 = vmatmul.mubr.msk.bf16.vlgmr.msra.gmra.mrb[0].mxu0 %vm230_vm2, %v1153_v19 }
  0xfe   : > { %1024 = vmatpush3.bf16.msra.mxu0 %v640_v20  ;;  %1025 = vmatprep.mubr.msk.bf16.mxu0 %vm1326_vm0, %v1325_v0 }
  0xff   : > { %1029 = vmatprep.subr.bf16.mxu0 %v1325_v0 }
 0x101   : > { %996 = vmatmul.mubr.msk.bf16.vlgmr.msra.gmra.mrb[0].mxu1 %vm230_vm2, %v1154_v22 }
 0x102   : > { %1000 = vmatpush3.bf16.msra.mxu1 %v404_v23  ;;  %1001 = vmatprep.mubr.msk.bf16.mxu1 %vm1326_vm0, %v1325_v0 }
 0x109   : > { %1026 = vmatmul.mubr.msk.bf16.vlgmr.msra.gmra.mrb[0].mxu0 %vm230_vm2, %v1155_v25 }
 0x10a   : > { %1030 = vmatpush3.bf16.msra.mxu0 %v699_v26  ;;  %1031 = vmatprep.mubr.msk.bf16.mxu0 %vm1326_vm0, %v1325_v0 }
 0x10d   : > { %1002 = vmatmul.mubr.msk.bf16.vlgmr.msra.gmra.mrb[0].mxu1 %vm230_vm2, %v1156_v27 }
 0x115   : > { %1032 = vmatmul.mubr.msk.bf16.vlgmr.msra.gmra.mrb[0].mxu0 %vm230_vm2, %v1157_v28 }
 0x1e0   : > { %v440_v29 = vpop.f32.mrb[0].mxu1 }
 0x1e1   : > { %v1003_v30 = vpop.f32.mrb[1].mxu1 }
 0x1e2   : > { %v443_v31 = vpop.f32.mrb[2].mxu1 }
 0x1e3   : > { %v1004_v32 = vpop.f32.mrb[3].mxu1 }
 0x1e8   : > { %v735_v33 = vpop.f32.mrb[0].mxu0 }
 0x1e9   : > { %v1035_v35 = vadd.f32 %v735_v33, %v440_v29  ;;  %v1033_v36 = vpop.f32.mrb[1].mxu0 }
 0x1ea   : > { %v738_v37 = vpop.f32.mrb[2].mxu0 }
 0x1eb   : > { %v1036_v38 = vadd.f32 %v738_v37, %v443_v31  ;;  %v1034_v39 = vpop.f32.mrb[3].mxu0  ;;  %v751_v40 = vmul.f32 %v1035_v35, %v952_v34  ;;  %v760_v41 = vmul.f32 %v1035_v35, %v1035_v35 }
 0x1ed   : > { %v754_v42 = vsel %vm753_vm3, %v751_v40, 0.0  ;;  %v752_v43 = vmul.f32 %v1036_v38, %v952_v34  ;;  %v762_v44 = vmul.f32 %v952_v34, %v760_v41  ;;  %v761_v45 = vmul.f32 %v1036_v38, %v1036_v38 }
 0x1ee   : > { %755 = vadd.xlane.f32.xlu0 %v754_v42 }
 0x1ef   : > { %v757_v46 = vsel %vm753_vm3, %v752_v43, 0.0  ;;  %v764_v47 = vsel %vm753_vm3, %v762_v44, 0.0  ;;  %v763_v48 = vmul.f32 %v952_v34, %v761_v45 }
 0x1f0   : > { %758 = vadd.xlane.f32.xlu1 %v757_v46 }
 0x1f1   : > { %v767_v49 = vsel %vm753_vm3, %v763_v48, 0.0 }
 0x1f2   : > { %765 = vadd.xlane.f32.xlu0 %v764_v47 }
 0x1f6   : > { %768 = vadd.xlane.f32.xlu0 %v767_v49 }
 0x27b   : > { %v756_v51 = vpop.xlane.xlu0 %755 }
 0x27c   : > { %v771_v52 = vmul.f32 0.0625, %v756_v51 }
 0x27d   : > { %v759_v53 = vpop.xlane.xlu1 %758 }
 0x27e   : > { %v775_v55 = vmul.f32 %v771_v52, %v771_v52  ;;  %v772_v56 = vmul.f32 0.0625, %v759_v53  ;;  %v781_v3 = vsub.f32 %v1035_v35, %v771_v52 }
 0x27f   : > { %v766_v54 = vpop.xlane.xlu0 %765 }
 0x280   : > { %v773_v57 = vmul.f32 0.0625, %v766_v54  ;;  %v776_v60 = vmul.f32 %v772_v56, %v772_v56  ;;  %v782_v6 = vsub.f32 %v1036_v38, %v772_v56 }
 0x282   : > { %v777_v58 = vsub.f32 %v773_v57, %v775_v55 }
 0x283   : > { %v769_v59 = vpop.xlane.xlu0 %768 }
 0x284   : > { %v779_v61 = vmax.f32 %v777_v58, 0.0  ;;  %v774_v62 = vmul.f32 0.0625, %v769_v59 }
 0x286   : > { %v783_v63 = vadd.f32 1e-05, %v779_v61  ;;  %v778_v0 = vsub.f32 %v774_v62, %v776_v60 }
 0x288   : > { %1158 = vrsqrt.f32 %v783_v63  ;;  %v780_v1 = vmax.f32 %v778_v0, 0.0 }
 0x28a   : > { %v784_v2 = vadd.f32 1e-05, %v780_v1 }
 0x28c   : > { %1160 = vrsqrt.f32 %v784_v2 }
 0x292   : > { %v1159_v4 = vpop.eup %1158 }
 0x293   : > { %v787_v5 = vmul.f32 %v1159_v4, %v781_v3 }
 0x295   : > { %vm789_vm5 = vcmp.ge.f32.partialorder %v787_v5, 0.0  ;;  %v791_v7 = vmul.f32 0.2, %v787_v5 }
 0x296   : > { %v1161_v8 = vpop.eup %1160 }
 0x297   : > { %v793_v9 = vsel %vm789_vm5, %v787_v5, %v791_v7  ;;  %v788_v10 = vmul.f32 %v1161_v8, %v782_v6 }
 0x298   : > { %v795_v11 = vmul.f32 %v952_v34, %v793_v9 }
 0x299   : > { %vm790_vm6 = vcmp.ge.f32.partialorder %v788_v10, 0.0  ;;  %v792_v12 = vmul.f32 0.2, %v788_v10 }
 0x29a   : > { %v960_v13 = vpack.c.bf16 %v795_v11, %v795_v11 }
 0x29b   : > { %v794_v14 = vsel %vm790_vm6, %v788_v10, %v792_v12 }
 0x29c   : > { %806 = vrot.lane.b32.xlu1 %v960_v13, %s1336_s9  ;;  %v796_v15 = vmul.f32 %v952_v34, %v794_v14 }
 0x29e   : > { %v961_v16 = vpack.c.bf16 %v796_v15, %v796_v15 }
 0x2a0   : > { %808 = vrot.lane.b32.xlu0 %v961_v16, %s1336_s9 }
 0x30e   : > { %v807_v17 = vpop.permute.xlu1 %806 }
 0x30f   : > { %813 = vst.msk [vmem:[%s1580_s6] sm:$0xf] %vm812_vm7, %v807_v17 }
 0x312   : > { %v809_v18 = vpop.permute.xlu0 %808 }
 0x313   : > { %814 = vst.msk [vmem:[%s1580_s6 + $0x4] sm:$0xf] %vm812_vm7, %v809_v18 }
 0x314   : > { %1261 = shalt.err (!%p1258_p7)
}
 0x315   : > { %s1262_s26 = scalar_lea.hbm %s1590_s22, 128  ;;  %s1266_s30 = scalar_lea.hbm %s1639_s3, 1024 }
 0x316   : > { %p1263_p9 = scmp.ne.s32.totalorder %s1590_s22, %s1262_s26  ;;  %p1267_p0 = scmp.lt.u32.totalorder %s1590_s22, %s1639_s3 }
 0x317   : > { %p1268_p11 = scmp.lt.u32.totalorder %s1266_s30, %s1262_s26  ;;  %p1270_p1 = scmp.lt.u32.totalorder %s1262_s26, %s1590_s22 }
 0x318   : > { %p1264_p12 = pnand %p1263_p9, %p1473_p4 }
 0x319   : > { %p1269_p10 = por %p1268_p11, %p1267_p0 }
 0x31a   : > { %p1265_p5 = pneg %p1264_p12 }
 0x31b   : > { %p1271_p2 = por %p1270_p1, %p1269_p10 }
 0x31d   : > { %p1272_p6 = pnand %p1271_p2, %p1265_p5 }
 0x31f   : > { %1275 = shalt.err (!%p1272_p6)
}
 0x320   : > { %s1338_s6 = smov 64   ;;  %s1339_s9 = smov 4  }
 0x321   : > { %1075 = dma.vmem_to_hbm [thread:$0]  (%p1473_p4), %s1592_s25, 128, %s1590_s22, %s816_s29, %s1338_s6, %s1338_s6, %s1339_s9  }
 0x322 PF: > { %p1097_p8 = scmp.ge.s32.totalorder %s1318_s15, 2  ;;  %s844_s10 = sand.u32 1, %s1306_s12  }
 0x323   : > { %p1654_p13 = scmp.ne.s32.totalorder %s1644_s19, 0  ;;  %s845_s11 = scalar_lea.sflag [#allocation4], %s844_s10 }
 0x325   : > { %p1089_p3 = pnand %p1097_p8, %p1654_p13 }
 0x327   : > { %1301 = dma.done.wait (!%p1089_p3), %s845_s11, 128  }
 0x328   : > { %1303 = vsyncadd (!%p1089_p3), %s845_s11, 4294967168  ;;  %p17_p7 = scmp.ge.s32.totalorder %s1463_s5, 10   ;;  %s1655_s12 = smov %s1310_s13 }
 0x329   : > { %s1656_s13 = smov %s1314_s14  ;;  %s1657_s14 = smov %s1479_s8 }
 0x32a   : > { %s1658_s15 = smov %s1463_s5  ;;  %19 = sbr.rel (!%p17_p7) target bundleno = 6 (0x6), region = 93 }
 0x331   :  { %850 = vsyncpa [#allocation3], 1 }
 0x332   :  { %852 = vsyncpa [#allocation3 + $0x1], 1 }
 0x333   :  { %853 = vsyncpa [#allocation6], 1 }
 0x334   :  { %854 = vsyncpa [#allocation4], 1 }
 0x335   :  { %856 = vsyncpa [#allocation4 + $0x1], 1 }

// kernel: sensitivity_model_forward.18
= control target key start
LH: loop header
LB: loop body
LE: loop exit
PB: predicated region body
PF: predicated region fallthrough
CT: control target
= control target key end

     0   :  { %8 = vsyncpa [#allocation3], 0  ;;  %s1628_s0 = inlined_call_operand.hbm [shape: bf16[8,16,36], index: 0, kind: input, shape index: {}]   ;;  %s1629_s1 = inlined_call_operand.hbm [shape: bf16[9,16,16], index: 1, kind: input, shape index: {}]   ;;  %s1630_s2 = inlined_call_operand.hbm [shape: f32[1,22], index: 2, kind: input, shape index: {}]   ;;  %s1631_s3 = inlined_call_operand.hbm [shape: bf16[8,16,36], index: 3, kind: output, shape index: {}]  }
   0x1   :  { %10 = vsyncpa [#allocation3 + $0x1], 0 }
   0x2   :  { %11 = vsyncpa [#allocation6], 0 }
   0x3   :  { %12 = vsyncpa [#allocation4], 0 }
   0x4   :  { %14 = vsyncpa [#allocation4 + $0x1], 0  ;;  %s1349_s12 = smov 0   ;;  %s1351_s13 = smov 0  }
   0x5   :  { %s1353_s14 = smov 0   ;;  %s1355_s15 = smov 0  }
   0x6 LB: > { %s1370_s16 = sadd.s32 4294967295, %s1307_s15   ;;  %s908_s17 = sadd.s32 4294967294, %s1307_s15   ;;  %s1307_s15 = sphi %s1355_s15, %s1650_s15   ;;  %s1303_s14 = sphi %s1353_s14, %s1649_s14   ;;  %s1299_s13 = sphi %s1351_s13, %s1648_s13   ;;  %s1295_s12 = sphi %s1349_s12, %s1647_s12  }
   0x7   : > { %p40_p0 = scmp.ne.s32.totalorder %s1299_s13, %s1295_s12  ;;  %p1632_p1 = scmp.eq.s32.totalorder %s1370_s16, 0 }
   0x8   : > { %p112_p3 = scmp.eq.s32.totalorder %s908_s17, 7  ;;  %p909_p5 = scmp.ge.s32.totalorder %s1307_s15, 1 }
   0x9   : > { %p1379_p4 = por %p1632_p1, %p40_p0  ;;  %p119_p7 = scmp.lt.s32.totalorder %s1307_s15, 9 }
   0xa   : > { %p1384_p6 = por %p112_p3, %p40_p0  ;;  %s1309_s21 = smov [#allocation5]  }
   0xb   : > { %s1635_s18 = scalar_select %p1379_p4, 1, 0 }
   0xc   : > { %s1636_s19 = scalar_select %p1384_p6, 1, 0 }
   0xd   : > { %p1389_p8 = pnand %p909_p5, %p119_p7  ;;  %s131_s22 = sshll.u32 %s1309_s21, 4  ;;  %s132_s22 = int_to_ptr.vmem [resolvable:$true] %s131_s22 }
   0xe   : > { %s1310_s24 = smov [#allocation7]   ;;  %s1151_s28 = scalar_lea.hbm %s1629_s1, 1152 }
   0xf   : > { %s1637_s20 = scalar_select %p1389_p8, 1, 0 }
  0x10   : > { %p1066_p9 = pneg %p1389_p8  ;;  %s145_s25 = sshll.u32 %s1310_s24, 4  ;;  %s1401_s25 = int_to_ptr.vmem [resolvable:$true] %s145_s25 }
  0x11   : > { %p1152_p11 = scmp.ne.s32.totalorder %s1629_s1, %s1151_s28  ;;  %p1158_p3 = scmp.lt.u32.totalorder %s1151_s28, %s1629_s1 }
  0x12   : > { %p1397_p10 = pnand %p1066_p9, %p1632_p1 }
  0x14   : > { %p1153_p12 = pneg %p1397_p10 }
  0x16   : > { %p1154_p13 = pnand %p1153_p12, %p1152_p11 }
  0x18   : > { %p1155_p0 = pneg %p1154_p13 }
  0x1a   : > { %p1160_p5 = pnand %p1158_p3, %p1155_p0 }
  0x1c   : > { %1163 = shalt.err (!%p1160_p5)
}
  0x1d   : > { %s1164_s6 = scalar_lea.vmem %s132_s22, 1152  ;;  %p1172_p2 = scmp.lt.s32.totalorder %s132_s22, %s132_s22 }
  0x1e   : > { %p1165_p7 = scmp.ne.s32.totalorder %s132_s22, %s1164_s6  ;;  %p1173_p6 = scmp.lt.s32.totalorder %s1164_s6, %s1164_s6 }
  0x20   : > { %p1167_p9 = pnand %p1165_p7, %p1153_p12  ;;  %p1174_p4 = por %p1173_p6, %p1172_p2 }
  0x22   : > { %p1168_p1 = pneg %p1167_p9 }
  0x24   : > { %p1175_p8 = pnand %p1174_p4, %p1168_p1 }
  0x26   : > { %1178 = shalt.err (!%p1175_p8)
}
  0x27   : > { %s1311_s7 = smov 64   ;;  %s1312_s8 = smov 4  }
  0x28   : > { %1069 = dma.hbm_to_vmem [thread:$0]  (!%p1397_p10), %s1629_s1, 1152, %s132_s22, [#allocation6], %s1311_s7, %s1311_s7, %s1312_s8  }
  0x29   : > { %s1179_s21 = scalar_lea.hbm %s1630_s2, 16 }
  0x2a   : > { %p1180_p1 = scmp.ne.s32.totalorder %s1630_s2, %s1179_s21  ;;  %p1186_p6 = scmp.lt.u32.totalorder %s1179_s21, %s1630_s2 }
  0x2c   : > { %p1182_p2 = pnand %p1180_p1, %p1153_p12 }
  0x2e   : > { %p1183_p4 = pneg %p1182_p2 }
  0x30   : > { %p1188_p8 = pnand %p1186_p6, %p1183_p4 }
  0x32   : > { %1191 = shalt.err (!%p1188_p8)
}
  0x33   : > { %s1192_s22 = scalar_lea.vmem %s1401_s25, 16  ;;  %s1199_s29 = scalar_lea.vmem %s1401_s25, 32 }
  0x34   : > { %p1193_p11 = scmp.ne.s32.totalorder %s1401_s25, %s1192_s22  ;;  %p1200_p3 = scmp.lt.s32.totalorder %s1401_s25, %s1401_s25 }
  0x35   : > { %p1201_p5 = scmp.lt.s32.totalorder %s1199_s29, %s1192_s22 }
  0x36   : > { %p1195_p13 = pnand %p1193_p11, %p1153_p12 }
  0x37   : > { %p1202_p7 = por %p1201_p5, %p1200_p3 }
  0x38   : > { %p1196_p0 = pneg %p1195_p13 }
  0x3a   : > { %p1203_p9 = pnand %p1202_p7, %p1196_p0 }
  0x3c   : > { %1206 = shalt.err (!%p1203_p9)
}
  0x3d   : > { %1072 = dma.hbm_to_vmem [thread:$0]  (!%p1397_p10), %s1630_s2, 16, %s1401_s25, [#allocation6]  }
  0x3e   : > { %s1455_s5 = sadd.s32 1, %s1307_s15   ;;  %s27_s23 = sadd.s32 1, %s1303_s14 }
  0x3f   : > { %s24_s6 = ssub.s32 %s1307_s15, %s1455_s5  ;;  %p34_p12 = scmp.ne.s32.totalorder %s1303_s14, %s1299_s13 }
  0x40   : > { %p25_p1 = scmp.eq.s32.totalorder %s24_s6, 0  ;;  %p35_p2 = scmp.eq.s32.totalorder %s1307_s15, 0 }
  0x41   : > { %p1639_p4 = scmp.eq.s32.totalorder %s1370_s16, 7  ;;  %p1083_p8 = scmp.lt.s32.totalorder %s1307_s15, 8 }
  0x42   : > { %s1471_s10 = scalar_select %p25_p1, %s1303_s14, %s27_s23  }
  0x43   : > { %p1465_p6 = por %p1639_p4, %p34_p12  ;;  %p36_p11 = por %p35_p2, %p34_p12 }
  0x44   : > { %s156_s11 = sand.u32 1, %s1303_s14   ;;  %s948_s25 = sshll.u32 %s1307_s15, 7 }
  0x45   : > { %s913_s17 = sshll.u32 %s156_s11, 3  ;;  %s1478_s26 = scalar_lea.hbm %s1628_s0, %s948_s25 }
  0x46   : > { %s160_s27 = scalar_lea.vmem [#allocation2], %s913_s17  ;;  %p1482_p10 = pnand %p1083_p8, %p36_p11 }
  0x47   : > { %s167_s28 = sshll.u32 %s160_s27, 4  ;;  %s1486_s29 = scalar_lea.sflag [#allocation3], %s156_s11  ;;  %s1480_s28 = int_to_ptr.vmem [resolvable:$true] %s167_s28 }
  0x48   : > { %s1207_s30 = scalar_lea.hbm %s1478_s26, 128  ;;  %p1209_p0 = pneg %p1482_p10 }
  0x49   : > { %p1208_p13 = scmp.ne.s32.totalorder %s1478_s26, %s1207_s30  ;;  %s1212_s6 = scalar_lea.hbm %s1628_s0, 1024 }
  0x4a   : > { %p1213_p7 = scmp.lt.u32.totalorder %s1478_s26, %s1628_s0  ;;  %p1214_p9 = scmp.lt.u32.totalorder %s1212_s6, %s1207_s30 }
  0x4b   : > { %p1210_p3 = pnand %p1209_p0, %p1208_p13  ;;  %p1216_p1 = scmp.lt.u32.totalorder %s1207_s30, %s1478_s26 }
  0x4c   : > { %p1215_p12 = por %p1214_p9, %p1213_p7 }
  0x4d   : > { %p1211_p5 = pneg %p1210_p3 }
  0x4e   : > { %p1217_p2 = por %p1216_p1, %p1215_p12 }
  0x50   : > { %p1218_p4 = pnand %p1217_p2, %p1211_p5 }
  0x52   : > { %1221 = shalt.err (!%p1218_p4)
}
  0x53   : > { %s1222_s11 = scalar_lea.vmem %s1480_s28, 128  ;;  %s1313_s21 = smov [#allocation2]  }
  0x54   : > { %p1223_p8 = scmp.ne.s32.totalorder %s1480_s28, %s1222_s11  ;;  %s1227_s24 = sshll.u32 %s1313_s21, 4  ;;  %s1228_s24 = int_to_ptr.vmem [resolvable:$false] %s1227_s24 }
  0x55   : > { %s1229_s27 = scalar_lea.vmem %s1228_s24, 256  ;;  %p1230_p3 = scmp.lt.s32.totalorder %s1480_s28, %s1228_s24 }
  0x56   : > { %p1225_p11 = pnand %p1223_p8, %p1209_p0  ;;  %p1231_p7 = scmp.lt.s32.totalorder %s1229_s27, %s1222_s11 }
  0x58   : > { %p1226_p13 = pneg %p1225_p11  ;;  %p1232_p9 = por %p1231_p7, %p1230_p3 }
  0x5a   : > { %p1233_p12 = pnand %p1232_p9, %p1226_p13 }
  0x5c   : > { %1236 = shalt.err (!%p1233_p12)
}
  0x5d   : > { %1076 = dma.hbm_to_vmem [thread:$0]  (!%p1482_p10), %s1478_s26, 128, %s1480_s28, %s1486_s29, %s1311_s7, %s1311_s7, %s1312_s8  }
  0x5e   : > { %p1642_p0 = scmp.ne.s32.totalorder %s1637_s20, 0 }
  0x5f   : > { %s1520_s30 = sand.u32 (!%p1642_p0), 1, %s1299_s13   ;;  %p1643_p5 = scmp.ne.s32.totalorder (!%p1642_p0), %s1635_s18, 0 }
  0x60   : > { %179 = sbr.rel (%p1642_p0) target bundleno = 801 (0x321), region = 32  ;;  %s917_s4 = sshll.u32 (!%p1642_p0), %s1520_s30, 3 }
  0x61   : > { %s182_s23 = scalar_lea.sflag (!%p1642_p0), [#allocation3], %s1520_s30  ;;  %s185_s22 = scalar_lea.vmem (!%p1642_p0), [#allocation2], %s917_s4 }
  0x67   : > { %1282 = dma.done.wait (%p1643_p5), %s182_s23, 128  }
  0x68   : > { %1284 = vsyncadd (%p1643_p5), %s182_s23, 4294967168  ;;  %p1644_p10 = scmp.eq.s32.totalorder %s1370_s16, 0 }
  0x6a   : > { %1286 = dma.done.wait (%p1644_p10), [#allocation6], 1168   ;;  %p1645_p1 = pmov %p1644_p10 }
  0x6b   : > { %v1314_v0 = vmov 0.0   ;;  %vm1315_vm0 = vmmov 0   ;;  %v1137_v1 = vld [vmem:[%s185_s22] sm:$0xff]   ;;  %s1316_s18 = smov 121   ;;  %s1317_s20 = smov 120   ;;  %v1138_v3 = vld [vmem:[#allocation5 + $0x20] sm:$0xff]  }
  0x6c   : > { %1288 = vsyncadd (%p1645_p1), [#allocation6], 4294966128  ;;  %994 = vmatprep.subr.bf16.mxu0 %v1314_v0  ;;  %996 = vmatprep.mubr.msk.bf16.mxu0 %vm1315_vm0, %v1314_v0  ;;  %s1318_s7 = smov 127   ;;  %s1319_s8 = smov 116   ;;  %vm237_vm1 = vcmask 130048   ;;  %v1139_v6 = vld [vmem:[#allocation5 + $0x8] sm:$0xff]  }
  0x6d   : > { %970 = vmatprep.subr.bf16.mxu1 %v1314_v0  ;;  %972 = vmatprep.mubr.msk.bf16.mxu1 %vm1315_vm0, %v1314_v0  ;;  %s1320_s26 = smov 115   ;;  %s1321_s28 = smov 126   ;;  %v1140_v7 = vld [vmem:[#allocation5 + $0x28] sm:$0xff]   ;;  %v1141_v9 = vld [vmem:[#allocation5] sm:$0xff]   ;;  %v1142_v11 = vld [vmem:[#allocation5 + $0x30] sm:$0xff]   ;;  %vm740_vm2 = vcmask 179200  }
  0x6e   : > { %454 = vrot.lane.b32.xlu0 %v1137_v1, %s1316_s18  ;;  %511 = vrot.lane.b32.xlu1 %v1137_v1, %s1317_s20  ;;  %s1322_s29 = smov 114   ;;  %s1323_s6 = smov 122   ;;  %v1143_v13 = vld [vmem:[#allocation5 + $0x10] sm:$0xff]   ;;  %v1144_v15 = vld [vmem:[#allocation5 + $0x38] sm:$0xff]   ;;  %v1146_v18 = vld [vmem:[#allocation5 + $0x40] sm:$0xff]   ;;  %vm784_vm3 = vcmask 289792  }
  0x6f   : > { %v1145_v17 = vld [vmem:[#allocation5 + $0x18] sm:$0xff]   ;;  %v940_v24 = vld [vmem:[#allocation7] ss:$0 sm:$0xff]  ;;  %s1572_s17 = scalar_lea.vmem [#allocation8], %s917_s4  ;;  %v1324_v40 = vmov 0   ;;  %s1325_s25 = smov 7  }
  0x70   : > { %785 = vst.msk [vmem:[%s1572_s17] sm:$0xf] %vm784_vm3, %v1324_v40  ;;  %786 = vst.msk [vmem:[%s1572_s17 + $0x4] sm:$0xf] %vm784_vm3, %v1324_v40  ;;  %vm799_vm6 = vcmask 232504   ;;  %s951_s11 = sshll.u32 %s1370_s16, 7 }
  0x71   : > { %s816_s21 = sshll.u32 %s1572_s17, 4  ;;  %s1582_s4 = scalar_lea.hbm %s1631_s3, %s951_s11  ;;  %s1584_s21 = int_to_ptr.vmem [resolvable:$true] %s816_s21 }
  0x72   : > { %234 = vrot.lane.b32.xlu0 %v1137_v1, %s1318_s7  ;;  %568 = vrot.lane.b32.xlu1 %v1137_v1, %s1319_s8  ;;  %s803_s23 = scalar_lea.sflag [#allocation4], %s1520_s30  ;;  %s1237_s22 = scalar_lea.vmem %s1584_s21, 128 }
  0x73   : > { %p1238_p2 = scmp.ne.s32.totalorder %s1584_s21, %s1237_s22  ;;  %s1326_s16 = smov [#allocation8]  }
  0x74   : > { %s1241_s18 = sshll.u32 %s1326_s16, 4  ;;  %s1242_s18 = int_to_ptr.vmem [resolvable:$false] %s1241_s18 }
  0x75   : > { %p1239_p4 = pnand %p1238_p2, %p1465_p6  ;;  %s1243_s20 = scalar_lea.vmem %s1242_s18, 256 }
  0x76   : > { %625 = vrot.lane.b32.xlu1 %v1137_v1, %s1320_s26  ;;  %340 = vrot.lane.b32.xlu0 %v1137_v1, %s1321_s28  ;;  %p1244_p11 = scmp.lt.s32.totalorder %s1584_s21, %s1242_s18  ;;  %p1245_p13 = scmp.lt.s32.totalorder %s1243_s20, %s1237_s22 }
  0x77   : > { %p1240_p8 = pneg %p1239_p4 }
  0x78   : > { %p1246_p3 = por %p1245_p13, %p1244_p11 }
  0x7a   : > { %682 = vrot.lane.b32.xlu1 %v1137_v1, %s1322_s29  ;;  %397 = vrot.lane.b32.xlu0 %v1137_v1, %s1323_s6  ;;  %p1247_p7 = pnand %p1246_p3, %p1240_p8 }
  0xe0   : > { %v455_v2 = vpop.permute.xlu0 %454  ;;  %v512_v4 = vpop.permute.xlu1 %511 }
  0xe1   : > { %995 = vmatpush3.bf16.msra.mxu0 %v455_v2 }
  0xe2   : > { %1000 = vmatprep.subr.bf16.mxu0 %v1314_v0 }
  0xe4   : > { %997 = vmatmul.mubr.msk.bf16.vlgmr.msra.gmra.mrb[0].mxu0 %vm237_vm1, %v1138_v3  ;;  %v235_v5 = vpop.permute.xlu0 %234  ;;  %v569_v8 = vpop.permute.xlu1 %568 }
  0xe5   : > { %971 = vmatpush3.bf16.msra.mxu1 %v235_v5  ;;  %1001 = vmatpush3.bf16.msra.mxu0 %v512_v4 }
  0xe6   : > { %1002 = vmatprep.mubr.msk.bf16.mxu0 %vm1315_vm0, %v1314_v0  ;;  %976 = vmatprep.subr.bf16.mxu1 %v1314_v0 }
  0xe7   : > { %1006 = vmatprep.subr.bf16.mxu0 %v1314_v0 }
  0xe8   : > { %973 = vmatmul.mubr.msk.bf16.vlgmr.msra.gmra.mrb[0].mxu1 %vm237_vm1, %v1139_v6  ;;  %v341_v10 = vpop.permute.xlu0 %340  ;;  %v626_v12 = vpop.permute.xlu1 %625 }
  0xe9   : > { %977 = vmatpush3.bf16.msra.mxu1 %v1137_v1  ;;  %978 = vmatprep.mubr.msk.bf16.mxu1 %vm1315_vm0, %v1314_v0 }
  0xea   : > { %982 = vmatprep.subr.bf16.mxu1 %v1314_v0 }
  0xec   : > { %v398_v14 = vpop.permute.xlu0 %397  ;;  %v683_v16 = vpop.permute.xlu1 %682 }
  0xf0   : > { %1003 = vmatmul.mubr.msk.bf16.vlgmr.msra.gmra.mrb[0].mxu0 %vm237_vm1, %v1140_v7 }
  0xf1   : > { %1007 = vmatpush3.bf16.msra.mxu0 %v569_v8  ;;  %1008 = vmatprep.mubr.msk.bf16.mxu0 %vm1315_vm0, %v1314_v0 }
  0xf2   : > { %1012 = vmatprep.subr.bf16.mxu0 %v1314_v0 }
  0xf4   : > { %979 = vmatmul.mubr.msk.bf16.vlgmr.msra.gmra.mrb[0].mxu1 %vm237_vm1, %v1141_v9 }
  0xf5   : > { %983 = vmatpush3.bf16.msra.mxu1 %v341_v10  ;;  %984 = vmatprep.mubr.msk.bf16.mxu1 %vm1315_vm0, %v1314_v0 }
  0xf6   : > { %988 = vmatprep.subr.bf16.mxu1 %v1314_v0 }
  0xfc   : > { %1009 = vmatmul.mubr.msk.bf16.vlgmr.msra.gmra.mrb[0].mxu0 %vm237_vm1, %v1142_v11 }
  0xfd   : > { %1013 = vmatpush3.bf16.msra.mxu0 %v626_v12  ;;  %1014 = vmatprep.mubr.msk.bf16.mxu0 %vm1315_vm0, %v1314_v0 }
  0xfe   : > { %1018 = vmatprep.subr.bf16.mxu0 %v1314_v0 }
 0x100   : > { %985 = vmatmul.mubr.msk.bf16.vlgmr.msra.gmra.mrb[0].mxu1 %vm237_vm1, %v1143_v13 }
 0x101   : > { %989 = vmatpush3.bf16.msra.mxu1 %v398_v14  ;;  %990 = vmatprep.mubr.msk.bf16.mxu1 %vm1315_vm0, %v1314_v0 }
 0x108   : > { %1015 = vmatmul.mubr.msk.bf16.vlgmr.msra.gmra.mrb[0].mxu0 %vm237_vm1, %v1144_v15 }
 0x109   : > { %1019 = vmatpush3.bf16.msra.mxu0 %v683_v16  ;;  %1020 = vmatprep.mubr.msk.bf16.mxu0 %vm1315_vm0, %v1314_v0 }
 0x10c   : > { %991 = vmatmul.mubr.msk.bf16.vlgmr.msra.gmra.mrb[0].mxu1 %vm237_vm1, %v1145_v17 }
 0x114   : > { %1021 = vmatmul.mubr.msk.bf16.vlgmr.msra.gmra.mrb[0].mxu0 %vm237_vm1, %v1146_v18 }
 0x1df   : > { %v437_v19 = vpop.f32.mrb[0].mxu1 }
 0x1e0   : > { %v992_v20 = vpop.f32.mrb[1].mxu1 }
 0x1e1   : > { %v440_v21 = vpop.f32.mrb[2].mxu1 }
 0x1e2   : > { %v993_v22 = vpop.f32.mrb[3].mxu1 }
 0x1e7   : > { %v722_v23 = vpop.f32.mrb[0].mxu0 }
 0x1e8   : > { %v1024_v25 = vadd.f32 %v722_v23, %v437_v19  ;;  %v1022_v26 = vpop.f32.mrb[1].mxu0 }
 0x1e9   : > { %v725_v27 = vpop.f32.mrb[2].mxu0 }
 0x1ea   : > { %v1025_v28 = vadd.f32 %v725_v27, %v440_v21  ;;  %v1023_v29 = vpop.f32.mrb[3].mxu0  ;;  %v738_v30 = vmul.f32 %v1024_v25, %v940_v24  ;;  %v747_v31 = vmul.f32 %v1024_v25, %v1024_v25 }
 0x1ec   : > { %v741_v32 = vsel %vm740_vm2, %v738_v30, 0.0  ;;  %v739_v33 = vmul.f32 %v1025_v28, %v940_v24  ;;  %v749_v34 = vmul.f32 %v940_v24, %v747_v31  ;;  %v748_v35 = vmul.f32 %v1025_v28, %v1025_v28 }
 0x1ed   : > { %742 = vadd.xlane.f32.xlu0 %v741_v32 }
 0x1ee   : > { %v744_v36 = vsel %vm740_vm2, %v739_v33, 0.0  ;;  %v751_v37 = vsel %vm740_vm2, %v749_v34, 0.0  ;;  %v750_v38 = vmul.f32 %v940_v24, %v748_v35 }
 0x1ef   : > { %745 = vadd.xlane.f32.xlu1 %v744_v36 }
 0x1f0   : > { %v754_v39 = vsel %vm740_vm2, %v750_v38, 0.0 }
 0x1f1   : > { %752 = vadd.xlane.f32.xlu0 %v751_v37 }
 0x1f5   : > { %755 = vadd.xlane.f32.xlu0 %v754_v39 }
 0x27a   : > { %v743_v41 = vpop.xlane.xlu0 %742 }
 0x27b   : > { %v758_v42 = vmul.f32 0.0625, %v743_v41 }
 0x27c   : > { %v746_v43 = vpop.xlane.xlu1 %745 }
 0x27d   : > { %v762_v45 = vmul.f32 %v758_v42, %v758_v42  ;;  %v759_v46 = vmul.f32 0.0625, %v746_v43  ;;  %v768_v57 = vsub.f32 %v1024_v25, %v758_v42 }
 0x27e   : > { %v753_v44 = vpop.xlane.xlu0 %752 }
 0x27f   : > { %v760_v47 = vmul.f32 0.0625, %v753_v44  ;;  %v763_v50 = vmul.f32 %v759_v46, %v759_v46  ;;  %v769_v60 = vsub.f32 %v1025_v28, %v759_v46 }
 0x281   : > { %v764_v48 = vsub.f32 %v760_v47, %v762_v45 }
 0x282   : > { %v756_v49 = vpop.xlane.xlu0 %755 }
 0x283   : > { %v766_v51 = vmax.f32 %v764_v48, 0.0  ;;  %v761_v52 = vmul.f32 0.0625, %v756_v49 }
 0x285   : > { %v770_v53 = vadd.f32 1e-05, %v766_v51  ;;  %v765_v54 = vsub.f32 %v761_v52, %v763_v50 }
 0x287   : > { %1147 = vrsqrt.f32 %v770_v53  ;;  %v767_v55 = vmax.f32 %v765_v54, 0.0 }
 0x289   : > { %v771_v56 = vadd.f32 1e-05, %v767_v55 }
 0x28b   : > { %1149 = vrsqrt.f32 %v771_v56 }
 0x291   : > { %v1148_v58 = vpop.eup %1147 }
 0x292   : > { %v774_v59 = vmul.f32 %v1148_v58, %v768_v57 }
 0x294   : > { %vm776_vm4 = vcmp.ge.f32.partialorder %v774_v59, 0.0  ;;  %v778_v61 = vmul.f32 0.2, %v774_v59 }
 0x295   : > { %v1150_v62 = vpop.eup %1149 }
 0x296   : > { %v780_v63 = vsel %vm776_vm4, %v774_v59, %v778_v61  ;;  %v775_v0 = vmul.f32 %v1150_v62, %v769_v60 }
 0x297   : > { %v782_v1 = vmul.f32 %v940_v24, %v780_v63 }
 0x298   : > { %vm777_vm5 = vcmp.ge.f32.partialorder %v775_v0, 0.0  ;;  %v779_v2 = vmul.f32 0.2, %v775_v0 }
 0x299   : > { %v949_v3 = vpack.c.bf16 %v782_v1, %v782_v1 }
 0x29a   : > { %v781_v4 = vsel %vm777_vm5, %v775_v0, %v779_v2 }
 0x29b   : > { %793 = vrot.lane.b32.xlu1 %v949_v3, %s1325_s25  ;;  %v783_v5 = vmul.f32 %v940_v24, %v781_v4 }
 0x29d   : > { %v950_v6 = vpack.c.bf16 %v783_v5, %v783_v5 }
 0x29f   : > { %795 = vrot.lane.b32.xlu0 %v950_v6, %s1325_s25 }
 0x30d   : > { %v794_v7 = vpop.permute.xlu1 %793 }
 0x30e   : > { %800 = vst.msk [vmem:[%s1572_s17] sm:$0xf] %vm799_vm6, %v794_v7 }
 0x311   : > { %v796_v8 = vpop.permute.xlu0 %795 }
 0x312   : > { %801 = vst.msk [vmem:[%s1572_s17 + $0x4] sm:$0xf] %vm799_vm6, %v796_v8 }
 0x313   : > { %1250 = shalt.err (!%p1247_p7)
}
 0x314   : > { %s1251_s7 = scalar_lea.hbm %s1582_s4, 128  ;;  %s1255_s28 = scalar_lea.hbm %s1631_s3, 1024 }
 0x315   : > { %p1252_p9 = scmp.ne.s32.totalorder %s1582_s4, %s1251_s7  ;;  %p1256_p5 = scmp.lt.u32.totalorder %s1582_s4, %s1631_s3 }
 0x316   : > { %p1257_p10 = scmp.lt.u32.totalorder %s1255_s28, %s1251_s7  ;;  %p1259_p2 = scmp.lt.u32.totalorder %s1251_s7, %s1582_s4 }
 0x317   : > { %p1253_p12 = pnand %p1252_p9, %p1465_p6 }
 0x318   : > { %p1258_p1 = por %p1257_p10, %p1256_p5 }
 0x319   : > { %p1254_p0 = pneg %p1253_p12 }
 0x31a   : > { %p1260_p4 = por %p1259_p2, %p1258_p1 }
 0x31c   : > { %p1261_p8 = pnand %p1260_p4, %p1254_p0 }
 0x31e   : > { %1264 = shalt.err (!%p1261_p8)
}
 0x31f   : > { %s1327_s17 = smov 64   ;;  %s1328_s25 = smov 4  }
 0x320   : > { %1064 = dma.vmem_to_hbm [thread:$0]  (%p1465_p6), %s1584_s21, 128, %s1582_s4, %s803_s23, %s1327_s17, %s1327_s17, %s1328_s25  }
 0x321 PF: > { %p1086_p11 = scmp.ge.s32.totalorder %s1307_s15, 2  ;;  %s831_s11 = sand.u32 1, %s1295_s12  }
 0x322   : > { %p1646_p13 = scmp.ne.s32.totalorder %s1636_s19, 0  ;;  %s832_s24 = scalar_lea.sflag [#allocation4], %s831_s11 }
 0x324   : > { %p1078_p3 = pnand %p1086_p11, %p1646_p13 }
 0x326   : > { %1290 = dma.done.wait (!%p1078_p3), %s832_s24, 128  }
 0x327   : > { %1292 = vsyncadd (!%p1078_p3), %s832_s24, 4294967168  ;;  %p17_p7 = scmp.ge.s32.totalorder %s1455_s5, 10   ;;  %s1647_s12 = smov %s1299_s13 }
 0x328   : > { %s1648_s13 = smov %s1303_s14  ;;  %s1649_s14 = smov %s1471_s10 }
 0x329   : > { %s1650_s15 = smov %s1455_s5  ;;  %19 = sbr.rel (!%p17_p7) target bundleno = 6 (0x6), region = 93 }
 0x330   :  { %837 = vsyncpa [#allocation3], 1 }
 0x331   :  { %839 = vsyncpa [#allocation3 + $0x1], 1 }
 0x332   :  { %840 = vsyncpa [#allocation6], 1 }
 0x333   :  { %841 = vsyncpa [#allocation4], 1 }
 0x334   :  { %843 = vsyncpa [#allocation4 + $0x1], 1 }

// kernel: sensitivity_model_forward.19
= control target key start
LH: loop header
LB: loop body
LE: loop exit
PB: predicated region body
PF: predicated region fallthrough
CT: control target
= control target key end

     0   :  { %7 = vsyncpa [#allocation3], 0  ;;  %s917_s0 = inlined_call_operand.hbm [shape: bf16[8,16,16], index: 0, kind: input, shape index: {}]   ;;  %s918_s1 = inlined_call_operand.hbm [shape: bf16[32,16], index: 1, kind: input, shape index: {}]   ;;  %s919_s2 = inlined_call_operand.hbm [shape: bf16[8,32,16], index: 2, kind: output, shape index: {}]  }
   0x1   :  { %9 = vsyncpa [#allocation3 + $0x1], 0 }
   0x2   :  { %10 = vsyncpa [#allocation6], 0 }
   0x3   :  { %11 = vsyncpa [#allocation4], 0 }
   0x4   :  { %13 = vsyncpa [#allocation4 + $0x1], 0  ;;  %s708_s9 = smov 0   ;;  %s710_s10 = smov 0  }
   0x5   :  { %s712_s11 = smov 0   ;;  %s714_s12 = smov 0  }
   0x6 LB: > { %s729_s13 = sadd.s32 4294967295, %s683_s12   ;;  %s446_s14 = sadd.s32 4294967294, %s683_s12   ;;  %s683_s12 = sphi %s714_s12, %s938_s12   ;;  %s679_s11 = sphi %s712_s11, %s937_s11   ;;  %s675_s10 = sphi %s710_s10, %s936_s10   ;;  %s671_s9 = sphi %s708_s9, %s935_s9  }
   0x7   : > { %p39_p0 = scmp.ne.s32.totalorder %s675_s10, %s671_s9  ;;  %p920_p1 = scmp.eq.s32.totalorder %s729_s13, 0 }
   0x8   : > { %p90_p3 = scmp.eq.s32.totalorder %s446_s14, 7  ;;  %p447_p5 = scmp.ge.s32.totalorder %s683_s12, 1 }
   0x9   : > { %p738_p4 = por %p920_p1, %p39_p0  ;;  %p97_p7 = scmp.lt.s32.totalorder %s683_s12, 9 }
   0xa   : > { %p743_p6 = por %p90_p3, %p39_p0  ;;  %s685_s18 = smov [#allocation5]  }
   0xb   : > { %s923_s15 = scalar_select %p738_p4, 1, 0 }
   0xc   : > { %s924_s16 = scalar_select %p743_p6, 1, 0 }
   0xd   : > { %p748_p8 = pnand %p447_p5, %p97_p7  ;;  %s109_s19 = sshll.u32 %s685_s18, 4  ;;  %s110_s19 = int_to_ptr.vmem [resolvable:$true] %s109_s19 }
   0xe   : > { %s761_s21 = sadd.s32 1, %s683_s12   ;;  %s26_s22 = sadd.s32 1, %s679_s11 }
   0xf   : > { %s925_s17 = scalar_select %p748_p8, 1, 0 }
  0x10   : > { %p494_p9 = pneg %p748_p8  ;;  %s23_s23 = ssub.s32 %s683_s12, %s761_s21 }
  0x11   : > { %s555_s26 = scalar_lea.hbm %s918_s1, 256 }
  0x12   : > { %p756_p10 = pnand %p494_p9, %p920_p1  ;;  %p556_p11 = scmp.ne.s32.totalorder %s918_s1, %s555_s26 }
  0x13   : > { %p562_p3 = scmp.lt.u32.totalorder %s555_s26, %s918_s1 }
  0x14   : > { %p557_p12 = pneg %p756_p10 }
  0x16   : > { %p558_p13 = pnand %p557_p12, %p556_p11 }
  0x18   : > { %p559_p0 = pneg %p558_p13 }
  0x1a   : > { %p564_p5 = pnand %p562_p3, %p559_p0 }
  0x1c   : > { %567 = shalt.err (!%p564_p5)
}
  0x1d   : > { %s568_s3 = scalar_lea.vmem %s110_s19, 256  ;;  %p576_p2 = scmp.lt.s32.totalorder %s110_s19, %s110_s19 }
  0x1e   : > { %p569_p7 = scmp.ne.s32.totalorder %s110_s19, %s568_s3  ;;  %p577_p6 = scmp.lt.s32.totalorder %s568_s3, %s568_s3 }
  0x20   : > { %p571_p9 = pnand %p569_p7, %p557_p12  ;;  %p578_p4 = por %p577_p6, %p576_p2 }
  0x22   : > { %p572_p1 = pneg %p571_p9 }
  0x24   : > { %p579_p8 = pnand %p578_p4, %p572_p1 }
  0x26   : > { %582 = shalt.err (!%p579_p8)
}
  0x27   : > { %s686_s4 = smov 64   ;;  %s687_s5 = smov 4  }
  0x28   : > { %497 = dma.hbm_to_vmem [thread:$0]  (!%p756_p10), %s918_s1, 256, %s110_s19, [#allocation6], %s686_s4, %s686_s4, %s687_s5  }
  0x29   : > { %p24_p1 = scmp.eq.s32.totalorder %s23_s23, 0  ;;  %p33_p2 = scmp.ne.s32.totalorder %s679_s11, %s675_s10 }
  0x2a   : > { %p34_p4 = scmp.eq.s32.totalorder %s683_s12, 0  ;;  %p507_p6 = scmp.lt.s32.totalorder %s683_s12, 8 }
  0x2b   : > { %s790_s8 = scalar_select %p24_p1, %s679_s11, %s26_s22  }
  0x2c   : > { %p35_p8 = por %p34_p4, %p33_p2  ;;  %p927_p11 = scmp.eq.s32.totalorder %s729_s13, 7 }
  0x2d   : > { %s123_s18 = sand.u32 1, %s679_s11   ;;  %s471_s20 = sshll.u32 %s683_s12, 7 }
  0x2e   : > { %p794_p12 = por %p927_p11, %p33_p2  ;;  %s450_s24 = sshll.u32 %s123_s18, 3 }
  0x2f   : > { %s803_s27 = scalar_lea.hbm %s917_s0, %s471_s20  ;;  %s127_s19 = scalar_lea.vmem [#allocation2], %s450_s24 }
  0x30   : > { %s134_s22 = sshll.u32 %s127_s19, 4  ;;  %p805_p10 = pnand %p507_p6, %p35_p8  ;;  %s809_s22 = int_to_ptr.vmem [resolvable:$true] %s134_s22 }
  0x31   : > { %s811_s28 = scalar_lea.sflag [#allocation3], %s123_s18  ;;  %s583_s29 = scalar_lea.hbm %s803_s27, 128 }
  0x32   : > { %p584_p13 = scmp.ne.s32.totalorder %s803_s27, %s583_s29  ;;  %p585_p0 = pneg %p805_p10 }
  0x33   : > { %s588_s6 = scalar_lea.hbm %s917_s0, 1024  ;;  %p589_p7 = scmp.lt.u32.totalorder %s803_s27, %s917_s0 }
  0x34   : > { %p586_p3 = pnand %p585_p0, %p584_p13  ;;  %p590_p9 = scmp.lt.u32.totalorder %s588_s6, %s583_s29 }
  0x35   : > { %p592_p2 = scmp.lt.u32.totalorder %s583_s29, %s803_s27 }
  0x36   : > { %p587_p5 = pneg %p586_p3  ;;  %p591_p1 = por %p590_p9, %p589_p7 }
  0x38   : > { %p593_p4 = por %p592_p2, %p591_p1 }
  0x3a   : > { %p594_p6 = pnand %p593_p4, %p587_p5 }
  0x3c   : > { %597 = shalt.err (!%p594_p6)
}
  0x3d   : > { %s598_s18 = scalar_lea.vmem %s809_s22, 128  ;;  %s688_s24 = smov [#allocation2]  }
  0x3e   : > { %p599_p8 = scmp.ne.s32.totalorder %s809_s22, %s598_s18  ;;  %s603_s25 = sshll.u32 %s688_s24, 4  ;;  %s604_s25 = int_to_ptr.vmem [resolvable:$false] %s603_s25 }
  0x3f   : > { %s605_s26 = scalar_lea.vmem %s604_s25, 256  ;;  %p606_p3 = scmp.lt.s32.totalorder %s809_s22, %s604_s25 }
  0x40   : > { %p601_p11 = pnand %p599_p8, %p585_p0  ;;  %p607_p7 = scmp.lt.s32.totalorder %s605_s26, %s598_s18 }
  0x42   : > { %p602_p13 = pneg %p601_p11  ;;  %p608_p9 = por %p607_p7, %p606_p3 }
  0x44   : > { %p609_p1 = pnand %p608_p9, %p602_p13 }
  0x46   : > { %612 = shalt.err (!%p609_p1)
}
  0x47   : > { %501 = dma.hbm_to_vmem [thread:$0]  (!%p805_p10), %s803_s27, 128, %s809_s22, %s811_s28, %s686_s4, %s686_s4, %s687_s5  }
  0x48   : > { %p930_p0 = scmp.ne.s32.totalorder %s925_s17, 0 }
  0x49   : > { %s845_s19 = sand.u32 (!%p930_p0), 1, %s675_s10   ;;  %p931_p5 = scmp.ne.s32.totalorder (!%p930_p0), %s923_s15, 0 }
  0x4a   : > { %146 = sbr.rel (%p930_p0) target bundleno = 633 (0x279), region = 28  ;;  %s454_s29 = sshll.u32 (!%p930_p0), %s845_s19, 3 }
  0x4b   : > { %s149_s30 = scalar_lea.sflag (!%p930_p0), [#allocation3], %s845_s19  ;;  %s152_s3 = scalar_lea.vmem (!%p930_p0), [#allocation2], %s454_s29 }
  0x51   : > { %658 = dma.done.wait (%p931_p5), %s149_s30, 128  }
  0x52   : > { %660 = vsyncadd (%p931_p5), %s149_s30, 4294967168  ;;  %p932_p2 = scmp.eq.s32.totalorder %s729_s13, 0 }
  0x54   : > { %662 = dma.done.wait (%p932_p2), [#allocation6], 256   ;;  %p933_p10 = pmov %p932_p2 }
  0x55   : > { %v550_v0 = vld [vmem:[%s152_s3] sm:$0xff]   ;;  %vm200_vm0 = vcmask 130048   ;;  %v551_v1 = vld [vmem:[#allocation5] sm:$0xff]   ;;  %v552_v2 = vld [vmem:[#allocation5 + $0x8] sm:$0xff]   ;;  %v689_v19 = vmov 0   ;;  %s456_s15 = sshll.u32 %s845_s19, 4 }
  0x56   : > { %664 = vsyncadd (%p933_p10), [#allocation6], 4294967040  ;;  %480 = vmatprep.subr.bf16.mxu0 %v550_v0  ;;  %482 = vmatprep.mubr.msk.bf16.mxu0 %vm200_vm0, %v551_v1  ;;  %s476_s17 = sshll.u32 %s729_s13, 8  ;;  %s176_s4 = scalar_lea.vmem [#allocation7], %s456_s15  ;;  %vm344_vm5 = vcmask 125952  }
  0x57   : > { %481 = vmatpush3.bf16.msra.mxu0 %v550_v0  ;;  %548 = vset.pattern.permute.xlu0 %v689_v19  ;;  %s363_s5 = sshll.u32 %s176_s4, 4  ;;  %s872_s13 = scalar_lea.hbm %s919_s2, %s476_s17  ;;  %s874_s5 = int_to_ptr.vmem [resolvable:$true] %s363_s5 }
  0x58   : > { %549 = vset.pattern.permute.xlu1 %v689_v19  ;;  %s350_s23 = scalar_lea.sflag [#allocation4], %s845_s19  ;;  %s613_s28 = scalar_lea.vmem %s874_s5, 256 }
  0x59   : > { %p614_p4 = scmp.ne.s32.totalorder %s874_s5, %s613_s28  ;;  %s690_s6 = smov [#allocation7]  }
  0x5a   : > { %483 = vmatmul.mubr.msk.bf16.vlgmr.msra.gmra.mrb[0].mxu0 %vm200_vm0, %v552_v2  ;;  %s617_s7 = sshll.u32 %s690_s6, 4  ;;  %s618_s7 = int_to_ptr.vmem [resolvable:$false] %s617_s7 }
  0x5b   : > { %p615_p6 = pnand %p614_p4, %p794_p12  ;;  %s619_s20 = scalar_lea.vmem %s618_s7, 512 }
  0x5c   : > { %p620_p11 = scmp.lt.s32.totalorder %s874_s5, %s618_s7  ;;  %p621_p13 = scmp.lt.s32.totalorder %s619_s20, %s613_s28 }
  0x5d   : > { %p616_p8 = pneg %p615_p6 }
  0x5e   : > { %p622_p3 = por %p621_p13, %p620_p11 }
  0x60   : > { %p623_p7 = pnand %p622_p3, %p616_p8 }
 0x12d   : > { %v484_v3 = vpop.f32.mrb[0].mxu0 }
 0x12e   : > { %v241_v4 = vpop.f32.mrb[1].mxu0  ;;  %v262_v5 = vsel %vm200_vm0, %v484_v3, 0.0  ;;  %v270_v16 = vmul.f32 %v484_v3, %v484_v3 }
 0x12f   : > { %263 = vadd.xlane.f32.xlu1 %v262_v5  ;;  %v485_v6 = vpop.f32.mrb[2].mxu0  ;;  %v256_v7 = vsel %vm200_vm0, %v241_v4, 0.0  ;;  %v268_v10 = vmul.f32 %v241_v4, %v241_v4 }
 0x130   : > { %257 = vadd.xlane.f32.xlu0 %v256_v7  ;;  %v244_v8 = vpop.f32.mrb[3].mxu0  ;;  %v265_v9 = vsel %vm200_vm0, %v485_v6, 0.0  ;;  %v271_v14 = vmul.f32 %v485_v6, %v485_v6  ;;  %v278_v18 = vsel %vm200_vm0, %v270_v16, 0.0 }
 0x131   : > { %v269_v11 = vmul.f32 %v244_v8, %v244_v8  ;;  %v259_v12 = vsel %vm200_vm0, %v244_v8, 0.0  ;;  %v272_v13 = vsel %vm200_vm0, %v268_v10, 0.0 }
 0x132   : > { %v281_v17 = vsel %vm200_vm0, %v271_v14, 0.0 }
 0x133   : > { %266 = vadd.xlane.f32.xlu1 %v265_v9  ;;  %v275_v15 = vsel %vm200_vm0, %v269_v11, 0.0 }
 0x134   : > { %260 = vadd.xlane.f32.xlu0 %v259_v12 }
 0x137   : > { %273 = vadd.xlane.f32.xlu1 %v272_v13 }
 0x138   : > { %276 = vadd.xlane.f32.xlu0 %v275_v15 }
 0x13b   : > { %282 = vadd.xlane.f32.xlu1 %v281_v17 }
 0x13c   : > { %279 = vadd.xlane.f32.xlu0 %v278_v18 }
 0x1bc   : > { %v264_v20 = vpop.xlane.xlu1 %263 }
 0x1bd   : > { %v258_v21 = vpop.xlane.xlu0 %257 }
 0x1c0   : > { %v267_v22 = vpop.xlane.xlu1 %266 }
 0x1c1   : > { %v261_v23 = vpop.xlane.xlu0 %260 }
 0x1c2   : > { %v284_v24 = vadd.f32 %v261_v23, %v258_v21 }
 0x1c4   : > { %v285_v25 = vadd.f32 %v284_v24, %v264_v20  ;;  %v274_v26 = vpop.xlane.xlu1 %273 }
 0x1c5   : > { %v277_v27 = vpop.xlane.xlu0 %276 }
 0x1c6   : > { %v286_v28 = vadd.f32 %v285_v25, %v267_v22  ;;  %v287_v29 = vadd.f32 %v277_v27, %v274_v26 }
 0x1c8   : > { %v291_v30 = vmul.f32 0.015625, %v286_v28  ;;  %v283_v33 = vpop.xlane.xlu1 %282 }
 0x1c9   : > { %v280_v31 = vpop.xlane.xlu0 %279 }
 0x1ca   : > { %v288_v32 = vadd.f32 %v287_v29, %v280_v31  ;;  %300 = vperm.xlu0 %548, %v291_v30   ;;  %v293_v36 = vmul.f32 %v291_v30, %v291_v30 }
 0x1cc   : > { %v289_v34 = vadd.f32 %v288_v32, %v283_v33 }
 0x1ce   : > { %v292_v35 = vmul.f32 0.015625, %v289_v34 }
 0x1d0   : > { %v294_v37 = vsub.f32 %v292_v35, %v293_v36 }
 0x1d2   : > { %v295_v38 = vmax.f32 %v294_v37, 0.0 }
 0x1d4   : > { %v296_v39 = vadd.f32 1e-05, %v295_v38 }
 0x1d6   : > { %553 = vrsqrt.f32 %v296_v39 }
 0x1e0   : > { %v554_v40 = vpop.eup %553 }
 0x1e1   : > { %309 = vperm.xlu1 %549, %v554_v40  }
 0x249   : > { %v301_v41 = vpop.permute.xlu0 %300 }
 0x24a   : > { %v303_v42 = vsub.f32 %v241_v4, %v301_v41  ;;  %v304_v43 = vsub.f32 %v244_v8, %v301_v41  ;;  %v305_v44 = vsub.f32 %v484_v3, %v301_v41  ;;  %v306_v45 = vsub.f32 %v485_v6, %v301_v41 }
 0x260   : > { %v310_v46 = vpop.permute.xlu1 %309 }
 0x261   : > { %v312_v47 = vmul.f32 %v310_v46, %v303_v42  ;;  %v313_v48 = vmul.f32 %v310_v46, %v304_v43  ;;  %v314_v49 = vmul.f32 %v310_v46, %v305_v44  ;;  %v315_v50 = vmul.f32 %v310_v46, %v306_v45 }
 0x263   : > { %vm316_vm1 = vcmp.ge.f32.partialorder %v312_v47, 0.0  ;;  %vm317_vm2 = vcmp.ge.f32.partialorder %v313_v48, 0.0  ;;  %vm318_vm3 = vcmp.ge.f32.partialorder %v314_v49, 0.0  ;;  %vm319_vm4 = vcmp.ge.f32.partialorder %v315_v50, 0.0 }
 0x264   : > { %v320_v51 = vmul.f32 0.2, %v312_v47  ;;  %v321_v52 = vmul.f32 0.2, %v313_v48  ;;  %v322_v53 = vmul.f32 0.2, %v314_v49 }
 0x265   : > { %v323_v54 = vmul.f32 0.2, %v315_v50 }
 0x266   : > { %v324_v55 = vsel %vm316_vm1, %v312_v47, %v320_v51  ;;  %v325_v56 = vsel %vm317_vm2, %v313_v48, %v321_v52  ;;  %v326_v57 = vsel %vm318_vm3, %v314_v49, %v322_v53 }
 0x267   : > { %v327_v58 = vsel %vm319_vm4, %v315_v50, %v323_v54  ;;  %v472_v59 = vpack.c.bf16 %v324_v55, %v324_v55  ;;  %v473_v60 = vpack.c.bf16 %v325_v56, %v325_v56  ;;  %v474_v61 = vpack.c.bf16 %v326_v57, %v326_v57 }
 0x268   : > { %v475_v62 = vpack.c.bf16 %v327_v58, %v327_v58 }
 0x269   : > { %345 = vst.msk [vmem:[%s176_s4] sm:$0xf] %vm344_vm5, %v472_v59  ;;  %346 = vst.msk [vmem:[%s176_s4 + $0x4] sm:$0xf] %vm344_vm5, %v473_v60 }
 0x26a   : > { %347 = vst.msk [vmem:[%s176_s4 + $0x8] sm:$0xf] %vm344_vm5, %v474_v61  ;;  %348 = vst.msk [vmem:[%s176_s4 + $0xc] sm:$0xf] %vm344_vm5, %v475_v62 }
 0x26b   : > { %626 = shalt.err (!%p623_p7)
}
 0x26c   : > { %s627_s18 = scalar_lea.hbm %s872_s13, 256  ;;  %s631_s26 = scalar_lea.hbm %s919_s2, 2048 }
 0x26d   : > { %p628_p9 = scmp.ne.s32.totalorder %s872_s13, %s627_s18  ;;  %p632_p5 = scmp.lt.u32.totalorder %s872_s13, %s919_s2 }
 0x26e   : > { %p633_p2 = scmp.lt.u32.totalorder %s631_s26, %s627_s18  ;;  %p635_p4 = scmp.lt.u32.totalorder %s627_s18, %s872_s13 }
 0x26f   : > { %p629_p1 = pnand %p628_p9, %p794_p12 }
 0x270   : > { %p634_p10 = por %p633_p2, %p632_p5 }
 0x271   : > { %p630_p0 = pneg %p629_p1 }
 0x272   : > { %p636_p6 = por %p635_p4, %p634_p10 }
 0x274   : > { %p637_p8 = pnand %p636_p6, %p630_p0 }
 0x276   : > { %640 = shalt.err (!%p637_p8)
}
 0x277   : > { %s691_s3 = smov 64   ;;  %s692_s15 = smov 4  }
 0x278   : > { %492 = dma.vmem_to_hbm [thread:$0]  (%p794_p12), %s874_s5, 256, %s872_s13, %s350_s23, %s691_s3, %s691_s3, %s692_s15  }
 0x279 PF: > { %p509_p11 = scmp.ge.s32.totalorder %s683_s12, 2  ;;  %s378_s17 = sand.u32 1, %s671_s9  }
 0x27a   : > { %p934_p13 = scmp.ne.s32.totalorder %s924_s16, 0  ;;  %s379_s4 = scalar_lea.sflag [#allocation4], %s378_s17 }
 0x27c   : > { %p503_p3 = pnand %p509_p11, %p934_p13 }
 0x27e   : > { %666 = dma.done.wait (!%p503_p3), %s379_s4, 256  }
 0x27f   : > { %668 = vsyncadd (!%p503_p3), %s379_s4, 4294967040  ;;  %p16_p7 = scmp.ge.s32.totalorder %s761_s21, 10   ;;  %s935_s9 = smov %s675_s10 }
 0x280   : > { %s936_s10 = smov %s679_s11  ;;  %s937_s11 = smov %s790_s8 }
 0x281   : > { %s938_s12 = smov %s761_s21  ;;  %18 = sbr.rel (!%p16_p7) target bundleno = 6 (0x6), region = 77 }
 0x288   :  { %384 = vsyncpa [#allocation3], 1 }
 0x289   :  { %386 = vsyncpa [#allocation3 + $0x1], 1 }
 0x28a   :  { %387 = vsyncpa [#allocation6], 1 }
 0x28b   :  { %388 = vsyncpa [#allocation4], 1 }
 0x28c   :  { %390 = vsyncpa [#allocation4 + $0x1], 1 }

// kernel: sensitivity_model_forward.20
= control target key start
LH: loop header
LB: loop body
LE: loop exit
PB: predicated region body
PF: predicated region fallthrough
CT: control target
= control target key end

     0   :  { %8 = vsyncpa [#allocation3], 0  ;;  %s1485_s0 = inlined_call_operand.hbm [shape: bf16[8,16,100], index: 0, kind: input, shape index: {}]   ;;  %s1486_s1 = inlined_call_operand.hbm [shape: bf16[9,8,16], index: 1, kind: input, shape index: {}]   ;;  %s1487_s2 = inlined_call_operand.hbm [shape: f32[1,78], index: 2, kind: input, shape index: {}]   ;;  %s1488_s3 = inlined_call_operand.hbm [shape: bf16[8,8,100], index: 3, kind: output, shape index: {}]  }
   0x1   :  { %10 = vsyncpa [#allocation3 + $0x1], 0 }
   0x2   :  { %11 = vsyncpa [#allocation6], 0 }
   0x3   :  { %12 = vsyncpa [#allocation4], 0 }
   0x4   :  { %14 = vsyncpa [#allocation4 + $0x1], 0  ;;  %s1218_s12 = smov 0   ;;  %s1220_s13 = smov 0  }
   0x5   :  { %s1222_s14 = smov 0   ;;  %s1224_s15 = smov 0  }
   0x6 LB: > { %s1239_s16 = sadd.s32 4294967295, %s1178_s15   ;;  %s806_s17 = sadd.s32 4294967294, %s1178_s15   ;;  %s1178_s15 = sphi %s1224_s15, %s1507_s15   ;;  %s1174_s14 = sphi %s1222_s14, %s1506_s14   ;;  %s1170_s13 = sphi %s1220_s13, %s1505_s13   ;;  %s1166_s12 = sphi %s1218_s12, %s1504_s12  }
   0x7   : > { %p40_p0 = scmp.ne.s32.totalorder %s1170_s13, %s1166_s12  ;;  %p1489_p1 = scmp.eq.s32.totalorder %s1239_s16, 0 }
   0x8   : > { %p112_p3 = scmp.eq.s32.totalorder %s806_s17, 7  ;;  %p807_p5 = scmp.ge.s32.totalorder %s1178_s15, 1 }
   0x9   : > { %p1248_p4 = por %p1489_p1, %p40_p0  ;;  %p119_p7 = scmp.lt.s32.totalorder %s1178_s15, 9 }
   0xa   : > { %p1253_p6 = por %p112_p3, %p40_p0  ;;  %s1180_s21 = smov [#allocation5]  }
   0xb   : > { %s1492_s18 = scalar_select %p1248_p4, 1, 0 }
   0xc   : > { %s1493_s19 = scalar_select %p1253_p6, 1, 0 }
   0xd   : > { %p1258_p8 = pnand %p807_p5, %p119_p7  ;;  %s131_s22 = sshll.u32 %s1180_s21, 4  ;;  %s132_s22 = int_to_ptr.vmem [resolvable:$true] %s131_s22 }
   0xe   : > { %s1181_s24 = smov [#allocation7]   ;;  %s1022_s28 = scalar_lea.hbm %s1486_s1, 576 }
   0xf   : > { %s1494_s20 = scalar_select %p1258_p8, 1, 0 }
  0x10   : > { %p950_p9 = pneg %p1258_p8  ;;  %s145_s25 = sshll.u32 %s1181_s24, 4  ;;  %s1270_s25 = int_to_ptr.vmem [resolvable:$true] %s145_s25 }
  0x11   : > { %p1023_p11 = scmp.ne.s32.totalorder %s1486_s1, %s1022_s28  ;;  %p1029_p3 = scmp.lt.u32.totalorder %s1022_s28, %s1486_s1 }
  0x12   : > { %p1266_p10 = pnand %p950_p9, %p1489_p1 }
  0x14   : > { %p1024_p12 = pneg %p1266_p10 }
  0x16   : > { %p1025_p13 = pnand %p1024_p12, %p1023_p11 }
  0x18   : > { %p1026_p0 = pneg %p1025_p13 }
  0x1a   : > { %p1031_p5 = pnand %p1029_p3, %p1026_p0 }
  0x1c   : > { %1034 = shalt.err (!%p1031_p5)
}
  0x1d   : > { %s1035_s6 = scalar_lea.vmem %s132_s22, 576  ;;  %p1043_p2 = scmp.lt.s32.totalorder %s132_s22, %s132_s22 }
  0x1e   : > { %p1036_p7 = scmp.ne.s32.totalorder %s132_s22, %s1035_s6  ;;  %p1044_p6 = scmp.lt.s32.totalorder %s1035_s6, %s1035_s6 }
  0x20   : > { %p1038_p9 = pnand %p1036_p7, %p1024_p12  ;;  %p1045_p4 = por %p1044_p6, %p1043_p2 }
  0x22   : > { %p1039_p1 = pneg %p1038_p9 }
  0x24   : > { %p1046_p8 = pnand %p1045_p4, %p1039_p1 }
  0x26   : > { %1049 = shalt.err (!%p1046_p8)
}
  0x27   : > { %s1182_s7 = smov 64   ;;  %s1183_s8 = smov 4  }
  0x28   : > { %953 = dma.hbm_to_vmem [thread:$0]  (!%p1266_p10), %s1486_s1, 576, %s132_s22, [#allocation6], %s1182_s7, %s1182_s7, %s1183_s8  }
  0x29   : > { %s1050_s21 = scalar_lea.hbm %s1487_s2, 16 }
  0x2a   : > { %p1051_p1 = scmp.ne.s32.totalorder %s1487_s2, %s1050_s21  ;;  %p1057_p6 = scmp.lt.u32.totalorder %s1050_s21, %s1487_s2 }
  0x2c   : > { %p1053_p2 = pnand %p1051_p1, %p1024_p12 }
  0x2e   : > { %p1054_p4 = pneg %p1053_p2 }
  0x30   : > { %p1059_p8 = pnand %p1057_p6, %p1054_p4 }
  0x32   : > { %1062 = shalt.err (!%p1059_p8)
}
  0x33   : > { %s1063_s22 = scalar_lea.vmem %s1270_s25, 16  ;;  %s1070_s29 = scalar_lea.vmem %s1270_s25, 32 }
  0x34   : > { %p1064_p11 = scmp.ne.s32.totalorder %s1270_s25, %s1063_s22  ;;  %p1071_p3 = scmp.lt.s32.totalorder %s1270_s25, %s1270_s25 }
  0x35   : > { %p1072_p5 = scmp.lt.s32.totalorder %s1070_s29, %s1063_s22 }
  0x36   : > { %p1066_p13 = pnand %p1064_p11, %p1024_p12 }
  0x37   : > { %p1073_p7 = por %p1072_p5, %p1071_p3 }
  0x38   : > { %p1067_p0 = pneg %p1066_p13 }
  0x3a   : > { %p1074_p9 = pnand %p1073_p7, %p1067_p0 }
  0x3c   : > { %1077 = shalt.err (!%p1074_p9)
}
  0x3d   : > { %956 = dma.hbm_to_vmem [thread:$0]  (!%p1266_p10), %s1487_s2, 16, %s1270_s25, [#allocation6]  }
  0x3e   : > { %s1324_s5 = sadd.s32 1, %s1178_s15   ;;  %s27_s23 = sadd.s32 1, %s1174_s14 }
  0x3f   : > { %s24_s6 = ssub.s32 %s1178_s15, %s1324_s5  ;;  %p34_p12 = scmp.ne.s32.totalorder %s1174_s14, %s1170_s13 }
  0x40   : > { %p25_p1 = scmp.eq.s32.totalorder %s24_s6, 0  ;;  %p35_p2 = scmp.eq.s32.totalorder %s1178_s15, 0 }
  0x41   : > { %p1496_p4 = scmp.eq.s32.totalorder %s1239_s16, 7  ;;  %p967_p8 = scmp.lt.s32.totalorder %s1178_s15, 8 }
  0x42   : > { %s1340_s10 = scalar_select %p25_p1, %s1174_s14, %s27_s23  }
  0x43   : > { %p1334_p6 = por %p1496_p4, %p34_p12  ;;  %p36_p11 = por %p35_p2, %p34_p12 }
  0x44   : > { %s156_s11 = sand.u32 1, %s1174_s14   ;;  %s835_s25 = sshll.u32 %s1178_s15, 7 }
  0x45   : > { %s811_s17 = sshll.u32 %s156_s11, 3  ;;  %s1347_s26 = scalar_lea.hbm %s1485_s0, %s835_s25 }
  0x46   : > { %s160_s27 = scalar_lea.vmem [#allocation2], %s811_s17  ;;  %p1351_p10 = pnand %p967_p8, %p36_p11 }
  0x47   : > { %s167_s28 = sshll.u32 %s160_s27, 4  ;;  %s1355_s29 = scalar_lea.sflag [#allocation3], %s156_s11  ;;  %s1349_s28 = int_to_ptr.vmem [resolvable:$true] %s167_s28 }
  0x48   : > { %s1078_s30 = scalar_lea.hbm %s1347_s26, 128  ;;  %p1080_p0 = pneg %p1351_p10 }
  0x49   : > { %p1079_p13 = scmp.ne.s32.totalorder %s1347_s26, %s1078_s30  ;;  %s1083_s6 = scalar_lea.hbm %s1485_s0, 1024 }
  0x4a   : > { %p1084_p7 = scmp.lt.u32.totalorder %s1347_s26, %s1485_s0  ;;  %p1085_p9 = scmp.lt.u32.totalorder %s1083_s6, %s1078_s30 }
  0x4b   : > { %p1081_p3 = pnand %p1080_p0, %p1079_p13  ;;  %p1087_p1 = scmp.lt.u32.totalorder %s1078_s30, %s1347_s26 }
  0x4c   : > { %p1086_p12 = por %p1085_p9, %p1084_p7 }
  0x4d   : > { %p1082_p5 = pneg %p1081_p3 }
  0x4e   : > { %p1088_p2 = por %p1087_p1, %p1086_p12 }
  0x50   : > { %p1089_p4 = pnand %p1088_p2, %p1082_p5 }
  0x52   : > { %1092 = shalt.err (!%p1089_p4)
}
  0x53   : > { %s1093_s11 = scalar_lea.vmem %s1349_s28, 128  ;;  %s1184_s21 = smov [#allocation2]  }
  0x54   : > { %p1094_p8 = scmp.ne.s32.totalorder %s1349_s28, %s1093_s11  ;;  %s1098_s24 = sshll.u32 %s1184_s21, 4  ;;  %s1099_s24 = int_to_ptr.vmem [resolvable:$false] %s1098_s24 }
  0x55   : > { %s1100_s27 = scalar_lea.vmem %s1099_s24, 256  ;;  %p1101_p3 = scmp.lt.s32.totalorder %s1349_s28, %s1099_s24 }
  0x56   : > { %p1096_p11 = pnand %p1094_p8, %p1080_p0  ;;  %p1102_p7 = scmp.lt.s32.totalorder %s1100_s27, %s1093_s11 }
  0x58   : > { %p1097_p13 = pneg %p1096_p11  ;;  %p1103_p9 = por %p1102_p7, %p1101_p3 }
  0x5a   : > { %p1104_p12 = pnand %p1103_p9, %p1097_p13 }
  0x5c   : > { %1107 = shalt.err (!%p1104_p12)
}
  0x5d   : > { %960 = dma.hbm_to_vmem [thread:$0]  (!%p1351_p10), %s1347_s26, 128, %s1349_s28, %s1355_s29, %s1182_s7, %s1182_s7, %s1183_s8  }
  0x5e   : > { %p1499_p0 = scmp.ne.s32.totalorder %s1494_s20, 0 }
  0x5f   : > { %s1389_s30 = sand.u32 (!%p1499_p0), 1, %s1170_s13   ;;  %p1500_p5 = scmp.ne.s32.totalorder (!%p1499_p0), %s1492_s18, 0 }
  0x60   : > { %179 = sbr.rel (%p1499_p0) target bundleno = 794 (0x31a), region = 32  ;;  %s815_s4 = sshll.u32 (!%p1499_p0), %s1389_s30, 3 }
  0x61   : > { %s182_s23 = scalar_lea.sflag (!%p1499_p0), [#allocation3], %s1389_s30  ;;  %s185_s6 = scalar_lea.vmem (!%p1499_p0), [#allocation2], %s815_s4 }
  0x67   : > { %1153 = dma.done.wait (%p1500_p5), %s182_s23, 128  }
  0x68   : > { %1155 = vsyncadd (%p1500_p5), %s182_s23, 4294967168  ;;  %p1501_p1 = scmp.eq.s32.totalorder %s1239_s16, 0 }
  0x6a   : > { %1157 = dma.done.wait (%p1501_p1), [#allocation6], 592   ;;  %p1502_p10 = pmov %p1501_p1 }
  0x6b   : > { %v1185_v0 = vmov 0.0   ;;  %vm1186_vm0 = vmmov 0   ;;  %v1019_v1 = vld [vmem:[%s185_s6] sm:$0xff]   ;;  %s1187_s18 = smov 117   ;;  %s1188_s20 = smov 116   ;;  %vm230_vm1 = vcmask 130048  }
  0x6c   : > { %1159 = vsyncadd (%p1502_p10), [#allocation6], 4294966704  ;;  %879 = vmatprep.subr.bf16.mxu0 %v1185_v0  ;;  %881 = vmatprep.mubr.msk.bf16.mxu0 %vm1186_vm0, %v1185_v0  ;;  %s1189_s7 = smov 127   ;;  %s1190_s8 = smov 108   ;;  %v417_v3 = vld [vmem:[#allocation5 + $0x10] sm:$0xf] }
  0x6d   : > { %855 = vmatprep.subr.bf16.mxu1 %v1185_v0  ;;  %857 = vmatprep.mubr.msk.bf16.mxu1 %vm1186_vm0, %v1185_v0  ;;  %s1191_s26 = smov 107   ;;  %s1192_s28 = smov 126   ;;  %v221_v6 = vld [vmem:[#allocation5 + $0x4] sm:$0xf]  ;;  %v466_v7 = vld [vmem:[#allocation5 + $0x14] sm:$0xf] }
  0x6e   : > { %418 = vrot.lane.b32.xlu0 %v1019_v1, %s1187_s18  ;;  %467 = vrot.lane.b32.xlu1 %v1019_v1, %s1188_s20  ;;  %s1193_s22 = smov 106   ;;  %s1194_s29 = smov 118   ;;  %v217_v9 = vld [vmem:[#allocation5] sm:$0xf]  ;;  %v515_v11 = vld [vmem:[#allocation5 + $0x18] sm:$0xf] }
  0x6f   : > { %v319_v13 = vld [vmem:[#allocation5 + $0x8] sm:$0xf]  ;;  %v564_v15 = vld [vmem:[#allocation5 + $0x1c] sm:$0xf]  ;;  %v368_v17 = vld [vmem:[#allocation5 + $0xc] sm:$0xf] }
  0x70   : > { %v613_v18 = vld [vmem:[#allocation5 + $0x20] sm:$0xf]  ;;  %v829_v24 = vld [vmem:[#allocation7] ss:$0 sm:$0xff]  ;;  %vm669_vm2 = vcmask 637952   ;;  %s818_s17 = sshll.u32 %s1389_s30, 2 }
  0x71   : > { %vm692_vm3 = vcmask 814080   ;;  %s215_s25 = scalar_lea.vmem [#allocation8], %s818_s17  ;;  %v1195_v42 = vmov 0   ;;  %s1196_s11 = smov 11   ;;  %vm701_vm5 = vcmask 724056  }
  0x72   : > { %227 = vrot.lane.b32.xlu0 %v1019_v1, %s1189_s7  ;;  %516 = vrot.lane.b32.xlu1 %v1019_v1, %s1190_s8  ;;  %693 = vst.msk [vmem:[%s215_s25] sm:$0xf] %vm692_vm3, %v1195_v42  ;;  %s832_s21 = sshll.u32 %s1239_s16, 6  ;;  %s717_s24 = sshll.u32 %s215_s25, 4  ;;  %s1444_s24 = int_to_ptr.vmem [resolvable:$true] %s717_s24 }
  0x73   : > { %s1442_s23 = scalar_lea.hbm %s1488_s3, %s832_s21  ;;  %s704_s6 = scalar_lea.sflag [#allocation4], %s1389_s30 }
  0x74   : > { %s1108_s18 = scalar_lea.vmem %s1444_s24, 64  ;;  %s1197_s16 = smov [#allocation8]  }
  0x75   : > { %p1109_p2 = scmp.ne.s32.totalorder %s1444_s24, %s1108_s18  ;;  %s1112_s20 = sshll.u32 %s1197_s16, 4  ;;  %s1113_s20 = int_to_ptr.vmem [resolvable:$false] %s1112_s20 }
  0x76   : > { %565 = vrot.lane.b32.xlu1 %v1019_v1, %s1191_s26  ;;  %320 = vrot.lane.b32.xlu0 %v1019_v1, %s1192_s28  ;;  %s1114_s7 = scalar_lea.vmem %s1113_s20, 128  ;;  %p1115_p11 = scmp.lt.s32.totalorder %s1444_s24, %s1113_s20 }
  0x77   : > { %p1110_p4 = pnand %p1109_p2, %p1334_p6  ;;  %p1116_p13 = scmp.lt.s32.totalorder %s1114_s7, %s1108_s18 }
  0x79   : > { %p1111_p8 = pneg %p1110_p4  ;;  %p1117_p3 = por %p1116_p13, %p1115_p11 }
  0x7a   : > { %614 = vrot.lane.b32.xlu1 %v1019_v1, %s1193_s22  ;;  %369 = vrot.lane.b32.xlu0 %v1019_v1, %s1194_s29 }
  0x7b   : > { %p1118_p7 = pnand %p1117_p3, %p1111_p8 }
  0xe0   : > { %v419_v2 = vpop.permute.xlu0 %418  ;;  %v468_v4 = vpop.permute.xlu1 %467 }
  0xe1   : > { %880 = vmatpush3.bf16.msra.mxu0 %v419_v2 }
  0xe2   : > { %885 = vmatprep.subr.bf16.mxu0 %v1185_v0 }
  0xe4   : > { %882 = vmatmul.mubr.msk.bf16.vlgmr.msra.gmra.mrb[0].mxu0 %vm230_vm1, %v417_v3  ;;  %v228_v5 = vpop.permute.xlu0 %227  ;;  %v517_v8 = vpop.permute.xlu1 %516 }
  0xe5   : > { %856 = vmatpush3.bf16.msra.mxu1 %v228_v5  ;;  %886 = vmatpush3.bf16.msra.mxu0 %v468_v4 }
  0xe6   : > { %887 = vmatprep.mubr.msk.bf16.mxu0 %vm1186_vm0, %v1185_v0  ;;  %861 = vmatprep.subr.bf16.mxu1 %v1185_v0 }
  0xe7   : > { %891 = vmatprep.subr.bf16.mxu0 %v1185_v0 }
  0xe8   : > { %858 = vmatmul.mubr.msk.bf16.vlgmr.msra.gmra.mrb[0].mxu1 %vm230_vm1, %v221_v6  ;;  %v321_v10 = vpop.permute.xlu0 %320  ;;  %v566_v12 = vpop.permute.xlu1 %565 }
  0xe9   : > { %862 = vmatpush3.bf16.msra.mxu1 %v1019_v1  ;;  %863 = vmatprep.mubr.msk.bf16.mxu1 %vm1186_vm0, %v1185_v0 }
  0xea   : > { %867 = vmatprep.subr.bf16.mxu1 %v1185_v0 }
  0xec   : > { %v370_v14 = vpop.permute.xlu0 %369  ;;  %v615_v16 = vpop.permute.xlu1 %614 }
  0xf0   : > { %888 = vmatmul.mubr.msk.bf16.vlgmr.msra.gmra.mrb[0].mxu0 %vm230_vm1, %v466_v7 }
  0xf1   : > { %892 = vmatpush3.bf16.msra.mxu0 %v517_v8  ;;  %893 = vmatprep.mubr.msk.bf16.mxu0 %vm1186_vm0, %v1185_v0 }
  0xf2   : > { %897 = vmatprep.subr.bf16.mxu0 %v1185_v0 }
  0xf4   : > { %864 = vmatmul.mubr.msk.bf16.vlgmr.msra.gmra.mrb[0].mxu1 %vm230_vm1, %v217_v9 }
  0xf5   : > { %868 = vmatpush3.bf16.msra.mxu1 %v321_v10  ;;  %869 = vmatprep.mubr.msk.bf16.mxu1 %vm1186_vm0, %v1185_v0 }
  0xf6   : > { %873 = vmatprep.subr.bf16.mxu1 %v1185_v0 }
  0xfc   : > { %894 = vmatmul.mubr.msk.bf16.vlgmr.msra.gmra.mrb[0].mxu0 %vm230_vm1, %v515_v11 }
  0xfd   : > { %898 = vmatpush3.bf16.msra.mxu0 %v566_v12  ;;  %899 = vmatprep.mubr.msk.bf16.mxu0 %vm1186_vm0, %v1185_v0 }
  0xfe   : > { %903 = vmatprep.subr.bf16.mxu0 %v1185_v0 }
 0x100   : > { %870 = vmatmul.mubr.msk.bf16.vlgmr.msra.gmra.mrb[0].mxu1 %vm230_vm1, %v319_v13 }
 0x101   : > { %874 = vmatpush3.bf16.msra.mxu1 %v370_v14  ;;  %875 = vmatprep.mubr.msk.bf16.mxu1 %vm1186_vm0, %v1185_v0 }
 0x108   : > { %900 = vmatmul.mubr.msk.bf16.vlgmr.msra.gmra.mrb[0].mxu0 %vm230_vm1, %v564_v15 }
 0x109   : > { %904 = vmatpush3.bf16.msra.mxu0 %v615_v16  ;;  %905 = vmatprep.mubr.msk.bf16.mxu0 %vm1186_vm0, %v1185_v0 }
 0x10c   : > { %876 = vmatmul.mubr.msk.bf16.vlgmr.msra.gmra.mrb[0].mxu1 %vm230_vm1, %v368_v17 }
 0x114   : > { %906 = vmatmul.mubr.msk.bf16.vlgmr.msra.gmra.mrb[0].mxu0 %vm230_vm1, %v613_v18 }
 0x1df   : > { %v409_v19 = vpop.f32.mrb[0].mxu1 }
 0x1e0   : > { %v877_v20 = vpop.f32.mrb[1].mxu1 }
 0x1e1   : > { %v412_v21 = vpop.f32.mrb[2].mxu1 }
 0x1e2   : > { %v878_v22 = vpop.f32.mrb[3].mxu1 }
 0x1e7   : > { %v654_v23 = vpop.f32.mrb[0].mxu0 }
 0x1e8   : > { %v909_v25 = vadd.f32 %v654_v23, %v409_v19  ;;  %v907_v26 = vpop.f32.mrb[1].mxu0 }
 0x1e9   : > { %v657_v27 = vpop.f32.mrb[2].mxu0 }
 0x1ea   : > { %v908_v28 = vpop.f32.mrb[3].mxu0  ;;  %v668_v29 = vmul.f32 %v909_v25, %v829_v24  ;;  %v673_v30 = vmul.f32 %v909_v25, %v909_v25 }
 0x1ec   : > { %v670_v31 = vsel %vm669_vm2, %v668_v29, 0.0  ;;  %v674_v32 = vmul.f32 %v829_v24, %v673_v30 }
 0x1ed   : > { %671 = vadd.xlane.f32.xlu0 %v670_v31 }
 0x1ee   : > { %v675_v33 = vsel %vm669_vm2, %v674_v32, 0.0 }
 0x1ef   : > { %676 = vadd.xlane.f32.xlu1 %v675_v33 }
 0x27a   : > { %v672_v34 = vpop.xlane.xlu0 %671 }
 0x27b   : > { %v679_v35 = vmul.f32 0.015625, %v672_v34 }
 0x27c   : > { %v677_v36 = vpop.xlane.xlu1 %676 }
 0x27d   : > { %v681_v37 = vmul.f32 %v679_v35, %v679_v35  ;;  %v680_v38 = vmul.f32 0.015625, %v677_v36  ;;  %v684_v43 = vsub.f32 %v909_v25, %v679_v35 }
 0x27f   : > { %v682_v39 = vsub.f32 %v680_v38, %v681_v37 }
 0x281   : > { %v683_v40 = vmax.f32 %v682_v39, 0.0 }
 0x283   : > { %v685_v41 = vadd.f32 1e-05, %v683_v40 }
 0x285   : > { %1020 = vrsqrt.f32 %v685_v41 }
 0x28f   : > { %v1021_v44 = vpop.eup %1020 }
 0x290   : > { %v687_v45 = vmul.f32 %v1021_v44, %v684_v43 }
 0x292   : > { %vm688_vm4 = vcmp.ge.f32.partialorder %v687_v45, 0.0  ;;  %v689_v46 = vmul.f32 0.2, %v687_v45 }
 0x294   : > { %v690_v47 = vsel %vm688_vm4, %v687_v45, %v689_v46 }
 0x295   : > { %v691_v48 = vmul.f32 %v829_v24, %v690_v47 }
 0x297   : > { %v836_v49 = vpack.c.bf16 %v691_v48, %v691_v48 }
 0x299   : > { %698 = vrot.lane.b32.xlu0 %v836_v49, %s1196_s11 }
 0x30b   : > { %v699_v50 = vpop.permute.xlu0 %698 }
 0x30c   : > { %702 = vst.msk [vmem:[%s215_s25] sm:$0xf] %vm701_vm5, %v699_v50 }
 0x30d   : > { %1121 = shalt.err (!%p1118_p7)
}
 0x30e   : > { %s1122_s30 = scalar_lea.hbm %s1442_s23, 64  ;;  %s1126_s28 = scalar_lea.hbm %s1488_s3, 512 }
 0x30f   : > { %p1123_p9 = scmp.ne.s32.totalorder %s1442_s23, %s1122_s30  ;;  %p1127_p5 = scmp.lt.u32.totalorder %s1442_s23, %s1488_s3 }
 0x310   : > { %p1128_p1 = scmp.lt.u32.totalorder %s1126_s28, %s1122_s30  ;;  %p1130_p2 = scmp.lt.u32.totalorder %s1122_s30, %s1442_s23 }
 0x311   : > { %p1124_p12 = pnand %p1123_p9, %p1334_p6 }
 0x312   : > { %p1129_p10 = por %p1128_p1, %p1127_p5 }
 0x313   : > { %p1125_p0 = pneg %p1124_p12 }
 0x314   : > { %p1131_p4 = por %p1130_p2, %p1129_p10 }
 0x316   : > { %p1132_p8 = pnand %p1131_p4, %p1125_p0 }
 0x318   : > { %1135 = shalt.err (!%p1132_p8)
}
 0x319   : > { %948 = dma.vmem_to_hbm [thread:$0]  (%p1334_p6), %s1444_s24, 64, %s1442_s23, %s704_s6  }
 0x31a PF: > { %p970_p11 = scmp.ge.s32.totalorder %s1178_s15, 2  ;;  %s729_s17 = sand.u32 1, %s1166_s12  }
 0x31b   : > { %p1503_p13 = scmp.ne.s32.totalorder %s1493_s19, 0  ;;  %s730_s25 = scalar_lea.sflag [#allocation4], %s729_s17 }
 0x31d   : > { %p962_p3 = pnand %p970_p11, %p1503_p13 }
 0x31f   : > { %1161 = dma.done.wait (!%p962_p3), %s730_s25, 64  }
 0x320   : > { %1163 = vsyncadd (!%p962_p3), %s730_s25, 4294967232  ;;  %p17_p7 = scmp.ge.s32.totalorder %s1324_s5, 10   ;;  %s1504_s12 = smov %s1170_s13 }
 0x321   : > { %s1505_s13 = smov %s1174_s14  ;;  %s1506_s14 = smov %s1340_s10 }
 0x322   : > { %s1507_s15 = smov %s1324_s5  ;;  %19 = sbr.rel (!%p17_p7) target bundleno = 6 (0x6), region = 93 }
 0x329   :  { %735 = vsyncpa [#allocation3], 1 }
 0x32a   :  { %737 = vsyncpa [#allocation3 + $0x1], 1 }
 0x32b   :  { %738 = vsyncpa [#allocation6], 1 }
 0x32c   :  { %739 = vsyncpa [#allocation4], 1 }
 0x32d   :  { %741 = vsyncpa [#allocation4 + $0x1], 1 }

// kernel: sensitivity_model_forward.22
= control target key start
LH: loop header
LB: loop body
LE: loop exit
PB: predicated region body
PF: predicated region fallthrough
CT: control target
= control target key end

     0   :  { %7 = vsyncpa [#allocation3], 0  ;;  %s856_s0 = inlined_call_operand.hbm [shape: bf16[8,8,64], index: 0, kind: input, shape index: {}]   ;;  %s857_s1 = inlined_call_operand.hbm [shape: bf16[16,8], index: 1, kind: input, shape index: {}]   ;;  %s858_s2 = inlined_call_operand.hbm [shape: bf16[8,16,64], index: 2, kind: output, shape index: {}]  }
   0x1   :  { %9 = vsyncpa [#allocation3 + $0x1], 0 }
   0x2   :  { %10 = vsyncpa [#allocation6], 0 }
   0x3   :  { %11 = vsyncpa [#allocation4], 0 }
   0x4   :  { %13 = vsyncpa [#allocation4 + $0x1], 0  ;;  %s663_s9 = smov 0   ;;  %s665_s10 = smov 0  }
   0x5   :  { %s667_s11 = smov 0   ;;  %s669_s12 = smov 0  }
   0x6 LB: > { %s684_s13 = sadd.s32 4294967295, %s636_s12   ;;  %s409_s14 = sadd.s32 4294967294, %s636_s12   ;;  %s636_s12 = sphi %s669_s12, %s877_s12   ;;  %s632_s11 = sphi %s667_s11, %s876_s11   ;;  %s628_s10 = sphi %s665_s10, %s875_s10   ;;  %s624_s9 = sphi %s663_s9, %s874_s9  }
   0x7   : > { %p39_p0 = scmp.ne.s32.totalorder %s628_s10, %s624_s9  ;;  %p859_p1 = scmp.eq.s32.totalorder %s684_s13, 0 }
   0x8   : > { %p90_p3 = scmp.eq.s32.totalorder %s409_s14, 7  ;;  %p410_p5 = scmp.ge.s32.totalorder %s636_s12, 1 }
   0x9   : > { %p693_p4 = por %p859_p1, %p39_p0  ;;  %p97_p7 = scmp.lt.s32.totalorder %s636_s12, 9 }
   0xa   : > { %p698_p6 = por %p90_p3, %p39_p0  ;;  %s638_s18 = smov [#allocation5]  }
   0xb   : > { %s862_s15 = scalar_select %p693_p4, 1, 0 }
   0xc   : > { %s863_s16 = scalar_select %p698_p6, 1, 0 }
   0xd   : > { %p703_p8 = pnand %p410_p5, %p97_p7  ;;  %s109_s19 = sshll.u32 %s638_s18, 4  ;;  %s110_s19 = int_to_ptr.vmem [resolvable:$true] %s109_s19 }
   0xe   : > { %s716_s21 = sadd.s32 1, %s636_s12   ;;  %s26_s22 = sadd.s32 1, %s632_s11 }
   0xf   : > { %s864_s17 = scalar_select %p703_p8, 1, 0 }
  0x10   : > { %p447_p9 = pneg %p703_p8  ;;  %s23_s23 = ssub.s32 %s636_s12, %s716_s21 }
  0x11   : > { %s508_s26 = scalar_lea.hbm %s857_s1, 128 }
  0x12   : > { %p711_p10 = pnand %p447_p9, %p859_p1  ;;  %p509_p11 = scmp.ne.s32.totalorder %s857_s1, %s508_s26 }
  0x13   : > { %p515_p3 = scmp.lt.u32.totalorder %s508_s26, %s857_s1 }
  0x14   : > { %p510_p12 = pneg %p711_p10 }
  0x16   : > { %p511_p13 = pnand %p510_p12, %p509_p11 }
  0x18   : > { %p512_p0 = pneg %p511_p13 }
  0x1a   : > { %p517_p5 = pnand %p515_p3, %p512_p0 }
  0x1c   : > { %520 = shalt.err (!%p517_p5)
}
  0x1d   : > { %s521_s3 = scalar_lea.vmem %s110_s19, 128  ;;  %p529_p2 = scmp.lt.s32.totalorder %s110_s19, %s110_s19 }
  0x1e   : > { %p522_p7 = scmp.ne.s32.totalorder %s110_s19, %s521_s3  ;;  %p530_p6 = scmp.lt.s32.totalorder %s521_s3, %s521_s3 }
  0x20   : > { %p524_p9 = pnand %p522_p7, %p510_p12  ;;  %p531_p4 = por %p530_p6, %p529_p2 }
  0x22   : > { %p525_p1 = pneg %p524_p9 }
  0x24   : > { %p532_p8 = pnand %p531_p4, %p525_p1 }
  0x26   : > { %535 = shalt.err (!%p532_p8)
}
  0x27   : > { %s639_s4 = smov 64   ;;  %s640_s5 = smov 4  }
  0x28   : > { %450 = dma.hbm_to_vmem [thread:$0]  (!%p711_p10), %s857_s1, 128, %s110_s19, [#allocation6], %s639_s4, %s639_s4, %s640_s5  }
  0x29   : > { %p24_p11 = scmp.eq.s32.totalorder %s23_s23, 0  ;;  %p33_p2 = scmp.ne.s32.totalorder %s632_s11, %s628_s10 }
  0x2a   : > { %p34_p1 = scmp.eq.s32.totalorder %s636_s12, 0  ;;  %p460_p4 = scmp.lt.s32.totalorder %s636_s12, 8 }
  0x2b   : > { %s742_s8 = scalar_select %p24_p11, %s632_s11, %s26_s22  }
  0x2c   : > { %p35_p6 = por %p34_p1, %p33_p2  ;;  %p866_p8 = scmp.eq.s32.totalorder %s684_s13, 7 }
  0x2d   : > { %s123_s18 = sand.u32 1, %s632_s11   ;;  %s414_s24 = sshll.u32 %s636_s12, 6 }
  0x2e   : > { %p746_p12 = por %p866_p8, %p33_p2  ;;  %s413_s25 = sshll.u32 %s123_s18, 2 }
  0x2f   : > { %s755_s27 = scalar_lea.hbm %s856_s0, %s414_s24  ;;  %s127_s19 = scalar_lea.vmem [#allocation2], %s413_s25 }
  0x30   : > { %s134_s22 = sshll.u32 %s127_s19, 4  ;;  %p757_p10 = pnand %p460_p4, %p35_p6  ;;  %s761_s22 = int_to_ptr.vmem [resolvable:$true] %s134_s22 }
  0x31   : > { %s124_s28 = scalar_lea.sflag [#allocation3], %s123_s18  ;;  %s536_s29 = scalar_lea.hbm %s755_s27, 64 }
  0x32   : > { %p537_p13 = scmp.ne.s32.totalorder %s755_s27, %s536_s29  ;;  %p538_p0 = pneg %p757_p10 }
  0x33   : > { %s541_s4 = scalar_lea.hbm %s856_s0, 512  ;;  %p542_p7 = scmp.lt.u32.totalorder %s755_s27, %s856_s0 }
  0x34   : > { %p539_p3 = pnand %p538_p0, %p537_p13  ;;  %p543_p9 = scmp.lt.u32.totalorder %s541_s4, %s536_s29 }
  0x35   : > { %p545_p2 = scmp.lt.u32.totalorder %s536_s29, %s755_s27 }
  0x36   : > { %p540_p5 = pneg %p539_p3  ;;  %p544_p11 = por %p543_p9, %p542_p7 }
  0x38   : > { %p546_p1 = por %p545_p2, %p544_p11 }
  0x3a   : > { %p547_p4 = pnand %p546_p1, %p540_p5 }
  0x3c   : > { %550 = shalt.err (!%p547_p4)
}
  0x3d   : > { %s551_s7 = scalar_lea.vmem %s761_s22, 64  ;;  %s641_s18 = smov [#allocation2]  }
  0x3e   : > { %p552_p6 = scmp.ne.s32.totalorder %s761_s22, %s551_s7  ;;  %s556_s24 = sshll.u32 %s641_s18, 4  ;;  %s557_s24 = int_to_ptr.vmem [resolvable:$false] %s556_s24 }
  0x3f   : > { %s558_s25 = scalar_lea.vmem %s557_s24, 128  ;;  %p559_p3 = scmp.lt.s32.totalorder %s761_s22, %s557_s24 }
  0x40   : > { %p554_p8 = pnand %p552_p6, %p538_p0  ;;  %p560_p7 = scmp.lt.s32.totalorder %s558_s25, %s551_s7 }
  0x42   : > { %p555_p13 = pneg %p554_p8  ;;  %p561_p9 = por %p560_p7, %p559_p3 }
  0x44   : > { %p562_p11 = pnand %p561_p9, %p555_p13 }
  0x46   : > { %565 = shalt.err (!%p562_p11)
}
  0x47   : > { %454 = dma.hbm_to_vmem [thread:$0]  (!%p757_p10), %s755_s27, 64, %s761_s22, %s124_s28  }
  0x48   : > { %p869_p5 = scmp.ne.s32.totalorder %s864_s17, 0 }
  0x49   : > { %s791_s20 = sand.u32 (!%p869_p5), 1, %s628_s10   ;;  %p870_p0 = scmp.ne.s32.totalorder (!%p869_p5), %s862_s15, 0 }
  0x4a   : > { %143 = sbr.rel (%p869_p5) target bundleno = 629 (0x275), region = 28  ;;  %s416_s26 = sshll.u32 (!%p869_p5), %s791_s20, 2 }
  0x4b   : > { %s146_s19 = scalar_lea.sflag (!%p869_p5), [#allocation3], %s791_s20  ;;  %s149_s29 = scalar_lea.vmem (!%p869_p5), [#allocation2], %s416_s26 }
  0x51   : > { %611 = dma.done.wait (%p870_p0), %s146_s19, 64  }
  0x52   : > { %613 = vsyncadd (%p870_p0), %s146_s19, 4294967232  ;;  %p871_p2 = scmp.eq.s32.totalorder %s684_s13, 0 }
  0x54   : > { %615 = dma.done.wait (%p871_p2), [#allocation6], 128   ;;  %p872_p10 = pmov %p871_p2 }
  0x55   : > { %v642_v0 = vmov 0.0   ;;  %vm643_vm0 = vmmov 0   ;;  %vm187_vm1 = vcmask 1043456   ;;  %v177_v1 = vld [vmem:[%s149_s29] sm:$0xf]  ;;  %v505_v3 = vld [vmem:[#allocation5] sm:$0xff]  }
  0x56   : > { %617 = vsyncadd (%p872_p10), [#allocation6], 4294967168  ;;  %433 = vmatprep.subr.bf16.mxu0 %v642_v0  ;;  %435 = vmatprep.mubr.msk.bf16.mxu0 %vm643_vm0, %v642_v0  ;;  %v189_v2 = vsel %vm187_vm1, %v177_v1, 0  ;;  %vm183_vm2 = vcmask 64512   ;;  %vm232_vm3 = vcmask 523264   ;;  %v644_v14 = vmov 0  }
  0x57   : > { %434 = vmatpush3.bf16.msra.mxu0 %v189_v2  ;;  %503 = vset.pattern.permute.xlu0 %v644_v14  ;;  %s418_s15 = sshll.u32 %s791_s20, 3  ;;  %s430_s17 = sshll.u32 %s684_s13, 7  ;;  %vm309_vm6 = vcmask 519168  }
  0x58   : > { %504 = vset.pattern.permute.xlu1 %v644_v14  ;;  %s173_s27 = scalar_lea.vmem [#allocation7], %s418_s15  ;;  %s811_s30 = scalar_lea.hbm %s858_s2, %s430_s17 }
  0x59   : > { %s326_s22 = sshll.u32 %s173_s27, 4  ;;  %s313_s13 = scalar_lea.sflag [#allocation4], %s791_s20  ;;  %s813_s22 = int_to_ptr.vmem [resolvable:$true] %s326_s22 }
  0x5a   : > { %436 = vmatmul.mubr.msk.bf16.vlgmr.msra.gmra.mrb[0].mxu0 %vm183_vm2, %v505_v3  ;;  %s566_s3 = scalar_lea.vmem %s813_s22, 128  ;;  %s645_s4 = smov [#allocation7]  }
  0x5b   : > { %p567_p1 = scmp.ne.s32.totalorder %s813_s22, %s566_s3  ;;  %s570_s5 = sshll.u32 %s645_s4, 4  ;;  %s571_s5 = int_to_ptr.vmem [resolvable:$false] %s570_s5 }
  0x5c   : > { %s572_s6 = scalar_lea.vmem %s571_s5, 256  ;;  %p573_p8 = scmp.lt.s32.totalorder %s813_s22, %s571_s5 }
  0x5d   : > { %p568_p4 = pnand %p567_p1, %p746_p12  ;;  %p574_p13 = scmp.lt.s32.totalorder %s572_s6, %s566_s3 }
  0x5f   : > { %p569_p6 = pneg %p568_p4  ;;  %p575_p3 = por %p574_p13, %p573_p8 }
  0x61   : > { %p576_p7 = pnand %p575_p3, %p569_p6 }
 0x12d   : > { %v225_v4 = vpop.f32.mrb[0].mxu0 }
 0x12e   : > { %v437_v5 = vpop.f32.mrb[1].mxu0  ;;  %v233_v6 = vsel %vm232_vm3, %v225_v4, 0.0  ;;  %v239_v7 = vmul.f32 %v225_v4, %v225_v4 }
 0x12f   : > { %234 = vadd.xlane.f32.xlu0 %v233_v6  ;;  %v228_v8 = vpop.f32.mrb[2].mxu0 }
 0x130   : > { %v438_v9 = vpop.f32.mrb[3].mxu0  ;;  %v236_v10 = vsel %vm232_vm3, %v228_v8, 0.0  ;;  %v240_v11 = vmul.f32 %v228_v8, %v228_v8  ;;  %v241_v12 = vsel %vm232_vm3, %v239_v7, 0.0 }
 0x131   : > { %237 = vadd.xlane.f32.xlu1 %v236_v10 }
 0x132   : > { %v244_v13 = vsel %vm232_vm3, %v240_v11, 0.0 }
 0x133   : > { %242 = vadd.xlane.f32.xlu0 %v241_v12 }
 0x135   : > { %245 = vadd.xlane.f32.xlu1 %v244_v13 }
 0x1bc   : > { %v235_v15 = vpop.xlane.xlu0 %234 }
 0x1bd   : > { %v248_v16 = vrot.slane %v235_v15, 4 }
 0x1be   : > { %v238_v17 = vpop.xlane.xlu1 %237 }
 0x1bf   : > { %v250_v18 = vadd.f32 %v248_v16, %v235_v15  ;;  %v253_v21 = vrot.slane %v238_v17, 4 }
 0x1c0   : > { %v243_v19 = vpop.xlane.xlu0 %242 }
 0x1c1   : > { %v251_v20 = vadd.f32 %v250_v18, %v238_v17  ;;  %v257_v22 = vrot.slane %v243_v19, 4 }
 0x1c2   : > { %v246_v23 = vpop.xlane.xlu1 %245 }
 0x1c3   : > { %v255_v24 = vadd.f32 %v253_v21, %v251_v20  ;;  %v259_v25 = vadd.f32 %v257_v22, %v243_v19  ;;  %v262_v28 = vrot.slane %v246_v23, 4 }
 0x1c5   : > { %v266_v26 = vmul.f32 0.00390625, %v255_v24  ;;  %v260_v27 = vadd.f32 %v259_v25, %v246_v23 }
 0x1c7   : > { %v264_v29 = vadd.f32 %v262_v28, %v260_v27  ;;  %v274_v30 = vrot.slane %v266_v26, 4  ;;  %v268_v31 = vmul.f32 %v266_v26, %v266_v26 }
 0x1c9   : > { %v267_v32 = vmul.f32 0.00390625, %v264_v29  ;;  %v276_v33 = vsel %vm187_vm1, %v266_v26, %v274_v30 }
 0x1ca   : > { %283 = vperm.xlu0 %503, %v276_v33  }
 0x1cb   : > { %v269_v34 = vsub.f32 %v267_v32, %v268_v31 }
 0x1cd   : > { %v270_v35 = vmax.f32 %v269_v34, 0.0 }
 0x1cf   : > { %v271_v36 = vadd.f32 1e-05, %v270_v35 }
 0x1d1   : > { %506 = vrsqrt.f32 %v271_v36 }
 0x1db   : > { %v507_v37 = vpop.eup %506 }
 0x1dc   : > { %v278_v38 = vrot.slane %v507_v37, 4 }
 0x1de   : > { %v280_v39 = vsel %vm187_vm1, %v507_v37, %v278_v38 }
 0x1df   : > { %290 = vperm.xlu1 %504, %v280_v39  }
 0x249   : > { %v284_v40 = vpop.permute.xlu0 %283 }
 0x24a   : > { %v286_v41 = vsub.f32 %v225_v4, %v284_v40  ;;  %v287_v42 = vsub.f32 %v228_v8, %v284_v40 }
 0x25e   : > { %v291_v43 = vpop.permute.xlu1 %290 }
 0x25f   : > { %v293_v44 = vmul.f32 %v291_v43, %v286_v41  ;;  %v294_v45 = vmul.f32 %v291_v43, %v287_v42 }
 0x261   : > { %vm295_vm4 = vcmp.ge.f32.partialorder %v293_v44, 0.0  ;;  %vm296_vm5 = vcmp.ge.f32.partialorder %v294_v45, 0.0  ;;  %v297_v46 = vmul.f32 0.2, %v293_v44  ;;  %v298_v47 = vmul.f32 0.2, %v294_v45 }
 0x263   : > { %v299_v48 = vsel %vm295_vm4, %v293_v44, %v297_v46  ;;  %v300_v49 = vsel %vm296_vm5, %v294_v45, %v298_v47 }
 0x264   : > { %v428_v50 = vpack.c.bf16 %v299_v48, %v299_v48  ;;  %v429_v51 = vpack.c.bf16 %v300_v49, %v300_v49 }
 0x266   : > { %310 = vst.msk [vmem:[%s173_s27] sm:$0xf] %vm309_vm6, %v428_v50  ;;  %311 = vst.msk [vmem:[%s173_s27 + $0x4] sm:$0xf] %vm309_vm6, %v429_v51 }
 0x267   : > { %579 = shalt.err (!%p576_p7)
}
 0x268   : > { %s580_s7 = scalar_lea.hbm %s811_s30, 128  ;;  %s584_s25 = scalar_lea.hbm %s858_s2, 1024 }
 0x269   : > { %p581_p9 = scmp.ne.s32.totalorder %s811_s30, %s580_s7  ;;  %p585_p0 = scmp.lt.u32.totalorder %s811_s30, %s858_s2 }
 0x26a   : > { %p586_p2 = scmp.lt.u32.totalorder %s584_s25, %s580_s7  ;;  %p588_p1 = scmp.lt.u32.totalorder %s580_s7, %s811_s30 }
 0x26b   : > { %p582_p11 = pnand %p581_p9, %p746_p12 }
 0x26c   : > { %p587_p10 = por %p586_p2, %p585_p0 }
 0x26d   : > { %p583_p5 = pneg %p582_p11 }
 0x26e   : > { %p589_p4 = por %p588_p1, %p587_p10 }
 0x270   : > { %p590_p6 = pnand %p589_p4, %p583_p5 }
 0x272   : > { %593 = shalt.err (!%p590_p6)
}
 0x273   : > { %s646_s29 = smov 64   ;;  %s647_s15 = smov 4  }
 0x274   : > { %445 = dma.vmem_to_hbm [thread:$0]  (%p746_p12), %s813_s22, 128, %s811_s30, %s313_s13, %s646_s29, %s646_s29, %s647_s15  }
 0x275 PF: > { %p462_p8 = scmp.ge.s32.totalorder %s636_s12, 2  ;;  %s341_s17 = sand.u32 1, %s624_s9  }
 0x276   : > { %p873_p13 = scmp.ne.s32.totalorder %s863_s16, 0  ;;  %s342_s27 = scalar_lea.sflag [#allocation4], %s341_s17 }
 0x278   : > { %p456_p3 = pnand %p462_p8, %p873_p13 }
 0x27a   : > { %619 = dma.done.wait (!%p456_p3), %s342_s27, 128  }
 0x27b   : > { %621 = vsyncadd (!%p456_p3), %s342_s27, 4294967168  ;;  %p16_p7 = scmp.ge.s32.totalorder %s716_s21, 10   ;;  %s874_s9 = smov %s628_s10 }
 0x27c   : > { %s875_s10 = smov %s632_s11  ;;  %s876_s11 = smov %s742_s8 }
 0x27d   : > { %s877_s12 = smov %s716_s21  ;;  %18 = sbr.rel (!%p16_p7) target bundleno = 6 (0x6), region = 77 }
 0x284   :  { %347 = vsyncpa [#allocation3], 1 }
 0x285   :  { %349 = vsyncpa [#allocation3 + $0x1], 1 }
 0x286   :  { %350 = vsyncpa [#allocation6], 1 }
 0x287   :  { %351 = vsyncpa [#allocation4], 1 }
 0x288   :  { %353 = vsyncpa [#allocation4 + $0x1], 1 }

// kernel: sensitivity_model_forward.23
= control target key start
LH: loop header
LB: loop body
LE: loop exit
PB: predicated region body
PF: predicated region fallthrough
CT: control target
= control target key end

     0   :  { %8 = vsyncpa [#allocation3], 0  ;;  %s2185_s0 = inlined_call_operand.hbm [shape: bf16[8,8,324], index: 0, kind: input, shape index: {}]   ;;  %s2186_s1 = inlined_call_operand.hbm [shape: bf16[9,4,8], index: 1, kind: input, shape index: {}]   ;;  %s2187_s2 = inlined_call_operand.hbm [shape: f32[1,286], index: 2, kind: input, shape index: {}]   ;;  %s2188_s3 = inlined_call_operand.hbm [shape: bf16[8,4,324], index: 3, kind: output, shape index: {}]  }
   0x1   :  { %10 = vsyncpa [#allocation3 + $0x1], 0 }
   0x2   :  { %11 = vsyncpa [#allocation6], 0 }
   0x3   :  { %12 = vsyncpa [#allocation4], 0 }
   0x4   :  { %14 = vsyncpa [#allocation4 + $0x1], 0  ;;  %s1852_s12 = smov 0   ;;  %s1854_s13 = smov 0  }
   0x5   :  { %s1856_s14 = smov 0   ;;  %s1858_s15 = smov 0  }
   0x6 LB: > { %s1873_s16 = sadd.s32 4294967295, %s1811_s15   ;;  %s1384_s17 = sadd.s32 4294967294, %s1811_s15   ;;  %s1811_s15 = sphi %s1858_s15, %s2207_s15   ;;  %s1807_s14 = sphi %s1856_s14, %s2206_s14   ;;  %s1803_s13 = sphi %s1854_s13, %s2205_s13   ;;  %s1799_s12 = sphi %s1852_s12, %s2204_s12  }
   0x7   : > { %p40_p0 = scmp.ne.s32.totalorder %s1803_s13, %s1799_s12  ;;  %p2189_p1 = scmp.eq.s32.totalorder %s1873_s16, 0 }
   0x8   : > { %p112_p3 = scmp.eq.s32.totalorder %s1384_s17, 7  ;;  %p1385_p5 = scmp.ge.s32.totalorder %s1811_s15, 1 }
   0x9   : > { %p1882_p4 = por %p2189_p1, %p40_p0  ;;  %p119_p7 = scmp.lt.s32.totalorder %s1811_s15, 9 }
   0xa   : > { %p1887_p6 = por %p112_p3, %p40_p0  ;;  %s1813_s21 = smov [#allocation5]  }
   0xb   : > { %s2192_s18 = scalar_select %p1882_p4, 1, 0 }
   0xc   : > { %s2193_s19 = scalar_select %p1887_p6, 1, 0 }
   0xd   : > { %p1892_p8 = pnand %p1385_p5, %p119_p7  ;;  %s131_s22 = sshll.u32 %s1813_s21, 4  ;;  %s132_s22 = int_to_ptr.vmem [resolvable:$true] %s131_s22 }
   0xe   : > { %s1814_s24 = smov [#allocation7]   ;;  %s1655_s28 = scalar_lea.hbm %s2186_s1, 288 }
   0xf   : > { %s2194_s20 = scalar_select %p1892_p8, 1, 0 }
  0x10   : > { %p1580_p9 = pneg %p1892_p8  ;;  %s145_s25 = sshll.u32 %s1814_s24, 4  ;;  %s1904_s25 = int_to_ptr.vmem [resolvable:$true] %s145_s25 }
  0x11   : > { %p1656_p11 = scmp.ne.s32.totalorder %s2186_s1, %s1655_s28  ;;  %p1662_p3 = scmp.lt.u32.totalorder %s1655_s28, %s2186_s1 }
  0x12   : > { %p1900_p10 = pnand %p1580_p9, %p2189_p1 }
  0x14   : > { %p1657_p12 = pneg %p1900_p10 }
  0x16   : > { %p1658_p13 = pnand %p1657_p12, %p1656_p11 }
  0x18   : > { %p1659_p0 = pneg %p1658_p13 }
  0x1a   : > { %p1664_p5 = pnand %p1662_p3, %p1659_p0 }
  0x1c   : > { %1667 = shalt.err (!%p1664_p5)
}
  0x1d   : > { %s1668_s6 = scalar_lea.vmem %s132_s22, 288  ;;  %p1676_p2 = scmp.lt.s32.totalorder %s132_s22, %s132_s22 }
  0x1e   : > { %p1669_p7 = scmp.ne.s32.totalorder %s132_s22, %s1668_s6  ;;  %p1677_p6 = scmp.lt.s32.totalorder %s1668_s6, %s1668_s6 }
  0x20   : > { %p1671_p9 = pnand %p1669_p7, %p1657_p12  ;;  %p1678_p4 = por %p1677_p6, %p1676_p2 }
  0x22   : > { %p1672_p1 = pneg %p1671_p9 }
  0x24   : > { %p1679_p8 = pnand %p1678_p4, %p1672_p1 }
  0x26   : > { %1682 = shalt.err (!%p1679_p8)
}
  0x27   : > { %s1815_s7 = smov 32   ;;  %s1816_s8 = smov 2  }
  0x28   : > { %1583 = dma.hbm_to_vmem [thread:$0]  (!%p1900_p10), %s2186_s1, 288, %s132_s22, [#allocation6], %s1815_s7, %s1815_s7, %s1816_s8  }
  0x29   : > { %s1683_s21 = scalar_lea.hbm %s2187_s2, 48 }
  0x2a   : > { %p1684_p11 = scmp.ne.s32.totalorder %s2187_s2, %s1683_s21  ;;  %p1690_p4 = scmp.lt.u32.totalorder %s1683_s21, %s2187_s2 }
  0x2c   : > { %p1686_p1 = pnand %p1684_p11, %p1657_p12 }
  0x2e   : > { %p1687_p2 = pneg %p1686_p1 }
  0x30   : > { %p1692_p6 = pnand %p1690_p4, %p1687_p2 }
  0x32   : > { %1695 = shalt.err (!%p1692_p6)
}
  0x33   : > { %s1696_s22 = scalar_lea.vmem %s1904_s25, 48  ;;  %s1703_s29 = scalar_lea.vmem %s1904_s25, 64 }
  0x34   : > { %p1697_p8 = scmp.ne.s32.totalorder %s1904_s25, %s1696_s22  ;;  %p1704_p3 = scmp.lt.s32.totalorder %s1904_s25, %s1904_s25 }
  0x35   : > { %p1705_p5 = scmp.lt.s32.totalorder %s1703_s29, %s1696_s22 }
  0x36   : > { %p1699_p13 = pnand %p1697_p8, %p1657_p12 }
  0x37   : > { %p1706_p7 = por %p1705_p5, %p1704_p3 }
  0x38   : > { %p1700_p0 = pneg %p1699_p13 }
  0x3a   : > { %p1707_p9 = pnand %p1706_p7, %p1700_p0 }
  0x3c   : > { %1710 = shalt.err (!%p1707_p9)
}
  0x3d   : > { %1586 = dma.hbm_to_vmem [thread:$0]  (!%p1900_p10), %s2187_s2, 48, %s1904_s25, [#allocation6]  }
  0x3e   : > { %s1955_s5 = sadd.s32 1, %s1811_s15   ;;  %s27_s23 = sadd.s32 1, %s1807_s14 }
  0x3f   : > { %s24_s6 = ssub.s32 %s1811_s15, %s1955_s5  ;;  %p34_p12 = scmp.ne.s32.totalorder %s1807_s14, %s1803_s13 }
  0x40   : > { %p25_p11 = scmp.eq.s32.totalorder %s24_s6, 0  ;;  %p35_p1 = scmp.eq.s32.totalorder %s1811_s15, 0 }
  0x41   : > { %p2196_p2 = scmp.eq.s32.totalorder %s1873_s16, 7  ;;  %p1597_p6 = scmp.lt.s32.totalorder %s1811_s15, 8 }
  0x42   : > { %s1971_s8 = scalar_select %p25_p11, %s1807_s14, %s27_s23  }
  0x43   : > { %p1965_p4 = por %p2196_p2, %p34_p12  ;;  %p36_p8 = por %p35_p1, %p34_p12 }
  0x44   : > { %s156_s9 = sand.u32 1, %s1807_s14   ;;  %s1564_s25 = smul.u32 192, %s1811_s15 }
  0x45   : > { %s1563_s10 = smul.u32 12, %s156_s9  ;;  %p1975_p10 = pnand %p1597_p6, %p36_p8 }
  0x46   : > { %s1982_s24 = scalar_lea.hbm %s2185_s0, %s1564_s25  ;;  %s157_s28 = scalar_lea.sflag [#allocation3], %s156_s9 }
  0x47   : > { %s160_s26 = scalar_lea.vmem [#allocation2], %s1563_s10  ;;  %s1711_s22 = scalar_lea.hbm %s1982_s24, 192 }
  0x48   : > { %s168_s27 = sshll.u32 %s160_s26, 4  ;;  %p1712_p13 = scmp.ne.s32.totalorder %s1982_s24, %s1711_s22  ;;  %s1984_s27 = int_to_ptr.vmem [resolvable:$true] %s168_s27 }
  0x49   : > { %p1713_p0 = pneg %p1975_p10  ;;  %s1716_s4 = scalar_lea.hbm %s2185_s0, 1536 }
  0x4a   : > { %p1717_p7 = scmp.lt.u32.totalorder %s1982_s24, %s2185_s0  ;;  %p1718_p9 = scmp.lt.u32.totalorder %s1716_s4, %s1711_s22 }
  0x4b   : > { %p1714_p3 = pnand %p1713_p0, %p1712_p13  ;;  %p1720_p11 = scmp.lt.u32.totalorder %s1711_s22, %s1982_s24 }
  0x4c   : > { %p1719_p12 = por %p1718_p9, %p1717_p7 }
  0x4d   : > { %p1715_p5 = pneg %p1714_p3 }
  0x4e   : > { %p1721_p1 = por %p1720_p11, %p1719_p12 }
  0x50   : > { %p1722_p2 = pnand %p1721_p1, %p1715_p5 }
  0x52   : > { %1725 = shalt.err (!%p1722_p2)
}
  0x53   : > { %s1726_s9 = scalar_lea.vmem %s1984_s27, 192  ;;  %s1817_s10 = smov [#allocation2]  }
  0x54   : > { %p1727_p6 = scmp.ne.s32.totalorder %s1984_s27, %s1726_s9  ;;  %s1731_s25 = sshll.u32 %s1817_s10, 4  ;;  %s1732_s25 = int_to_ptr.vmem [resolvable:$false] %s1731_s25 }
  0x55   : > { %s1733_s17 = scalar_lea.vmem %s1732_s25, 384  ;;  %p1734_p3 = scmp.lt.s32.totalorder %s1984_s27, %s1732_s25 }
  0x56   : > { %p1729_p8 = pnand %p1727_p6, %p1713_p0  ;;  %p1735_p7 = scmp.lt.s32.totalorder %s1733_s17, %s1726_s9 }
  0x58   : > { %p1730_p13 = pneg %p1729_p8  ;;  %p1736_p9 = por %p1735_p7, %p1734_p3 }
  0x5a   : > { %p1737_p12 = pnand %p1736_p9, %p1730_p13 }
  0x5c   : > { %1740 = shalt.err (!%p1737_p12)
}
  0x5d   : > { %1590 = dma.hbm_to_vmem [thread:$0]  (!%p1975_p10), %s1982_s24, 192, %s1984_s27, %s157_s28  }
  0x5e   : > { %p2199_p5 = scmp.ne.s32.totalorder %s2194_s20, 0 }
  0x5f   : > { %s2014_s21 = sand.u32 (!%p2199_p5), 1, %s1803_s13   ;;  %p2200_p0 = scmp.ne.s32.totalorder (!%p2199_p5), %s2192_s18, 0 }
  0x60   : > { %177 = sbr.rel (%p2199_p5) target bundleno = 859 (0x35b), region = 32  ;;  %s180_s22 = scalar_lea.sflag (!%p2199_p5), [#allocation3], %s2014_s21 }
  0x61   : > { %s1565_s26 = smul.u32 (!%p2199_p5), 12, %s2014_s21 }
  0x63   : > { %s183_s29 = scalar_lea.vmem (!%p2199_p5), [#allocation2], %s1565_s26 }
  0x67   : > { %1786 = dma.done.wait (%p2200_p0), %s180_s22, 192  }
  0x68   : > { %1788 = vsyncadd (%p2200_p0), %s180_s22, 4294967104  ;;  %p2201_p11 = scmp.eq.s32.totalorder %s1873_s16, 0 }
  0x6a   : > { %1790 = dma.done.wait (%p2201_p11), [#allocation6], 336   ;;  %p2202_p10 = pmov %p2201_p11 }
  0x6b   : > { %v1818_v0 = vmov 0.0   ;;  %vm1819_vm0 = vmmov 0   ;;  %v1820_v1 = vmov 0   ;;  %v1650_v2 = vld [vmem:[%s183_s29 + $0x8] ss:$0 sps:$4 sm:$0xff]   ;;  %v216_v3 = vld [vmem:[%s183_s29] sm:$0xff] }
  0x6c   : > { %1792 = vsyncadd (%p2202_p10), [#allocation6], 4294966960  ;;  %1445 = vmatprep.subr.bf16.mxu1 %v1818_v0  ;;  %1447 = vmatprep.mubr.msk.bf16.mxu1 %vm1819_vm0, %v1818_v0  ;;  %v1393_v4 = vcombine.low %v216_v3, %v216_v3  ;;  %s1821_s18 = smov 127   ;;  %v1394_v5 = vcombine.high %v216_v3, %v216_v3  ;;  %s1822_s20 = smov 126   ;;  %vm241_vm1 = vcmask 1043456   ;;  %vm237_vm2 = vcmask 64512  }
  0x6d   : > { %283 = vmatprep.mubr.bf16.mxu0 %v1820_v1  ;;  %232 = vrot.lane.b32.xlu1 %v1650_v2, %s1821_s18  ;;  %s1823_s11 = smov 110   ;;  %s1824_s24 = smov 109   ;;  %v219_v9 = vld [vmem:[#allocation5 + $0x2] sm:$0x3]  ;;  %vm234_vm3 = vcmask 1039360   ;;  %v342_v10 = vsel %vm241_vm1, %v1650_v2, 0 }
  0x6e   : > { %228 = vrot.lane.b32.xlu0 %v1393_v4, %s1821_s18  ;;  %s1825_s27 = smov 108   ;;  %s1826_s28 = smov 92   ;;  %vm433_vm4 = vcmask 1031168   ;;  %v336_v17 = vsel %vm241_vm1, %v1393_v4, 0  ;;  %v215_v21 = vld [vmem:[#allocation5] sm:$0x3] }
  0x6f   : > { %s1827_s30 = smov 91   ;;  %s1828_s4 = smov 90   ;;  %vm540_vm5 = vcmask 900096   ;;  %v426_v29 = vld [vmem:[#allocation5 + $0x4] sm:$0x3]  ;;  %vm647_vm6 = vcmask 891904  }
  0x70   : > { %v533_v37 = vld [vmem:[#allocation5 + $0x6] sm:$0x3]  ;;  %vm754_vm7 = vcmask 883712   ;;  %v640_v45 = vld [vmem:[#allocation5 + $0x8] sm:$0x3]  ;;  %vm861_vm8 = vcmask 752640  }
  0x71   : > { %427 = vrot.lane.b32.xlu1 %v1393_v4, %s1822_s20  ;;  %v747_v53 = vld [vmem:[#allocation5 + $0xa] sm:$0x3]  ;;  %vm968_vm9 = vcmask 744448   ;;  %v854_v61 = vld [vmem:[#allocation5 + $0xc] sm:$0x3]  ;;  %vm1075_vm10 = vcmask 736256  }
  0x72   : > { %230 = vrot.lane.b32.xlu0 %v1394_v5, %s1821_s18  ;;  %vm1197_vm11 = vcmask 240640   ;;  %s1566_s23 = smul.u32 6, %s2014_s21  ;;  %vm1241_vm12 = vcmask 1041408   ;;  %vm1242_vm13 = vcmask 1043458   ;;  %vm1244_vm14 = vcmask 553988   ;;  %s1830_s9 = smov 19  }
  0x73   : > { %s1567_s10 = smul.u32 96, %s1873_s16  ;;  %s1281_s29 = scalar_lea.sflag [#allocation4], %s2014_s21 }
  0x74   : > { %s213_s6 = scalar_lea.vmem [#allocation8], %s1566_s23  ;;  %s1831_s16 = smov [#allocation8]  }
  0x75   : > { %431 = vrot.lane.b32.xlu1 %v1650_v2, %s1822_s20  ;;  %s1295_s25 = sshll.u32 %s213_s6, 4  ;;  %s2142_s22 = scalar_lea.hbm %s2188_s3, %s1567_s10  ;;  %s2144_s25 = int_to_ptr.vmem [resolvable:$true] %s1295_s25 }
  0x76   : > { %429 = vrot.lane.b32.xlu0 %v1394_v5, %s1822_s20  ;;  %s1741_s18 = scalar_lea.vmem %s2144_s25, 96  ;;  %s1745_s20 = sshll.u32 %s1831_s16, 4  ;;  %s1746_s20 = int_to_ptr.vmem [resolvable:$false] %s1745_s20 }
  0x77   : > { %p1742_p1 = scmp.ne.s32.totalorder %s2144_s25, %s1741_s18  ;;  %p1748_p8 = scmp.lt.s32.totalorder %s2144_s25, %s1746_s20 }
  0x79   : > { %536 = vrot.lane.b32.xlu1 %v1394_v5, %s1823_s11  ;;  %p1743_p2 = pnand %p1742_p1, %p1965_p4 }
  0x7a   : > { %534 = vrot.lane.b32.xlu0 %v1393_v4, %s1823_s11 }
  0x7b   : > { %p1744_p6 = pneg %p1743_p2 }
  0x7d   : > { %641 = vrot.lane.b32.xlu1 %v1393_v4, %s1824_s24 }
  0x7e   : > { %538 = vrot.lane.b32.xlu0 %v1650_v2, %s1823_s11  ;;  %s1747_s11 = scalar_lea.vmem %s1746_s20, 192 }
  0x7f   : > { %p1749_p13 = scmp.lt.s32.totalorder %s1747_s11, %s1741_s18 }
  0x81   : > { %645 = vrot.lane.b32.xlu1 %v1650_v2, %s1824_s24  ;;  %p1750_p3 = por %p1749_p13, %p1748_p8 }
  0x82   : > { %643 = vrot.lane.b32.xlu0 %v1394_v5, %s1824_s24 }
  0x83   : > { %p1751_p7 = pnand %p1750_p3, %p1744_p6 }
  0x85   : > { %750 = vrot.lane.b32.xlu1 %v1394_v5, %s1825_s27 }
  0x86   : > { %748 = vrot.lane.b32.xlu0 %v1393_v4, %s1825_s27 }
  0x89   : > { %855 = vrot.lane.b32.xlu1 %v1393_v4, %s1826_s28 }
  0x8a   : > { %752 = vrot.lane.b32.xlu0 %v1650_v2, %s1825_s27 }
  0x8d   : > { %859 = vrot.lane.b32.xlu1 %v1650_v2, %s1826_s28 }
  0x8e   : > { %857 = vrot.lane.b32.xlu0 %v1394_v5, %s1826_s28 }
  0x91   : > { %964 = vrot.lane.b32.xlu1 %v1394_v5, %s1827_s30 }
  0x92   : > { %962 = vrot.lane.b32.xlu0 %v1393_v4, %s1827_s30 }
  0x95   : > { %1069 = vrot.lane.b32.xlu1 %v1393_v4, %s1828_s4 }
  0x96   : > { %966 = vrot.lane.b32.xlu0 %v1650_v2, %s1827_s30 }
  0x99   : > { %1073 = vrot.lane.b32.xlu1 %v1650_v2, %s1828_s4 }
  0x9a   : > { %1071 = vrot.lane.b32.xlu0 %v1394_v5, %s1828_s4 }
  0xdf   : > { %v233_v6 = vpop.permute.xlu1 %232 }
  0xe0   : > { %v229_v7 = vpop.permute.xlu0 %228  ;;  %v249_v8 = vsel %vm241_vm1, %v233_v6, 0 }
  0xe1   : > { %1446 = vmatpush3.bf16.msra.mxu1 %v249_v8 }
  0xe2   : > { %1451 = vmatprep.subr.bf16.mxu1 %v1818_v0 }
  0xe3   : > { %v428_v11 = vpop.permute.xlu1 %427 }
  0xe4   : > { %v231_v12 = vpop.permute.xlu0 %230  ;;  %1448 = vmatmul.mubr.msk.bf16.vlgmr.msra.gmra.mrb[0].mxu1 %vm237_vm2, %v219_v9 }
  0xe5   : > { %v236_v13 = vsel %vm234_vm3, %v231_v12, %v233_v6  ;;  %v235_v14 = vsel %vm234_vm3, %v229_v7, %v231_v12  ;;  %1452 = vmatpush3.bf16.msra.mxu1 %v342_v10  ;;  %1453 = vmatprep.mubr.msk.bf16.mxu1 %vm1819_vm0, %v1818_v0  ;;  %v961_v6 = vld [vmem:[#allocation5 + $0xe] sm:$0x3]  ;;  %v1068_v10 = vld [vmem:[#allocation5 + $0x10] sm:$0x3] }
  0xe6   : > { %1396 = vmatprep.subr.msk.bf16.mxu0 %vm241_vm1, %v236_v13  ;;  %v243_v15 = vsel %vm241_vm1, %v235_v14, 0  ;;  %1457 = vmatprep.subr.bf16.mxu1 %v1818_v0 }
  0xe7   : > { %252 = vmatpush1.bf16.msra.mxu0 %v243_v15  ;;  %v432_v16 = vpop.permute.xlu1 %431 }
  0xe8   : > { %1399 = vmatprep.subr.msk.bf16.mxu0 %vm241_vm1, %v1394_v5  ;;  %v430_v18 = vpop.permute.xlu0 %429  ;;  %v446_v22 = vsel %vm241_vm1, %v432_v16, 0 }
  0xe9   : > { %v435_v19 = vsel %vm433_vm4, %v430_v18, %v432_v16  ;;  %v434_v23 = vsel %vm433_vm4, %v428_v11, %v430_v18  ;;  %v1176_v11 = vlaneseq  ;;  %v1174_v16 = vld [vmem:[#allocation7] sm:$0x7]  ;;  %vm1275_vm4 = vcmask 1041560  }
  0xea   : > { %1397 = vmatmul.mubr.msk.bf16.vlgmr.msra.gmra.mrb[0].mxu0 %vm237_vm2, %v219_v9  ;;  %v440_v26 = vsel %vm241_vm1, %v434_v23, 0 }
  0xeb   : > { %345 = vmatpush1.bf16.msra.mxu0 %v336_v17  ;;  %376 = vmatprep.mubr.bf16.mxu0 %v1820_v1  ;;  %v537_v24 = vpop.permute.xlu1 %536  ;;  %v2109_v12 = vshrl.u32 %v1176_v11, 7 }
  0xec   : > { %1402 = vmatprep.subr.msk.bf16.mxu0 %vm241_vm1, %v435_v19  ;;  %v535_v20 = vpop.permute.xlu0 %534 }
  0xed   : > { %v541_v31 = vsel %vm540_vm5, %v535_v20, %v537_v24  ;;  %v1178_v13 = vsub.s32 0, %v2109_v12  ;;  %v1182_v15 = vsub.s32 1, %v2109_v12 }
  0xee   : > { %v547_v34 = vsel %vm241_vm1, %v541_v31, 0 }
  0xef   : > { %v642_v28 = vpop.permute.xlu1 %641  ;;  %v2114_v20 = vrot.slane %v1174_v16, %v1178_v13 }
  0xf0   : > { %1454 = vmatmul.mubr.msk.bf16.vlgmr.msra.gmra.mrb[0].mxu1 %vm237_vm2, %v215_v21  ;;  %v539_v25 = vpop.permute.xlu0 %538 }
  0xf1   : > { %1458 = vmatpush3.bf16.msra.mxu1 %v446_v22  ;;  %1459 = vmatprep.mubr.msk.bf16.mxu1 %vm1819_vm0, %v1818_v0  ;;  %v542_v27 = vsel %vm540_vm5, %v537_v24, %v539_v25  ;;  %v553_v30 = vsel %vm241_vm1, %v539_v25, 0  ;;  %v2118_v22 = vrot.slane %v1174_v16, %v1182_v15  ;;  %vm1276_vm5 = vmor %vm1242_vm13, %vm1275_vm4 }
  0xf2   : > { %1463 = vmatprep.subr.bf16.mxu1 %v1818_v0 }
  0xf3   : > { %v646_v33 = vpop.permute.xlu1 %645 }
  0xf4   : > { %v644_v32 = vpop.permute.xlu0 %643  ;;  %v660_v38 = vsel %vm241_vm1, %v646_v33, 0 }
  0xf5   : > { %v649_v35 = vsel %vm647_vm6, %v644_v32, %v646_v33  ;;  %v648_v39 = vsel %vm647_vm6, %v642_v28, %v644_v32  ;;  %vm1277_vm6 = vcmask 398340  }
  0xf6   : > { %1400 = vmatmul.mubr.msk.bf16.vlgmr.msra.gmra.mrb[0].mxu0 %vm237_vm2, %v215_v21  ;;  %v654_v42 = vsel %vm241_vm1, %v648_v39, 0 }
  0xf7   : > { %449 = vmatpush1.bf16.msra.mxu0 %v440_v26  ;;  %480 = vmatprep.mubr.bf16.mxu0 %v1820_v1  ;;  %v751_v40 = vpop.permute.xlu1 %750 }
  0xf8   : > { %1405 = vmatprep.subr.msk.bf16.mxu0 %vm241_vm1, %v542_v27  ;;  %v749_v36 = vpop.permute.xlu0 %748 }
  0xf9   : > { %v755_v47 = vsel %vm754_vm7, %v749_v36, %v751_v40 }
  0xfa   : > { %v761_v50 = vsel %vm241_vm1, %v755_v47, 0 }
  0xfb   : > { %v856_v44 = vpop.permute.xlu1 %855 }
  0xfc   : > { %1460 = vmatmul.mubr.msk.bf16.vlgmr.msra.gmra.mrb[0].mxu1 %vm237_vm2, %v426_v29  ;;  %v753_v41 = vpop.permute.xlu0 %752 }
  0xfd   : > { %1464 = vmatpush3.bf16.msra.mxu1 %v553_v30  ;;  %1465 = vmatprep.mubr.msk.bf16.mxu1 %vm1819_vm0, %v1818_v0  ;;  %v756_v43 = vsel %vm754_vm7, %v751_v40, %v753_v41  ;;  %v767_v46 = vsel %vm241_vm1, %v753_v41, 0  ;;  %vm1272_vm7 = vcmask 154624  }
  0xfe   : > { %1469 = vmatprep.subr.bf16.mxu1 %v1818_v0 }
  0xff   : > { %v860_v49 = vpop.permute.xlu1 %859 }
 0x100   : > { %v858_v48 = vpop.permute.xlu0 %857  ;;  %v874_v54 = vsel %vm241_vm1, %v860_v49, 0 }
 0x101   : > { %v863_v51 = vsel %vm861_vm8, %v858_v48, %v860_v49  ;;  %v862_v55 = vsel %vm861_vm8, %v856_v44, %v858_v48  ;;  %vm1278_vm8 = vmor %vm1277_vm6, %vm1276_vm5 }
 0x102   : > { %1403 = vmatmul.mubr.msk.bf16.vlgmr.msra.gmra.mrb[0].mxu0 %vm237_vm2, %v426_v29  ;;  %v868_v58 = vsel %vm241_vm1, %v862_v55, 0 }
 0x103   : > { %556 = vmatpush1.bf16.msra.mxu0 %v547_v34  ;;  %587 = vmatprep.mubr.bf16.mxu0 %v1820_v1  ;;  %v965_v56 = vpop.permute.xlu1 %964 }
 0x104   : > { %1408 = vmatprep.subr.msk.bf16.mxu0 %vm241_vm1, %v649_v35  ;;  %v963_v52 = vpop.permute.xlu0 %962 }
 0x105   : > { %v969_v63 = vsel %vm968_vm9, %v963_v52, %v965_v56 }
 0x106   : > { %v975_v4 = vsel %vm241_vm1, %v969_v63, 0 }
 0x107   : > { %v1070_v60 = vpop.permute.xlu1 %1069 }
 0x108   : > { %1466 = vmatmul.mubr.msk.bf16.vlgmr.msra.gmra.mrb[0].mxu1 %vm237_vm2, %v533_v37  ;;  %v967_v57 = vpop.permute.xlu0 %966 }
 0x109   : > { %1470 = vmatpush3.bf16.msra.mxu1 %v660_v38  ;;  %1471 = vmatprep.mubr.msk.bf16.mxu1 %vm1819_vm0, %v1818_v0  ;;  %v970_v59 = vsel %vm968_vm9, %v965_v56, %v967_v57  ;;  %v981_v62 = vsel %vm241_vm1, %v967_v57, 0 }
 0x10a   : > { %1475 = vmatprep.subr.bf16.mxu1 %v1818_v0 }
 0x10b   : > { %v1074_v3 = vpop.permute.xlu1 %1073 }
 0x10c   : > { %v1072_v2 = vpop.permute.xlu0 %1071  ;;  %v1088_v7 = vsel %vm241_vm1, %v1074_v3, 0 }
 0x10d   : > { %v1077_v5 = vsel %vm1075_vm10, %v1072_v2, %v1074_v3  ;;  %v1076_v8 = vsel %vm1075_vm10, %v1070_v60, %v1072_v2 }
 0x10e   : > { %1406 = vmatmul.mubr.msk.bf16.vlgmr.msra.gmra.mrb[0].mxu0 %vm237_vm2, %v533_v37  ;;  %v1082_v9 = vsel %vm241_vm1, %v1076_v8, 0 }
 0x10f   : > { %663 = vmatpush1.bf16.msra.mxu0 %v654_v42  ;;  %694 = vmatprep.mubr.bf16.mxu0 %v1820_v1 }
 0x110   : > { %1411 = vmatprep.subr.msk.bf16.mxu0 %vm241_vm1, %v756_v43 }
 0x114   : > { %1472 = vmatmul.mubr.msk.bf16.vlgmr.msra.gmra.mrb[0].mxu1 %vm237_vm2, %v640_v45 }
 0x115   : > { %1476 = vmatpush3.bf16.msra.mxu1 %v767_v46  ;;  %1477 = vmatprep.mubr.msk.bf16.mxu1 %vm1819_vm0, %v1818_v0 }
 0x116   : > { %1481 = vmatprep.subr.bf16.mxu1 %v1818_v0 }
 0x11a   : > { %1409 = vmatmul.mubr.msk.bf16.vlgmr.msra.gmra.mrb[0].mxu0 %vm237_vm2, %v640_v45 }
 0x11b   : > { %770 = vmatpush1.bf16.msra.mxu0 %v761_v50  ;;  %801 = vmatprep.mubr.bf16.mxu0 %v1820_v1 }
 0x11c   : > { %1414 = vmatprep.subr.msk.bf16.mxu0 %vm241_vm1, %v863_v51 }
 0x120   : > { %1478 = vmatmul.mubr.msk.bf16.vlgmr.msra.gmra.mrb[0].mxu1 %vm237_vm2, %v747_v53 }
 0x121   : > { %1482 = vmatpush3.bf16.msra.mxu1 %v874_v54  ;;  %1483 = vmatprep.mubr.msk.bf16.mxu1 %vm1819_vm0, %v1818_v0  ;;  %v1829_v54 = vmov 1983009808  }
 0x122   : > { %1487 = vmatprep.subr.bf16.mxu1 %v1818_v0  ;;  %v1255_v55 = vunpack.c.l.s4 %v1829_v54 }
 0x124   : > { %v1256_v63 = vunpack.c.0.s8 %v1255_v55 }
 0x126   : > { %1412 = vmatmul.mubr.msk.bf16.vlgmr.msra.gmra.mrb[0].mxu0 %vm237_vm2, %v747_v53  ;;  %v1259_v11 = vsub.s32 %v1256_v63, %v2109_v12 }
 0x127   : > { %877 = vmatpush1.bf16.msra.mxu0 %v868_v58  ;;  %908 = vmatprep.mubr.bf16.mxu0 %v1820_v1 }
 0x128   : > { %1417 = vmatprep.subr.msk.bf16.mxu0 %vm241_vm1, %v970_v59 }
 0x12c   : > { %1484 = vmatmul.mubr.msk.bf16.vlgmr.msra.gmra.mrb[0].mxu1 %vm237_vm2, %v854_v61 }
 0x12d   : > { %1488 = vmatpush3.bf16.msra.mxu1 %v981_v62  ;;  %1489 = vmatprep.mubr.msk.bf16.mxu1 %vm1819_vm0, %v1818_v0 }
 0x12e   : > { %1493 = vmatprep.subr.bf16.mxu1 %v1818_v0 }
 0x132   : > { %1415 = vmatmul.mubr.msk.bf16.vlgmr.msra.gmra.mrb[0].mxu0 %vm237_vm2, %v854_v61 }
 0x133   : > { %984 = vmatpush1.bf16.msra.mxu0 %v975_v4  ;;  %1015 = vmatprep.mubr.bf16.mxu0 %v1820_v1 }
 0x134   : > { %1420 = vmatprep.subr.msk.bf16.mxu0 %vm241_vm1, %v1077_v5 }
 0x138   : > { %1490 = vmatmul.mubr.msk.bf16.vlgmr.msra.gmra.mrb[0].mxu1 %vm237_vm2, %v961_v6 }
 0x139   : > { %1494 = vmatpush3.bf16.msra.mxu1 %v1088_v7  ;;  %1495 = vmatprep.mubr.msk.bf16.mxu1 %vm1819_vm0, %v1818_v0  ;;  %v1186_v0 = vsub.s32 2, %v2109_v12 }
 0x13b   : > { %v2116_v21 = vrot.slane %v1174_v16, %v1186_v0 }
 0x13e   : > { %1418 = vmatmul.mubr.msk.bf16.vlgmr.msra.gmra.mrb[0].mxu0 %vm237_vm2, %v961_v6 }
 0x13f   : > { %1091 = vmatpush1.bf16.msra.mxu0 %v1082_v9  ;;  %1122 = vmatprep.mubr.bf16.mxu0 %v1820_v1 }
 0x144   : > { %1496 = vmatmul.mubr.msk.bf16.vlgmr.msra.gmra.mrb[0].mxu1 %vm237_vm2, %v1068_v10 }
 0x14a   : > { %1421 = vmatmul.mubr.msk.bf16.vlgmr.msra.gmra.mrb[0].mxu0 %vm237_vm2, %v1068_v10  ;;  %vm1243_vm2 = vmor %vm1242_vm13, %vm1241_vm12 }
 0x14b   : > { %vm1245_vm3 = vmor %vm1244_vm14, %vm1243_vm2 }
 0x14c   : > { %1246 = vst.msk [vmem:[%s213_s6] sm:$0x3f] %vm1245_vm3, %v1820_v1 }
 0x217   : > { %v1165_v14 = vpop.f32.mrb[0].mxu1 }
 0x218   : > { %v1497_v17 = vpop.f32.mrb[1].mxu1  ;;  %v1204_v23 = vmul.f32 %v1165_v14, %v1165_v14  ;;  %v1193_v28 = vmul.f32 %v2116_v21, %v1165_v14 }
 0x219   : > { %v1168_v18 = vpop.f32.mrb[2].mxu1 }
 0x21a   : > { %v1498_v19 = vpop.f32.mrb[3].mxu1  ;;  %v1207_v37 = vmul.f32 %v1204_v23, %v2116_v21  ;;  %v1198_v40 = vsel %vm1197_vm11, %v1193_v28, 0.0 }
 0x21c   : > { %v1211_v44 = vsel %vm1197_vm11, %v1207_v37, 0.0 }
 0x21d   : > { %v1124_v24 = vpop.f32.mrb[0].mxu0 }
 0x21e   : > { %v1191_v25 = vmul.f32 %v2114_v20, %v1124_v24  ;;  %v1202_v26 = vmul.f32 %v1124_v24, %v1124_v24  ;;  %v1126_v27 = vpop.f32.mrb[1].mxu0 }
 0x21f   : > { %v1192_v29 = vmul.f32 %v2118_v22, %v1126_v27  ;;  %v1203_v30 = vmul.f32 %v1126_v27, %v1126_v27  ;;  %v1128_v31 = vpop.f32.mrb[2].mxu0 }
 0x220   : > { %v1205_v32 = vmul.f32 %v1202_v26, %v2114_v20  ;;  %v1129_v33 = vpop.f32.mrb[3].mxu0  ;;  %v1194_v34 = vsel %vm241_vm1, %v1191_v25, 0.0 }
 0x221   : > { %v1206_v35 = vmul.f32 %v1203_v30, %v2118_v22  ;;  %v1195_v36 = vsel %vm241_vm1, %v1192_v29, 0.0 }
 0x222   : > { %v1196_v38 = vadd.f32 %v1195_v36, %v1194_v34  ;;  %v1208_v39 = vsel %vm241_vm1, %v1205_v32, 0.0 }
 0x223   : > { %v1209_v41 = vsel %vm241_vm1, %v1206_v35, 0.0 }
 0x224   : > { %v1199_v42 = vadd.f32 %v1198_v40, %v1196_v38  ;;  %v1210_v43 = vadd.f32 %v1209_v41, %v1208_v39 }
 0x226   : > { %1200 = vadd.xlane.f32.xlu0 %v1199_v42  ;;  %v1212_v45 = vadd.f32 %v1211_v44, %v1210_v43 }
 0x228   : > { %1213 = vadd.xlane.f32.xlu1 %v1212_v45 }
 0x2b3   : > { %v1201_v46 = vpop.xlane.xlu0 %1200 }
 0x2b4   : > { %v1216_v47 = vmul.f32 0.00390625, %v1201_v46 }
 0x2b5   : > { %v1214_v48 = vpop.xlane.xlu1 %1213 }
 0x2b6   : > { %v1217_v49 = vmul.f32 0.00390625, %v1214_v48  ;;  %v1218_v50 = vmul.f32 %v1216_v47, %v1216_v47  ;;  %v1221_v56 = vsub.f32 %v1124_v24, %v1216_v47  ;;  %v1222_v57 = vsub.f32 %v1126_v27, %v1216_v47 }
 0x2b7   : > { %v1223_v58 = vsub.f32 %v1165_v14, %v1216_v47 }
 0x2b8   : > { %v1219_v51 = vsub.f32 %v1217_v49, %v1218_v50 }
 0x2ba   : > { %v1220_v52 = vmax.f32 %v1219_v51, 0.0 }
 0x2bc   : > { %v1224_v53 = vadd.f32 1e-05, %v1220_v52 }
 0x2be   : > { %1653 = vrsqrt.f32 %v1224_v53 }
 0x2c8   : > { %v1654_v59 = vpop.eup %1653 }
 0x2c9   : > { %v1226_v60 = vmul.f32 %v1654_v59, %v1221_v56  ;;  %v1227_v61 = vmul.f32 %v1654_v59, %v1222_v57  ;;  %v1228_v62 = vmul.f32 %v1654_v59, %v1223_v58 }
 0x2cb   : > { %vm1229_vm15 = vcmp.ge.f32.partialorder %v1226_v60, 0.0  ;;  %vm1230_vm0 = vcmp.ge.f32.partialorder %v1227_v61, 0.0  ;;  %vm1231_vm1 = vcmp.ge.f32.partialorder %v1228_v62, 0.0  ;;  %v1232_v2 = vmul.f32 0.2, %v1226_v60 }
 0x2cc   : > { %v1233_v3 = vmul.f32 0.2, %v1227_v61  ;;  %v1234_v4 = vmul.f32 0.2, %v1228_v62 }
 0x2cd   : > { %v1235_v5 = vsel %vm1229_vm15, %v1226_v60, %v1232_v2 }
 0x2ce   : > { %v1236_v6 = vsel %vm1230_vm0, %v1227_v61, %v1233_v3  ;;  %v1237_v7 = vsel %vm1231_vm1, %v1228_v62, %v1234_v4  ;;  %v1238_v8 = vmul.f32 %v1235_v5, %v2114_v20 }
 0x2cf   : > { %v1239_v9 = vmul.f32 %v1236_v6, %v2118_v22  ;;  %v1240_v10 = vmul.f32 %v1237_v7, %v2116_v21 }
 0x2d1   : > { %v1249_v13 = vpack.c.bf16 %v1240_v10, %v1240_v10  ;;  %v1423_v14 = vpack.c.bf16 %v1239_v9, %v1238_v8 }
 0x2d3   : > { %v1260_v0 = vrot.slane %v1423_v14, %v1259_v11  ;;  %v1267_v15 = vrot.slane %v1249_v13, %v1259_v11 }
 0x2d5   : > { %v1268_v16 = vcombine.low %v1260_v0, %v1267_v15 }
 0x2d7   : > { %1269 = vrot.lane.b32.xlu0 %v1268_v16, %s1830_s9 }
 0x349   : > { %v1270_v1 = vpop.permute.xlu0 %1269 }
 0x34a   : > { %v1271_v17 = vrot.slane %v1270_v1, 6 }
 0x34c   : > { %v1273_v12 = vsel %vm1272_vm7, %v1271_v17, %v1270_v1 }
 0x34d   : > { %1279 = vst.msk [vmem:[%s213_s6] sm:$0x3f] %vm1278_vm8, %v1273_v12 }
 0x34e   : > { %1754 = shalt.err (!%p1751_p7)
}
 0x34f   : > { %s1755_s21 = scalar_lea.hbm %s2142_s22, 96  ;;  %s1759_s28 = scalar_lea.hbm %s2188_s3, 768 }
 0x350   : > { %p1756_p9 = scmp.ne.s32.totalorder %s2142_s22, %s1755_s21  ;;  %p1760_p0 = scmp.lt.u32.totalorder %s2142_s22, %s2188_s3 }
 0x351   : > { %p1761_p11 = scmp.lt.u32.totalorder %s1759_s28, %s1755_s21  ;;  %p1763_p1 = scmp.lt.u32.totalorder %s1755_s21, %s2142_s22 }
 0x352   : > { %p1757_p12 = pnand %p1756_p9, %p1965_p4 }
 0x353   : > { %p1762_p10 = por %p1761_p11, %p1760_p0 }
 0x354   : > { %p1758_p5 = pneg %p1757_p12 }
 0x355   : > { %p1764_p2 = por %p1763_p1, %p1762_p10 }
 0x357   : > { %p1765_p6 = pnand %p1764_p2, %p1758_p5 }
 0x359   : > { %1768 = shalt.err (!%p1765_p6)
}
 0x35a   : > { %1578 = dma.vmem_to_hbm [thread:$0]  (%p1965_p4), %s2144_s25, 96, %s2142_s22, %s1281_s29  }
 0x35b PF: > { %p1600_p8 = scmp.ge.s32.totalorder %s1811_s15, 2  ;;  %s1307_s23 = sand.u32 1, %s1799_s12  }
 0x35c   : > { %p2203_p13 = scmp.ne.s32.totalorder %s2193_s19, 0  ;;  %s1308_s6 = scalar_lea.sflag [#allocation4], %s1307_s23 }
 0x35e   : > { %p1592_p3 = pnand %p1600_p8, %p2203_p13 }
 0x360   : > { %1794 = dma.done.wait (!%p1592_p3), %s1308_s6, 96  }
 0x361   : > { %1796 = vsyncadd (!%p1592_p3), %s1308_s6, 4294967200  ;;  %p17_p7 = scmp.ge.s32.totalorder %s1955_s5, 10   ;;  %s2204_s12 = smov %s1803_s13 }
 0x362   : > { %s2205_s13 = smov %s1807_s14  ;;  %s2206_s14 = smov %s1971_s8 }
 0x363   : > { %s2207_s15 = smov %s1955_s5  ;;  %19 = sbr.rel (!%p17_p7) target bundleno = 6 (0x6), region = 93 }
 0x36a   :  { %1313 = vsyncpa [#allocation3], 1 }
 0x36b   :  { %1315 = vsyncpa [#allocation3 + $0x1], 1 }
 0x36c   :  { %1316 = vsyncpa [#allocation6], 1 }
 0x36d   :  { %1317 = vsyncpa [#allocation4], 1 }
 0x36e   :  { %1319 = vsyncpa [#allocation4 + $0x1], 1 }

// kernel: sensitivity_model_forward.24
= control target key start
LH: loop header
LB: loop body
LE: loop exit
PB: predicated region body
PF: predicated region fallthrough
CT: control target
= control target key end

     0   :  { %10 = vsyncpa [#allocation3], 0  ;;  %s2719_s0 = inlined_call_operand.hbm [shape: bf16[8,4,324], index: 0, kind: input, shape index: {}]   ;;  %s2720_s1 = inlined_call_operand.hbm [shape: bf16[9,4,4], index: 1, kind: input, shape index: {}]   ;;  %s2721_s2 = inlined_call_operand.hbm [shape: f32[1,286], index: 2, kind: input, shape index: {}]   ;;  %s2722_s3 = inlined_call_operand.hbm [shape: bf16[2,4], index: 3, kind: input, shape index: {}]   ;;  %s2723_s4 = inlined_call_operand.hbm [shape: f32[2,1], index: 4, kind: input, shape index: {}]   ;;  %s2724_s5 = inlined_call_operand.hbm [shape: f32[8,2,324], index: 5, kind: output, shape index: {}]  }
   0x1   :  { %12 = vsyncpa [#allocation3 + $0x1], 0 }
   0x2   :  { %13 = vsyncpa [#allocation6], 0 }
   0x3   :  { %14 = vsyncpa [#allocation9], 0 }
   0x4   :  { %15 = vsyncpa [#allocation4], 0 }
   0x5   :  { %17 = vsyncpa [#allocation4 + $0x1], 0  ;;  %s2292_s18 = smov 0   ;;  %s2294_s19 = smov 0  }
   0x6   :  { %s2296_s20 = smov 0   ;;  %s2298_s21 = smov 0  }
   0x7 LB: > { %s2241_s22 = smov [#allocation5]   ;;  %s2313_s24 = sadd.s32 4294967295, %s2239_s21   ;;  %s2239_s21 = sphi %s2298_s21, %s2746_s21   ;;  %s2235_s20 = sphi %s2296_s20, %s2745_s20   ;;  %s2231_s19 = sphi %s2294_s19, %s2744_s19   ;;  %s2227_s18 = sphi %s2292_s18, %s2743_s18  }
   0x8   : > { %s176_s23 = sshll.u32 %s2241_s22, 4  ;;  %p1717_p0 = scmp.ge.s32.totalorder %s2239_s21, 1  ;;  %s2318_s23 = int_to_ptr.vmem [resolvable:$true] %s176_s23 }
   0x9   : > { %p2725_p1 = scmp.eq.s32.totalorder %s2313_s24, 0  ;;  %p164_p2 = scmp.lt.s32.totalorder %s2239_s21, 9 }
   0xa   : > { %s2242_s26 = smov [#allocation8]   ;;  %s2243_s29 = smov [#allocation7]  }
   0xb   : > { %p2320_p3 = pnand %p1717_p0, %p164_p2  ;;  %s201_s27 = sshll.u32 %s2242_s26, 4  ;;  %s2332_s27 = int_to_ptr.vmem [resolvable:$true] %s201_s27 }
   0xc   : > { %s190_s30 = sshll.u32 %s2243_s29, 4  ;;  %s2023_s8 = scalar_lea.hbm %s2720_s1, 288  ;;  %s2334_s30 = int_to_ptr.vmem [resolvable:$true] %s190_s30 }
   0xd   : > { %s2728_s25 = scalar_select %p2320_p3, 1, 0 }
   0xe   : > { %p1930_p4 = pneg %p2320_p3  ;;  %p2024_p6 = scmp.ne.s32.totalorder %s2720_s1, %s2023_s8 }
   0xf   : > { %p2030_p10 = scmp.lt.u32.totalorder %s2023_s8, %s2720_s1 }
  0x10   : > { %p2328_p5 = pnand %p1930_p4, %p2725_p1 }
  0x12   : > { %p2344_p7 = pneg %p2328_p5 }
  0x14   : > { %p2026_p8 = pnand %p2344_p7, %p2024_p6 }
  0x16   : > { %p2027_p9 = pneg %p2026_p8 }
  0x18   : > { %p2032_p11 = pnand %p2030_p10, %p2027_p9 }
  0x1a   : > { %2035 = shalt.err (!%p2032_p11)
}
  0x1b   : > { %s2036_s14 = scalar_lea.vmem %s2318_s23, 288  ;;  %p2044_p2 = scmp.lt.s32.totalorder %s2318_s23, %s2318_s23 }
  0x1c   : > { %p2037_p12 = scmp.ne.s32.totalorder %s2318_s23, %s2036_s14  ;;  %p2045_p4 = scmp.lt.s32.totalorder %s2036_s14, %s2036_s14 }
  0x1e   : > { %p2039_p13 = pnand %p2037_p12, %p2344_p7  ;;  %p2046_p6 = por %p2045_p4, %p2044_p2 }
  0x20   : > { %p2040_p0 = pneg %p2039_p13 }
  0x22   : > { %p2047_p8 = pnand %p2046_p6, %p2040_p0 }
  0x24   : > { %2050 = shalt.err (!%p2047_p8)
}
  0x25   : > { %s2244_s15 = smov 32   ;;  %s2245_s16 = smov 2  }
  0x26   : > { %1933 = dma.hbm_to_vmem [thread:$0]  (!%p2328_p5), %s2720_s1, 288, %s2318_s23, [#allocation6], %s2244_s15, %s2244_s15, %s2245_s16  }
  0x27   : > { %s2051_s6 = scalar_lea.hbm %s2722_s3, 16 }
  0x28   : > { %p2052_p9 = scmp.ne.s32.totalorder %s2722_s3, %s2051_s6  ;;  %p2058_p12 = scmp.lt.u32.totalorder %s2051_s6, %s2722_s3 }
  0x2a   : > { %p2054_p10 = pnand %p2052_p9, %p2344_p7 }
  0x2c   : > { %p2055_p11 = pneg %p2054_p10 }
  0x2e   : > { %p2060_p13 = pnand %p2058_p12, %p2055_p11 }
  0x30   : > { %2063 = shalt.err (!%p2060_p13)
}
  0x31   : > { %s2064_s23 = scalar_lea.vmem %s2332_s27, 16  ;;  %s2071_s12 = scalar_lea.vmem %s2332_s27, 32 }
  0x32   : > { %p2065_p0 = scmp.ne.s32.totalorder %s2332_s27, %s2064_s23  ;;  %p2072_p6 = scmp.lt.s32.totalorder %s2332_s27, %s2332_s27 }
  0x33   : > { %p2073_p8 = scmp.lt.s32.totalorder %s2071_s12, %s2064_s23 }
  0x34   : > { %p2067_p2 = pnand %p2065_p0, %p2344_p7 }
  0x35   : > { %p2074_p9 = por %p2073_p8, %p2072_p6 }
  0x36   : > { %p2068_p4 = pneg %p2067_p2 }
  0x38   : > { %p2075_p10 = pnand %p2074_p9, %p2068_p4 }
  0x3a   : > { %2078 = shalt.err (!%p2075_p10)
}
  0x3b   : > { %1939 = dma.hbm_to_vmem [thread:$0]  (!%p2328_p5), %s2722_s3, 16, %s2332_s27, [#allocation9]  }
  0x3c   : > { %s2079_s17 = scalar_lea.hbm %s2721_s2, 48 }
  0x3d   : > { %p2080_p11 = scmp.ne.s32.totalorder %s2721_s2, %s2079_s17  ;;  %p2086_p0 = scmp.lt.u32.totalorder %s2079_s17, %s2721_s2 }
  0x3f   : > { %p2082_p12 = pnand %p2080_p11, %p2344_p7 }
  0x41   : > { %p2083_p13 = pneg %p2082_p12 }
  0x43   : > { %p2088_p2 = pnand %p2086_p0, %p2083_p13 }
  0x45   : > { %2091 = shalt.err (!%p2088_p2)
}
  0x46   : > { %s2092_s27 = scalar_lea.vmem %s2334_s30, 48  ;;  %s2099_s7 = scalar_lea.vmem %s2334_s30, 64 }
  0x47   : > { %p2093_p4 = scmp.ne.s32.totalorder %s2334_s30, %s2092_s27  ;;  %p2100_p9 = scmp.lt.s32.totalorder %s2334_s30, %s2334_s30 }
  0x48   : > { %p2101_p10 = scmp.lt.s32.totalorder %s2099_s7, %s2092_s27 }
  0x49   : > { %p2095_p6 = pnand %p2093_p4, %p2344_p7 }
  0x4a   : > { %p2102_p11 = por %p2101_p10, %p2100_p9 }
  0x4b   : > { %p2096_p8 = pneg %p2095_p6 }
  0x4d   : > { %p2103_p12 = pnand %p2102_p11, %p2096_p8 }
  0x4f   : > { %2106 = shalt.err (!%p2103_p12)
}
  0x50   : > { %1936 = dma.hbm_to_vmem [thread:$0]  (!%p2328_p5), %s2721_s2, 48, %s2334_s30, [#allocation6]  }
  0x51   : > { %s2246_s10 = smov [#allocation10]   ;;  %s2107_s14 = scalar_lea.hbm %s2723_s4, 32 }
  0x52   : > { %s212_s23 = sshll.u32 %s2246_s10, 4  ;;  %p2108_p13 = scmp.ne.s32.totalorder %s2723_s4, %s2107_s14  ;;  %s213_s23 = int_to_ptr.vmem [resolvable:$true] %s212_s23 }
  0x53   : > { %p2114_p4 = scmp.lt.u32.totalorder %s2107_s14, %s2723_s4 }
  0x54   : > { %p2110_p0 = pnand %p2108_p13, %p2344_p7 }
  0x56   : > { %p2111_p2 = pneg %p2110_p0 }
  0x58   : > { %p2116_p6 = pnand %p2114_p4, %p2111_p2 }
  0x5a   : > { %2119 = shalt.err (!%p2116_p6)
}
  0x5b   : > { %s2120_s30 = scalar_lea.vmem %s213_s23, 32  ;;  %p2128_p11 = scmp.lt.s32.totalorder %s213_s23, %s213_s23 }
  0x5c   : > { %p2121_p8 = scmp.ne.s32.totalorder %s213_s23, %s2120_s30  ;;  %p2129_p12 = scmp.lt.s32.totalorder %s2120_s30, %s2120_s30 }
  0x5e   : > { %p2123_p9 = pnand %p2121_p8, %p2344_p7  ;;  %p2130_p1 = por %p2129_p12, %p2128_p11 }
  0x60   : > { %p2124_p10 = pneg %p2123_p9 }
  0x62   : > { %p2131_p3 = pnand %p2130_p1, %p2124_p10 }
  0x64   : > { %2134 = shalt.err (!%p2131_p3)
}
  0x65   : > { %1942 = dma.hbm_to_vmem [thread:$0]  (!%p2328_p5), %s2723_s4, 32, %s213_s23, [#allocation9]  }
  0x66   : > { %s1716_s11 = sadd.s32 4294967294, %s2239_s21   ;;  %s2433_s28 = sadd.s32 1, %s2239_s21  }
  0x67   : > { %s27_s6 = ssub.s32 %s2239_s21, %s2433_s28  ;;  %s30_s27 = sadd.s32 1, %s2235_s20 }
  0x68   : > { %p28_p1 = scmp.eq.s32.totalorder %s27_s6, 0  ;;  %p37_p3 = scmp.ne.s32.totalorder %s2235_s20, %s2231_s19 }
  0x69   : > { %p38_p7 = scmp.eq.s32.totalorder %s2239_s21, 0  ;;  %p43_p13 = scmp.ne.s32.totalorder %s2231_s19, %s2227_s18 }
  0x6a   : > { %s2444_s7 = scalar_select %p28_p1, %s2235_s20, %s30_s27  }
  0x6b   : > { %p39_p0 = por %p38_p7, %p37_p3  ;;  %p2731_p2 = scmp.eq.s32.totalorder %s2313_s24, 0 }
  0x6c   : > { %p151_p5 = scmp.eq.s32.totalorder %s2313_s24, 7  ;;  %p157_p6 = scmp.eq.s32.totalorder %s1716_s11, 7 }
  0x6d   : > { %p2448_p4 = por %p2731_p2, %p43_p13  ;;  %p1955_p8 = scmp.lt.s32.totalorder %s2239_s21, 8 }
  0x6e   : > { %s223_s9 = sand.u32 1, %s2235_s20   ;;  %p2455_p9 = por %p151_p5, %p37_p3 }
  0x6f   : > { %p2459_p10 = por %p157_p6, %p43_p13  ;;  %s1906_s12 = smul.u32 6, %s223_s9 }
  0x70   : > { %s2733_s10 = scalar_select %p2455_p9, 1, 0 }
  0x71   : > { %s2734_s23 = scalar_select %p2459_p10, 1, 0 }
  0x72   : > { %s1907_s13 = smul.u32 96, %s2239_s21  ;;  %p2464_p11 = pnand %p1955_p8, %p39_p0 }
  0x73   : > { %s227_s22 = scalar_lea.vmem [#allocation2], %s1906_s12  ;;  %s224_s26 = scalar_lea.sflag [#allocation3], %s223_s9 }
  0x74   : > { %s2471_s17 = scalar_lea.hbm %s2719_s0, %s1907_s13  ;;  %s235_s30 = sshll.u32 %s227_s22, 4  ;;  %s2473_s30 = int_to_ptr.vmem [resolvable:$true] %s235_s30 }
  0x75   : > { %s2135_s29 = scalar_lea.hbm %s2471_s17, 96  ;;  %p2137_p1 = pneg %p2464_p11 }
  0x76   : > { %p2136_p12 = scmp.ne.s32.totalorder %s2471_s17, %s2135_s29  ;;  %s2140_s27 = scalar_lea.hbm %s2719_s0, 768 }
  0x77   : > { %p2141_p13 = scmp.lt.u32.totalorder %s2471_s17, %s2719_s0  ;;  %p2142_p0 = scmp.lt.u32.totalorder %s2140_s27, %s2135_s29 }
  0x78   : > { %p2138_p3 = pnand %p2137_p1, %p2136_p12  ;;  %p2144_p5 = scmp.lt.u32.totalorder %s2135_s29, %s2471_s17 }
  0x79   : > { %p2143_p2 = por %p2142_p0, %p2141_p13 }
  0x7a   : > { %p2139_p7 = pneg %p2138_p3 }
  0x7b   : > { %p2145_p6 = por %p2144_p5, %p2143_p2 }
  0x7d   : > { %p2146_p8 = pnand %p2145_p6, %p2139_p7 }
  0x7f   : > { %2149 = shalt.err (!%p2146_p8)
}
  0x80   : > { %s2150_s9 = scalar_lea.vmem %s2473_s30, 96  ;;  %s2247_s12 = smov [#allocation2]  }
  0x81   : > { %p2151_p12 = scmp.ne.s32.totalorder %s2473_s30, %s2150_s9  ;;  %s2155_s16 = sshll.u32 %s2247_s12, 4  ;;  %s2156_s16 = int_to_ptr.vmem [resolvable:$false] %s2155_s16 }
  0x82   : > { %s2157_s22 = scalar_lea.vmem %s2156_s16, 192  ;;  %p2158_p9 = scmp.lt.s32.totalorder %s2473_s30, %s2156_s16 }
  0x83   : > { %p2153_p3 = pnand %p2151_p12, %p2137_p1  ;;  %p2159_p13 = scmp.lt.s32.totalorder %s2157_s22, %s2150_s9 }
  0x85   : > { %p2154_p10 = pneg %p2153_p3  ;;  %p2160_p0 = por %p2159_p13, %p2158_p9 }
  0x87   : > { %p2161_p2 = pnand %p2160_p0, %p2154_p10 }
  0x89   : > { %2164 = shalt.err (!%p2161_p2)
}
  0x8a   : > { %1946 = dma.hbm_to_vmem [thread:$0]  (!%p2464_p11), %s2471_s17, 96, %s2473_s30, %s224_s26  }
  0x8b   : > { %p2736_p7 = scmp.ne.s32.totalorder %s2728_s25, 0 }
  0x8c   : > { %s2503_s29 = sand.u32 (!%p2736_p7), 1, %s2231_s19  }
  0x8d   : > { %244 = sbr.rel (%p2736_p7) target bundleno = 1133 (0x46d), region = 40  ;;  %s247_s6 = scalar_lea.sflag (!%p2736_p7), [#allocation3], %s2503_s29 }
  0x8e   : > { %s1908_s11 = smul.u32 (!%p2736_p7), 6, %s2503_s29 }
  0x90   : > { %s2509_s27 = scalar_lea.vmem (!%p2736_p7), [#allocation2], %s1908_s11 }
  0x94   : > { %2210 = dma.done.wait (%p2448_p4), %s247_s6, 96  }
  0x95   : > { %2212 = vsyncadd (%p2448_p4), %s247_s6, 4294967200  ;;  %p2737_p9 = scmp.eq.s32.totalorder %s2313_s24, 0 }
  0x97   : > { %2214 = dma.done.wait (%p2737_p9), [#allocation6], 336   ;;  %p2738_p10 = pmov %p2737_p9 }
  0x98   : > { %p2739_p11 = pmov %p2737_p9 }
  0x99   : > { %2216 = vsyncadd (%p2738_p10), [#allocation6], 4294966960 }
  0x9a   : > { %2218 = dma.done.wait (%p2739_p11), [#allocation9], 48   ;;  %p2740_p1 = pmov %p2737_p9 }
  0x9b   : > { %v303_v0 = vlaneseq  ;;  %v2248_v1 = vmov 1983009808   ;;  %v2249_v4 = vmov 0.0   ;;  %vm2250_vm0 = vmmov 0   ;;  %v295_v8 = vld [vmem:[%s2509_s27] sm:$0x3f] }
  0x9c   : > { %2220 = vsyncadd (%p2740_p1), [#allocation9], 4294967248  ;;  %v301_v2 = vunpack.c.l.s4 %v2248_v1  ;;  %1782 = vmatprep.subr.bf16.mxu1 %v2249_v4  ;;  %1784 = vmatprep.mubr.msk.bf16.mxu1 %vm2250_vm0, %v2249_v4  ;;  %v2251_v6 = vmov 0   ;;  %v299_v10 = vcombine.high %v295_v8, %v295_v8  ;;  %v514_v11 = vld [vmem:[%s2509_s27] sm:$0x3f]  ;;  %s2252_s25 = smov 127  }
  0x9d   : > { %v2523_v3 = vshrl.u32 %v303_v0, 7  ;;  %370 = vmatprep.mubr.bf16.mxu0 %v2251_v6  ;;  %2012 = vset.pattern.permute.xlu0 %v2251_v6  ;;  %v516_v15 = vcombine.high %v514_v11, %v514_v11  ;;  %v639_v17 = vld [vmem:[%s2509_s27] sm:$0x3f]  ;;  %s2253_s8 = smov 126   ;;  %s2254_s14 = smov 110   ;;  %vm328_vm1 = vcmask 1041408  }
  0x9e   : > { %v302_v5 = vunpack.c.0.s8 %v301_v2  ;;  %v641_v20 = vcombine.high %v639_v17, %v639_v17  ;;  %v764_v22 = vld [vmem:[%s2509_s27] sm:$0x3f]  ;;  %s2255_s17 = smov 109   ;;  %s2256_s30 = smov 108   ;;  %vm321_vm2 = vcmask 1039360   ;;  %vm324_vm3 = vcmask 31744  }
  0x9f   : > { %v766_v25 = vcombine.high %v764_v22, %v764_v22  ;;  %v889_v27 = vld [vmem:[%s2509_s27] sm:$0x3f]  ;;  %s2257_s26 = smov 92   ;;  %s2258_s13 = smov 91   ;;  %v297_v52 = vld [vmem:[#allocation5 + $0x2] sm:$0x3] }
  0xa0   : > { %v2531_v7 = vsub.s32 %v302_v5, %v2523_v3  ;;  %v891_v30 = vcombine.high %v889_v27, %v889_v27  ;;  %v1014_v32 = vld [vmem:[%s2509_s27] sm:$0x3f]  ;;  %s2259_s15 = smov 90   ;;  %vm538_vm4 = vcmask 1031168   ;;  %v294_v63 = vld [vmem:[#allocation5] sm:$0x3] }
  0xa1   : > { %v1016_v35 = vcombine.high %v1014_v32, %v1014_v32  ;;  %v1139_v37 = vld [vmem:[%s2509_s27] sm:$0x3f]  ;;  %vm663_vm5 = vcmask 900096   ;;  %vm788_vm6 = vcmask 891904   ;;  %vm913_vm7 = vcmask 883712   ;;  %s292_s9 = scalar_lea.vmem [#allocation11], %s1908_s11 }
  0xa2   : > { %v2535_v9 = vrot.slane %v295_v8, %v2531_v7  ;;  %v2540_v12 = vrot.slane %v299_v10, %v2531_v7  ;;  %v523_v14 = vrot.slane %v514_v11, %v2531_v7  ;;  %v530_v18 = vrot.slane %v516_v15, %v2531_v7  ;;  %v1264_v42 = vld [vmem:[%s2509_s27] sm:$0x3f]  ;;  %v513_v11 = vld [vmem:[#allocation5 + $0x4] sm:$0x3]  ;;  %s2260_s12 = smov 19   ;;  %s1909_s16 = smul.u32 96, %s2313_s24 }
  0xa3   : > { %v648_v19 = vrot.slane %v639_v17, %v2531_v7  ;;  %v655_v23 = vrot.slane %v641_v20, %v2531_v7  ;;  %v773_v24 = vrot.slane %v764_v22, %v2531_v7  ;;  %v780_v28 = vrot.slane %v766_v25, %v2531_v7  ;;  %s1608_s22 = sshll.u32 %s292_s9, 4  ;;  %p2741_p5 = scmp.ne.s32.totalorder %s2733_s10, 0  ;;  %s2678_s22 = int_to_ptr.vmem [resolvable:$true] %s1608_s22 }
  0xa4   : > { %315 = vrot.lane.b32.xlu0 %v2535_v9, %s2252_s25  ;;  %v2544_v13 = vcombine.high %v2535_v9, %v2535_v9  ;;  %319 = vrot.lane.b32.xlu1 %v2540_v12, %s2252_s25  ;;  %v531_v16 = vcombine.high %v523_v14, %v523_v14  ;;  %v898_v29 = vrot.slane %v889_v27, %v2531_v7  ;;  %v429_v55 = vsel %vm328_vm1, %v2540_v12, 0  ;;  %v763_v27 = vld [vmem:[#allocation5 + $0x8] sm:$0x3]  ;;  %s2676_s27 = scalar_lea.hbm %s2724_s5, %s1909_s16  ;;  %s2261_s24 = smov [#allocation11]  }
  0xa5   : > { %v656_v21 = vcombine.high %v648_v19, %v648_v19  ;;  %v781_v26 = vcombine.high %v773_v24, %v773_v24  ;;  %v905_v33 = vrot.slane %v891_v30, %v2531_v7  ;;  %v1023_v34 = vrot.slane %v1014_v32, %v2531_v7 }
  0xa6   : > { %v906_v31 = vcombine.high %v898_v29, %v898_v29  ;;  %v1030_v38 = vrot.slane %v1016_v35, %v2531_v7  ;;  %v1148_v39 = vrot.slane %v1139_v37, %v2531_v7  ;;  %v1141_v40 = vcombine.high %v1139_v37, %v1139_v37  ;;  %v888_v35 = vld [vmem:[#allocation5 + $0xa] sm:$0x3] }
  0xa7   : > { %v1031_v36 = vcombine.high %v1023_v34, %v1023_v34  ;;  %v1273_v44 = vrot.slane %v1264_v42, %v2531_v7  ;;  %v1266_v45 = vcombine.high %v1264_v42, %v1264_v42  ;;  %v423_v58 = vsel %vm328_vm1, %v2535_v9, 0 }
  0xa8   : > { %317 = vrot.lane.b32.xlu0 %v2544_v13, %s2252_s25  ;;  %532 = vrot.lane.b32.xlu1 %v523_v14, %s2253_s8  ;;  %v1156_v41 = vcombine.high %v1148_v39, %v1148_v39  ;;  %v1155_v43 = vrot.slane %v1141_v40, %v2531_v7  ;;  %vm1038_vm8 = vcmask 752640   ;;  %vm1163_vm9 = vcmask 744448   ;;  %s1594_s25 = scalar_lea.sflag [#allocation4], %s2503_s29 }
  0xa9   : > { %v1281_v46 = vcombine.high %v1273_v44, %v1273_v44  ;;  %v1280_v47 = vrot.slane %v1266_v45, %v2531_v7  ;;  %vm1288_vm10 = vcmask 736256   ;;  %vm1407_vm11 = vcmask 1043456  }
  0xaa   : > { %vm1411_vm12 = vcmask 240640  }
  0xac   : > { %534 = vrot.lane.b32.xlu0 %v531_v16, %s2253_s8  ;;  %536 = vrot.lane.b32.xlu1 %v530_v18, %s2253_s8  ;;  %s2165_s8 = scalar_lea.vmem %s2678_s22, 96 }
  0xad   : > { %p2166_p4 = scmp.ne.s32.totalorder %s2678_s22, %s2165_s8 }
  0xaf   : > { %p2167_p6 = pnand %p2166_p4, %p2741_p5 }
  0xb0   : > { %657 = vrot.lane.b32.xlu0 %v648_v19, %s2254_s14  ;;  %659 = vrot.lane.b32.xlu1 %v656_v21, %s2254_s14  ;;  %v638_v19 = vld [vmem:[#allocation5 + $0x6] sm:$0x3] }
  0xb1   : > { %p2168_p8 = pneg %p2167_p6 }
  0xb4   : > { %661 = vrot.lane.b32.xlu0 %v655_v23, %s2254_s14  ;;  %782 = vrot.lane.b32.xlu1 %v773_v24, %s2255_s17  ;;  %s2169_s14 = sshll.u32 %s2261_s24, 4  ;;  %s2170_s14 = int_to_ptr.vmem [resolvable:$false] %s2169_s14 }
  0xb5   : > { %p2172_p12 = scmp.lt.s32.totalorder %s2678_s22, %s2170_s14 }
  0xb8   : > { %784 = vrot.lane.b32.xlu0 %v781_v26, %s2255_s17  ;;  %786 = vrot.lane.b32.xlu1 %v780_v28, %s2255_s17  ;;  %s2171_s17 = scalar_lea.vmem %s2170_s14, 192 }
  0xb9   : > { %p2173_p3 = scmp.lt.s32.totalorder %s2171_s17, %s2165_s8 }
  0xbb   : > { %p2174_p13 = por %p2173_p3, %p2172_p12 }
  0xbc   : > { %907 = vrot.lane.b32.xlu0 %v898_v29, %s2256_s30  ;;  %909 = vrot.lane.b32.xlu1 %v906_v31, %s2256_s30 }
  0xbd   : > { %p2175_p0 = pnand %p2174_p13, %p2168_p8 }
  0xc0   : > { %911 = vrot.lane.b32.xlu0 %v905_v33, %s2256_s30  ;;  %1032 = vrot.lane.b32.xlu1 %v1023_v34, %s2257_s26 }
  0xc4   : > { %1034 = vrot.lane.b32.xlu0 %v1031_v36, %s2257_s26  ;;  %1036 = vrot.lane.b32.xlu1 %v1030_v38, %s2257_s26 }
  0xc8   : > { %1157 = vrot.lane.b32.xlu0 %v1148_v39, %s2258_s13  ;;  %1159 = vrot.lane.b32.xlu1 %v1156_v41, %s2258_s13 }
  0xcc   : > { %1161 = vrot.lane.b32.xlu0 %v1155_v43, %s2258_s13  ;;  %1282 = vrot.lane.b32.xlu1 %v1273_v44, %s2259_s15  ;;  %v1013_v43 = vld [vmem:[#allocation5 + $0xc] sm:$0x3] }
  0xd0   : > { %1284 = vrot.lane.b32.xlu0 %v1281_v46, %s2259_s15  ;;  %1286 = vrot.lane.b32.xlu1 %v1280_v47, %s2259_s15 }
 0x116   : > { %v316_v48 = vpop.permute.xlu0 %315  ;;  %v320_v49 = vpop.permute.xlu1 %319 }
 0x117   : > { %v336_v50 = vsel %vm328_vm1, %v320_v49, 0 }
 0x118   : > { %1783 = vmatpush3.bf16.msra.mxu1 %v336_v50  ;;  %v1138_v50 = vld [vmem:[#allocation5 + $0xe] sm:$0x3] }
 0x119   : > { %1788 = vmatprep.subr.bf16.mxu1 %v2249_v4 }
 0x11a   : > { %v318_v51 = vpop.permute.xlu0 %317  ;;  %v533_v57 = vpop.permute.xlu1 %532 }
 0x11b   : > { %v323_v53 = vsel %vm321_vm2, %v318_v51, %v320_v49  ;;  %v322_v54 = vsel %vm321_vm2, %v316_v48, %v318_v51  ;;  %1785 = vmatmul.mubr.msk.bf16.vlgmr.msra.gmra.mrb[0].mxu1 %vm324_vm3, %v297_v52 }
 0x11c   : > { %1729 = vmatprep.subr.msk.bf16.mxu0 %vm328_vm1, %v323_v53  ;;  %v330_v56 = vsel %vm328_vm1, %v322_v54, 0  ;;  %1789 = vmatpush3.bf16.msra.mxu1 %v429_v55  ;;  %v1263_v54 = vld [vmem:[#allocation5 + $0x10] sm:$0x3]  ;;  %v1391_v55 = vsub.s32 0, %v2523_v3 }
 0x11d   : > { %339 = vmatpush1.bf16.msra.mxu0 %v330_v56  ;;  %1790 = vmatprep.mubr.msk.bf16.mxu1 %vm2250_vm0, %v2249_v4  ;;  %v1399_v56 = vsub.s32 2, %v2523_v3 }
 0x11e   : > { %1732 = vmatprep.subr.msk.bf16.mxu0 %vm328_vm1, %v2544_v13  ;;  %v535_v59 = vpop.permute.xlu0 %534  ;;  %1794 = vmatprep.subr.bf16.mxu1 %v2249_v4  ;;  %v537_v60 = vpop.permute.xlu1 %536 }
 0x11f   : > { %v540_v61 = vsel %vm538_vm4, %v535_v59, %v537_v60  ;;  %v539_v0 = vsel %vm538_vm4, %v533_v57, %v535_v59  ;;  %v551_v1 = vsel %vm328_vm1, %v537_v60, 0  ;;  %v1395_v57 = vsub.s32 1, %v2523_v3 }
 0x120   : > { %1730 = vmatmul.mubr.msk.bf16.vlgmr.msra.gmra.mrb[0].mxu0 %vm324_vm3, %v297_v52  ;;  %v545_v8 = vsel %vm328_vm1, %v539_v0, 0  ;;  %vm1560_vm4 = vcmask 553988  }
 0x121   : > { %432 = vmatpush1.bf16.msra.mxu0 %v423_v58  ;;  %463 = vmatprep.mubr.bf16.mxu0 %v2251_v6  ;;  %v1387_v58 = vld [vmem:[#allocation7] sm:$0x7] }
 0x122   : > { %1735 = vmatprep.subr.msk.bf16.mxu0 %vm328_vm1, %v540_v61  ;;  %v658_v62 = vpop.permute.xlu0 %657  ;;  %v660_v5 = vpop.permute.xlu1 %659  ;;  %v1392_v60 = vrot.slane %v1387_v58, %v1391_v55  ;;  %v1400_v61 = vrot.slane %v1387_v58, %v1399_v56 }
 0x123   : > { %v664_v13 = vsel %vm663_vm5, %v658_v62, %v660_v5 }
 0x124   : > { %v670_v16 = vsel %vm328_vm1, %v664_v13, 0 }
 0x126   : > { %v662_v2 = vpop.permute.xlu0 %661  ;;  %v783_v10 = vpop.permute.xlu1 %782 }
 0x127   : > { %1791 = vmatmul.mubr.msk.bf16.vlgmr.msra.gmra.mrb[0].mxu1 %vm324_vm3, %v294_v63  ;;  %v665_v9 = vsel %vm663_vm5, %v660_v5, %v662_v2  ;;  %v676_v12 = vsel %vm328_vm1, %v662_v2, 0 }
 0x128   : > { %1795 = vmatpush3.bf16.msra.mxu1 %v551_v1  ;;  %1796 = vmatprep.mubr.msk.bf16.mxu1 %vm2250_vm0, %v2249_v4 }
 0x129   : > { %1800 = vmatprep.subr.bf16.mxu1 %v2249_v4 }
 0x12a   : > { %v785_v14 = vpop.permute.xlu0 %784  ;;  %v787_v15 = vpop.permute.xlu1 %786 }
 0x12b   : > { %v790_v17 = vsel %vm788_vm6, %v785_v14, %v787_v15  ;;  %v789_v20 = vsel %vm788_vm6, %v783_v10, %v785_v14  ;;  %v801_v21 = vsel %vm328_vm1, %v787_v15, 0  ;;  %vm1590_vm6 = vcmask 398340  }
 0x12c   : > { %1733 = vmatmul.mubr.msk.bf16.vlgmr.msra.gmra.mrb[0].mxu0 %vm324_vm3, %v294_v63  ;;  %v795_v24 = vsel %vm328_vm1, %v789_v20, 0  ;;  %v1396_v63 = vrot.slane %v1387_v58, %v1395_v57  ;;  %v1455_v57 = vld [vmem:[#allocation8] sm:$0x1] }
 0x12d   : > { %554 = vmatpush1.bf16.msra.mxu0 %v545_v8  ;;  %585 = vmatprep.mubr.bf16.mxu0 %v2251_v6 }
 0x12e   : > { %1738 = vmatprep.subr.msk.bf16.mxu0 %vm328_vm1, %v665_v9  ;;  %v908_v18 = vpop.permute.xlu0 %907  ;;  %v910_v23 = vpop.permute.xlu1 %909 }
 0x12f   : > { %v914_v29 = vsel %vm913_vm7, %v908_v18, %v910_v23 }
 0x130   : > { %v920_v32 = vsel %vm328_vm1, %v914_v29, 0 }
 0x132   : > { %v912_v22 = vpop.permute.xlu0 %911  ;;  %v1033_v26 = vpop.permute.xlu1 %1032 }
 0x133   : > { %1797 = vmatmul.mubr.msk.bf16.vlgmr.msra.gmra.mrb[0].mxu1 %vm324_vm3, %v513_v11  ;;  %v915_v25 = vsel %vm913_vm7, %v910_v23, %v912_v22  ;;  %v926_v28 = vsel %vm328_vm1, %v912_v22, 0  ;;  %vm1585_vm7 = vcmask 154624  }
 0x134   : > { %1801 = vmatpush3.bf16.msra.mxu1 %v676_v12  ;;  %1802 = vmatprep.mubr.msk.bf16.mxu1 %vm2250_vm0, %v2249_v4 }
 0x135   : > { %1806 = vmatprep.subr.bf16.mxu1 %v2249_v4 }
 0x136   : > { %v1035_v30 = vpop.permute.xlu0 %1034  ;;  %v1037_v31 = vpop.permute.xlu1 %1036 }
 0x137   : > { %v1040_v33 = vsel %vm1038_vm8, %v1035_v30, %v1037_v31  ;;  %v1039_v36 = vsel %vm1038_vm8, %v1033_v26, %v1035_v30  ;;  %v1051_v37 = vsel %vm328_vm1, %v1037_v31, 0 }
 0x138   : > { %1736 = vmatmul.mubr.msk.bf16.vlgmr.msra.gmra.mrb[0].mxu0 %vm324_vm3, %v513_v11  ;;  %v1045_v40 = vsel %vm328_vm1, %v1039_v36, 0 }
 0x139   : > { %679 = vmatpush1.bf16.msra.mxu0 %v670_v16  ;;  %710 = vmatprep.mubr.bf16.mxu0 %v2251_v6 }
 0x13a   : > { %1741 = vmatprep.subr.msk.bf16.mxu0 %vm328_vm1, %v790_v17  ;;  %v1158_v34 = vpop.permute.xlu0 %1157  ;;  %v1160_v39 = vpop.permute.xlu1 %1159 }
 0x13b   : > { %v1164_v45 = vsel %vm1163_vm9, %v1158_v34, %v1160_v39 }
 0x13c   : > { %v1170_v48 = vsel %vm328_vm1, %v1164_v45, 0 }
 0x13e   : > { %v1162_v38 = vpop.permute.xlu0 %1161  ;;  %v1283_v42 = vpop.permute.xlu1 %1282 }
 0x13f   : > { %1803 = vmatmul.mubr.msk.bf16.vlgmr.msra.gmra.mrb[0].mxu1 %vm324_vm3, %v638_v19  ;;  %v1165_v41 = vsel %vm1163_vm9, %v1160_v39, %v1162_v38  ;;  %v1176_v44 = vsel %vm328_vm1, %v1162_v38, 0 }
 0x140   : > { %1807 = vmatpush3.bf16.msra.mxu1 %v801_v21  ;;  %1808 = vmatprep.mubr.msk.bf16.mxu1 %vm2250_vm0, %v2249_v4 }
 0x141   : > { %1812 = vmatprep.subr.bf16.mxu1 %v2249_v4 }
 0x142   : > { %v1285_v46 = vpop.permute.xlu0 %1284  ;;  %v1287_v47 = vpop.permute.xlu1 %1286 }
 0x143   : > { %v1290_v49 = vsel %vm1288_vm10, %v1285_v46, %v1287_v47  ;;  %v1289_v51 = vsel %vm1288_vm10, %v1283_v42, %v1285_v46  ;;  %v1301_v52 = vsel %vm328_vm1, %v1287_v47, 0 }
 0x144   : > { %1739 = vmatmul.mubr.msk.bf16.vlgmr.msra.gmra.mrb[0].mxu0 %vm324_vm3, %v638_v19  ;;  %v1295_v53 = vsel %vm328_vm1, %v1289_v51, 0 }
 0x145   : > { %804 = vmatpush1.bf16.msra.mxu0 %v795_v24  ;;  %835 = vmatprep.mubr.bf16.mxu0 %v2251_v6 }
 0x146   : > { %1744 = vmatprep.subr.msk.bf16.mxu0 %vm328_vm1, %v915_v25 }
 0x14b   : > { %1809 = vmatmul.mubr.msk.bf16.vlgmr.msra.gmra.mrb[0].mxu1 %vm324_vm3, %v763_v27 }
 0x14c   : > { %1813 = vmatpush3.bf16.msra.mxu1 %v926_v28  ;;  %1814 = vmatprep.mubr.msk.bf16.mxu1 %vm2250_vm0, %v2249_v4 }
 0x14d   : > { %1818 = vmatprep.subr.bf16.mxu1 %v2249_v4 }
 0x150   : > { %1742 = vmatmul.mubr.msk.bf16.vlgmr.msra.gmra.mrb[0].mxu0 %vm324_vm3, %v763_v27  ;;  %v1459_v27 = vld [vmem:[#allocation10] sm:$0x3] }
 0x151   : > { %929 = vmatpush1.bf16.msra.mxu0 %v920_v32  ;;  %960 = vmatprep.mubr.bf16.mxu0 %v2251_v6 }
 0x152   : > { %1747 = vmatprep.subr.msk.bf16.mxu0 %vm328_vm1, %v1040_v33 }
 0x157   : > { %1815 = vmatmul.mubr.msk.bf16.vlgmr.msra.gmra.mrb[0].mxu1 %vm324_vm3, %v888_v35 }
 0x158   : > { %1819 = vmatpush3.bf16.msra.mxu1 %v1051_v37  ;;  %1820 = vmatprep.mubr.msk.bf16.mxu1 %vm2250_vm0, %v2249_v4 }
 0x159   : > { %1824 = vmatprep.subr.bf16.mxu1 %v2249_v4 }
 0x15c   : > { %1745 = vmatmul.mubr.msk.bf16.vlgmr.msra.gmra.mrb[0].mxu0 %vm324_vm3, %v888_v35 }
 0x15d   : > { %1054 = vmatpush1.bf16.msra.mxu0 %v1045_v40  ;;  %1085 = vmatprep.mubr.bf16.mxu0 %v2251_v6 }
 0x15e   : > { %1750 = vmatprep.subr.msk.bf16.mxu0 %vm328_vm1, %v1165_v41 }
 0x163   : > { %1821 = vmatmul.mubr.msk.bf16.vlgmr.msra.gmra.mrb[0].mxu1 %vm324_vm3, %v1013_v43 }
 0x164   : > { %1825 = vmatpush3.bf16.msra.mxu1 %v1176_v44  ;;  %1826 = vmatprep.mubr.msk.bf16.mxu1 %vm2250_vm0, %v2249_v4 }
 0x165   : > { %1830 = vmatprep.subr.bf16.mxu1 %v2249_v4 }
 0x168   : > { %1748 = vmatmul.mubr.msk.bf16.vlgmr.msra.gmra.mrb[0].mxu0 %vm324_vm3, %v1013_v43 }
 0x169   : > { %1179 = vmatpush1.bf16.msra.mxu0 %v1170_v48  ;;  %1210 = vmatprep.mubr.bf16.mxu0 %v2251_v6 }
 0x16a   : > { %1753 = vmatprep.subr.msk.bf16.mxu0 %vm328_vm1, %v1290_v49 }
 0x16f   : > { %1827 = vmatmul.mubr.msk.bf16.vlgmr.msra.gmra.mrb[0].mxu1 %vm324_vm3, %v1138_v50 }
 0x170   : > { %1831 = vmatpush3.bf16.msra.mxu1 %v1301_v52  ;;  %1832 = vmatprep.mubr.msk.bf16.mxu1 %vm2250_vm0, %v2249_v4 }
 0x171   : > { %1836 = vmatprep.subr.bf16.mxu1 %v2249_v4 }
 0x174   : > { %1751 = vmatmul.mubr.msk.bf16.vlgmr.msra.gmra.mrb[0].mxu0 %vm324_vm3, %v1138_v50 }
 0x175   : > { %1304 = vmatpush1.bf16.msra.mxu0 %v1295_v53  ;;  %1335 = vmatprep.mubr.bf16.mxu0 %v2251_v6 }
 0x17b   : > { %1833 = vmatmul.mubr.msk.bf16.vlgmr.msra.gmra.mrb[0].mxu1 %vm324_vm3, %v1263_v54 }
 0x17c   : > { %1838 = vmatprep.mubr.msk.bf16.mxu1 %vm2250_vm0, %v2249_v4  ;;  %vm1558_vm0 = vcmask 1043458  }
 0x17d   : > { %vm1559_vm2 = vmor %vm1558_vm0, %vm328_vm1 }
 0x17e   : > { %vm1561_vm5 = vmor %vm1560_vm4, %vm1559_vm2 }
 0x17f   : > { %1562 = vst.msk [vmem:[%s292_s9] sm:$0x3f] %vm1561_vm5, %v2249_v4 }
 0x180   : > { %1754 = vmatmul.mubr.msk.bf16.vlgmr.msra.gmra.mrb[0].mxu0 %vm324_vm3, %v1263_v54 }
 0x181   : > { %1509 = vmatprep.mubr.bf16.mxu0 %v2251_v6 }
 0x24e   : > { %v1378_v59 = vpop.f32.mrb[0].mxu1 }
 0x24f   : > { %v1834_v62 = vpop.f32.mrb[1].mxu1  ;;  %v1418_v1 = vmul.f32 %v1378_v59, %v1378_v59  ;;  %v1406_v10 = vmul.f32 %v1400_v61, %v1378_v59 }
 0x250   : > { %v1381_v0 = vpop.f32.mrb[2].mxu1 }
 0x251   : > { %v1835_v5 = vpop.f32.mrb[3].mxu1  ;;  %v1421_v18 = vmul.f32 %v1418_v1, %v1400_v61  ;;  %v1412_v21 = vsel %vm1411_vm12, %v1406_v10, 0.0 }
 0x253   : > { %v1337_v2 = vpop.f32.mrb[0].mxu0  ;;  %v1425_v25 = vsel %vm1411_vm12, %v1421_v18, 0.0 }
 0x254   : > { %v1404_v8 = vmul.f32 %v1392_v60, %v1337_v2  ;;  %v1416_v9 = vmul.f32 %v1337_v2, %v1337_v2  ;;  %v1339_v6 = vpop.f32.mrb[1].mxu0 }
 0x255   : > { %v1405_v11 = vmul.f32 %v1396_v63, %v1339_v6  ;;  %v1417_v12 = vmul.f32 %v1339_v6, %v1339_v6  ;;  %v1341_v13 = vpop.f32.mrb[2].mxu0 }
 0x256   : > { %v1419_v14 = vmul.f32 %v1416_v9, %v1392_v60  ;;  %v1342_v3 = vpop.f32.mrb[3].mxu0  ;;  %v1408_v15 = vsel %vm1407_vm11, %v1404_v8, 0.0 }
 0x257   : > { %v1420_v16 = vmul.f32 %v1417_v12, %v1396_v63  ;;  %v1409_v17 = vsel %vm1407_vm11, %v1405_v11, 0.0 }
 0x258   : > { %v1410_v19 = vadd.f32 %v1409_v17, %v1408_v15  ;;  %v1422_v20 = vsel %vm1407_vm11, %v1419_v14, 0.0 }
 0x259   : > { %v1423_v22 = vsel %vm1407_vm11, %v1420_v16, 0.0 }
 0x25a   : > { %v1413_v23 = vadd.f32 %v1412_v21, %v1410_v19  ;;  %v1424_v24 = vadd.f32 %v1423_v22, %v1422_v20 }
 0x25c   : > { %1414 = vadd.xlane.f32.xlu0 %v1413_v23  ;;  %v1426_v26 = vadd.f32 %v1425_v25, %v1424_v24 }
 0x25e   : > { %1427 = vadd.xlane.f32.xlu1 %v1426_v26 }
 0x272   : > { %1462 = vperm.xlu0 %2012, %v1459_v27  }
 0x2e9   : > { %v1415_v28 = vpop.xlane.xlu0 %1414 }
 0x2ea   : > { %v1430_v29 = vmul.f32 0.00390625, %v1415_v28 }
 0x2eb   : > { %v1428_v30 = vpop.xlane.xlu1 %1427 }
 0x2ec   : > { %v1431_v31 = vmul.f32 0.00390625, %v1428_v30  ;;  %v1432_v32 = vmul.f32 %v1430_v29, %v1430_v29  ;;  %v1435_v36 = vsub.f32 %v1337_v2, %v1430_v29  ;;  %v1436_v37 = vsub.f32 %v1339_v6, %v1430_v29 }
 0x2ed   : > { %v1437_v38 = vsub.f32 %v1378_v59, %v1430_v29 }
 0x2ee   : > { %v1433_v33 = vsub.f32 %v1431_v31, %v1432_v32 }
 0x2f0   : > { %v1434_v34 = vmax.f32 %v1433_v33, 0.0 }
 0x2f1   : > { %v1463_v58 = vpop.permute.xlu0 %1462 }
 0x2f2   : > { %v1438_v35 = vadd.f32 1e-05, %v1434_v34 }
 0x2f4   : > { %2021 = vrsqrt.f32 %v1438_v35 }
 0x2fe   : > { %v2022_v39 = vpop.eup %2021 }
 0x2ff   : > { %v1441_v40 = vmul.f32 %v2022_v39, %v1436_v37  ;;  %v1440_v41 = vmul.f32 %v2022_v39, %v1435_v36  ;;  %v1442_v42 = vmul.f32 %v2022_v39, %v1437_v38 }
 0x301   : > { %vm1444_vm13 = vcmp.ge.f32.partialorder %v1441_v40, 0.0  ;;  %v1447_v43 = vmul.f32 0.2, %v1441_v40  ;;  %vm1443_vm14 = vcmp.ge.f32.partialorder %v1440_v41, 0.0  ;;  %v1446_v44 = vmul.f32 0.2, %v1440_v41 }
 0x302   : > { %vm1445_vm15 = vcmp.ge.f32.partialorder %v1442_v42, 0.0  ;;  %v1448_v45 = vmul.f32 0.2, %v1442_v42 }
 0x303   : > { %v1450_v46 = vsel %vm1444_vm13, %v1441_v40, %v1447_v43  ;;  %v1449_v47 = vsel %vm1443_vm14, %v1440_v41, %v1446_v44 }
 0x304   : > { %v1453_v48 = vmul.f32 %v1450_v46, %v1396_v63  ;;  %v1452_v49 = vmul.f32 %v1449_v47, %v1392_v60  ;;  %v1451_v50 = vsel %vm1445_vm15, %v1442_v42, %v1448_v45 }
 0x305   : > { %v1454_v51 = vmul.f32 %v1451_v50, %v1400_v61 }
 0x306   : > { %v1457_v52 = vpack.c.bf16 %v1453_v48, %v1453_v48  ;;  %v1456_v53 = vpack.c.bf16 %v1452_v49, %v1452_v49 }
 0x307   : > { %v1458_v54 = vpack.c.bf16 %v1454_v51, %v1454_v51 }
 0x308   : > { %1756 = vmatprep.subr.msk.bf16.mxu0 %vm328_vm1, %v1457_v52  ;;  %v1469_v55 = vsel %vm328_vm1, %v1456_v53, 0 }
 0x309   : > { %1478 = vmatpush1.bf16.msra.mxu0 %v1469_v55  ;;  %v1475_v56 = vsel %vm328_vm1, %v1458_v54, 0  ;;  %vm1588_vm1 = vcmask 1041560  }
 0x30a   : > { %1837 = vmatpush3.bf16.msra.mxu1 %v1475_v56 }
 0x30c   : > { %1757 = vmatmul.mubr.msk.bf16.vlgmr.msra.gmra.mrb[4].mxu0 %vm324_vm3, %v1455_v57 }
 0x30d   : > { %1839 = vmatmul.mubr.msk.bf16.vlgmr.msra.gmra.mrb[4].mxu1 %vm324_vm3, %v1455_v57  ;;  %vm1589_vm3 = vmor %vm1558_vm0, %vm1588_vm1 }
 0x30e   : > { %vm1591_vm8 = vmor %vm1590_vm6, %vm1589_vm3 }
 0x3df   : > { %v1511_v59 = vpop.f32.mrb[4].mxu0 }
 0x3e0   : > { %v1512_v60 = vadd.f32 %v1511_v59, %v1463_v58  ;;  %v1513_v61 = vpop.f32.mrb[5].mxu0  ;;  %v1552_v62 = vpop.f32.mrb[4].mxu1 }
 0x3e1   : > { %v1514_v63 = vadd.f32 %v1513_v61, %v1463_v58  ;;  %v1515_v0 = vpop.f32.mrb[6].mxu0  ;;  %v1553_v1 = vadd.f32 %v1552_v62, %v1463_v58  ;;  %v1840_v2 = vpop.f32.mrb[5].mxu1 }
 0x3e2   : > { %v1516_v5 = vpop.f32.mrb[7].mxu0  ;;  %v1555_v8 = vpop.f32.mrb[6].mxu1 }
 0x3e3   : > { %v1566_v9 = vcombine.low %v1512_v60, %v1514_v63  ;;  %v1841_v6 = vpop.f32.mrb[7].mxu1  ;;  %v1580_v11 = vrot.slane %v1553_v1, %v2531_v7 }
 0x3e5   : > { %v1573_v10 = vrot.slane %v1566_v9, %v2531_v7 }
 0x3e7   : > { %v1581_v12 = vcombine.low %v1573_v10, %v1580_v11 }
 0x3e9   : > { %1582 = vrot.lane.b32.xlu1 %v1581_v12, %s2260_s12 }
 0x45b   : > { %v1583_v4 = vpop.permute.xlu1 %1582 }
 0x45c   : > { %v1584_v13 = vrot.slane %v1583_v4, 6 }
 0x45e   : > { %v1586_v7 = vsel %vm1585_vm7, %v1584_v13, %v1583_v4 }
 0x45f   : > { %1592 = vst.msk [vmem:[%s292_s9] sm:$0x3f] %vm1591_vm8, %v1586_v7 }
 0x460   : > { %2178 = shalt.err (!%p2175_p0)
}
 0x461   : > { %s2179_s29 = scalar_lea.hbm %s2676_s27, 96  ;;  %s2183_s13 = scalar_lea.hbm %s2724_s5, 768 }
 0x462   : > { %p2180_p2 = scmp.ne.s32.totalorder %s2676_s27, %s2179_s29  ;;  %p2184_p10 = scmp.lt.u32.totalorder %s2676_s27, %s2724_s5 }
 0x463   : > { %p2185_p11 = scmp.lt.u32.totalorder %s2183_s13, %s2179_s29  ;;  %p2187_p4 = scmp.lt.u32.totalorder %s2179_s29, %s2676_s27 }
 0x464   : > { %p2181_p7 = pnand %p2180_p2, %p2741_p5 }
 0x465   : > { %p2186_p1 = por %p2185_p11, %p2184_p10 }
 0x466   : > { %p2182_p9 = pneg %p2181_p7 }
 0x467   : > { %p2188_p6 = por %p2187_p4, %p2186_p1 }
 0x469   : > { %p2189_p8 = pnand %p2188_p6, %p2182_p9 }
 0x46b   : > { %2192 = shalt.err (!%p2189_p8)
}
 0x46c   : > { %1928 = dma.vmem_to_hbm [thread:$0]  (%p2741_p5), %s2678_s22, 96, %s2676_s27, %s1594_s25  }
 0x46d PF: > { %p1960_p12 = scmp.ge.s32.totalorder %s2239_s21, 2  ;;  %s1620_s12 = sand.u32 1, %s2227_s18  }
 0x46e   : > { %p2742_p3 = scmp.ne.s32.totalorder %s2734_s23, 0  ;;  %s1621_s16 = scalar_lea.sflag [#allocation4], %s1620_s12 }
 0x470   : > { %p1948_p13 = pnand %p1960_p12, %p2742_p3 }
 0x472   : > { %2222 = dma.done.wait (!%p1948_p13), %s1621_s16, 96  }
 0x473   : > { %2224 = vsyncadd (!%p1948_p13), %s1621_s16, 4294967200  ;;  %p20_p0 = scmp.ge.s32.totalorder %s2433_s28, 10   ;;  %s2743_s18 = smov %s2231_s19 }
 0x474   : > { %s2744_s19 = smov %s2235_s20  ;;  %s2745_s20 = smov %s2444_s7 }
 0x475   : > { %s2746_s21 = smov %s2433_s28  ;;  %22 = sbr.rel (!%p20_p0) target bundleno = 7 (0x7), region = 109 }
 0x47c   :  { %1626 = vsyncpa [#allocation3], 1 }
 0x47d   :  { %1628 = vsyncpa [#allocation3 + $0x1], 1 }
 0x47e   :  { %1629 = vsyncpa [#allocation6], 1 }
 0x47f   :  { %1630 = vsyncpa [#allocation9], 1 }
 0x480   :  { %1631 = vsyncpa [#allocation4], 1 }
 0x481   :  { %1633 = vsyncpa [#allocation4 + $0x1], 1 }

// kernel: sensitivity_model_forward.25
= control target key start
LH: loop header
LB: loop body
LE: loop exit
PB: predicated region body
PF: predicated region fallthrough
CT: control target
= control target key end

     0   :  { %s237_s6 = smov 0   ;;  %s254_s0 = inlined_call_operand.vmem [shape: f32[2,8,256], index: 0, kind: input, shape index: {}]   ;;  %s255_s1 = inlined_call_operand.vmem [shape: f32[2,8,256], index: 1, kind: output, shape index: {}]  }
   0x1 LB: > { %s194_s7 = sadd.s32 4294967295, %s225_s6   ;;  %p198_p0 = scmp.ge.s32.totalorder %s225_s6, 1  ;;  %s225_s6 = sphi %s237_s6, %s11_s6  }
   0x2   : > { %p87_p1 = scmp.lt.s32.totalorder %s225_s6, 3 }
   0x4   : > { %p88_p2 = pnand %p198_p0, %p87_p1 }
   0x5   : > { %p107_p3 = scmp.lt.s32.totalorder (!%p88_p2), %s194_s7, 1 }
   0x6   : > { %91 = sbr.rel (%p88_p2) target bundleno = 46 (0x2e), region = 24 }
   0xd   : > { %s257_s7 = smov (!%p107_p3, %s194_s7), 1 }
   0xe   : > { %s205_s8 = sshll.u32 %s257_s7, 4 }
   0xf   : > { %s111_s11 = scalar_lea.vmem %s254_s0, %s205_s8  ;;  %s116_s14 = scalar_lea.vmem %s255_s1, %s205_s8 }
  0x10   : > { %v117_v0 = vld [vmem:[%s111_s11] sm:$0xff]  ;;  %v118_v1 = vld [vmem:[%s111_s11 + $0x8] sm:$0xff] }
  0x11   : > { %v119_v2 = vmul.f32 %v117_v0, %v117_v0  ;;  %v120_v3 = vmul.f32 %v118_v1, %v118_v1 }
  0x13   : > { %v121_v4 = vrot.slane %v119_v2, 4  ;;  %v127_v5 = vrot.slane %v120_v3, 4 }
  0x15   : > { %v122_v6 = vadd.f32 %v121_v4, %v119_v2  ;;  %v128_v7 = vadd.f32 %v127_v5, %v120_v3 }
  0x17   : > { %v123_v8 = vrot.slane %v122_v6, 2  ;;  %v129_v9 = vrot.slane %v128_v7, 2 }
  0x19   : > { %v124_v10 = vadd.f32 %v123_v8, %v122_v6  ;;  %v130_v11 = vadd.f32 %v129_v9, %v128_v7 }
  0x1b   : > { %v125_v12 = vrot.slane %v124_v10, 1  ;;  %v131_v13 = vrot.slane %v130_v11, 1 }
  0x1d   : > { %v126_v14 = vadd.f32 %v125_v12, %v124_v10  ;;  %v132_v15 = vadd.f32 %v131_v13, %v130_v11 }
  0x1f   : > { %215 = vrsqrt.f32 %v126_v14 }
  0x20   : > { %217 = vrsqrt.f32 %v132_v15 }
  0x29   : > { %v216_v16 = vpop.eup %215 }
  0x2a   : > { %v218_v17 = vpop.eup %217  ;;  %v135_v18 = vmul.f32 %v216_v16, %v117_v0 }
  0x2b   : > { %v136_v19 = vmul.f32 %v218_v17, %v118_v1 }
  0x2c   : > { %137 = vst [vmem:[%s116_s14] sm:$0xff] %v135_v18 }
  0x2d   : > { %138 = vst [vmem:[%s116_s14 + $0x8] sm:$0xff] %v136_v19 }
  0x2e PF: > { %s11_s6 = sadd.s32 1, %s225_s6  }
  0x2f   : > { %p8_p4 = scmp.ge.s32.totalorder %s11_s6, 4  }
  0x31   :  { %10 = sbr.rel (!%p8_p4) target bundleno = 1 (0x1), region = 54 }

</bundles_post_ra>
